<compile_context>
chip_gen: v5e
topology: v5e:2x2
jax: 0.10.0
libtpu: 0.0.40
codegen_flags: <defaults>
</compile_context>

<pallas_src>
import functools

import jax
import jax.numpy as jnp
import numpy as np
from jax import lax
from jax.experimental import pallas as pl
from jax.experimental.pallas import tpu as pltpu

EPS = 1e-5
LANE = 128
MXU_DTYPE = jnp.bfloat16   # matmul-input dtype (accumulation is always f32)
ACT_DTYPE = jnp.bfloat16   # HBM dtype of the y1/y2 intermediates (halves HBM traffic)
PACK_TAPS = True           # pack 2 taps along K (K=2*CP) -> fills v6e/v7x 256-wide MXU.
                           # Set False on v5e (4x128x128 MXU already full at K=128).

_MIB = 1024 * 1024


def _round_up(x, m):
    return (x + m - 1) // m * m


def _bn_scale_shift(mean, var, gamma, beta):
    """Training-mode BN folded into a per-channel (scale, shift), all f32."""
    scale = gamma * lax.rsqrt(var + EPS)
    return scale, beta - mean * scale


def _compiler_params(bytes_needed):
    # Explicit scoped-VMEM limit sized from the real per-step footprint with 2x
    # headroom, clamped to [32 MiB, 64 MiB] so it is legal on v5e/v6e/v7x.
    limit = int(min(max(2 * bytes_needed, 32 * _MIB), 64 * _MIB))
    return pltpu.CompilerParams(dimension_semantics=("parallel",),
                                vmem_limit_bytes=limit)


# ----------------------------- Pallas kernels ------------------------------ #

def _conv_bn_stats_kernel(src_ref, mask_ref, scale_ref, shift_ref, w_ref,
                          y_ref, stats_ref, acc_ref, *maybe_z,
                          mi, taps, pad_rows, fuse_bn_relu, pack_taps):
    """One image: [optional bn+ReLU + zero-pad staging] -> 3x3 conv (implicit GEMM),
    emitting the raw conv output plus masked partial BN statistics.

      src_ref:   pass 1: (Mi+2P, CP) bf16 pre-padded input; pass 2: (Mi, CP) bf16 y1
      mask_ref:  (Mi, 1)     1.0 on valid rows, 0.0 on spatial/round-up pad rows
      scale_ref: (1, CP)     folded BN scale (unused in pass 1)
      shift_ref: (1, CP)     folded BN shift (unused in pass 1)
      w_ref:     (9*CP, CP)  packed per-tap weight matrices (bf16)
      y_ref:     (Mi, CP)    raw conv output (ACT_DTYPE)
      stats_ref: (2, CP)     row 0: sum(y*mask), row 1: sum(y^2*mask)   (f32)
      acc_ref:   (Mi, CP)    f32 accumulator scratch
      maybe_z:   pass 2 only: (Mi+2P, CP) bf16 staging scratch
    """
    cp = acc_ref.shape[1]
    mask = mask_ref[...]

    if fuse_bn_relu:
        # Pass 2: normalize + ReLU the previous conv output, zero spatial-pad rows,
        # cast ONCE to bf16 and stage into the zero-ring buffer.
        (z_ref,) = maybe_z
        a = src_ref[...].astype(jnp.float32)
        a = jnp.maximum(a * scale_ref[...] + shift_ref[...], 0.0) * mask
        ring = jnp.zeros((pad_rows, cp), MXU_DTYPE)
        # NOTE: rings are rewritten every step (they are tiny).  Zeroing them only at
        # program_id==0 would be unsafe under megacore "parallel" sharding because
        # each core has its own scratch and may never execute step 0.
        z_ref[0:pad_rows, :] = ring
        z_ref[pad_rows:pad_rows + mi, :] = a.astype(MXU_DTYPE)
        z_ref[pad_rows + mi:pad_rows + mi + pad_rows, :] = ring

        def tap(d):
            return z_ref[d:d + mi, :]
    else:
        # Pass 1: the HBM input already carries the zero rings / zero spatial padding /
        # zero channel padding, so no staging copy and no masking of the input.
        def tap(d):
            return src_ref[d:d + mi, :]

    def wtap(t, ntaps=1):   # rows [t*CP, (t+ntaps)*CP) of the packed weight matrix
        return w_ref[t * cp:(t + ntaps) * cp, :]

    dot = functools.partial(jnp.dot, preferred_element_type=jnp.float32)

    if pack_taps:
        # 4 K=2*CP matmuls + 1 K=CP matmul; 5 accumulator passes instead of 9, first
        # one a plain store (no zero-init pass).
        def pair(t):
            lhs = jnp.concatenate([tap(taps[t]), tap(taps[t + 1])], axis=1)
            return dot(lhs, wtap(t, 2))
        acc_ref[...] = pair(0)
        acc_ref[...] += pair(2)
        acc_ref[...] += pair(4)
        acc_ref[...] += pair(6)
        acc_ref[...] += dot(tap(taps[8]), wtap(8))
    else:
        acc_ref[...] = dot(tap(taps[0]), wtap(0))
        for t in range(1, 9):
            acc_ref[...] += dot(tap(taps[t]), wtap(t))

    y = acc_ref[...]
    ym = y * mask                          # exclude pad rows from BN statistics
    # TODO(synk): var via E[x^2]-E[x]^2 can cancel for large-mean activations; a
    #             mean-subtracted second pass would be more robust.
    stats_ref[0:1, :] = jnp.sum(ym, axis=0, keepdims=True)        # sum(y)
    stats_ref[1:2, :] = jnp.sum(ym * y, axis=0, keepdims=True)    # sum(y^2)
    y_ref[...] = y.astype(y_ref.dtype)


def _bn_add_relu_kernel(y_ref, res_ref, scale_ref, shift_ref, o_ref, *, mi, pad_rows):
    """Fused bn2 -> residual add -> ReLU for one image (all f32 math)."""
    y = y_ref[...].astype(jnp.float32) * scale_ref[...] + shift_ref[...]
    res = res_ref[pad_rows:pad_rows + mi, :].astype(jnp.float32)
    o_ref[...] = jnp.maximum(y + res, 0.0)


# --------------------------- pallas_call wrappers --------------------------- #

def _conv_bn_pass(src, mask, scale, shift, w_packed, *, mi, pad_rows, taps,
                  fuse_bn_relu):
    n, src_rows, cp = src.shape
    kernel = functools.partial(_conv_bn_stats_kernel, mi=mi, taps=taps,
                               pad_rows=pad_rows, fuse_bn_relu=fuse_bn_relu,
                               pack_taps=PACK_TAPS)
    scratch = [pltpu.VMEM((mi, cp), jnp.float32)]                       # accumulator
    if fuse_bn_relu:
        scratch.append(pltpu.VMEM((mi + 2 * pad_rows, cp), MXU_DTYPE))  # bf16 staging

    act_bytes = jnp.dtype(ACT_DTYPE).itemsize
    vmem_needed = (2 * src_rows * cp * src.dtype.itemsize          # src (dbl-buffered)
                   + 2 * mi * LANE * 4                             # mask (lane-padded)
                   + 2 * mi * cp * act_bytes                       # y out
                   + 2 * 9 * cp * cp * 2                           # weights
                   + mi * cp * 4                                   # acc scratch
                   + (mi + 2 * pad_rows) * cp * 2                  # staging scratch
                   + 64 * 1024)                                    # small blocks
    return pl.pallas_call(
        kernel,
        out_shape=(jax.ShapeDtypeStruct((n, mi, cp), ACT_DTYPE),
                   jax.ShapeDtypeStruct((n, 2, cp), jnp.float32)),
        grid_spec=pltpu.PrefetchScalarGridSpec(
            num_scalar_prefetch=0,
            grid=(n,),
            in_specs=[
                pl.BlockSpec((None, src_rows, cp), lambda i: (i, 0, 0)),  # per image
                pl.BlockSpec((mi, 1), lambda i: (0, 0)),                  # invariant
                pl.BlockSpec((1, cp), lambda i: (0, 0)),                  # invariant
                pl.BlockSpec((1, cp), lambda i: (0, 0)),                  # invariant
                pl.BlockSpec((9 * cp, cp), lambda i: (0, 0)),             # invariant
            ],
            out_specs=(
                pl.BlockSpec((None, mi, cp), lambda i: (i, 0, 0)),
                pl.BlockSpec((None, 2, cp), lambda i: (i, 0, 0)),
            ),
            scratch_shapes=scratch,
        ),
        compiler_params=_compiler_params(vmem_needed),
    )(src, mask, scale, shift, w_packed)


def _bn_add_relu_pass(y2, x_res_padded, scale, shift, *, mi, pad_rows):
    n, src_rows, cp = x_res_padded.shape
    kernel = functools.partial(_bn_add_relu_kernel, mi=mi, pad_rows=pad_rows)
    vmem_needed = (2 * mi * cp * jnp.dtype(ACT_DTYPE).itemsize
                   + 2 * src_rows * cp * 2
                   + 2 * mi * cp * 4
                   + 64 * 1024)
    return pl.pallas_call(
        kernel,
        out_shape=jax.ShapeDtypeStruct((n, mi, cp), jnp.float32),
        grid_spec=pltpu.PrefetchScalarGridSpec(
            num_scalar_prefetch=0,
            grid=(n,),
            in_specs=[
                pl.BlockSpec((None, mi, cp), lambda i: (i, 0, 0)),
                pl.BlockSpec((None, src_rows, cp), lambda i: (i, 0, 0)),
                pl.BlockSpec((1, cp), lambda i: (0, 0)),
                pl.BlockSpec((1, cp), lambda i: (0, 0)),
            ],
            out_specs=pl.BlockSpec((None, mi, cp), lambda i: (i, 0, 0)),
        ),
        compiler_params=_compiler_params(vmem_needed),
    )(y2, x_res_padded, scale, shift)


# ------------------------------ JAX-side glue ------------------------------- #

def basic_block_forward(x_nchw, params):
    """Forward of BasicBlock(in_c=channels, stride=1, dilation=1), training BN."""
    w1, g1, b1, w2, g2, b2 = params
    n, c, h, w = x_nchw.shape
    f32 = jnp.float32
    cp = _round_up(max(c, LANE), LANE)       # lane-dense channel padding
    assert cp % LANE == 0
    wp = w + 2                               # right-padded width
    mi_valid = (h + 2) * wp                  # rows actually holding the padded image
    mi = _round_up(mi_valid, 8)              # sublane-aligned M
    pad_rows = wp + 1                        # flat offset of the (1,1) interior
    src_rows = _round_up(mi + 2 * pad_rows, 8)
    taps = tuple(ky * wp + kx for ky in range(3) for kx in range(3))

    # "Anchor" layout: NHWC, channel-pad to CP, spatial right-pad by 2 in H and W,
    # flatten rows (row r = y*(W+2)+x), then prepend/append zero rings so pass 1 can
    # slice its conv taps directly from this single bf16 HBM array (no in-kernel
    # staging / masking).  The same array feeds the residual add in pass 3.
    x_nhwc = jnp.transpose(x_nchw, (0, 2, 3, 1)).astype(f32)
    x_flat = jnp.pad(x_nhwc, ((0, 0), (0, 2), (0, 2), (0, cp - c)))
    x_flat = x_flat.reshape(n, mi_valid, cp)
    x_res = jnp.pad(
        x_flat, ((0, 0), (pad_rows, src_rows - pad_rows - mi_valid), (0, 0))
    ).astype(MXU_DTYPE)

    # Valid-row mask in anchor layout (excludes spatial / round-up padding from BN).
    row_valid = ((jnp.arange(h + 2) < h)[:, None] &
                 (jnp.arange(wp) < w)[None, :]).reshape(mi_valid)
    mask = jnp.pad(row_valid.astype(f32), (0, mi - mi_valid)).reshape(mi, 1)

    def prep_w(wt):   # (3,3,C,C) HWIO -> packed (9*CP, CP) per-tap matrix, bf16
        wt = jnp.pad(wt.astype(f32), ((0, 0), (0, 0), (0, cp - c), (0, cp - c)))
        return wt.reshape(9 * cp, cp).astype(MXU_DTYPE)

    def prep_v(v):
        return jnp.pad(v.astype(f32), (0, cp - c))

    w1p, w2p = prep_w(w1), prep_w(w2)
    g1p, b1p, g2p, b2p = prep_v(g1), prep_v(b1), prep_v(g2), prep_v(b2)
    ones = jnp.ones((1, cp), f32)
    zeros = jnp.zeros((1, cp), f32)

    count = n * h * w

    def finalize(stats, gamma, beta):
        mean = jnp.sum(stats[:, 0, :], axis=0) / count
        var = jnp.maximum(jnp.sum(stats[:, 1, :], axis=0) / count - mean * mean, 0.0)
        scale, shift = _bn_scale_shift(mean, var, gamma, beta)
        return scale[None, :], shift[None, :]

    # Pass 1: conv1 + per-image masked partial BN1 statistics.
    y1, st1 = _conv_bn_pass(x_res, mask, ones, zeros, w1p, mi=mi,
                            pad_rows=pad_rows, taps=taps, fuse_bn_relu=False)
    sc1, sh1 = finalize(st1, g1p, b1p)
    # Pass 2: bn1 -> ReLU -> conv2 fused, + partial BN2 statistics.
    y2, st2 = _conv_bn_pass(y1, mask, sc1, sh1, w2p, mi=mi,
                            pad_rows=pad_rows, taps=taps, fuse_bn_relu=True)
    sc2, sh2 = finalize(st2, g2p, b2p)
    # Pass 3: bn2 -> +residual -> ReLU fused.
    out_flat = _bn_add_relu_pass(y2, x_res, sc2, sh2, mi=mi, pad_rows=pad_rows)

    # TODO(synk): in a ResNet stack, keep the anchor layout between blocks and drop
    #             this slice+transpose epilogue; it is only needed to return NCHW.
    out = out_flat[:, :mi_valid, :].reshape(n, h + 2, wp, cp)[:, :h, :w, :c]
    return jnp.transpose(out, (0, 3, 1, 2))                       # back to NCHW


# --------------------------- pure-JAX reference ----------------------------- #

def basic_block_reference(x_nchw, params, *, mirror_kernel_precision=False):
    """XLA reference.  With mirror_kernel_precision=True it replays the kernel's
    precision policy exactly (bf16 matmul inputs / residual, f32 accumulation, BN
    statistics from the f32 conv output, bf16 round-trip of the stored y1/y2),
    isolating kernel correctness from the mixed-precision policy."""
    w1, g1, b1, w2, g2, b2 = params
    f32 = jnp.float32
    if mirror_kernel_precision:
        q_in = lambda a: a.astype(MXU_DTYPE).astype(f32)    # matmul-input rounding
        q_act = lambda a: a.astype(ACT_DTYPE).astype(f32)   # HBM intermediate rounding
    else:
        q_in = q_act = lambda a: a
    dn = ("NHWC", "HWIO", "NHWC")

    x = jnp.transpose(x_nchw, (0, 2, 3, 1)).astype(f32)
    xr = q_in(x)
    y1 = lax.conv_general_dilated(xr, q_in(w1.astype(f32)), (1, 1), ((1, 1), (1, 1)),
                                  dimension_numbers=dn)
    m1 = y1.mean(axis=(0, 1, 2))
    v1 = jnp.maximum((y1 * y1).mean(axis=(0, 1, 2)) - m1 * m1, 0.0)
    s1, t1 = _bn_scale_shift(m1, v1, g1, b1)
    a1 = jnp.maximum(q_act(y1) * s1 + t1, 0.0)
    y2 = lax.conv_general_dilated(q_in(a1), q_in(w2.astype(f32)), (1, 1), ((1, 1), (1, 1)),
                                  dimension_numbers=dn)
    m2 = y2.mean(axis=(0, 1, 2))
    v2 = jnp.maximum((y2 * y2).mean(axis=(0, 1, 2)) - m2 * m2, 0.0)
    s2, t2 = _bn_scale_shift(m2, v2, g2, b2)
    out = jnp.maximum(q_act(y2) * s2 + t2 + xr, 0.0)
    return jnp.transpose(out, (0, 3, 1, 2))


# ----------------------------------- main ----------------------------------- #

if __name__ == "__main__":
    N, C, H, W = 2, 4, 16, 16          # in_channels == channels == 4, stride=1

    key = jax.random.PRNGKey(0)
    k_x, k_w1, k_w2 = jax.random.split(key, 3)

    x = jax.random.normal(k_x, (N, C, H, W), dtype=jnp.float32)
    # Conv weights in HWIO layout (3, 3, Cin, Cout); deterministic init.
    w1 = jax.random.normal(k_w1, (3, 3, C, C), dtype=jnp.float32) * 0.1
    w2 = jax.random.normal(k_w2, (3, 3, C, C), dtype=jnp.float32) * 0.1
    # BatchNorm affine params at PyTorch defaults: gamma=1, beta=0.
    g1 = jnp.ones((C,), jnp.float32)
    b1 = jnp.zeros((C,), jnp.float32)
    g2 = jnp.ones((C,), jnp.float32)
    b2 = jnp.zeros((C,), jnp.float32)
    params = (w1, g1, b1, w2, g2, b2)

    out = jax.block_until_ready(jax.jit(basic_block_forward)(x, params))

    # Check vs. a reference replaying the same mixed-precision policy -> validates
    # implicit-GEMM indexing, tap packing, masking and the BN restructuring.
    ref_mixed = jax.block_until_ready(
        basic_block_reference(x, params, mirror_kernel_precision=True))
    np.testing.assert_allclose(np.asarray(out), np.asarray(ref_mixed),
                               rtol=1e-2, atol=1e-2)

    # Looser check vs. the plain f32 module forward; the gap is the expected bf16
    # rounding of conv inputs, the residual and the y1/y2 intermediates.
    ref_f32 = jax.block_until_ready(basic_block_reference(x, params))
    np.testing.assert_allclose(np.asarray(out), np.asarray(ref_f32),
                               rtol=5e-2, atol=5e-2)

    print("KERNEL_OK")
</pallas_src>

<mosaic_0001>
module attributes {stable_mosaic.version = 11 : i64} {
  func.func @_conv_bn_stats_kernel(%arg0: i32, %arg1: memref<1x368x128xbf16, #tpu.memory_space<vmem>>, %arg2: memref<328x1xf32, #tpu.memory_space<vmem>>, %arg3: memref<1x128xf32, #tpu.memory_space<vmem>>, %arg4: memref<1x128xf32, #tpu.memory_space<vmem>>, %arg5: memref<1152x128xbf16, #tpu.memory_space<vmem>>, %arg6: memref<1x328x128xbf16, #tpu.memory_space<vmem>>, %arg7: memref<1x2x128xf32, #tpu.memory_space<vmem>>, %arg8: memref<328x128xf32, #tpu.memory_space<vmem>>) attributes {dimension_semantics = [#tpu.dimension_semantics<parallel>], iteration_bounds = array<i64: 2>, scalar_prefetch = 0 : i64, scratch_operands = 1 : i64, tpu.core_type = #tpu.core_type<tc>, window_params = [{transform_indices = @transform_0, window_bounds = array<i64: 1, 368, 128>}, {pipeline_mode = #tpu.pipeline_mode<synchronous>, transform_indices = @transform_1, window_bounds = array<i64: 328, 1>}, {pipeline_mode = #tpu.pipeline_mode<synchronous>, transform_indices = @transform_2, window_bounds = array<i64: 1, 128>}, {pipeline_mode = #tpu.pipeline_mode<synchronous>, transform_indices = @transform_3, window_bounds = array<i64: 1, 128>}, {pipeline_mode = #tpu.pipeline_mode<synchronous>, transform_indices = @transform_4, window_bounds = array<i64: 1152, 128>}, {transform_indices = @transform_5, window_bounds = array<i64: 1, 328, 128>}, {transform_indices = @transform_6, window_bounds = array<i64: 1, 2, 128>}]} {
    %c0 = arith.constant 0 : index
    %c0_0 = arith.constant 0 : index
    %0 = vector.load %arg2[%c0, %c0_0] : memref<328x1xf32, #tpu.memory_space<vmem>>, vector<328x1xf32>
    %c0_1 = arith.constant 0 : index
    %c0_2 = arith.constant 0 : index
    %c0_3 = arith.constant 0 : index
    %1 = vector.load %arg1[%c0_1, %c0_2, %c0_3] : memref<1x368x128xbf16, #tpu.memory_space<vmem>>, vector<1x328x128xbf16>
    %2 = vector.shape_cast %1 : vector<1x328x128xbf16> to vector<328x128xbf16>
    %c0_4 = arith.constant 0 : index
    %c1 = arith.constant 1 : index
    %c0_5 = arith.constant 0 : index
    %3 = vector.load %arg1[%c0_4, %c1, %c0_5] : memref<1x368x128xbf16, #tpu.memory_space<vmem>>, vector<1x328x128xbf16>
    %4 = vector.shape_cast %3 : vector<1x328x128xbf16> to vector<328x128xbf16>
    %5 = tpu.concatenate %2, %4 in 1 : vector<328x128xbf16>, vector<328x128xbf16> -> vector<328x256xbf16>
    %c0_6 = arith.constant 0 : index
    %c0_7 = arith.constant 0 : index
    %6 = vector.load %arg5[%c0_6, %c0_7] : memref<1152x128xbf16, #tpu.memory_space<vmem>>, vector<256x128xbf16>
    %cst = arith.constant dense<0.000000e+00> : vector<328x128xf32>
    %7 = tpu.matmul %5, %6, %cst {dimension_numbers = #tpu.dot_dimension_numbers<[1], [0], [0], [1], [0, 0, 1, 1], [], []>} : vector<328x256xbf16>, vector<256x128xbf16>, vector<328x128xf32> -> vector<328x128xf32>
    %c0_8 = arith.constant 0 : index
    %c0_9 = arith.constant 0 : index
    %8 = vector.load %arg8[%c0_8, %c0_9] : memref<328x128xf32, #tpu.memory_space<vmem>>, vector<328x128xf32>
    tpu.vector_store %arg8[%c0_8, %c0_9], %7 {strides = array<i32>} : memref<328x128xf32, #tpu.memory_space<vmem>>, vector<328x128xf32>,
    %c0_10 = arith.constant 0 : index
    %c0_11 = arith.constant 0 : index
    %9 = vector.load %arg8[%c0_10, %c0_11] : memref<328x128xf32, #tpu.memory_space<vmem>>, vector<328x128xf32>
    %c0_12 = arith.constant 0 : index
    %c2 = arith.constant 2 : index
    %c0_13 = arith.constant 0 : index
    %10 = vector.load %arg1[%c0_12, %c2, %c0_13] : memref<1x368x128xbf16, #tpu.memory_space<vmem>>, vector<1x328x128xbf16>
    %11 = vector.shape_cast %10 : vector<1x328x128xbf16> to vector<328x128xbf16>
    %c0_14 = arith.constant 0 : index
    %c18 = arith.constant 18 : index
    %c0_15 = arith.constant 0 : index
    %12 = vector.load %arg1[%c0_14, %c18, %c0_15] : memref<1x368x128xbf16, #tpu.memory_space<vmem>>, vector<1x328x128xbf16>
    %13 = vector.shape_cast %12 : vector<1x328x128xbf16> to vector<328x128xbf16>
    %14 = tpu.concatenate %11, %13 in 1 : vector<328x128xbf16>, vector<328x128xbf16> -> vector<328x256xbf16>
    %c256 = arith.constant 256 : index
    %c0_16 = arith.constant 0 : index
    %15 = vector.load %arg5[%c256, %c0_16] : memref<1152x128xbf16, #tpu.memory_space<vmem>>, vector<256x128xbf16>
    %cst_17 = arith.constant dense<0.000000e+00> : vector<328x128xf32>
    %16 = tpu.matmul %14, %15, %cst_17 {dimension_numbers = #tpu.dot_dimension_numbers<[1], [0], [0], [1], [0, 0, 1, 1], [], []>} : vector<328x256xbf16>, vector<256x128xbf16>, vector<328x128xf32> -> vector<328x128xf32>
    %17 = arith.addf %9, %16 : vector<328x128xf32>
    %c0_18 = arith.constant 0 : index
    %c0_19 = arith.constant 0 : index
    %18 = vector.load %arg8[%c0_18, %c0_19] : memref<328x128xf32, #tpu.memory_space<vmem>>, vector<328x128xf32>
    tpu.vector_store %arg8[%c0_18, %c0_19], %17 {strides = array<i32>} : memref<328x128xf32, #tpu.memory_space<vmem>>, vector<328x128xf32>,
    %c0_20 = arith.constant 0 : index
    %c0_21 = arith.constant 0 : index
    %19 = vector.load %arg8[%c0_20, %c0_21] : memref<328x128xf32, #tpu.memory_space<vmem>>, vector<328x128xf32>
    %c0_22 = arith.constant 0 : index
    %c19 = arith.constant 19 : index
    %c0_23 = arith.constant 0 : index
    %20 = vector.load %arg1[%c0_22, %c19, %c0_23] : memref<1x368x128xbf16, #tpu.memory_space<vmem>>, vector<1x328x128xbf16>
    %21 = vector.shape_cast %20 : vector<1x328x128xbf16> to vector<328x128xbf16>
    %c0_24 = arith.constant 0 : index
    %c20 = arith.constant 20 : index
    %c0_25 = arith.constant 0 : index
    %22 = vector.load %arg1[%c0_24, %c20, %c0_25] : memref<1x368x128xbf16, #tpu.memory_space<vmem>>, vector<1x328x128xbf16>
    %23 = vector.shape_cast %22 : vector<1x328x128xbf16> to vector<328x128xbf16>
    %24 = tpu.concatenate %21, %23 in 1 : vector<328x128xbf16>, vector<328x128xbf16> -> vector<328x256xbf16>
    %c512 = arith.constant 512 : index
    %c0_26 = arith.constant 0 : index
    %25 = vector.load %arg5[%c512, %c0_26] : memref<1152x128xbf16, #tpu.memory_space<vmem>>, vector<256x128xbf16>
    %cst_27 = arith.constant dense<0.000000e+00> : vector<328x128xf32>
    %26 = tpu.matmul %24, %25, %cst_27 {dimension_numbers = #tpu.dot_dimension_numbers<[1], [0], [0], [1], [0, 0, 1, 1], [], []>} : vector<328x256xbf16>, vector<256x128xbf16>, vector<328x128xf32> -> vector<328x128xf32>
    %27 = arith.addf %19, %26 : vector<328x128xf32>
    %c0_28 = arith.constant 0 : index
    %c0_29 = arith.constant 0 : index
    %28 = vector.load %arg8[%c0_28, %c0_29] : memref<328x128xf32, #tpu.memory_space<vmem>>, vector<328x128xf32>
    tpu.vector_store %arg8[%c0_28, %c0_29], %27 {strides = array<i32>} : memref<328x128xf32, #tpu.memory_space<vmem>>, vector<328x128xf32>,
    %c0_30 = arith.constant 0 : index
    %c0_31 = arith.constant 0 : index
    %29 = vector.load %arg8[%c0_30, %c0_31] : memref<328x128xf32, #tpu.memory_space<vmem>>, vector<328x128xf32>
    %c0_32 = arith.constant 0 : index
    %c36 = arith.constant 36 : index
    %c0_33 = arith.constant 0 : index
    %30 = vector.load %arg1[%c0_32, %c36, %c0_33] : memref<1x368x128xbf16, #tpu.memory_space<vmem>>, vector<1x328x128xbf16>
    %31 = vector.shape_cast %30 : vector<1x328x128xbf16> to vector<328x128xbf16>
    %c0_34 = arith.constant 0 : index
    %c37 = arith.constant 37 : index
    %c0_35 = arith.constant 0 : index
    %32 = vector.load %arg1[%c0_34, %c37, %c0_35] : memref<1x368x128xbf16, #tpu.memory_space<vmem>>, vector<1x328x128xbf16>
    %33 = vector.shape_cast %32 : vector<1x328x128xbf16> to vector<328x128xbf16>
    %34 = tpu.concatenate %31, %33 in 1 : vector<328x128xbf16>, vector<328x128xbf16> -> vector<328x256xbf16>
    %c768 = arith.constant 768 : index
    %c0_36 = arith.constant 0 : index
    %35 = vector.load %arg5[%c768, %c0_36] : memref<1152x128xbf16, #tpu.memory_space<vmem>>, vector<256x128xbf16>
    %cst_37 = arith.constant dense<0.000000e+00> : vector<328x128xf32>
    %36 = tpu.matmul %34, %35, %cst_37 {dimension_numbers = #tpu.dot_dimension_numbers<[1], [0], [0], [1], [0, 0, 1, 1], [], []>} : vector<328x256xbf16>, vector<256x128xbf16>, vector<328x128xf32> -> vector<328x128xf32>
    %37 = arith.addf %29, %36 : vector<328x128xf32>
    %c0_38 = arith.constant 0 : index
    %c0_39 = arith.constant 0 : index
    %38 = vector.load %arg8[%c0_38, %c0_39] : memref<328x128xf32, #tpu.memory_space<vmem>>, vector<328x128xf32>
    tpu.vector_store %arg8[%c0_38, %c0_39], %37 {strides = array<i32>} : memref<328x128xf32, #tpu.memory_space<vmem>>, vector<328x128xf32>,
    %c0_40 = arith.constant 0 : index
    %c0_41 = arith.constant 0 : index
    %39 = vector.load %arg8[%c0_40, %c0_41] : memref<328x128xf32, #tpu.memory_space<vmem>>, vector<328x128xf32>
    %c0_42 = arith.constant 0 : index
    %c38 = arith.constant 38 : index
    %c0_43 = arith.constant 0 : index
    %40 = vector.load %arg1[%c0_42, %c38, %c0_43] : memref<1x368x128xbf16, #tpu.memory_space<vmem>>, vector<1x328x128xbf16>
    %41 = vector.shape_cast %40 : vector<1x328x128xbf16> to vector<328x128xbf16>
    %c1024 = arith.constant 1024 : index
    %c0_44 = arith.constant 0 : index
    %42 = vector.load %arg5[%c1024, %c0_44] : memref<1152x128xbf16, #tpu.memory_space<vmem>>, vector<128x128xbf16>
    %cst_45 = arith.constant dense<0.000000e+00> : vector<328x128xf32>
    %43 = tpu.matmul %41, %42, %cst_45 {dimension_numbers = #tpu.dot_dimension_numbers<[1], [0], [0], [1], [0, 0, 1, 1], [], []>} : vector<328x128xbf16>, vector<128x128xbf16>, vector<328x128xf32> -> vector<328x128xf32>
    %44 = arith.addf %39, %43 : vector<328x128xf32>
    %c0_46 = arith.constant 0 : index
    %c0_47 = arith.constant 0 : index
    %45 = vector.load %arg8[%c0_46, %c0_47] : memref<328x128xf32, #tpu.memory_space<vmem>>, vector<328x128xf32>
    tpu.vector_store %arg8[%c0_46, %c0_47], %44 {strides = array<i32>} : memref<328x128xf32, #tpu.memory_space<vmem>>, vector<328x128xf32>,
    %c0_48 = arith.constant 0 : index
    %c0_49 = arith.constant 0 : index
    %46 = vector.load %arg8[%c0_48, %c0_49] : memref<328x128xf32, #tpu.memory_space<vmem>>, vector<328x128xf32>
    %47 = vector.broadcast %0 : vector<328x1xf32> to vector<328x128xf32>
    %48 = arith.mulf %46, %47 : vector<328x128xf32>
    %cst_50 = arith.constant dense<0.000000e+00> : vector<128xf32>
    %49 = vector.multi_reduction <add>, %48, %cst_50 [0] : vector<328x128xf32> to vector<128xf32>
    %50 = vector.shape_cast %49 : vector<128xf32> to vector<1x128xf32>
    %c0_51 = arith.constant 0 : index
    %c0_52 = arith.constant 0 : index
    %c0_53 = arith.constant 0 : index
    %51 = vector.load %arg7[%c0_51, %c0_52, %c0_53] : memref<1x2x128xf32, #tpu.memory_space<vmem>>, vector<1x1x128xf32>
    %52 = vector.shape_cast %51 : vector<1x1x128xf32> to vector<1x128xf32>
    %53 = vector.shape_cast %50 : vector<1x128xf32> to vector<1x1x128xf32>
    tpu.vector_store %arg7[%c0_51, %c0_52, %c0_53], %53 {strides = array<i32>} : memref<1x2x128xf32, #tpu.memory_space<vmem>>, vector<1x1x128xf32>,
    %54 = arith.mulf %48, %46 : vector<328x128xf32>
    %cst_54 = arith.constant dense<0.000000e+00> : vector<128xf32>
    %55 = vector.multi_reduction <add>, %54, %cst_54 [0] : vector<328x128xf32> to vector<128xf32>
    %56 = vector.shape_cast %55 : vector<128xf32> to vector<1x128xf32>
    %c0_55 = arith.constant 0 : index
    %c1_56 = arith.constant 1 : index
    %c0_57 = arith.constant 0 : index
    %57 = vector.load %arg7[%c0_55, %c1_56, %c0_57] : memref<1x2x128xf32, #tpu.memory_space<vmem>>, vector<1x1x128xf32>
    %58 = vector.shape_cast %57 : vector<1x1x128xf32> to vector<1x128xf32>
    %59 = vector.shape_cast %56 : vector<1x128xf32> to vector<1x1x128xf32>
    tpu.vector_store %arg7[%c0_55, %c1_56, %c0_57], %59 {strides = array<i32>} : memref<1x2x128xf32, #tpu.memory_space<vmem>>, vector<1x1x128xf32>,
    %60 = arith.truncf %46 : vector<328x128xf32> to vector<328x128xbf16>
    %c0_58 = arith.constant 0 : index
    %c0_59 = arith.constant 0 : index
    %c0_60 = arith.constant 0 : index
    %61 = vector.load %arg6[%c0_58, %c0_59, %c0_60] : memref<1x328x128xbf16, #tpu.memory_space<vmem>>, vector<1x328x128xbf16>
    %62 = vector.shape_cast %61 : vector<1x328x128xbf16> to vector<328x128xbf16>
    %63 = vector.shape_cast %60 : vector<328x128xbf16> to vector<1x328x128xbf16>
    tpu.vector_store %arg6[%c0_58, %c0_59, %c0_60], %63 {strides = array<i32>} : memref<1x328x128xbf16, #tpu.memory_space<vmem>>, vector<1x328x128xbf16>,
    return
  }
  func.func @transform_0(%arg0: i32) -> (i32, i32, i32) {
    %c0_i32 = arith.constant 0 : i32
    %c0_i32_0 = arith.constant 0 : i32
    %c0_i32_1 = arith.constant 0 : i32
    return %arg0, %c0_i32, %c0_i32_0 : i32, i32, i32
  }
  func.func @transform_1(%arg0: i32) -> (i32, i32) {
    %c0_i32 = arith.constant 0 : i32
    %c0_i32_0 = arith.constant 0 : i32
    %c0_i32_1 = arith.constant 0 : i32
    return %c0_i32, %c0_i32_0 : i32, i32
  }
  func.func @transform_2(%arg0: i32) -> (i32, i32) {
    %c0_i32 = arith.constant 0 : i32
    %c0_i32_0 = arith.constant 0 : i32
    %c0_i32_1 = arith.constant 0 : i32
    return %c0_i32, %c0_i32_0 : i32, i32
  }
  func.func @transform_3(%arg0: i32) -> (i32, i32) {
    %c0_i32 = arith.constant 0 : i32
    %c0_i32_0 = arith.constant 0 : i32
    %c0_i32_1 = arith.constant 0 : i32
    return %c0_i32, %c0_i32_0 : i32, i32
  }
  func.func @transform_4(%arg0: i32) -> (i32, i32) {
    %c0_i32 = arith.constant 0 : i32
    %c0_i32_0 = arith.constant 0 : i32
    %c0_i32_1 = arith.constant 0 : i32
    return %c0_i32, %c0_i32_0 : i32, i32
  }
  func.func @transform_5(%arg0: i32) -> (i32, i32, i32) {
    %c0_i32 = arith.constant 0 : i32
    %c0_i32_0 = arith.constant 0 : i32
    %c0_i32_1 = arith.constant 0 : i32
    return %arg0, %c0_i32, %c0_i32_0 : i32, i32, i32
  }
  func.func @transform_6(%arg0: i32) -> (i32, i32, i32) {
    %c0_i32 = arith.constant 0 : i32
    %c0_i32_0 = arith.constant 0 : i32
    %c0_i32_1 = arith.constant 0 : i32
    return %arg0, %c0_i32, %c0_i32_0 : i32, i32, i32
  }
}

module attributes {stable_mosaic.version = 11 : i64} {
  func.func @_conv_bn_stats_kernel(%arg0: i32, %arg1: memref<1x328x128xbf16, #tpu.memory_space<vmem>>, %arg2: memref<328x1xf32, #tpu.memory_space<vmem>>, %arg3: memref<1x128xf32, #tpu.memory_space<vmem>>, %arg4: memref<1x128xf32, #tpu.memory_space<vmem>>, %arg5: memref<1152x128xbf16, #tpu.memory_space<vmem>>, %arg6: memref<1x328x128xbf16, #tpu.memory_space<vmem>>, %arg7: memref<1x2x128xf32, #tpu.memory_space<vmem>>, %arg8: memref<328x128xf32, #tpu.memory_space<vmem>>, %arg9: memref<366x128xbf16, #tpu.memory_space<vmem>>) attributes {dimension_semantics = [#tpu.dimension_semantics<parallel>], iteration_bounds = array<i64: 2>, scalar_prefetch = 0 : i64, scratch_operands = 2 : i64, tpu.core_type = #tpu.core_type<tc>, window_params = [{transform_indices = @transform_0, window_bounds = array<i64: 1, 328, 128>}, {pipeline_mode = #tpu.pipeline_mode<synchronous>, transform_indices = @transform_1, window_bounds = array<i64: 328, 1>}, {pipeline_mode = #tpu.pipeline_mode<synchronous>, transform_indices = @transform_2, window_bounds = array<i64: 1, 128>}, {pipeline_mode = #tpu.pipeline_mode<synchronous>, transform_indices = @transform_3, window_bounds = array<i64: 1, 128>}, {pipeline_mode = #tpu.pipeline_mode<synchronous>, transform_indices = @transform_4, window_bounds = array<i64: 1152, 128>}, {transform_indices = @transform_5, window_bounds = array<i64: 1, 328, 128>}, {transform_indices = @transform_6, window_bounds = array<i64: 1, 2, 128>}]} {
    %c0 = arith.constant 0 : index
    %c0_0 = arith.constant 0 : index
    %0 = vector.load %arg2[%c0, %c0_0] : memref<328x1xf32, #tpu.memory_space<vmem>>, vector<328x1xf32>
    %c0_1 = arith.constant 0 : index
    %c0_2 = arith.constant 0 : index
    %c0_3 = arith.constant 0 : index
    %1 = vector.load %arg1[%c0_1, %c0_2, %c0_3] : memref<1x328x128xbf16, #tpu.memory_space<vmem>>, vector<1x328x128xbf16>
    %2 = vector.shape_cast %1 : vector<1x328x128xbf16> to vector<328x128xbf16>
    %3 = arith.extf %2 : vector<328x128xbf16> to vector<328x128xf32>
    %c0_4 = arith.constant 0 : index
    %c0_5 = arith.constant 0 : index
    %4 = vector.load %arg3[%c0_4, %c0_5] : memref<1x128xf32, #tpu.memory_space<vmem>>, vector<1x128xf32>
    %5 = vector.broadcast %4 : vector<1x128xf32> to vector<328x128xf32>
    %6 = arith.mulf %3, %5 : vector<328x128xf32>
    %c0_6 = arith.constant 0 : index
    %c0_7 = arith.constant 0 : index
    %7 = vector.load %arg4[%c0_6, %c0_7] : memref<1x128xf32, #tpu.memory_space<vmem>>, vector<1x128xf32>
    %8 = vector.broadcast %7 : vector<1x128xf32> to vector<328x128xf32>
    %9 = arith.addf %6, %8 : vector<328x128xf32>
    %cst = arith.constant 0.000000e+00 : f32
    %10 = vector.broadcast %cst : f32 to vector<328x128xf32>
    %11 = arith.maximumf %9, %10 : vector<328x128xf32>
    %12 = vector.broadcast %0 : vector<328x1xf32> to vector<328x128xf32>
    %13 = arith.mulf %11, %12 : vector<328x128xf32>
    %cst_8 = arith.constant 0.000000e+00 : bf16
    %14 = vector.broadcast %cst_8 : bf16 to vector<19x128xbf16>
    %c0_9 = arith.constant 0 : index
    %c0_10 = arith.constant 0 : index
    %15 = vector.load %arg9[%c0_9, %c0_10] : memref<366x128xbf16, #tpu.memory_space<vmem>>, vector<19x128xbf16>
    tpu.vector_store %arg9[%c0_9, %c0_10], %14 {strides = array<i32>} : memref<366x128xbf16, #tpu.memory_space<vmem>>, vector<19x128xbf16>,
    %16 = arith.truncf %13 : vector<328x128xf32> to vector<328x128xbf16>
    %c19 = arith.constant 19 : index
    %c0_11 = arith.constant 0 : index
    %17 = vector.load %arg9[%c19, %c0_11] : memref<366x128xbf16, #tpu.memory_space<vmem>>, vector<328x128xbf16>
    tpu.vector_store %arg9[%c19, %c0_11], %16 {strides = array<i32>} : memref<366x128xbf16, #tpu.memory_space<vmem>>, vector<328x128xbf16>,
    %c347 = arith.constant 347 : index
    %c0_12 = arith.constant 0 : index
    %18 = vector.load %arg9[%c347, %c0_12] : memref<366x128xbf16, #tpu.memory_space<vmem>>, vector<19x128xbf16>
    tpu.vector_store %arg9[%c347, %c0_12], %14 {strides = array<i32>} : memref<366x128xbf16, #tpu.memory_space<vmem>>, vector<19x128xbf16>,
    %c0_13 = arith.constant 0 : index
    %c0_14 = arith.constant 0 : index
    %19 = vector.load %arg9[%c0_13, %c0_14] : memref<366x128xbf16, #tpu.memory_space<vmem>>, vector<328x128xbf16>
    %c1 = arith.constant 1 : index
    %c0_15 = arith.constant 0 : index
    %20 = vector.load %arg9[%c1, %c0_15] : memref<366x128xbf16, #tpu.memory_space<vmem>>, vector<328x128xbf16>
    %21 = tpu.concatenate %19, %20 in 1 : vector<328x128xbf16>, vector<328x128xbf16> -> vector<328x256xbf16>
    %c0_16 = arith.constant 0 : index
    %c0_17 = arith.constant 0 : index
    %22 = vector.load %arg5[%c0_16, %c0_17] : memref<1152x128xbf16, #tpu.memory_space<vmem>>, vector<256x128xbf16>
    %cst_18 = arith.constant dense<0.000000e+00> : vector<328x128xf32>
    %23 = tpu.matmul %21, %22, %cst_18 {dimension_numbers = #tpu.dot_dimension_numbers<[1], [0], [0], [1], [0, 0, 1, 1], [], []>} : vector<328x256xbf16>, vector<256x128xbf16>, vector<328x128xf32> -> vector<328x128xf32>
    %c0_19 = arith.constant 0 : index
    %c0_20 = arith.constant 0 : index
    %24 = vector.load %arg8[%c0_19, %c0_20] : memref<328x128xf32, #tpu.memory_space<vmem>>, vector<328x128xf32>
    tpu.vector_store %arg8[%c0_19, %c0_20], %23 {strides = array<i32>} : memref<328x128xf32, #tpu.memory_space<vmem>>, vector<328x128xf32>,
    %c0_21 = arith.constant 0 : index
    %c0_22 = arith.constant 0 : index
    %25 = vector.load %arg8[%c0_21, %c0_22] : memref<328x128xf32, #tpu.memory_space<vmem>>, vector<328x128xf32>
    %c2 = arith.constant 2 : index
    %c0_23 = arith.constant 0 : index
    %26 = vector.load %arg9[%c2, %c0_23] : memref<366x128xbf16, #tpu.memory_space<vmem>>, vector<328x128xbf16>
    %c18 = arith.constant 18 : index
    %c0_24 = arith.constant 0 : index
    %27 = vector.load %arg9[%c18, %c0_24] : memref<366x128xbf16, #tpu.memory_space<vmem>>, vector<328x128xbf16>
    %28 = tpu.concatenate %26, %27 in 1 : vector<328x128xbf16>, vector<328x128xbf16> -> vector<328x256xbf16>
    %c256 = arith.constant 256 : index
    %c0_25 = arith.constant 0 : index
    %29 = vector.load %arg5[%c256, %c0_25] : memref<1152x128xbf16, #tpu.memory_space<vmem>>, vector<256x128xbf16>
    %cst_26 = arith.constant dense<0.000000e+00> : vector<328x128xf32>
    %30 = tpu.matmul %28, %29, %cst_26 {dimension_numbers = #tpu.dot_dimension_numbers<[1], [0], [0], [1], [0, 0, 1, 1], [], []>} : vector<328x256xbf16>, vector<256x128xbf16>, vector<328x128xf32> -> vector<328x128xf32>
    %31 = arith.addf %25, %30 : vector<328x128xf32>
    %c0_27 = arith.constant 0 : index
    %c0_28 = arith.constant 0 : index
    %32 = vector.load %arg8[%c0_27, %c0_28] : memref<328x128xf32, #tpu.memory_space<vmem>>, vector<328x128xf32>
    tpu.vector_store %arg8[%c0_27, %c0_28], %31 {strides = array<i32>} : memref<328x128xf32, #tpu.memory_space<vmem>>, vector<328x128xf32>,
    %c0_29 = arith.constant 0 : index
    %c0_30 = arith.constant 0 : index
    %33 = vector.load %arg8[%c0_29, %c0_30] : memref<328x128xf32, #tpu.memory_space<vmem>>, vector<328x128xf32>
    %c19_31 = arith.constant 19 : index
    %c0_32 = arith.constant 0 : index
    %34 = vector.load %arg9[%c19_31, %c0_32] : memref<366x128xbf16, #tpu.memory_space<vmem>>, vector<328x128xbf16>
    %c20 = arith.constant 20 : index
    %c0_33 = arith.constant 0 : index
    %35 = vector.load %arg9[%c20, %c0_33] : memref<366x128xbf16, #tpu.memory_space<vmem>>, vector<328x128xbf16>
    %36 = tpu.concatenate %34, %35 in 1 : vector<328x128xbf16>, vector<328x128xbf16> -> vector<328x256xbf16>
    %c512 = arith.constant 512 : index
    %c0_34 = arith.constant 0 : index
    %37 = vector.load %arg5[%c512, %c0_34] : memref<1152x128xbf16, #tpu.memory_space<vmem>>, vector<256x128xbf16>
    %cst_35 = arith.constant dense<0.000000e+00> : vector<328x128xf32>
    %38 = tpu.matmul %36, %37, %cst_35 {dimension_numbers = #tpu.dot_dimension_numbers<[1], [0], [0], [1], [0, 0, 1, 1], [], []>} : vector<328x256xbf16>, vector<256x128xbf16>, vector<328x128xf32> -> vector<328x128xf32>
    %39 = arith.addf %33, %38 : vector<328x128xf32>
    %c0_36 = arith.constant 0 : index
    %c0_37 = arith.constant 0 : index
    %40 = vector.load %arg8[%c0_36, %c0_37] : memref<328x128xf32, #tpu.memory_space<vmem>>, vector<328x128xf32>
    tpu.vector_store %arg8[%c0_36, %c0_37], %39 {strides = array<i32>} : memref<328x128xf32, #tpu.memory_space<vmem>>, vector<328x128xf32>,
    %c0_38 = arith.constant 0 : index
    %c0_39 = arith.constant 0 : index
    %41 = vector.load %arg8[%c0_38, %c0_39] : memref<328x128xf32, #tpu.memory_space<vmem>>, vector<328x128xf32>
    %c36 = arith.constant 36 : index
    %c0_40 = arith.constant 0 : index
    %42 = vector.load %arg9[%c36, %c0_40] : memref<366x128xbf16, #tpu.memory_space<vmem>>, vector<328x128xbf16>
    %c37 = arith.constant 37 : index
    %c0_41 = arith.constant 0 : index
    %43 = vector.load %arg9[%c37, %c0_41] : memref<366x128xbf16, #tpu.memory_space<vmem>>, vector<328x128xbf16>
    %44 = tpu.concatenate %42, %43 in 1 : vector<328x128xbf16>, vector<328x128xbf16> -> vector<328x256xbf16>
    %c768 = arith.constant 768 : index
    %c0_42 = arith.constant 0 : index
    %45 = vector.load %arg5[%c768, %c0_42] : memref<1152x128xbf16, #tpu.memory_space<vmem>>, vector<256x128xbf16>
    %cst_43 = arith.constant dense<0.000000e+00> : vector<328x128xf32>
    %46 = tpu.matmul %44, %45, %cst_43 {dimension_numbers = #tpu.dot_dimension_numbers<[1], [0], [0], [1], [0, 0, 1, 1], [], []>} : vector<328x256xbf16>, vector<256x128xbf16>, vector<328x128xf32> -> vector<328x128xf32>
    %47 = arith.addf %41, %46 : vector<328x128xf32>
    %c0_44 = arith.constant 0 : index
    %c0_45 = arith.constant 0 : index
    %48 = vector.load %arg8[%c0_44, %c0_45] : memref<328x128xf32, #tpu.memory_space<vmem>>, vector<328x128xf32>
    tpu.vector_store %arg8[%c0_44, %c0_45], %47 {strides = array<i32>} : memref<328x128xf32, #tpu.memory_space<vmem>>, vector<328x128xf32>,
    %c0_46 = arith.constant 0 : index
    %c0_47 = arith.constant 0 : index
    %49 = vector.load %arg8[%c0_46, %c0_47] : memref<328x128xf32, #tpu.memory_space<vmem>>, vector<328x128xf32>
    %c38 = arith.constant 38 : index
    %c0_48 = arith.constant 0 : index
    %50 = vector.load %arg9[%c38, %c0_48] : memref<366x128xbf16, #tpu.memory_space<vmem>>, vector<328x128xbf16>
    %c1024 = arith.constant 1024 : index
    %c0_49 = arith.constant 0 : index
    %51 = vector.load %arg5[%c1024, %c0_49] : memref<1152x128xbf16, #tpu.memory_space<vmem>>, vector<128x128xbf16>
    %cst_50 = arith.constant dense<0.000000e+00> : vector<328x128xf32>
    %52 = tpu.matmul %50, %51, %cst_50 {dimension_numbers = #tpu.dot_dimension_numbers<[1], [0], [0], [1], [0, 0, 1, 1], [], []>} : vector<328x128xbf16>, vector<128x128xbf16>, vector<328x128xf32> -> vector<328x128xf32>
    %53 = arith.addf %49, %52 : vector<328x128xf32>
    %c0_51 = arith.constant 0 : index
    %c0_52 = arith.constant 0 : index
    %54 = vector.load %arg8[%c0_51, %c0_52] : memref<328x128xf32, #tpu.memory_space<vmem>>, vector<328x128xf32>
    tpu.vector_store %arg8[%c0_51, %c0_52], %53 {strides = array<i32>} : memref<328x128xf32, #tpu.memory_space<vmem>>, vector<328x128xf32>,
    %c0_53 = arith.constant 0 : index
    %c0_54 = arith.constant 0 : index
    %55 = vector.load %arg8[%c0_53, %c0_54] : memref<328x128xf32, #tpu.memory_space<vmem>>, vector<328x128xf32>
    %56 = vector.broadcast %0 : vector<328x1xf32> to vector<328x128xf32>
    %57 = arith.mulf %55, %56 : vector<328x128xf32>
    %cst_55 = arith.constant dense<0.000000e+00> : vector<128xf32>
    %58 = vector.multi_reduction <add>, %57, %cst_55 [0] : vector<328x128xf32> to vector<128xf32>
    %59 = vector.shape_cast %58 : vector<128xf32> to vector<1x128xf32>
    %c0_56 = arith.constant 0 : index
    %c0_57 = arith.constant 0 : index
    %c0_58 = arith.constant 0 : index
    %60 = vector.load %arg7[%c0_56, %c0_57, %c0_58] : memref<1x2x128xf32, #tpu.memory_space<vmem>>, vector<1x1x128xf32>
    %61 = vector.shape_cast %60 : vector<1x1x128xf32> to vector<1x128xf32>
    %62 = vector.shape_cast %59 : vector<1x128xf32> to vector<1x1x128xf32>
    tpu.vector_store %arg7[%c0_56, %c0_57, %c0_58], %62 {strides = array<i32>} : memref<1x2x128xf32, #tpu.memory_space<vmem>>, vector<1x1x128xf32>,
    %63 = arith.mulf %57, %55 : vector<328x128xf32>
    %cst_59 = arith.constant dense<0.000000e+00> : vector<128xf32>
    %64 = vector.multi_reduction <add>, %63, %cst_59 [0] : vector<328x128xf32> to vector<128xf32>
    %65 = vector.shape_cast %64 : vector<128xf32> to vector<1x128xf32>
    %c0_60 = arith.constant 0 : index
    %c1_61 = arith.constant 1 : index
    %c0_62 = arith.constant 0 : index
    %66 = vector.load %arg7[%c0_60, %c1_61, %c0_62] : memref<1x2x128xf32, #tpu.memory_space<vmem>>, vector<1x1x128xf32>
    %67 = vector.shape_cast %66 : vector<1x1x128xf32> to vector<1x128xf32>
    %68 = vector.shape_cast %65 : vector<1x128xf32> to vector<1x1x128xf32>
    tpu.vector_store %arg7[%c0_60, %c1_61, %c0_62], %68 {strides = array<i32>} : memref<1x2x128xf32, #tpu.memory_space<vmem>>, vector<1x1x128xf32>,
    %69 = arith.truncf %55 : vector<328x128xf32> to vector<328x128xbf16>
    %c0_63 = arith.constant 0 : index
    %c0_64 = arith.constant 0 : index
    %c0_65 = arith.constant 0 : index
    %70 = vector.load %arg6[%c0_63, %c0_64, %c0_65] : memref<1x328x128xbf16, #tpu.memory_space<vmem>>, vector<1x328x128xbf16>
    %71 = vector.shape_cast %70 : vector<1x328x128xbf16> to vector<328x128xbf16>
    %72 = vector.shape_cast %69 : vector<328x128xbf16> to vector<1x328x128xbf16>
    tpu.vector_store %arg6[%c0_63, %c0_64, %c0_65], %72 {strides = array<i32>} : memref<1x328x128xbf16, #tpu.memory_space<vmem>>, vector<1x328x128xbf16>,
    return
  }
  func.func @transform_0(%arg0: i32) -> (i32, i32, i32) {
    %c0_i32 = arith.constant 0 : i32
    %c0_i32_0 = arith.constant 0 : i32
    %c0_i32_1 = arith.constant 0 : i32
    return %arg0, %c0_i32, %c0_i32_0 : i32, i32, i32
  }
  func.func @transform_1(%arg0: i32) -> (i32, i32) {
    %c0_i32 = arith.constant 0 : i32
    %c0_i32_0 = arith.constant 0 : i32
    %c0_i32_1 = arith.constant 0 : i32
    return %c0_i32, %c0_i32_0 : i32, i32
  }
  func.func @transform_2(%arg0: i32) -> (i32, i32) {
    %c0_i32 = arith.constant 0 : i32
    %c0_i32_0 = arith.constant 0 : i32
    %c0_i32_1 = arith.constant 0 : i32
    return %c0_i32, %c0_i32_0 : i32, i32
  }
  func.func @transform_3(%arg0: i32) -> (i32, i32) {
    %c0_i32 = arith.constant 0 : i32
    %c0_i32_0 = arith.constant 0 : i32
    %c0_i32_1 = arith.constant 0 : i32
    return %c0_i32, %c0_i32_0 : i32, i32
  }
  func.func @transform_4(%arg0: i32) -> (i32, i32) {
    %c0_i32 = arith.constant 0 : i32
    %c0_i32_0 = arith.constant 0 : i32
    %c0_i32_1 = arith.constant 0 : i32
    return %c0_i32, %c0_i32_0 : i32, i32
  }
  func.func @transform_5(%arg0: i32) -> (i32, i32, i32) {
    %c0_i32 = arith.constant 0 : i32
    %c0_i32_0 = arith.constant 0 : i32
    %c0_i32_1 = arith.constant 0 : i32
    return %arg0, %c0_i32, %c0_i32_0 : i32, i32, i32
  }
  func.func @transform_6(%arg0: i32) -> (i32, i32, i32) {
    %c0_i32 = arith.constant 0 : i32
    %c0_i32_0 = arith.constant 0 : i32
    %c0_i32_1 = arith.constant 0 : i32
    return %arg0, %c0_i32, %c0_i32_0 : i32, i32, i32
  }
}

module attributes {stable_mosaic.version = 11 : i64} {
  func.func @_bn_add_relu_kernel(%arg0: i32, %arg1: memref<1x328x128xbf16, #tpu.memory_space<vmem>>, %arg2: memref<1x368x128xbf16, #tpu.memory_space<vmem>>, %arg3: memref<1x128xf32, #tpu.memory_space<vmem>>, %arg4: memref<1x128xf32, #tpu.memory_space<vmem>>, %arg5: memref<1x328x128xf32, #tpu.memory_space<vmem>>) attributes {dimension_semantics = [#tpu.dimension_semantics<parallel>], iteration_bounds = array<i64: 2>, scalar_prefetch = 0 : i64, scratch_operands = 0 : i64, tpu.core_type = #tpu.core_type<tc>, window_params = [{transform_indices = @transform_0, window_bounds = array<i64: 1, 328, 128>}, {transform_indices = @transform_1, window_bounds = array<i64: 1, 368, 128>}, {pipeline_mode = #tpu.pipeline_mode<synchronous>, transform_indices = @transform_2, window_bounds = array<i64: 1, 128>}, {pipeline_mode = #tpu.pipeline_mode<synchronous>, transform_indices = @transform_3, window_bounds = array<i64: 1, 128>}, {transform_indices = @transform_4, window_bounds = array<i64: 1, 328, 128>}]} {
    %c0 = arith.constant 0 : index
    %c0_0 = arith.constant 0 : index
    %c0_1 = arith.constant 0 : index
    %0 = vector.load %arg1[%c0, %c0_0, %c0_1] : memref<1x328x128xbf16, #tpu.memory_space<vmem>>, vector<1x328x128xbf16>
    %1 = vector.shape_cast %0 : vector<1x328x128xbf16> to vector<328x128xbf16>
    %2 = arith.extf %1 : vector<328x128xbf16> to vector<328x128xf32>
    %c0_2 = arith.constant 0 : index
    %c0_3 = arith.constant 0 : index
    %3 = vector.load %arg3[%c0_2, %c0_3] : memref<1x128xf32, #tpu.memory_space<vmem>>, vector<1x128xf32>
    %4 = vector.broadcast %3 : vector<1x128xf32> to vector<328x128xf32>
    %5 = arith.mulf %2, %4 : vector<328x128xf32>
    %c0_4 = arith.constant 0 : index
    %c0_5 = arith.constant 0 : index
    %6 = vector.load %arg4[%c0_4, %c0_5] : memref<1x128xf32, #tpu.memory_space<vmem>>, vector<1x128xf32>
    %7 = vector.broadcast %6 : vector<1x128xf32> to vector<328x128xf32>
    %8 = arith.addf %5, %7 : vector<328x128xf32>
    %c0_6 = arith.constant 0 : index
    %c19 = arith.constant 19 : index
    %c0_7 = arith.constant 0 : index
    %9 = vector.load %arg2[%c0_6, %c19, %c0_7] : memref<1x368x128xbf16, #tpu.memory_space<vmem>>, vector<1x328x128xbf16>
    %10 = vector.shape_cast %9 : vector<1x328x128xbf16> to vector<328x128xbf16>
    %11 = arith.extf %10 : vector<328x128xbf16> to vector<328x128xf32>
    %12 = arith.addf %8, %11 : vector<328x128xf32>
    %cst = arith.constant 0.000000e+00 : f32
    %13 = vector.broadcast %cst : f32 to vector<328x128xf32>
    %14 = arith.maximumf %12, %13 : vector<328x128xf32>
    %c0_8 = arith.constant 0 : index
    %c0_9 = arith.constant 0 : index
    %c0_10 = arith.constant 0 : index
    %15 = vector.load %arg5[%c0_8, %c0_9, %c0_10] : memref<1x328x128xf32, #tpu.memory_space<vmem>>, vector<1x328x128xf32>
    %16 = vector.shape_cast %15 : vector<1x328x128xf32> to vector<328x128xf32>
    %17 = vector.shape_cast %14 : vector<328x128xf32> to vector<1x328x128xf32>
    tpu.vector_store %arg5[%c0_8, %c0_9, %c0_10], %17 {strides = array<i32>} : memref<1x328x128xf32, #tpu.memory_space<vmem>>, vector<1x328x128xf32>,
    return
  }
  func.func @transform_0(%arg0: i32) -> (i32, i32, i32) {
    %c0_i32 = arith.constant 0 : i32
    %c0_i32_0 = arith.constant 0 : i32
    %c0_i32_1 = arith.constant 0 : i32
    return %arg0, %c0_i32, %c0_i32_0 : i32, i32, i32
  }
  func.func @transform_1(%arg0: i32) -> (i32, i32, i32) {
    %c0_i32 = arith.constant 0 : i32
    %c0_i32_0 = arith.constant 0 : i32
    %c0_i32_1 = arith.constant 0 : i32
    return %arg0, %c0_i32, %c0_i32_0 : i32, i32, i32
  }
  func.func @transform_2(%arg0: i32) -> (i32, i32) {
    %c0_i32 = arith.constant 0 : i32
    %c0_i32_0 = arith.constant 0 : i32
    %c0_i32_1 = arith.constant 0 : i32
    return %c0_i32, %c0_i32_0 : i32, i32
  }
  func.func @transform_3(%arg0: i32) -> (i32, i32) {
    %c0_i32 = arith.constant 0 : i32
    %c0_i32_0 = arith.constant 0 : i32
    %c0_i32_1 = arith.constant 0 : i32
    return %c0_i32, %c0_i32_0 : i32, i32
  }
  func.func @transform_4(%arg0: i32) -> (i32, i32, i32) {
    %c0_i32 = arith.constant 0 : i32
    %c0_i32_0 = arith.constant 0 : i32
    %c0_i32_1 = arith.constant 0 : i32
    return %arg0, %c0_i32, %c0_i32_0 : i32, i32, i32
  }
}

</mosaic_0001>

<bundles_post_ra>
// kernel: basic_block_forward.5
= control target key start
LH: loop header
LB: loop body
LE: loop exit
PB: predicated region body
PF: predicated region fallthrough
CT: control target
= control target key end

     0   :  { %s1081_s15 = smov 0   ;;  %s1330_s0 = inlined_call_operand.vmem [shape: bf16[2,328,128], index: 0, kind: input, shape index: {}]   ;;  %s1331_s1 = inlined_call_operand.vmem [shape: bf16[2,368,128], index: 1, kind: input, shape index: {}]   ;;  %s1332_s2 = inlined_call_operand.vmem [shape: f32[1,128], index: 2, kind: input, shape index: {}]   ;;  %s1333_s3 = inlined_call_operand.vmem [shape: f32[1,128], index: 3, kind: input, shape index: {}]   ;;  %s1334_s4 = inlined_call_operand.vmem [shape: f32[2,328,128], index: 4, kind: output, shape index: {}]  }
   0x1 LB: > { %s831_s16 = sadd.s32 4294967295, %s1054_s15   ;;  %p835_p0 = scmp.ge.s32.totalorder %s1054_s15, 1  ;;  %s1054_s15 = sphi %s1081_s15, %s14_s15  }
   0x2   : > { %p172_p1 = scmp.lt.s32.totalorder %s1054_s15, 3 }
   0x4   : > { %p173_p2 = pnand %p835_p0, %p172_p1 }
   0x5   : > { %p203_p3 = scmp.lt.s32.totalorder (!%p173_p2), %s831_s16, 1 }
   0x6   : > { %176 = sbr.rel (%p173_p2) target bundleno = 104 (0x68), region = 36 }
   0xb   : > { %s1336_s16 = smov (!%p203_p3, %s831_s16), 1  ;;  %v1101_v0 = vld [vmem:[%s1332_s2] ss:$0 sm:$0xff]  ;;  %vm516_vm0 = vcmask 1044480  }
   0xc   : > { %s1035_s17 = smul.u32 164, %s1336_s16  ;;  %v1112_v2 = vld [vmem:[%s1333_s3] ss:$0 sm:$0xff] }
   0xd   : > { %s1036_s18 = smul.u32 184, %s1336_s16 }
   0xe   : > { %s1096_s21 = scalar_lea.vmem %s1330_s0, %s1035_s17  ;;  %s1037_s29 = smul.u32 328, %s1336_s16 }
   0xf   : > { %s1106_s26 = scalar_lea.vmem %s1331_s1, %s1036_s18  ;;  %v842_v1 = vld [vmem:[%s1096_s21] sm:$0xff]   ;;  %v997_v3 = vld [vmem:[%s1096_s21 + $0x8] sm:$0xff]   ;;  %v998_v24 = vld [vmem:[%s1096_s21 + $0x10] sm:$0xff]  }
  0x10   : > { %v843_v4 = vunpack.c.l.bf16 %v842_v1  ;;  %v390_v5 = vld [vmem:[%s1106_s26 + $0x8] sm:$0xe]  ;;  %v391_v6 = vld [vmem:[%s1106_s26 + $0xc] sm:$0xf]  ;;  %v844_v7 = vunpack.c.h.bf16 %v842_v1  ;;  %v1016_v8 = vld [vmem:[%s1106_s26 + $0x10] sm:$0xff]   ;;  %v847_v9 = vunpack.c.l.bf16 %v997_v3  ;;  %v848_v10 = vunpack.c.h.bf16 %v997_v3  ;;  %s1136_s6 = scalar_lea.vmem %s1334_s4, %s1037_s29 }
  0x11   : > { %v432_v11 = vunpack.c.l.bf16 %v390_v5  ;;  %v433_v12 = vunpack.c.l.bf16 %v391_v6  ;;  %v923_v13 = vunpack.c.l.bf16 %v1016_v8  ;;  %v924_v14 = vunpack.c.h.bf16 %v1016_v8  ;;  %v1017_v19 = vld [vmem:[%s1106_s26 + $0x18] sm:$0xff]   ;;  %v1018_v29 = vld [vmem:[%s1106_s26 + $0x20] sm:$0xff]   ;;  %v1019_v55 = vld [vmem:[%s1106_s26 + $0x28] sm:$0xff]  }
  0x12   : > { %v304_v15 = vmul.f32 %v1101_v0, %v843_v4  ;;  %v305_v16 = vmul.f32 %v1101_v0, %v844_v7  ;;  %v306_v17 = vmul.f32 %v1101_v0, %v847_v9  ;;  %v307_v18 = vmul.f32 %v1101_v0, %v848_v10  ;;  %v999_v42 = vld [vmem:[%s1096_s21 + $0x18] sm:$0xff]   ;;  %v1000_v56 = vld [vmem:[%s1096_s21 + $0x20] sm:$0xff]   ;;  %v1020_v7 = vld [vmem:[%s1106_s26 + $0x30] sm:$0xff]  }
  0x13   : > { %v517_v20 = vrot.slane %v432_v11, 3  ;;  %v518_v21 = vrot.slane %v433_v12, 3  ;;  %v520_v22 = vrot.slane %v923_v13, 3  ;;  %v522_v23 = vrot.slane %v924_v14, 3  ;;  %v1001_v12 = vld [vmem:[%s1096_s21 + $0x28] sm:$0xff]  }
  0x14   : > { %v349_v25 = vadd.f32 %v1112_v2, %v304_v15  ;;  %v350_v26 = vadd.f32 %v1112_v2, %v305_v16  ;;  %v351_v27 = vadd.f32 %v1112_v2, %v306_v17  ;;  %v352_v28 = vadd.f32 %v1112_v2, %v307_v18 }
  0x15   : > { %v519_v30 = vsel %vm516_vm0, %v517_v20, %v518_v21  ;;  %v521_v31 = vsel %vm516_vm0, %v518_v21, %v520_v22  ;;  %v523_v32 = vsel %vm516_vm0, %v520_v22, %v522_v23  ;;  %v927_v33 = vunpack.c.l.bf16 %v1017_v19 }
  0x16   : > { %v641_v34 = vadd.f32 %v519_v30, %v349_v25  ;;  %v642_v35 = vadd.f32 %v521_v31, %v350_v26  ;;  %v643_v36 = vadd.f32 %v523_v32, %v351_v27  ;;  %v851_v37 = vunpack.c.l.bf16 %v998_v24  ;;  %v1021_v25 = vld [vmem:[%s1106_s26 + $0x38] sm:$0xff]  }
  0x17   : > { %v524_v38 = vrot.slane %v927_v33, 3  ;;  %v928_v39 = vunpack.c.h.bf16 %v1017_v19  ;;  %v852_v40 = vunpack.c.h.bf16 %v998_v24  ;;  %v931_v41 = vunpack.c.l.bf16 %v1018_v29 }
  0x18   : > { %v682_v43 = vmax.f32 %v641_v34, 0.0  ;;  %v683_v44 = vmax.f32 %v642_v35, 0.0  ;;  %v684_v45 = vmax.f32 %v643_v36, 0.0  ;;  %v308_v46 = vmul.f32 %v1101_v0, %v851_v37  ;;  %v1002_v34 = vld [vmem:[%s1096_s21 + $0x30] sm:$0xff]  }
  0x19   : > { %v525_v47 = vsel %vm516_vm0, %v522_v23, %v524_v38  ;;  %v526_v48 = vrot.slane %v928_v39, 3  ;;  %v309_v49 = vmul.f32 %v1101_v0, %v852_v40  ;;  %v528_v50 = vrot.slane %v931_v41, 3  ;;  %v1022_v39 = vld [vmem:[%s1106_s26 + $0x40] sm:$0xff]  }
  0x1a   : > { %723 = vst [vmem:[%s1136_s6] sm:$0xff] %v682_v43  ;;  %v644_v51 = vadd.f32 %v525_v47, %v352_v28  ;;  %v353_v52 = vadd.f32 %v1112_v2, %v308_v46  ;;  %v855_v53 = vunpack.c.l.bf16 %v999_v42  ;;  %v932_v54 = vunpack.c.h.bf16 %v1018_v29 }
  0x1b   : > { %724 = vst [vmem:[%s1136_s6 + $0x8] sm:$0xff] %v683_v44  ;;  %v527_v57 = vsel %vm516_vm0, %v524_v38, %v526_v48  ;;  %v354_v58 = vadd.f32 %v1112_v2, %v309_v49  ;;  %v529_v59 = vsel %vm516_vm0, %v526_v48, %v528_v50  ;;  %v856_v60 = vunpack.c.h.bf16 %v999_v42 }
  0x1c   : > { %725 = vst [vmem:[%s1136_s6 + $0x10] sm:$0xff] %v684_v45  ;;  %v685_v61 = vmax.f32 %v644_v51, 0.0  ;;  %v645_v62 = vadd.f32 %v527_v57, %v353_v52  ;;  %v310_v63 = vmul.f32 %v1101_v0, %v855_v53  ;;  %v530_v1 = vrot.slane %v932_v54, 3  ;;  %v1003_v52 = vld [vmem:[%s1096_s21 + $0x38] sm:$0xff]  }
  0x1d   : > { %v646_v3 = vadd.f32 %v529_v59, %v354_v58  ;;  %v311_v4 = vmul.f32 %v1101_v0, %v856_v60  ;;  %v935_v5 = vunpack.c.l.bf16 %v1019_v55  ;;  %v859_v6 = vunpack.c.l.bf16 %v1000_v56 }
  0x1e   : > { %726 = vst [vmem:[%s1136_s6 + $0x18] sm:$0xff] %v685_v61  ;;  %v686_v8 = vmax.f32 %v645_v62, 0.0  ;;  %v355_v9 = vadd.f32 %v1112_v2, %v310_v63  ;;  %v531_v10 = vsel %vm516_vm0, %v528_v50, %v530_v1  ;;  %v936_v11 = vunpack.c.h.bf16 %v1019_v55 }
  0x1f   : > { %v687_v13 = vmax.f32 %v646_v3, 0.0  ;;  %v356_v14 = vadd.f32 %v1112_v2, %v311_v4  ;;  %v532_v15 = vrot.slane %v935_v5, 3  ;;  %v312_v16 = vmul.f32 %v1101_v0, %v859_v6  ;;  %v1023_v3 = vld [vmem:[%s1106_s26 + $0x48] sm:$0xff]   ;;  %v1004_v4 = vld [vmem:[%s1096_s21 + $0x40] sm:$0xff]  }
  0x20   : > { %727 = vst [vmem:[%s1136_s6 + $0x20] sm:$0xff] %v686_v8  ;;  %v647_v17 = vadd.f32 %v531_v10, %v355_v9  ;;  %v534_v18 = vrot.slane %v936_v11, 3  ;;  %v860_v19 = vunpack.c.h.bf16 %v1000_v56  ;;  %v939_v20 = vunpack.c.l.bf16 %v1020_v7 }
  0x21   : > { %728 = vst [vmem:[%s1136_s6 + $0x28] sm:$0xff] %v687_v13  ;;  %v533_v21 = vsel %vm516_vm0, %v530_v1, %v532_v15  ;;  %v357_v22 = vadd.f32 %v1112_v2, %v312_v16  ;;  %v863_v23 = vunpack.c.l.bf16 %v1001_v12  ;;  %v940_v24 = vunpack.c.h.bf16 %v1020_v7 }
  0x22   : > { %v688_v26 = vmax.f32 %v647_v17, 0.0  ;;  %v648_v27 = vadd.f32 %v533_v21, %v356_v14  ;;  %v535_v28 = vsel %vm516_vm0, %v532_v15, %v534_v18  ;;  %v313_v29 = vmul.f32 %v1101_v0, %v860_v19  ;;  %v1024_v17 = vld [vmem:[%s1106_s26 + $0x50] sm:$0xff]  }
  0x23   : > { %v649_v30 = vadd.f32 %v535_v28, %v357_v22  ;;  %v536_v31 = vrot.slane %v939_v20, 3  ;;  %v314_v32 = vmul.f32 %v1101_v0, %v863_v23  ;;  %v538_v33 = vrot.slane %v940_v24, 3  ;;  %v1005_v22 = vld [vmem:[%s1096_s21 + $0x48] sm:$0xff]  }
  0x24   : > { %729 = vst [vmem:[%s1136_s6 + $0x30] sm:$0xff] %v688_v26  ;;  %v689_v35 = vmax.f32 %v648_v27, 0.0  ;;  %v358_v36 = vadd.f32 %v1112_v2, %v313_v29  ;;  %v864_v37 = vunpack.c.h.bf16 %v1001_v12  ;;  %v943_v38 = vunpack.c.l.bf16 %v1021_v25 }
  0x25   : > { %v690_v40 = vmax.f32 %v649_v30, 0.0  ;;  %v537_v41 = vsel %vm516_vm0, %v534_v18, %v536_v31  ;;  %v359_v42 = vadd.f32 %v1112_v2, %v314_v32  ;;  %v539_v43 = vsel %vm516_vm0, %v536_v31, %v538_v33 }
  0x26   : > { %730 = vst [vmem:[%s1136_s6 + $0x38] sm:$0xff] %v689_v35  ;;  %v650_v44 = vadd.f32 %v537_v41, %v358_v36  ;;  %v315_v45 = vmul.f32 %v1101_v0, %v864_v37  ;;  %v540_v46 = vrot.slane %v943_v38, 3  ;;  %v867_v47 = vunpack.c.l.bf16 %v1002_v34  ;;  %v1025_v35 = vld [vmem:[%s1106_s26 + $0x58] sm:$0xff]  }
  0x27   : > { %731 = vst [vmem:[%s1136_s6 + $0x40] sm:$0xff] %v690_v40  ;;  %v651_v48 = vadd.f32 %v539_v43, %v359_v42  ;;  %v944_v49 = vunpack.c.h.bf16 %v1021_v25  ;;  %v868_v50 = vunpack.c.h.bf16 %v1002_v34  ;;  %v947_v51 = vunpack.c.l.bf16 %v1022_v39 }
  0x28   : > { %v691_v53 = vmax.f32 %v650_v44, 0.0  ;;  %v360_v54 = vadd.f32 %v1112_v2, %v315_v45  ;;  %v541_v55 = vsel %vm516_vm0, %v538_v33, %v540_v46  ;;  %v316_v56 = vmul.f32 %v1101_v0, %v867_v47  ;;  %v1006_v44 = vld [vmem:[%s1096_s21 + $0x50] sm:$0xff]  }
  0x29   : > { %v692_v57 = vmax.f32 %v651_v48, 0.0  ;;  %v542_v58 = vrot.slane %v944_v49, 3  ;;  %v317_v59 = vmul.f32 %v1101_v0, %v868_v50  ;;  %v544_v60 = vrot.slane %v947_v51, 3  ;;  %v1026_v49 = vld [vmem:[%s1106_s26 + $0x60] sm:$0xff]  }
  0x2a   : > { %732 = vst [vmem:[%s1136_s6 + $0x48] sm:$0xff] %v691_v53  ;;  %v652_v61 = vadd.f32 %v541_v55, %v360_v54  ;;  %v361_v62 = vadd.f32 %v1112_v2, %v316_v56  ;;  %v871_v63 = vunpack.c.l.bf16 %v1003_v52  ;;  %v948_v1 = vunpack.c.h.bf16 %v1022_v39 }
  0x2b   : > { %733 = vst [vmem:[%s1136_s6 + $0x50] sm:$0xff] %v692_v57  ;;  %v543_v5 = vsel %vm516_vm0, %v540_v46, %v542_v58  ;;  %v362_v6 = vadd.f32 %v1112_v2, %v317_v59  ;;  %v545_v7 = vsel %vm516_vm0, %v542_v58, %v544_v60  ;;  %v872_v8 = vunpack.c.h.bf16 %v1003_v52 }
  0x2c   : > { %v693_v9 = vmax.f32 %v652_v61, 0.0  ;;  %v653_v10 = vadd.f32 %v543_v5, %v361_v62  ;;  %v318_v11 = vmul.f32 %v1101_v0, %v871_v63  ;;  %v546_v12 = vrot.slane %v948_v1, 3  ;;  %v1007_v62 = vld [vmem:[%s1096_s21 + $0x58] sm:$0xff]  }
  0x2d   : > { %v654_v13 = vadd.f32 %v545_v7, %v362_v6  ;;  %v319_v14 = vmul.f32 %v1101_v0, %v872_v8  ;;  %v951_v15 = vunpack.c.l.bf16 %v1023_v3  ;;  %v875_v16 = vunpack.c.l.bf16 %v1004_v4 }
  0x2e   : > { %734 = vst [vmem:[%s1136_s6 + $0x58] sm:$0xff] %v693_v9  ;;  %v694_v18 = vmax.f32 %v653_v10, 0.0  ;;  %v363_v19 = vadd.f32 %v1112_v2, %v318_v11  ;;  %v547_v20 = vsel %vm516_vm0, %v544_v60, %v546_v12  ;;  %v952_v21 = vunpack.c.h.bf16 %v1023_v3 }
  0x2f   : > { %v695_v23 = vmax.f32 %v654_v13, 0.0  ;;  %v364_v24 = vadd.f32 %v1112_v2, %v319_v14  ;;  %v548_v25 = vrot.slane %v951_v15, 3  ;;  %v320_v26 = vmul.f32 %v1101_v0, %v875_v16  ;;  %v1027_v13 = vld [vmem:[%s1106_s26 + $0x68] sm:$0xff]   ;;  %v1008_v14 = vld [vmem:[%s1096_s21 + $0x60] sm:$0xff]  }
  0x30   : > { %735 = vst [vmem:[%s1136_s6 + $0x60] sm:$0xff] %v694_v18  ;;  %v655_v27 = vadd.f32 %v547_v20, %v363_v19  ;;  %v550_v28 = vrot.slane %v952_v21, 3  ;;  %v876_v29 = vunpack.c.h.bf16 %v1004_v4  ;;  %v955_v30 = vunpack.c.l.bf16 %v1024_v17 }
  0x31   : > { %736 = vst [vmem:[%s1136_s6 + $0x68] sm:$0xff] %v695_v23  ;;  %v549_v31 = vsel %vm516_vm0, %v546_v12, %v548_v25  ;;  %v365_v32 = vadd.f32 %v1112_v2, %v320_v26  ;;  %v879_v33 = vunpack.c.l.bf16 %v1005_v22  ;;  %v956_v34 = vunpack.c.h.bf16 %v1024_v17 }
  0x32   : > { %v696_v36 = vmax.f32 %v655_v27, 0.0  ;;  %v656_v37 = vadd.f32 %v549_v31, %v364_v24  ;;  %v551_v38 = vsel %vm516_vm0, %v548_v25, %v550_v28  ;;  %v321_v39 = vmul.f32 %v1101_v0, %v876_v29  ;;  %v1028_v27 = vld [vmem:[%s1106_s26 + $0x70] sm:$0xff]  }
  0x33   : > { %v657_v40 = vadd.f32 %v551_v38, %v365_v32  ;;  %v552_v41 = vrot.slane %v955_v30, 3  ;;  %v322_v42 = vmul.f32 %v1101_v0, %v879_v33  ;;  %v554_v43 = vrot.slane %v956_v34, 3  ;;  %v1009_v32 = vld [vmem:[%s1096_s21 + $0x68] sm:$0xff]  }
  0x34   : > { %737 = vst [vmem:[%s1136_s6 + $0x70] sm:$0xff] %v696_v36  ;;  %v697_v45 = vmax.f32 %v656_v37, 0.0  ;;  %v366_v46 = vadd.f32 %v1112_v2, %v321_v39  ;;  %v880_v47 = vunpack.c.h.bf16 %v1005_v22  ;;  %v959_v48 = vunpack.c.l.bf16 %v1025_v35 }
  0x35   : > { %v698_v50 = vmax.f32 %v657_v40, 0.0  ;;  %v553_v51 = vsel %vm516_vm0, %v550_v28, %v552_v41  ;;  %v367_v52 = vadd.f32 %v1112_v2, %v322_v42  ;;  %v555_v53 = vsel %vm516_vm0, %v552_v41, %v554_v43 }
  0x36   : > { %738 = vst [vmem:[%s1136_s6 + $0x78] sm:$0xff] %v697_v45  ;;  %v658_v54 = vadd.f32 %v553_v51, %v366_v46  ;;  %v323_v55 = vmul.f32 %v1101_v0, %v880_v47  ;;  %v556_v56 = vrot.slane %v959_v48, 3  ;;  %v883_v57 = vunpack.c.l.bf16 %v1006_v44  ;;  %v1029_v45 = vld [vmem:[%s1106_s26 + $0x78] sm:$0xff]  }
  0x37   : > { %739 = vst [vmem:[%s1136_s6 + $0x80] sm:$0xff] %v698_v50  ;;  %v659_v58 = vadd.f32 %v555_v53, %v367_v52  ;;  %v960_v59 = vunpack.c.h.bf16 %v1025_v35  ;;  %v884_v60 = vunpack.c.h.bf16 %v1006_v44  ;;  %v963_v61 = vunpack.c.l.bf16 %v1026_v49 }
  0x38   : > { %v699_v63 = vmax.f32 %v658_v54, 0.0  ;;  %v368_v1 = vadd.f32 %v1112_v2, %v323_v55  ;;  %v557_v3 = vsel %vm516_vm0, %v554_v43, %v556_v56  ;;  %v324_v4 = vmul.f32 %v1101_v0, %v883_v57  ;;  %v1010_v54 = vld [vmem:[%s1096_s21 + $0x70] sm:$0xff]  }
  0x39   : > { %v700_v5 = vmax.f32 %v659_v58, 0.0  ;;  %v558_v6 = vrot.slane %v960_v59, 3  ;;  %v325_v7 = vmul.f32 %v1101_v0, %v884_v60  ;;  %v560_v8 = vrot.slane %v963_v61, 3  ;;  %v1030_v59 = vld [vmem:[%s1106_s26 + $0x80] sm:$0xff]  }
  0x3a   : > { %740 = vst [vmem:[%s1136_s6 + $0x88] sm:$0xff] %v699_v63  ;;  %v660_v9 = vadd.f32 %v557_v3, %v368_v1  ;;  %v369_v10 = vadd.f32 %v1112_v2, %v324_v4  ;;  %v887_v11 = vunpack.c.l.bf16 %v1007_v62  ;;  %v964_v12 = vunpack.c.h.bf16 %v1026_v49 }
  0x3b   : > { %741 = vst [vmem:[%s1136_s6 + $0x90] sm:$0xff] %v700_v5  ;;  %v559_v15 = vsel %vm516_vm0, %v556_v56, %v558_v6  ;;  %v370_v16 = vadd.f32 %v1112_v2, %v325_v7  ;;  %v561_v17 = vsel %vm516_vm0, %v558_v6, %v560_v8  ;;  %v888_v18 = vunpack.c.h.bf16 %v1007_v62 }
  0x3c   : > { %v701_v19 = vmax.f32 %v660_v9, 0.0  ;;  %v661_v20 = vadd.f32 %v559_v15, %v369_v10  ;;  %v326_v21 = vmul.f32 %v1101_v0, %v887_v11  ;;  %v562_v22 = vrot.slane %v964_v12, 3  ;;  %v1011_v10 = vld [vmem:[%s1096_s21 + $0x78] sm:$0xff]  }
  0x3d   : > { %v662_v23 = vadd.f32 %v561_v17, %v370_v16  ;;  %v327_v24 = vmul.f32 %v1101_v0, %v888_v18  ;;  %v967_v25 = vunpack.c.l.bf16 %v1027_v13  ;;  %v891_v26 = vunpack.c.l.bf16 %v1008_v14 }
  0x3e   : > { %742 = vst [vmem:[%s1136_s6 + $0x98] sm:$0xff] %v701_v19  ;;  %v702_v28 = vmax.f32 %v661_v20, 0.0  ;;  %v371_v29 = vadd.f32 %v1112_v2, %v326_v21  ;;  %v563_v30 = vsel %vm516_vm0, %v560_v8, %v562_v22  ;;  %v968_v31 = vunpack.c.h.bf16 %v1027_v13 }
  0x3f   : > { %v703_v33 = vmax.f32 %v662_v23, 0.0  ;;  %v372_v34 = vadd.f32 %v1112_v2, %v327_v24  ;;  %v564_v35 = vrot.slane %v967_v25, 3  ;;  %v328_v36 = vmul.f32 %v1101_v0, %v891_v26  ;;  %v1031_v23 = vld [vmem:[%s1106_s26 + $0x88] sm:$0xff]   ;;  %v1012_v24 = vld [vmem:[%s1096_s21 + $0x80] sm:$0xff]  }
  0x40   : > { %743 = vst [vmem:[%s1136_s6 + $0xa0] sm:$0xff] %v702_v28  ;;  %v663_v37 = vadd.f32 %v563_v30, %v371_v29  ;;  %v566_v38 = vrot.slane %v968_v31, 3  ;;  %v892_v39 = vunpack.c.h.bf16 %v1008_v14  ;;  %v971_v40 = vunpack.c.l.bf16 %v1028_v27 }
  0x41   : > { %744 = vst [vmem:[%s1136_s6 + $0xa8] sm:$0xff] %v703_v33  ;;  %v565_v41 = vsel %vm516_vm0, %v562_v22, %v564_v35  ;;  %v373_v42 = vadd.f32 %v1112_v2, %v328_v36  ;;  %v895_v43 = vunpack.c.l.bf16 %v1009_v32  ;;  %v972_v44 = vunpack.c.h.bf16 %v1028_v27 }
  0x42   : > { %v704_v46 = vmax.f32 %v663_v37, 0.0  ;;  %v664_v47 = vadd.f32 %v565_v41, %v372_v34  ;;  %v567_v48 = vsel %vm516_vm0, %v564_v35, %v566_v38  ;;  %v329_v49 = vmul.f32 %v1101_v0, %v892_v39  ;;  %v1032_v37 = vld [vmem:[%s1106_s26 + $0x90] sm:$0xff]  }
  0x43   : > { %v665_v50 = vadd.f32 %v567_v48, %v373_v42  ;;  %v568_v51 = vrot.slane %v971_v40, 3  ;;  %v330_v52 = vmul.f32 %v1101_v0, %v895_v43  ;;  %v570_v53 = vrot.slane %v972_v44, 3  ;;  %v1013_v42 = vld [vmem:[%s1096_s21 + $0x88] sm:$0xff]  }
  0x44   : > { %745 = vst [vmem:[%s1136_s6 + $0xb0] sm:$0xff] %v704_v46  ;;  %v705_v55 = vmax.f32 %v664_v47, 0.0  ;;  %v374_v56 = vadd.f32 %v1112_v2, %v329_v49  ;;  %v896_v57 = vunpack.c.h.bf16 %v1009_v32  ;;  %v975_v58 = vunpack.c.l.bf16 %v1029_v45 }
  0x45   : > { %v706_v60 = vmax.f32 %v665_v50, 0.0  ;;  %v569_v61 = vsel %vm516_vm0, %v566_v38, %v568_v51  ;;  %v375_v62 = vadd.f32 %v1112_v2, %v330_v52  ;;  %v571_v63 = vsel %vm516_vm0, %v568_v51, %v570_v53 }
  0x46   : > { %746 = vst [vmem:[%s1136_s6 + $0xb8] sm:$0xff] %v705_v55  ;;  %v666_v1 = vadd.f32 %v569_v61, %v374_v56  ;;  %v331_v3 = vmul.f32 %v1101_v0, %v896_v57  ;;  %v572_v4 = vrot.slane %v975_v58, 3  ;;  %v899_v5 = vunpack.c.l.bf16 %v1010_v54  ;;  %v1033_v55 = vld [vmem:[%s1106_s26 + $0x98] sm:$0xff]  }
  0x47   : > { %747 = vst [vmem:[%s1136_s6 + $0xc0] sm:$0xff] %v706_v60  ;;  %v667_v6 = vadd.f32 %v571_v63, %v375_v62  ;;  %v976_v7 = vunpack.c.h.bf16 %v1029_v45  ;;  %v900_v8 = vunpack.c.h.bf16 %v1010_v54  ;;  %v979_v9 = vunpack.c.l.bf16 %v1030_v59 }
  0x48   : > { %v707_v11 = vmax.f32 %v666_v1, 0.0  ;;  %v376_v12 = vadd.f32 %v1112_v2, %v331_v3  ;;  %v573_v13 = vsel %vm516_vm0, %v570_v53, %v572_v4  ;;  %v332_v14 = vmul.f32 %v1101_v0, %v899_v5  ;;  %v1014_v1 = vld [vmem:[%s1096_s21 + $0x90] sm:$0xff]  }
  0x49   : > { %v708_v15 = vmax.f32 %v667_v6, 0.0  ;;  %v574_v16 = vrot.slane %v976_v7, 3  ;;  %v333_v17 = vmul.f32 %v1101_v0, %v900_v8  ;;  %v576_v18 = vrot.slane %v979_v9, 3  ;;  %v1034_v7 = vld [vmem:[%s1106_s26 + $0xa0] sm:$0xff]  }
  0x4a   : > { %748 = vst [vmem:[%s1136_s6 + $0xc8] sm:$0xff] %v707_v11  ;;  %v668_v19 = vadd.f32 %v573_v13, %v376_v12  ;;  %v377_v20 = vadd.f32 %v1112_v2, %v332_v14  ;;  %v903_v21 = vunpack.c.l.bf16 %v1011_v10  ;;  %v980_v22 = vunpack.c.h.bf16 %v1030_v59 }
  0x4b   : > { %749 = vst [vmem:[%s1136_s6 + $0xd0] sm:$0xff] %v708_v15  ;;  %v575_v25 = vsel %vm516_vm0, %v572_v4, %v574_v16  ;;  %v378_v26 = vadd.f32 %v1112_v2, %v333_v17  ;;  %v577_v27 = vsel %vm516_vm0, %v574_v16, %v576_v18  ;;  %v904_v28 = vunpack.c.h.bf16 %v1011_v10 }
  0x4c   : > { %v709_v29 = vmax.f32 %v668_v19, 0.0  ;;  %v669_v30 = vadd.f32 %v575_v25, %v377_v20  ;;  %v334_v31 = vmul.f32 %v1101_v0, %v903_v21  ;;  %v578_v32 = vrot.slane %v980_v22, 3  ;;  %v1015_v20 = vld [vmem:[%s1096_s21 + $0x98] sm:$0xff]  }
  0x4d   : > { %v670_v33 = vadd.f32 %v577_v27, %v378_v26  ;;  %v335_v34 = vmul.f32 %v1101_v0, %v904_v28  ;;  %v983_v35 = vunpack.c.l.bf16 %v1031_v23  ;;  %v907_v36 = vunpack.c.l.bf16 %v1012_v24 }
  0x4e   : > { %750 = vst [vmem:[%s1136_s6 + $0xd8] sm:$0xff] %v709_v29  ;;  %v710_v38 = vmax.f32 %v669_v30, 0.0  ;;  %v379_v39 = vadd.f32 %v1112_v2, %v334_v31  ;;  %v579_v40 = vsel %vm516_vm0, %v576_v18, %v578_v32  ;;  %v984_v41 = vunpack.c.h.bf16 %v1031_v23 }
  0x4f   : > { %v711_v43 = vmax.f32 %v670_v33, 0.0  ;;  %v380_v44 = vadd.f32 %v1112_v2, %v335_v34  ;;  %v580_v45 = vrot.slane %v983_v35, 3  ;;  %v336_v46 = vmul.f32 %v1101_v0, %v907_v36  ;;  %v430_v33 = vld [vmem:[%s1106_s26 + $0xa8] sm:$0xf]  ;;  %v258_v34 = vld [vmem:[%s1096_s21 + $0xa0] sm:$0xf] }
  0x50   : > { %751 = vst [vmem:[%s1136_s6 + $0xe0] sm:$0xff] %v710_v38  ;;  %v671_v47 = vadd.f32 %v579_v40, %v379_v39  ;;  %v582_v48 = vrot.slane %v984_v41, 3  ;;  %v908_v49 = vunpack.c.h.bf16 %v1012_v24  ;;  %v987_v50 = vunpack.c.l.bf16 %v1032_v37  ;;  %v431_v39 = vld [vmem:[%s1106_s26 + $0xac] sm:$0x3] }
  0x51   : > { %752 = vst [vmem:[%s1136_s6 + $0xe8] sm:$0xff] %v711_v43  ;;  %v581_v51 = vsel %vm516_vm0, %v578_v32, %v580_v45  ;;  %v381_v52 = vadd.f32 %v1112_v2, %v336_v46  ;;  %v911_v53 = vunpack.c.l.bf16 %v1013_v42  ;;  %v988_v54 = vunpack.c.h.bf16 %v1032_v37 }
  0x52   : > { %v712_v56 = vmax.f32 %v671_v47, 0.0  ;;  %v672_v57 = vadd.f32 %v581_v51, %v380_v44  ;;  %v583_v58 = vsel %vm516_vm0, %v580_v45, %v582_v48  ;;  %v337_v59 = vmul.f32 %v1101_v0, %v908_v49 }
  0x53   : > { %v673_v60 = vadd.f32 %v583_v58, %v381_v52  ;;  %v584_v61 = vrot.slane %v987_v50, 3  ;;  %v338_v62 = vmul.f32 %v1101_v0, %v911_v53  ;;  %v586_v63 = vrot.slane %v988_v54, 3 }
  0x54   : > { %753 = vst [vmem:[%s1136_s6 + $0xf0] sm:$0xff] %v712_v56  ;;  %v713_v3 = vmax.f32 %v672_v57, 0.0  ;;  %v382_v4 = vadd.f32 %v1112_v2, %v337_v59  ;;  %v912_v5 = vunpack.c.h.bf16 %v1013_v42  ;;  %v991_v6 = vunpack.c.l.bf16 %v1033_v55 }
  0x55   : > { %v714_v8 = vmax.f32 %v673_v60, 0.0  ;;  %v585_v9 = vsel %vm516_vm0, %v582_v48, %v584_v61  ;;  %v383_v10 = vadd.f32 %v1112_v2, %v338_v62  ;;  %v587_v11 = vsel %vm516_vm0, %v584_v61, %v586_v63 }
  0x56   : > { %754 = vst [vmem:[%s1136_s6 + $0xf8] sm:$0xff] %v713_v3  ;;  %v674_v12 = vadd.f32 %v585_v9, %v382_v4  ;;  %v339_v13 = vmul.f32 %v1101_v0, %v912_v5  ;;  %v588_v14 = vrot.slane %v991_v6, 3  ;;  %v915_v15 = vunpack.c.l.bf16 %v1014_v1 }
  0x57   : > { %755 = vst [vmem:[%s1136_s6 + $0x100] sm:$0xff] %v714_v8  ;;  %v675_v16 = vadd.f32 %v587_v11, %v383_v10  ;;  %v992_v17 = vunpack.c.h.bf16 %v1033_v55  ;;  %v916_v18 = vunpack.c.h.bf16 %v1014_v1  ;;  %v995_v19 = vunpack.c.l.bf16 %v1034_v7 }
  0x58   : > { %v715_v21 = vmax.f32 %v674_v12, 0.0  ;;  %v384_v22 = vadd.f32 %v1112_v2, %v339_v13  ;;  %v589_v23 = vsel %vm516_vm0, %v586_v63, %v588_v14  ;;  %v340_v24 = vmul.f32 %v1101_v0, %v915_v15 }
  0x59   : > { %v716_v25 = vmax.f32 %v675_v16, 0.0  ;;  %v590_v26 = vrot.slane %v992_v17, 3  ;;  %v341_v27 = vmul.f32 %v1101_v0, %v916_v18  ;;  %v592_v28 = vrot.slane %v995_v19, 3 }
  0x5a   : > { %756 = vst [vmem:[%s1136_s6 + $0x108] sm:$0xff] %v715_v21  ;;  %v676_v29 = vadd.f32 %v589_v23, %v384_v22  ;;  %v385_v30 = vadd.f32 %v1112_v2, %v340_v24  ;;  %v919_v31 = vunpack.c.l.bf16 %v1015_v20  ;;  %v996_v32 = vunpack.c.h.bf16 %v1034_v7 }
  0x5b   : > { %757 = vst [vmem:[%s1136_s6 + $0x110] sm:$0xff] %v716_v25  ;;  %v591_v35 = vsel %vm516_vm0, %v588_v14, %v590_v26  ;;  %v386_v36 = vadd.f32 %v1112_v2, %v341_v27  ;;  %v593_v37 = vsel %vm516_vm0, %v590_v26, %v592_v28  ;;  %v920_v38 = vunpack.c.h.bf16 %v1015_v20 }
  0x5c   : > { %v717_v40 = vmax.f32 %v676_v29, 0.0  ;;  %v677_v41 = vadd.f32 %v591_v35, %v385_v30  ;;  %v342_v42 = vmul.f32 %v1101_v0, %v919_v31  ;;  %v594_v43 = vrot.slane %v996_v32, 3 }
  0x5d   : > { %v678_v44 = vadd.f32 %v593_v37, %v386_v36  ;;  %v343_v45 = vmul.f32 %v1101_v0, %v920_v38  ;;  %v472_v46 = vunpack.c.l.bf16 %v430_v33  ;;  %v299_v47 = vunpack.c.l.bf16 %v258_v34 }
  0x5e   : > { %758 = vst [vmem:[%s1136_s6 + $0x118] sm:$0xff] %v717_v40  ;;  %v718_v48 = vmax.f32 %v677_v41, 0.0  ;;  %v387_v49 = vadd.f32 %v1112_v2, %v342_v42  ;;  %v595_v50 = vsel %vm516_vm0, %v592_v28, %v594_v43  ;;  %v473_v51 = vunpack.c.l.bf16 %v431_v39 }
  0x5f   : > { %v719_v52 = vmax.f32 %v678_v44, 0.0  ;;  %v388_v53 = vadd.f32 %v1112_v2, %v343_v45  ;;  %v596_v54 = vrot.slane %v472_v46, 3  ;;  %v344_v55 = vmul.f32 %v1101_v0, %v299_v47 }
  0x60   : > { %759 = vst [vmem:[%s1136_s6 + $0x120] sm:$0xff] %v718_v48  ;;  %v679_v56 = vadd.f32 %v595_v50, %v387_v49  ;;  %v598_v57 = vrot.slane %v473_v51, 3 }
  0x61   : > { %760 = vst [vmem:[%s1136_s6 + $0x128] sm:$0xff] %v719_v52  ;;  %v597_v58 = vsel %vm516_vm0, %v594_v43, %v596_v54  ;;  %v389_v59 = vadd.f32 %v1112_v2, %v344_v55 }
  0x62   : > { %v720_v60 = vmax.f32 %v679_v56, 0.0  ;;  %v680_v61 = vadd.f32 %v597_v58, %v388_v53  ;;  %v599_v62 = vsel %vm516_vm0, %v596_v54, %v598_v57 }
  0x63   : > { %v681_v63 = vadd.f32 %v599_v62, %v389_v59 }
  0x64   : > { %761 = vst [vmem:[%s1136_s6 + $0x130] sm:$0xff] %v720_v60  ;;  %v721_v1 = vmax.f32 %v680_v61, 0.0 }
  0x65   : > { %v722_v3 = vmax.f32 %v681_v63, 0.0 }
  0x66   : > { %762 = vst [vmem:[%s1136_s6 + $0x138] sm:$0xff] %v721_v1 }
  0x67   : > { %763 = vst [vmem:[%s1136_s6 + $0x140] sm:$0xff] %v722_v3 }
  0x68 PF: > { %s14_s15 = sadd.s32 1, %s1054_s15  }
  0x69   : > { %p11_p4 = scmp.ge.s32.totalorder %s14_s15, 4  }
  0x6b   :  { %13 = sbr.rel (!%p11_p4) target bundleno = 1 (0x1), region = 69 }

// kernel: basic_block_forward.3
= control target key start
LH: loop header
LB: loop body
LE: loop exit
PB: predicated region body
PF: predicated region fallthrough
CT: control target
= control target key end

     0   :  { %s6005_s21 = smov 0   ;;  %s8065_s0 = inlined_call_operand.vmem [shape: bf16[2,368,128], index: 0, kind: input, shape index: {}]   ;;  %s8066_s1 = inlined_call_operand.vmem [shape: f32[328,1], index: 1, kind: input, shape index: {}]   ;;  %s8067_s2 = inlined_call_operand.vmem [shape: f32[1,128], index: 2, kind: input, shape index: {}]   ;;  %s8068_s3 = inlined_call_operand.vmem [shape: f32[1,128], index: 3, kind: input, shape index: {}]   ;;  %s8069_s4 = inlined_call_operand.vmem [shape: bf16[1152,128], index: 4, kind: input, shape index: {}]   ;;  %s8070_s5 = inlined_call_operand.vmem [shape: bf16[2,328,128], index: 5, kind: output, shape index: {0}]   ;;  %s8071_s6 = inlined_call_operand.vmem [shape: f32[2,2,128], index: 6, kind: output, shape index: {1}]  }
   0x1 LB: > { %s4903_s2 = sadd.s32 4294967295, %s5967_s21   ;;  %p4907_p0 = scmp.ge.s32.totalorder %s5967_s21, 1  ;;  %s5967_s21 = sphi %s6005_s21, %s17_s21  }
   0x2   : > { %p215_p1 = scmp.lt.s32.totalorder %s5967_s21, 3 }
   0x4   : > { %p216_p2 = pnand %p4907_p0, %p215_p1 }
   0x6   : > { %219 = sbr.rel (%p216_p2) target bundleno = 952 (0x3b8), region = 40 }
   0xb   : > { %v5632_v0 = vld [vmem:[%s8069_s4 + $0x38] sm:$0xff]  ;;  %v5631_v1 = vld [vmem:[%s8069_s4 + $0x30] sm:$0xff]  ;;  %v5630_v2 = vld [vmem:[%s8069_s4 + $0x28] sm:$0xff]  ;;  %p249_p3 = scmp.lt.s32.totalorder %s4903_s2, 1  ;;  %vm1292_vm0 = vcmask 1046528   ;;  %vm3274_vm3 = vcmask 1045504  }
   0xc   : > { %5914 = vmatpush.bf16.msra.mxu1 %v5632_v0  ;;  %5915 = vmatpush.bf16.msra.mxu2 %v5632_v0  ;;  %v5629_v3 = vld [vmem:[%s8069_s4 + $0x20] sm:$0xff]  ;;  %v5628_v4 = vld [vmem:[%s8069_s4 + $0x18] sm:$0xff]  ;;  %v5627_v5 = vld [vmem:[%s8069_s4 + $0x10] sm:$0xff]  ;;  %vm473_vm1 = vsmask.f32 7424  ;;  %vm4007_vm4 = vcmask 1044480  }
   0xd   : > { %790 = vmatpush.bf16.msra.mxu0 %v5632_v0  ;;  %5916 = vmatpush.bf16.msra.mxu3 %v5632_v0  ;;  %s8306_s2 = smov (!%p249_p3, %s4903_s2), 1  ;;  %v5626_v6 = vld [vmem:[%s8069_s4 + $0x8] sm:$0xff]  ;;  %v5625_v7 = vld [vmem:[%s8069_s4] sm:$0xff]  ;;  %v5668_v8 = vld [vmem:[%s8069_s4 + $0xb8] sm:$0xff]  ;;  %vm2160_vm2 = vsmask.f32 6400 }
   0xe   : > { %s5939_s11 = smul.u32 184, %s8306_s2  ;;  %v5640_v9 = vld [vmem:[%s8069_s4 + $0x78] sm:$0xff]  ;;  %v5667_v14 = vld [vmem:[%s8069_s4 + $0xb0] sm:$0xff]  ;;  %v5666_v18 = vld [vmem:[%s8069_s4 + $0xa8] sm:$0xff] }
   0xf   : > { %v5704_v10 = vld [vmem:[%s8069_s4 + $0x138] sm:$0xff]  ;;  %v5639_v15 = vld [vmem:[%s8069_s4 + $0x70] sm:$0xff]  ;;  %v5638_v19 = vld [vmem:[%s8069_s4 + $0x68] sm:$0xff]  ;;  %s5940_s20 = smul.u32 164, %s8306_s2 }
  0x10   : > { %5917 = vmatpush.bf16.msra.mxu1 %v5631_v1  ;;  %5918 = vmatpush.bf16.msra.mxu2 %v5631_v1  ;;  %s6047_s16 = scalar_lea.vmem %s8065_s0, %s5939_s11  ;;  %v5703_v16 = vld [vmem:[%s8069_s4 + $0x130] sm:$0xff]  ;;  %v5702_v20 = vld [vmem:[%s8069_s4 + $0x128] sm:$0xff]  ;;  %v5665_v21 = vld [vmem:[%s8069_s4 + $0xa0] sm:$0xff] }
  0x11   : > { %791 = vmatpush.bf16.msra.mxu0 %v5631_v1  ;;  %5919 = vmatpush.bf16.msra.mxu3 %v5631_v1  ;;  %v6059_v11 = vld [vmem:[%s6047_s16 + $0x30] sm:$0xff]  ;;  %v6062_v12 = vld [vmem:[%s6047_s16 + $0x60] sm:$0xff]  ;;  %v6099_v24 = vld [vmem:[%s6047_s16 + $0x38] sm:$0xff]  ;;  %s7457_s25 = scalar_lea.vmem %s8070_s5, %s5940_s20 }
  0x12   : > { %v6065_v13 = vld [vmem:[%s6047_s16] sm:$0xff]  ;;  %v5623_v17 = vld [vmem:[%s6047_s16 + $0x90] sm:$0xff]  ;;  %v5618_v25 = vld [vmem:[%s6047_s16 + $0x68] sm:$0xff] }
  0x13   : > { %v5637_v22 = vld [vmem:[%s8069_s4 + $0x60] sm:$0xff]  ;;  %v6103_v26 = vld [vmem:[%s6047_s16 + $0x8] sm:$0xff]  ;;  %v5664_v27 = vld [vmem:[%s8069_s4 + $0x98] sm:$0xff] }
  0x14   : > { %5920 = vmatpush.bf16.msra.mxu1 %v5630_v2  ;;  %5921 = vmatpush.bf16.msra.mxu2 %v5630_v2  ;;  %v5701_v23 = vld [vmem:[%s8069_s4 + $0x120] sm:$0xff]  ;;  %v5676_v28 = vld [vmem:[%s8069_s4 + $0xf8] sm:$0xff]  ;;  %v5675_v31 = vld [vmem:[%s8069_s4 + $0xf0] sm:$0xff] }
  0x15   : > { %792 = vmatpush.bf16.msra.mxu0 %v5630_v2  ;;  %5922 = vmatpush.bf16.msra.mxu3 %v5630_v2  ;;  %v5636_v29 = vld [vmem:[%s8069_s4 + $0x58] sm:$0xff]  ;;  %v5663_v33 = vld [vmem:[%s8069_s4 + $0x90] sm:$0xff]  ;;  %v5674_v34 = vld [vmem:[%s8069_s4 + $0xe8] sm:$0xff] }
  0x16   : > { %v5624_v30 = vld [vmem:[%s6047_s16 + $0x98] sm:$0xff]  ;;  %v6130_v35 = vld [vmem:[%s6047_s16 + $0x40] sm:$0xff]  ;;  %v5619_v36 = vld [vmem:[%s6047_s16 + $0x70] sm:$0xff] }
  0x17   : > { %v5700_v32 = vld [vmem:[%s8069_s4 + $0x118] sm:$0xff]  ;;  %v6134_v37 = vld [vmem:[%s6047_s16 + $0x10] sm:$0xff]  ;;  %v5673_v39 = vld [vmem:[%s8069_s4 + $0xe0] sm:$0xff] }
  0x18   : > { %5923 = vmatpush.bf16.msra.mxu1 %v5629_v3  ;;  %5924 = vmatpush.bf16.msra.mxu2 %v5629_v3  ;;  %v5635_v38 = vld [vmem:[%s8069_s4 + $0x50] sm:$0xff]  ;;  %v344_v41 = vld [vmem:[%s6047_s16 + $0xa0] sm:$0xf]  ;;  %v5662_v43 = vld [vmem:[%s8069_s4 + $0x88] sm:$0xff] }
  0x19   : > { %793 = vmatpush.bf16.msra.mxu0 %v5629_v3  ;;  %5925 = vmatpush.bf16.msra.mxu3 %v5629_v3  ;;  %v5699_v40 = vld [vmem:[%s8069_s4 + $0x110] sm:$0xff]  ;;  %v6148_v42 = vunpack.c.l.b16 %v344_v41  ;;  %v5672_v44 = vld [vmem:[%s8069_s4 + $0xd8] sm:$0xff]  ;;  %v5634_v45 = vld [vmem:[%s8069_s4 + $0x48] sm:$0xff] }
  0x1a   : > { %v5671_v47 = vld [vmem:[%s8069_s4 + $0xd0] sm:$0xff]  ;;  %v6165_v48 = vld [vmem:[%s6047_s16 + $0x48] sm:$0xff]  ;;  %v5620_v49 = vld [vmem:[%s6047_s16 + $0x78] sm:$0xff] }
  0x1b   : > { %v448_v46 = vpack.c.b16 %v6148_v42, %v6148_v42  ;;  %v6169_v50 = vld [vmem:[%s6047_s16 + $0x18] sm:$0xff]  ;;  %v5670_v51 = vld [vmem:[%s8069_s4 + $0xc8] sm:$0xff]  ;;  %v5661_v53 = vld [vmem:[%s8069_s4 + $0x80] sm:$0xff] }
  0x1c   : > { %5926 = vmatpush.bf16.msra.mxu1 %v5628_v4  ;;  %5927 = vmatpush.bf16.msra.mxu2 %v5628_v4  ;;  %v5698_v52 = vld [vmem:[%s8069_s4 + $0x108] sm:$0xff]  ;;  %v5669_v54 = vld [vmem:[%s8069_s4 + $0xc0] sm:$0xff]  ;;  %v5642_v57 = vld [vmem:[%s6047_s16 + $0x10] sm:$0xff] }
  0x1d   : > { %794 = vmatpush.bf16.msra.mxu0 %v5628_v4  ;;  %5928 = vmatpush.bf16.msra.mxu3 %v5628_v4  ;;  %v5633_v55 = vld [vmem:[%s8069_s4 + $0x40] sm:$0xff]  ;;  %v5888_v56 = vld [vmem:[%s6047_s16 + $0x8] sm:$0xf0]  ;;  %v5889_v58 = vld [vmem:[%s6047_s16 + $0x8] sm:$0xe]  ;;  %v6194_v61 = vrot.slane %v5642_v57, 1 }
  0x1e   : > { %v5697_v59 = vld [vmem:[%s8069_s4 + $0x100] sm:$0xff]  ;;  %v5890_v60 = vor.u32 %v5889_v58, %v5888_v56  ;;  %v5677_v0 = vld [vmem:[%s6047_s16 + $0x10] sm:$0xff]  ;;  %v482_v4 = vshll.u32 %v6103_v26, 16 }
  0x1f   : > { %v6200_v1 = vld [vmem:[%s6047_s16 + $0x50] sm:$0xff]  ;;  %v5621_v2 = vld [vmem:[%s6047_s16 + $0x80] sm:$0xff] }
  0x20   : > { %5929 = vmatpush.bf16.msra.mxu1 %v5627_v5  ;;  %5930 = vmatpush.bf16.msra.mxu2 %v5627_v5  ;;  %v1296_v62 = vrot.slane %v5890_v60, 1  ;;  %v6204_v3 = vld [vmem:[%s6047_s16 + $0x20] sm:$0xff] }
  0x21   : > { %795 = vmatpush.bf16.msra.mxu0 %v5627_v5  ;;  %5931 = vmatpush.bf16.msra.mxu3 %v5627_v5  ;;  %v1969_v5 = vshll.u32 %v5677_v0, 16 }
  0x22   : > { %v1298_v63 = vsel %vm1292_vm0, %v1296_v62, %v6194_v61 }
  0x23   : > { %v2170_v58 = vrot.slane %v1969_v5, 2 }
  0x24   : > { %5932 = vmatpush.bf16.msra.mxu1 %v5626_v6  ;;  %5933 = vmatpush.bf16.msra.mxu2 %v5626_v6 }
  0x25   : > { %796 = vmatpush.bf16.msra.mxu0 %v5626_v6  ;;  %5934 = vmatpush.bf16.msra.mxu3 %v5626_v6  ;;  %v5740_v6 = vld [vmem:[%s8069_s4 + $0x1b8] sm:$0xff] }
  0x28   : > { %5935 = vmatpush.bf16.msra.mxu1 %v5625_v7  ;;  %5936 = vmatpush.bf16.msra.mxu2 %v5625_v7 }
  0x29   : > { %797 = vmatpush.bf16.msra.mxu0 %v5625_v7  ;;  %5937 = vmatpush.bf16.msra.mxu3 %v5625_v7  ;;  %v5748_v7 = vld [vmem:[%s8069_s4 + $0x1f8] sm:$0xff] }
  0x2b   : > { %828 = vmatmul.bf16.vlgmr.msra.gmra.mxu1 %v6059_v11  ;;  %858 = vmatmul.bf16.vlgmr.msra.gmra.mxu2 %v6062_v12 }
  0x2c   : > { %1461 = vmatpush.bf16.msrb.mxu2 %v5668_v8  ;;  %903 = vmatpush.bf16.msrb.mxu1 %v5640_v9  ;;  %v6214_v8 = vrot.slane %v1969_v5, 1  ;;  %v1973_v9 = vshrl.u32 %v5677_v0, 16 }
  0x2d   : > { %2575 = vmatpush.bf16.msrb.mxu0 %v5704_v10  ;;  %888 = vmatmul.bf16.vlgmr.msra.gmra.mxu3 %v5623_v17  ;;  %v484_v10 = vrot.slane %v482_v4, 1  ;;  %v486_v17 = vshrl.u32 %v6103_v26, 16  ;;  %v5679_v4 = vld [vmem:[%s6047_s16 + $0x20] sm:$0xff] }
  0x2e   : > { %798 = vmatmul.bf16.vlgmr.msra.gmra.mxu0 %v6065_v13  ;;  %1574 = vmatpush.bf16.msrb.mxu3 %v5676_v28  ;;  %v2169_v57 = vrot.slane %v1973_v9, 1 }
  0x30   : > { %1462 = vmatpush.bf16.msrb.mxu2 %v5667_v14  ;;  %904 = vmatpush.bf16.msrb.mxu1 %v5639_v15  ;;  %v5712_v14 = vld [vmem:[%s8069_s4 + $0x178] sm:$0xff] }
  0x31   : > { %2576 = vmatpush.bf16.msrb.mxu0 %v5703_v16  ;;  %v5643_v15 = vld [vmem:[%s6047_s16 + $0x18] sm:$0xff] }
  0x32   : > { %1575 = vmatpush.bf16.msrb.mxu3 %v5675_v31  ;;  %v5777_v16 = vld [vmem:[%s8069_s4 + $0x238] sm:$0xff] }
  0x33   : > { %v6244_v31 = vld [vmem:[%s6047_s16 + $0x58] sm:$0xff] }
  0x34   : > { %1463 = vmatpush.bf16.msrb.mxu2 %v5666_v18  ;;  %905 = vmatpush.bf16.msrb.mxu1 %v5638_v19  ;;  %v6226_v18 = vor.u32 %v1973_v9, %v6214_v8  ;;  %v490_v19 = vshll.u32 %v6134_v37, 16 }
  0x35   : > { %2577 = vmatpush.bf16.msrb.mxu0 %v5702_v20  ;;  %v1300_v20 = vrot.slane %v5643_v15, 1 }
  0x36   : > { %1576 = vmatpush.bf16.msrb.mxu3 %v5674_v34 }
  0x38   : > { %1464 = vmatpush.bf16.msrb.mxu2 %v5665_v21  ;;  %906 = vmatpush.bf16.msrb.mxu1 %v5637_v22  ;;  %v488_v21 = vor.u32 %v486_v17, %v484_v10  ;;  %v492_v22 = vrot.slane %v490_v19, 1 }
  0x39   : > { %2578 = vmatpush.bf16.msrb.mxu0 %v5701_v23  ;;  %v1810_v23 = vld [vmem:[%s6047_s16 + $0x8] sm:$0xe] }
  0x3a   : > { %1577 = vmatpush.bf16.msrb.mxu3 %v5673_v39  ;;  %v1895_v28 = vunpack.c.l.b16 %v1810_v23 }
  0x3b   : > { %833 = vmatmul.bf16.gmra.mxu1 %v6099_v24  ;;  %863 = vmatmul.bf16.gmra.mxu2 %v5618_v25  ;;  %v6231_v25 = vld [vmem:[%s6047_s16 + $0xc] sm:$0xf] }
  0x3c   : > { %1465 = vmatpush.bf16.msrb.mxu2 %v5664_v27  ;;  %907 = vmatpush.bf16.msrb.mxu1 %v5636_v29  ;;  %v6238_v27 = vsel %vm473_vm1, %v488_v21, %v492_v22  ;;  %v8072_v29 = vunpack.c.l.b16 %v6231_v25 }
  0x3d   : > { %893 = vmatmul.bf16.gmra.mxu3 %v5624_v30  ;;  %2579 = vmatpush.bf16.msrb.mxu0 %v5700_v32  ;;  %v5678_v30 = vld [vmem:[%s6047_s16 + $0x18] sm:$0xff]  ;;  %v5622_v32 = vld [vmem:[%s6047_s16 + $0x88] sm:$0xff] }
  0x3e   : > { %803 = vmatmul.bf16.gmra.mxu0 %v6103_v26  ;;  %1578 = vmatpush.bf16.msrb.mxu3 %v5672_v44  ;;  %v6235_v26 = vsel %vm1292_vm0, %v6194_v61, %v1300_v20  ;;  %v1937_v34 = vpack.c.b16 %v8072_v29, %v1895_v28  ;;  %v1981_v39 = vshrl.u32 %v5678_v30, 16  ;;  %v5057_v44 = vld [vmem:[%s6047_s16] sm:$0xe]  ;;  %v5739_v28 = vld [vmem:[%s8069_s4 + $0x1b0] sm:$0xff] }
  0x40   : > { %1466 = vmatpush.bf16.msrb.mxu2 %v5663_v33  ;;  %908 = vmatpush.bf16.msrb.mxu1 %v5635_v38  ;;  %v6248_v33 = vld [vmem:[%s6047_s16 + $0x28] sm:$0xff]  ;;  %v2162_v41 = vshrl.u32 %v1937_v34, 16  ;;  %v2190_v23 = vrot.slane %v1981_v39, 1 }
  0x41   : > { %2580 = vmatpush.bf16.msrb.mxu0 %v5699_v40  ;;  %v477_v40 = vshll.u32 %v6065_v13, 16 }
  0x42   : > { %1579 = vmatpush.bf16.msrb.mxu3 %v5671_v47 }
  0x44   : > { %1467 = vmatpush.bf16.msrb.mxu2 %v5662_v43  ;;  %909 = vmatpush.bf16.msrb.mxu1 %v5634_v45  ;;  %v5644_v43 = vld [vmem:[%s6047_s16 + $0x20] sm:$0xff] }
  0x45   : > { %2581 = vmatpush.bf16.msrb.mxu0 %v5698_v52  ;;  %v5641_v45 = vld [vmem:[%s6047_s16] sm:$0xf0]  ;;  %v479_v52 = vrot.slane %v477_v40, 1  ;;  %v5680_v40 = vld [vmem:[%s6047_s16 + $0x28] sm:$0xff] }
  0x46   : > { %1580 = vmatpush.bf16.msrb.mxu3 %v5670_v51  ;;  %v475_v51 = vshrl.u32 %v6065_v13, 16  ;;  %v494_v13 = vshrl.u32 %v6134_v37, 16 }
  0x48   : > { %1468 = vmatpush.bf16.msrb.mxu2 %v5661_v53  ;;  %910 = vmatpush.bf16.msrb.mxu1 %v5633_v55  ;;  %v5058_v53 = vor.u32 %v5641_v45, %v5057_v44  ;;  %v5886_v55 = vld [vmem:[%s6047_s16 + $0x8] sm:$0xff]   ;;  %v480_v60 = vor.u32 %v479_v52, %v475_v51  ;;  %v496_v9 = vor.u32 %v494_v13, %v492_v22  ;;  %v1997_v52 = vshrl.u32 %v5680_v40, 16 }
  0x49   : > { %2582 = vmatpush.bf16.msrb.mxu0 %v5697_v59 }
  0x4a   : > { %1581 = vmatpush.bf16.msrb.mxu3 %v5669_v54  ;;  %v2164_v54 = vrot.slane %v2162_v41, 1  ;;  %v1293_v62 = vrot.slane %v5058_v53, 1  ;;  %v5776_v53 = vld [vmem:[%s8069_s4 + $0x230] sm:$0xff] }
  0x4b   : > { %838 = vmatmul.bf16.gmra.mxu1 %v6130_v35  ;;  %868 = vmatmul.bf16.gmra.mxu2 %v5619_v36  ;;  %v1977_v36 = vshll.u32 %v5678_v30, 16  ;;  %v5747_v30 = vld [vmem:[%s8069_s4 + $0x1f0] sm:$0xff] }
  0x4c   : > { %3495 = vmatpush.bf16.msra.mxu2 %v5740_v6  ;;  %2688 = vmatpush.bf16.msra.mxu1 %v5712_v14  ;;  %v498_v6 = vshll.u32 %v6169_v50, 16 }
  0x4d   : > { %898 = vmatmul.bf16.gmra.mxu3 %v448_v46  ;;  %4118 = vmatpush.bf16.msra.mxu0 %v5777_v16  ;;  %v6253_v38 = vrot.slane %v1977_v36, 1  ;;  %v2165_v46 = vshll.u32 %v1937_v34, 16  ;;  %v1985_v16 = vshll.u32 %v5679_v4, 16  ;;  %v2191_v22 = vrot.slane %v1977_v36, 2 }
  0x4e   : > { %808 = vmatmul.bf16.gmra.mxu0 %v6134_v37  ;;  %3608 = vmatpush.bf16.msra.mxu3 %v5748_v7  ;;  %v485_v7 = vsel %vm473_vm1, %v480_v60, %v484_v10  ;;  %v500_v14 = vrot.slane %v498_v6, 1  ;;  %v5645_v10 = vld [vmem:[%s6047_s16 + $0x28] sm:$0xff]  ;;  %v506_v36 = vshll.u32 %v6204_v3, 16  ;;  %v5681_v60 = vld [vmem:[%s6047_s16 + $0x30] sm:$0xff] }
  0x4f   : > { %v6261_v47 = vor.u32 %v1981_v39, %v6253_v38  ;;  %v2167_v56 = vrot.slane %v2165_v46, 2  ;;  %v6276_v19 = vrot.slane %v1985_v16, 1  ;;  %v1304_v21 = vrot.slane %v5645_v10, 1 }
  0x50   : > { %v501_v17 = vsel %vm473_vm1, %v496_v9, %v500_v14  ;;  %3496 = vmatpush.bf16.msra.mxu2 %v5739_v28  ;;  %v2192_v34 = vor.u32 %v2191_v22, %v2190_v23  ;;  %v502_v39 = vshrl.u32 %v6169_v50, 16  ;;  %v508_v45 = vrot.slane %v506_v36, 1  ;;  %v5682_v28 = vld [vmem:[%s6047_s16 + $0x38] sm:$0xff] }
  0x51   : > { %v2168_v0 = vor.u32 %v2167_v56, %v2164_v54  ;;  %v5646_v54 = vld [vmem:[%s6047_s16 + $0x30] sm:$0xff]  ;;  %4119 = vmatpush.bf16.msra.mxu0 %v5776_v53  ;;  %v2005_v9 = vshrl.u32 %v5681_v60, 16  ;;  %v2216_v23 = vrot.slane %v1997_v52, 1 }
  0x52   : > { %3609 = vmatpush.bf16.msra.mxu3 %v5747_v30  ;;  %v504_v44 = vor.u32 %v502_v39, %v500_v14 }
  0x54   : > { %v509_v51 = vsel %vm473_vm1, %v504_v44, %v508_v45  ;;  %v2013_v44 = vshrl.u32 %v5682_v28, 16 }
  0x5b   : > { %843 = vmatmul.bf16.gmra.mxu1 %v6165_v48  ;;  %873 = vmatmul.bf16.gmra.mxu2 %v5620_v49  ;;  %v1302_v49 = vrot.slane %v5644_v43, 1  ;;  %v5711_v43 = vld [vmem:[%s8069_s4 + $0x170] sm:$0xff] }
  0x5c   : > { %2689 = vmatpush.bf16.msra.mxu1 %v5711_v43 }
  0x5d   : > { %1582 = vmatmul.bf16.vlgmr.msrb.gmra.mxu3 %v1298_v63  ;;  %v6266_v59 = vsel %vm1292_vm0, %v1300_v20, %v1302_v49  ;;  %v1294_v63 = vrot.slane %v5886_v55, 1  ;;  %v1989_v20 = vshrl.u32 %v5679_v4, 16  ;;  %v1306_v55 = vrot.slane %v5646_v54, 1 }
  0x5e   : > { %813 = vmatmul.bf16.gmra.mxu0 %v6169_v50 }
  0x5f   : > { %v1295_v5 = vsel %vm1292_vm0, %v1293_v62, %v1294_v63  ;;  %v6279_v37 = vor.u32 %v1989_v20, %v6276_v19  ;;  %v1299_v41 = vsel %vm1292_vm0, %v1294_v63, %v6194_v61  ;;  %v2203_v56 = vrot.slane %v1989_v20, 1 }
  0x60   : > { %v510_v62 = vshrl.u32 %v6204_v3, 16  ;;  %v514_v63 = vshll.u32 %v6248_v33, 16 }
  0x61   : > { %8085 = vst [vmem:[#allocation3_spill] sm:$0xff] %v6279_v37 }
  0x62   : > { %v6321_v4 = vrot.slane %v514_v63, 1  ;;  %v5683_v63 = vld [vmem:[%s6047_s16 + $0x40] sm:$0xff] }
  0x6b   : > { %848 = vmatmul.bf16.gmra.mxu1 %v6200_v1  ;;  %878 = vmatmul.bf16.gmra.mxu2 %v5621_v2  ;;  %v2171_v2 = vor.u32 %v2170_v58, %v2169_v57  ;;  %v2204_v57 = vrot.slane %v1985_v16, 2  ;;  %v6313_v58 = vsel %vm1292_vm0, %v1304_v21, %v1306_v55  ;;  %v5647_v16 = vld [vmem:[%s6047_s16 + $0x38] sm:$0xff] }
  0x6c   : > { %v1308_v10 = vrot.slane %v5647_v16, 1 }
  0x6d   : > { %1587 = vmatmul.bf16.gmra.mxu3 %v6235_v26  ;;  %v2172_v15 = vsel %vm2160_vm2, %v2168_v0, %v2171_v2  ;;  %v2193_v46 = vsel %vm2160_vm2, %v2171_v2, %v2192_v34  ;;  %v512_v2 = vor.u32 %v510_v62, %v508_v45 }
  0x6e   : > { %818 = vmatmul.bf16.gmra.mxu0 %v6204_v3  ;;  %v6342_v22 = vsel %vm1292_vm0, %v1306_v55, %v1308_v10 }
  0x7b   : > { %853 = vmatmul.bf16.gmra.mxu1 %v6244_v31  ;;  %883 = vmatmul.bf16.gmra.mxu2 %v5622_v32  ;;  %v6289_v32 = vsel %vm1292_vm0, %v1302_v49, %v1304_v21  ;;  %v1993_v49 = vshll.u32 %v5680_v40, 16 }
  0x7d   : > { %1592 = vmatmul.bf16.gmra.mxu3 %v6266_v59  ;;  %v6303_v50 = vrot.slane %v1993_v49, 1 }
  0x7e   : > { %823 = vmatmul.bf16.gmra.mxu0 %v6248_v33 }
  0x7f   : > { %8086 = vst [vmem:[#allocation4_spill] sm:$0xff] %v6303_v50  ;;  %v6306_v61 = vor.u32 %v1997_v52, %v6303_v50  ;;  %v5738_v52 = vld [vmem:[%s8069_s4 + $0x1a8] sm:$0xff] }
  0x80   : > { %3497 = vmatpush.bf16.msra.mxu2 %v5738_v52 }
  0x81   : > { %8087 = vst [vmem:[#allocation5_spill] sm:$0xff] %v6306_v61 }
  0x8b   : > { %911 = vmatmul.bf16.vlgmr.msrb.gmra.mxu1 %v485_v7  ;;  %1469 = vmatmul.bf16.vlgmr.msrb.gmra.mxu2 %v1295_v5  ;;  %v2001_v7 = vshll.u32 %v5681_v60, 16  ;;  %v517_v5 = vsel %vm473_vm1, %v512_v2, %v6321_v4 }
  0x8d   : > { %1597 = vmatmul.bf16.gmra.mxu3 %v6289_v32  ;;  %v6329_v3 = vrot.slane %v2001_v7, 1 }
  0x8e   : > { %2583 = vmatmul.bf16.vlgmr.msrb.gmra.mxu0 %v2172_v15 }
  0x8f   : > { %8088 = vst [vmem:[#allocation6_spill] sm:$0xff] %v6329_v3  ;;  %v6332_v14 = vor.u32 %v2005_v9, %v6329_v3 }
  0x91   : > { %8089 = vst [vmem:[#allocation7_spill] sm:$0xff] %v6332_v14 }
  0x9b   : > { %916 = vmatmul.bf16.gmra.mxu1 %v6238_v27  ;;  %1474 = vmatmul.bf16.gmra.mxu2 %v1299_v41  ;;  %v2205_v27 = vor.u32 %v2204_v57, %v2203_v56  ;;  %v2009_v41 = vshll.u32 %v5682_v28, 16  ;;  %v2229_v56 = vrot.slane %v2005_v9, 1  ;;  %v2230_v57 = vrot.slane %v2001_v7, 2  ;;  %v5775_v7 = vld [vmem:[%s8069_s4 + $0x228] sm:$0xff] }
  0x9c   : > { %4120 = vmatpush.bf16.msra.mxu0 %v5775_v7  ;;  %v2021_v28 = vshrl.u32 %v5683_v63, 16 }
  0x9d   : > { %1602 = vmatmul.bf16.gmra.mxu3 %v6313_v58  ;;  %v2206_v6 = vsel %vm2160_vm2, %v2192_v34, %v2205_v27  ;;  %v6356_v43 = vrot.slane %v2009_v41, 1  ;;  %v2231_v62 = vor.u32 %v2230_v57, %v2229_v56 }
  0x9e   : > { %2588 = vmatmul.bf16.gmra.mxu0 %v2193_v46 }
  0x9f   : > { %8093 = vst [vmem:[#allocation11_spill] sm:$0xff] %v6356_v43  ;;  %v6359_v45 = vor.u32 %v2013_v44, %v6356_v43 }
  0xa1   : > { %8094 = vst [vmem:[#allocation12_spill] sm:$0xff] %v6359_v45  ;;  %v2255_v45 = vrot.slane %v2021_v28, 1 }
  0xa8   : > { %v6319_v0 = vpop.f32.mrf.mxu1 }
  0xab   : > { %v6323_v13 = vpop.f32.mrf.mxu0  ;;  %921 = vmatmul.bf16.gmra.mxu1 %v501_v17  ;;  %1479 = vmatmul.bf16.gmra.mxu2 %v6235_v26  ;;  %v2217_v17 = vrot.slane %v1993_v49, 2 }
  0xad   : > { %1607 = vmatmul.bf16.gmra.mxu3 %v6342_v22  ;;  %v2218_v26 = vor.u32 %v2217_v17, %v2216_v23  ;;  %v2017_v23 = vshll.u32 %v5683_v63, 16  ;;  %v2243_v63 = vrot.slane %v2009_v41, 2 }
  0xae   : > { %2593 = vmatmul.bf16.gmra.mxu0 %v2206_v6  ;;  %v6334_v15 = vpop.f32.mrf.mxu2 }
  0xaf   : > { %8090 = vst [vmem:[#allocation8_spill] sm:$0xff] %v6334_v15  ;;  %v2219_v36 = vsel %vm2160_vm2, %v2205_v27, %v2218_v26  ;;  %v5710_v27 = vld [vmem:[%s8069_s4 + $0x168] sm:$0xff]  ;;  %v6397_v17 = vrot.slane %v2017_v23, 1 }
  0xb0   : > { %v6337_v20 = vpop.f32.mrf.mxu1  ;;  %v6348_v34 = vpop.f32.mrf.mxu3  ;;  %2690 = vmatpush.bf16.msra.mxu1 %v5710_v27  ;;  %v2242_v27 = vrot.slane %v2013_v44, 1 }
  0xb1   : > { %8092 = vst [vmem:[#allocation10_spill] sm:$0xff] %v6348_v34 }
  0xb2   : > { %8099 = vst [vmem:[#allocation17_spill] sm:$0xff] %v6397_v17 }
  0xb3   : > { %v6339_v21 = vpop.f32.mrf.mxu0 }
  0xb6   : > { %v6346_v30 = vpop.f32.mrf.mxu2 }
  0xb7   : > { %8091 = vst [vmem:[#allocation9_spill] sm:$0xff] %v6346_v30  ;;  %v6525_v30 = vld [vmem:[%s6047_s16 + $0x60] sm:$0xff] }
  0xb8   : > { %v6350_v40 = vpop.f32.mrf.mxu1  ;;  %v6363_v49 = vpop.f32.mrf.mxu3 }
  0xb9   : > { %8096 = vst [vmem:[#allocation14_spill] sm:$0xff] %v6363_v49 }
  0xbb   : > { %v6352_v39 = vpop.f32.mrf.mxu0  ;;  %926 = vmatmul.bf16.gmra.mxu1 %v509_v51  ;;  %1484 = vmatmul.bf16.gmra.mxu2 %v6266_v59  ;;  %v5746_v59 = vld [vmem:[%s8069_s4 + $0x1e8] sm:$0xff]  ;;  %v5648_v51 = vld [vmem:[%s6047_s16 + $0x40] sm:$0xff] }
  0xbc   : > { %3610 = vmatpush.bf16.msra.mxu3 %v5746_v59  ;;  %v1310_v54 = vrot.slane %v5648_v51, 1  ;;  %v5649_v51 = vld [vmem:[%s6047_s16 + $0x48] sm:$0xff] }
  0xbe   : > { %2598 = vmatmul.bf16.gmra.mxu0 %v2219_v36  ;;  %v6361_v46 = vpop.f32.mrf.mxu2  ;;  %v6380_v60 = vsel %vm1292_vm0, %v1308_v10, %v1310_v54  ;;  %v2232_v10 = vsel %vm2160_vm2, %v2218_v26, %v2231_v62  ;;  %v6400_v36 = vor.u32 %v2021_v28, %v6397_v17  ;;  %v518_v26 = vshrl.u32 %v6248_v33, 16  ;;  %v5685_v17 = vld [vmem:[%s6047_s16 + $0x50] sm:$0xff] }
  0xbf   : > { %8095 = vst [vmem:[#allocation13_spill] sm:$0xff] %v6361_v46  ;;  %1612 = vmatmul.bf16.gmra.mxu3 %v6380_v60  ;;  %v2033_v28 = vshll.u32 %v5685_v17, 16 }
  0xc0   : > { %v6372_v53 = vpop.f32.mrf.mxu1  ;;  %v6386_v6 = vpop.f32.mrf.mxu3  ;;  %8100 = vst [vmem:[#allocation18_spill] sm:$0xff] %v6400_v36 }
  0xc1   : > { %8098 = vst [vmem:[#allocation16_spill] sm:$0xff] %v6386_v6  ;;  %v5684_v6 = vld [vmem:[%s6047_s16 + $0x48] sm:$0xff] }
  0xc2   : > { %v2025_v34 = vshll.u32 %v5684_v6, 16 }
  0xc3   : > { %v6374_v55 = vpop.f32.mrf.mxu0 }
  0xc4   : > { %v2269_v43 = vrot.slane %v2025_v34, 2 }
  0xc6   : > { %v6384_v2 = vpop.f32.mrf.mxu2 }
  0xc7   : > { %8097 = vst [vmem:[#allocation15_spill] sm:$0xff] %v6384_v2 }
  0xc8   : > { %v6388_v16 = vpop.f32.mrf.mxu1  ;;  %v6404_v59 = vpop.f32.mrf.mxu3 }
  0xc9   : > { %8102 = vst [vmem:[#allocation20_spill] sm:$0xff] %v6404_v59  ;;  %v2244_v59 = vor.u32 %v2243_v63, %v2242_v27 }
  0xcb   : > { %v6393_v9 = vpop.f32.mrf.mxu0  ;;  %931 = vmatmul.bf16.gmra.mxu1 %v517_v5  ;;  %1489 = vmatmul.bf16.gmra.mxu2 %v6289_v32  ;;  %v522_v5 = vshll.u32 %v6059_v11, 16  ;;  %v1312_v32 = vrot.slane %v5649_v51, 1 }
  0xcd   : > { %v6414_v7 = vsel %vm1292_vm0, %v1310_v54, %v1312_v32  ;;  %v524_v29 = vrot.slane %v522_v5, 1  ;;  %v2245_v54 = vsel %vm2160_vm2, %v2231_v62, %v2244_v59  ;;  %v526_v62 = vshrl.u32 %v6059_v11, 16 }
  0xce   : > { %2603 = vmatmul.bf16.gmra.mxu0 %v2232_v10  ;;  %v6402_v52 = vpop.f32.mrf.mxu2  ;;  %v520_v10 = vor.u32 %v518_v26, %v6321_v4  ;;  %v6430_v4 = vrot.slane %v2025_v34, 1  ;;  %v2029_v26 = vshrl.u32 %v5684_v6, 16  ;;  %v2256_v6 = vrot.slane %v2017_v23, 2 }
  0xcf   : > { %8101 = vst [vmem:[#allocation19_spill] sm:$0xff] %v6402_v52  ;;  %1617 = vmatmul.bf16.gmra.mxu3 %v6414_v7  ;;  %v5686_v52 = vld [vmem:[%s6047_s16 + $0x58] sm:$0xff] }
  0xd0   : > { %v6407_v56 = vpop.f32.mrf.mxu1  ;;  %v6421_v33 = vpop.f32.mrf.mxu3  ;;  %v525_v44 = vsel %vm473_vm1, %v520_v10, %v524_v29  ;;  %8105 = vst [vmem:[#allocation23_spill] sm:$0xff] %v6430_v4  ;;  %v6433_v5 = vor.u32 %v2029_v26, %v6430_v4  ;;  %v5650_v10 = vld [vmem:[%s6047_s16 + $0x50] sm:$0xff] }
  0xd1   : > { %8104 = vst [vmem:[#allocation22_spill] sm:$0xff] %v6421_v33  ;;  %v1314_v36 = vrot.slane %v5650_v10, 1 }
  0xd2   : > { %8106 = vst [vmem:[#allocation24_spill] sm:$0xff] %v6433_v5  ;;  %v528_v5 = vor.u32 %v526_v62, %v524_v29  ;;  %v5737_v29 = vld [vmem:[%s8069_s4 + $0x1a0] sm:$0xff] }
  0xd3   : > { %v6411_v57 = vpop.f32.mrf.mxu0  ;;  %3498 = vmatpush.bf16.msra.mxu2 %v5737_v29 }
  0xd6   : > { %v6419_v49 = vpop.f32.mrf.mxu2 }
  0xd7   : > { %8103 = vst [vmem:[#allocation21_spill] sm:$0xff] %v6419_v49 }
  0xd8   : > { %v6423_v51 = vpop.f32.mrf.mxu1  ;;  %v901_v63 = vpop.f32.mrf.mxu3 }
  0xd9   : > { %v2257_v63 = vor.u32 %v2256_v6, %v2255_v45  ;;  %v5745_v45 = vld [vmem:[%s8069_s4 + $0x1e0] sm:$0xff]  ;;  %v5651_v6 = vld [vmem:[%s6047_s16 + $0x58] sm:$0xff] }
  0xda   : > { %3611 = vmatpush.bf16.msra.mxu3 %v5745_v45  ;;  %v1316_v29 = vrot.slane %v5651_v6, 1  ;;  %v2268_v45 = vrot.slane %v2029_v26, 1 }
  0xdb   : > { %v6426_v41 = vpop.f32.mrf.mxu0  ;;  %936 = vmatmul.bf16.gmra.mxu1 %v525_v44  ;;  %1494 = vmatmul.bf16.gmra.mxu2 %v6313_v58  ;;  %v530_v44 = vshll.u32 %v6099_v24, 16  ;;  %v2258_v23 = vsel %vm2160_vm2, %v2244_v59, %v2257_v63  ;;  %v5709_v59 = vld [vmem:[%s8069_s4 + $0x160] sm:$0xff] }
  0xdc   : > { %2691 = vmatpush.bf16.msra.mxu1 %v5709_v59  ;;  %v6489_v59 = vsel %vm1292_vm0, %v1314_v36, %v1316_v29 }
  0xdd   : > { %v532_v4 = vrot.slane %v530_v44, 1 }
  0xde   : > { %2608 = vmatmul.bf16.gmra.mxu0 %v2245_v54  ;;  %v6435_v27 = vpop.f32.mrf.mxu2  ;;  %v6445_v54 = vsel %vm1292_vm0, %v1312_v32, %v1314_v36  ;;  %v6466_v32 = vrot.slane %v2033_v28, 1 }
  0xdf   : > { %8107 = vst [vmem:[#allocation25_spill] sm:$0xff] %v6435_v27  ;;  %1622 = vmatmul.bf16.gmra.mxu3 %v6445_v54  ;;  %v533_v10 = vsel %vm473_vm1, %v528_v5, %v532_v4  ;;  %v2037_v5 = vshrl.u32 %v5685_v17, 16  ;;  %v534_v17 = vshrl.u32 %v6099_v24, 16  ;;  %v2270_v24 = vor.u32 %v2269_v43, %v2268_v45  ;;  %v5652_v45 = vld [vmem:[%s6047_s16 + $0x60] sm:$0xff] }
  0xe0   : > { %v6438_v33 = vpop.f32.mrf.mxu1  ;;  %v6451_v49 = vpop.f32.mrf.mxu3  ;;  %8109 = vst [vmem:[#allocation27_spill] sm:$0xff] %v6466_v32  ;;  %v2045_v43 = vshrl.u32 %v5686_v52, 16 }
  0xe1   : > { %v6472_v62 = vor.u32 %v2037_v5, %v6466_v32  ;;  %v536_v32 = vor.u32 %v534_v17, %v532_v4  ;;  %v2271_v36 = vsel %vm2160_vm2, %v2257_v63, %v2270_v24  ;;  %v542_v63 = vshrl.u32 %v6130_v35, 16 }
  0xe3   : > { %v6442_v58 = vpop.f32.mrf.mxu0  ;;  %8110 = vst [vmem:[#allocation28_spill] sm:$0xff] %v6472_v62  ;;  %v5774_v62 = vld [vmem:[%s8069_s4 + $0x220] sm:$0xff] }
  0xe4   : > { %4121 = vmatpush.bf16.msra.mxu0 %v5774_v62  ;;  %v2041_v62 = vshll.u32 %v5686_v52, 16  ;;  %v2281_v52 = vrot.slane %v2037_v5, 1 }
  0xe6   : > { %v6449_v27 = vpop.f32.mrf.mxu2  ;;  %v6504_v4 = vrot.slane %v2041_v62, 1 }
  0xe7   : > { %8108 = vst [vmem:[#allocation26_spill] sm:$0xff] %v6449_v27 }
  0xe8   : > { %v6453_v11 = vpop.f32.mrf.mxu1  ;;  %8113 = vst [vmem:[#allocation31_spill] sm:$0xff] %v6504_v4  ;;  %v6507_v17 = vor.u32 %v2045_v43, %v6504_v4 }
  0xea   : > { %8114 = vst [vmem:[#allocation32_spill] sm:$0xff] %v6507_v17 }
  0xeb   : > { %v6456_v14 = vpop.f32.mrf.mxu0  ;;  %941 = vmatmul.bf16.gmra.mxu1 %v533_v10  ;;  %1499 = vmatmul.bf16.gmra.mxu2 %v6342_v22  ;;  %v6477_v10 = vpop.f32.mrf.mxu3 }
  0xee   : > { %2613 = vmatmul.bf16.gmra.mxu0 %v2258_v23  ;;  %v6474_v44 = vpop.f32.mrf.mxu2  ;;  %v538_v23 = vshll.u32 %v6130_v35, 16 }
  0xef   : > { %8111 = vst [vmem:[#allocation29_spill] sm:$0xff] %v6474_v44  ;;  %1627 = vmatmul.bf16.gmra.mxu3 %v6489_v59 }
  0xf0   : > { %v6479_v22 = vpop.f32.mrf.mxu1  ;;  %v540_v44 = vrot.slane %v538_v23, 1 }
  0xf2   : > { %v541_v26 = vsel %vm473_vm1, %v536_v32, %v540_v44  ;;  %v544_v17 = vor.u32 %v542_v63, %v540_v44  ;;  %v2049_v44 = vshll.u32 %v6525_v30, 16  ;;  %v2053_v63 = vshrl.u32 %v6525_v30, 16 }
  0xf3   : > { %v6483_v27 = vpop.f32.mrf.mxu0  ;;  %v6495_v2 = vpop.f32.mrf.mxu3 }
  0xf6   : > { %v6493_v6 = vpop.f32.mrf.mxu2 }
  0xf7   : > { %8112 = vst [vmem:[#allocation30_spill] sm:$0xff] %v6493_v6 }
  0xf8   : > { %v6497_v34 = vpop.f32.mrf.mxu1 }
  0xfb   : > { %v6500_v61 = vpop.f32.mrf.mxu0  ;;  %946 = vmatmul.bf16.gmra.mxu1 %v541_v26  ;;  %1504 = vmatmul.bf16.gmra.mxu2 %v6380_v60  ;;  %v6512_v32 = vpop.f32.mrf.mxu3  ;;  %v546_v26 = vshll.u32 %v6165_v48, 16  ;;  %v1318_v60 = vrot.slane %v5652_v45, 1 }
  0xfd   : > { %v6521_v4 = vsel %vm1292_vm0, %v1316_v29, %v1318_v60  ;;  %v548_v46 = vrot.slane %v546_v26, 1  ;;  %v6537_v29 = vrot.slane %v2049_v44, 1 }
  0xfe   : > { %2618 = vmatmul.bf16.gmra.mxu0 %v2271_v36  ;;  %v6509_v23 = vpop.f32.mrf.mxu2  ;;  %v2282_v36 = vrot.slane %v2033_v28, 2 }
  0xff   : > { %8115 = vst [vmem:[#allocation33_spill] sm:$0xff] %v6509_v23  ;;  %1632 = vmatmul.bf16.gmra.mxu3 %v6521_v4  ;;  %v549_v50 = vsel %vm473_vm1, %v544_v17, %v548_v46  ;;  %v6541_v26 = vor.u32 %v2053_v63, %v6537_v29 }
 0x100   : > { %v6514_v6 = vpop.f32.mrf.mxu1  ;;  %v2283_v23 = vor.u32 %v2282_v36, %v2281_v52  ;;  %8118 = vst [vmem:[#allocation36_spill] sm:$0xff] %v6537_v29  ;;  %v5653_v36 = vld [vmem:[%s6047_s16 + $0x68] sm:$0xff]  ;;  %v2295_v29 = vrot.slane %v2041_v62, 2 }
 0x101   : > { %8119 = vst [vmem:[#allocation37_spill] sm:$0xff] %v6541_v26  ;;  %v1320_v15 = vrot.slane %v5653_v36, 1  ;;  %v2294_v26 = vrot.slane %v2045_v43, 1  ;;  %v6565_v43 = vld [vmem:[%s6047_s16 + $0x68] sm:$0xff] }
 0x102   : > { %v2284_v28 = vsel %vm2160_vm2, %v2270_v24, %v2283_v23 }
 0x103   : > { %v6518_v3 = vpop.f32.mrf.mxu0  ;;  %v6529_v35 = vpop.f32.mrf.mxu3 }
 0x106   : > { %v6527_v37 = vpop.f32.mrf.mxu2 }
 0x107   : > { %8116 = vst [vmem:[#allocation34_spill] sm:$0xff] %v6527_v37 }
 0x108   : > { %v912_v45 = vpop.f32.mrf.mxu1 }
 0x109   : > { %v913_v17 = vadd.f32 %v912_v45, %v6323_v13  ;;  %v5736_v13 = vld [vmem:[%s8069_s4 + $0x198] sm:$0xff] }
 0x10a   : > { %3499 = vmatpush.bf16.msra.mxu2 %v5736_v13 }
 0x10b   : > { %v6532_v5 = vpop.f32.mrf.mxu0  ;;  %951 = vmatmul.bf16.gmra.mxu1 %v549_v50  ;;  %1509 = vmatmul.bf16.gmra.mxu2 %v6414_v7  ;;  %v6546_v24 = vpop.f32.mrf.mxu3  ;;  %v550_v50 = vshrl.u32 %v6165_v48, 16  ;;  %v554_v7 = vshll.u32 %v6200_v1, 16  ;;  %v6561_v48 = vsel %vm1292_vm0, %v1318_v60, %v1320_v15 }
 0x10c   : > { %8117 = vst [vmem:[#allocation35_spill] sm:$0xff] %v6532_v5 }
 0x10d   : > { %v552_v45 = vor.u32 %v550_v50, %v548_v46 }
 0x10e   : > { %2623 = vmatmul.bf16.gmra.mxu0 %v2284_v28  ;;  %v1470_v52 = vpop.f32.mrf.mxu2 }
 0x10f   : > { %v1584_v5 = vadd.f32 %v6451_v49, %v1470_v52  ;;  %v5744_v49 = vld [vmem:[%s8069_s4 + $0x1d8] sm:$0xff]  ;;  %1637 = vmatmul.bf16.gmra.mxu3 %v6561_v48  ;;  %v2296_v52 = vor.u32 %v2295_v29, %v2294_v26 }
 0x110   : > { %v914_v37 = vpop.f32.mrf.mxu1  ;;  %3612 = vmatpush.bf16.msra.mxu3 %v5744_v49  ;;  %v5708_v29 = vld [vmem:[%s8069_s4 + $0x158] sm:$0xff]  ;;  %v5654_v49 = vld [vmem:[%s6047_s16 + $0x70] sm:$0xff] }
 0x111   : > { %v6550_v30 = vadd.f32 %v1584_v5, %v913_v17  ;;  %v556_v5 = vrot.slane %v554_v7, 1  ;;  %v915_v36 = vadd.f32 %v914_v37, %v6339_v21  ;;  %v2297_v50 = vsel %vm2160_vm2, %v2283_v23, %v2296_v52  ;;  %2692 = vmatpush.bf16.msra.mxu1 %v5708_v29  ;;  %v5773_v26 = vld [vmem:[%s8069_s4 + $0x218] sm:$0xff] }
 0x112   : > { %v2057_v37 = vshll.u32 %v6565_v43, 16  ;;  %4122 = vmatpush.bf16.msra.mxu0 %v5773_v26  ;;  %v2308_v26 = vrot.slane %v2049_v44, 2 }
 0x113   : > { %8120 = vst [vmem:[#allocation38_spill] sm:$0xff] %v6550_v30  ;;  %v6552_v28 = vpop.f32.mrf.mxu0  ;;  %v557_v60 = vsel %vm473_vm1, %v552_v45, %v556_v5 }
 0x114   : > { %8121 = vst [vmem:[#allocation39_spill] sm:$0xff] %v6552_v28  ;;  %v6569_v28 = vpop.f32.mrf.mxu3  ;;  %v6582_v21 = vrot.slane %v2057_v37, 1 }
 0x116   : > { %v1472_v62 = vpop.f32.mrf.mxu2 }
 0x117   : > { %v1586_v17 = vadd.f32 %v6477_v10, %v1472_v62  ;;  %v2061_v10 = vshrl.u32 %v6565_v43, 16 }
 0x118   : > { %v917_v30 = vpop.f32.mrf.mxu1 }
 0x119   : > { %v6572_v13 = vadd.f32 %v1586_v17, %v915_v36  ;;  %v6589_v23 = vor.u32 %v2061_v10, %v6582_v21  ;;  %v918_v45 = vadd.f32 %v917_v30, %v6352_v39  ;;  %v558_v36 = vshrl.u32 %v6200_v1, 16 }
 0x11a   : > { %v562_v17 = vshll.u32 %v6244_v31, 16 }
 0x11b   : > { %8122 = vst [vmem:[#allocation40_spill] sm:$0xff] %v6572_v13  ;;  %v6574_v46 = vpop.f32.mrf.mxu0  ;;  %956 = vmatmul.bf16.gmra.mxu1 %v557_v60  ;;  %1514 = vmatmul.bf16.gmra.mxu2 %v6445_v54  ;;  %v1322_v60 = vrot.slane %v5654_v49, 1  ;;  %v560_v39 = vor.u32 %v558_v36, %v556_v5 }
 0x11c   : > { %8123 = vst [vmem:[#allocation41_spill] sm:$0xff] %v6574_v46  ;;  %v6594_v62 = vpop.f32.mrf.mxu3  ;;  %v2307_v46 = vrot.slane %v2053_v63, 1  ;;  %v564_v30 = vrot.slane %v562_v17, 1 }
 0x11d   : > { %8124 = vst [vmem:[#allocation42_spill] sm:$0xff] %v6589_v23  ;;  %v6603_v13 = vsel %vm1292_vm0, %v1320_v15, %v1322_v60 }
 0x11e   : > { %2628 = vmatmul.bf16.gmra.mxu0 %v2297_v50  ;;  %v1475_v7 = vpop.f32.mrf.mxu2  ;;  %v565_v44 = vsel %vm473_vm1, %v560_v39, %v564_v30 }
 0x11f   : > { %v1589_v54 = vadd.f32 %v6495_v2, %v1475_v7  ;;  %1642 = vmatmul.bf16.gmra.mxu3 %v6603_v13  ;;  %v2309_v2 = vor.u32 %v2308_v26, %v2307_v46  ;;  %v6607_v7 = vld [vmem:[%s6047_s16 + $0x70] sm:$0xff] }
 0x120   : > { %v919_v43 = vpop.f32.mrf.mxu1  ;;  %v2065_v46 = vshll.u32 %v6607_v7, 16 }
 0x121   : > { %v6598_v50 = vadd.f32 %v1589_v54, %v918_v45  ;;  %v920_v23 = vadd.f32 %v919_v43, %v6374_v55  ;;  %v2310_v54 = vsel %vm2160_vm2, %v2296_v52, %v2309_v2 }
 0x122   : > { %v6621_v55 = vrot.slane %v2065_v46, 1 }
 0x123   : > { %v6600_v29 = vpop.f32.mrf.mxu0 }
 0x124   : > { %v6611_v45 = vpop.f32.mrf.mxu3 }
 0x126   : > { %v1477_v1 = vpop.f32.mrf.mxu2 }
 0x127   : > { %v1591_v49 = vadd.f32 %v6512_v32, %v1477_v1  ;;  %v2069_v32 = vshrl.u32 %v6607_v7, 16  ;;  %v570_v1 = vshll.u32 %v6062_v12, 16 }
 0x128   : > { %v922_v63 = vpop.f32.mrf.mxu1 }
 0x129   : > { %v6614_v15 = vadd.f32 %v1591_v49, %v920_v23  ;;  %v6625_v43 = vor.u32 %v2069_v32, %v6621_v55  ;;  %v5655_v23 = vld [vmem:[%s6047_s16 + $0x78] sm:$0xff]  ;;  %v923_v17 = vadd.f32 %v922_v63, %v6393_v9  ;;  %v572_v63 = vrot.slane %v570_v1, 1  ;;  %v5656_v1 = vld [vmem:[%s6047_s16 + $0x80] sm:$0xff] }
 0x12a   : > { %v1324_v49 = vrot.slane %v5655_v23, 1 }
 0x12b   : > { %8125 = vst [vmem:[#allocation43_spill] sm:$0xff] %v6614_v15  ;;  %v6616_v5 = vpop.f32.mrf.mxu0  ;;  %961 = vmatmul.bf16.gmra.mxu1 %v565_v44  ;;  %1519 = vmatmul.bf16.gmra.mxu2 %v6489_v59  ;;  %v566_v59 = vshrl.u32 %v6244_v31, 16 }
 0x12c   : > { %8126 = vst [vmem:[#allocation44_spill] sm:$0xff] %v6616_v5  ;;  %v6630_v26 = vpop.f32.mrf.mxu3  ;;  %v2321_v5 = vrot.slane %v2057_v37, 2  ;;  %v6639_v15 = vsel %vm1292_vm0, %v1322_v60, %v1324_v49 }
 0x12d   : > { %v568_v9 = vor.u32 %v566_v59, %v564_v30 }
 0x12e   : > { %2633 = vmatmul.bf16.gmra.mxu0 %v2310_v54  ;;  %v1480_v36 = vpop.f32.mrf.mxu2  ;;  %v2320_v54 = vrot.slane %v2061_v10, 1 }
 0x12f   : > { %v1594_v52 = vadd.f32 %v6529_v35, %v1480_v36  ;;  %1647 = vmatmul.bf16.gmra.mxu3 %v6639_v15  ;;  %v6643_v36 = vld [vmem:[%s6047_s16 + $0x78] sm:$0xff]  ;;  %v573_v37 = vsel %vm473_vm1, %v568_v9, %v572_v63 }
 0x130   : > { %v924_v39 = vpop.f32.mrf.mxu1  ;;  %v2322_v35 = vor.u32 %v2321_v5, %v2320_v54  ;;  %v8081_v5 = vshll.u32 %v6643_v36, 16 }
 0x131   : > { %v6634_v7 = vadd.f32 %v1594_v52, %v923_v17  ;;  %v925_v12 = vadd.f32 %v924_v39, %v6411_v57  ;;  %v5735_v39 = vld [vmem:[%s8069_s4 + $0x190] sm:$0xff] }
 0x132   : > { %v2323_v30 = vsel %vm2160_vm2, %v2309_v2, %v2322_v35  ;;  %v6659_v57 = vrot.slane %v8081_v5, 1  ;;  %v5743_v2 = vld [vmem:[%s8069_s4 + $0x1d0] sm:$0xff]  ;;  %3500 = vmatpush.bf16.msra.mxu2 %v5735_v39  ;;  %v2333_v39 = vrot.slane %v2069_v32, 1 }
 0x133   : > { %v6636_v44 = vpop.f32.mrf.mxu0  ;;  %3613 = vmatpush.bf16.msra.mxu3 %v5743_v2  ;;  %v2334_v2 = vrot.slane %v2065_v46, 2 }
 0x134   : > { %v6647_v17 = vpop.f32.mrf.mxu3 }
 0x136   : > { %v1482_v31 = vpop.f32.mrf.mxu2 }
 0x137   : > { %v1596_v23 = vadd.f32 %v6546_v24, %v1482_v31  ;;  %v2077_v24 = vshrl.u32 %v6643_v36, 16 }
 0x138   : > { %v927_v52 = vpop.f32.mrf.mxu1 }
 0x139   : > { %v6650_v10 = vadd.f32 %v1596_v23, %v925_v12  ;;  %v6669_v59 = vor.u32 %v2077_v24, %v6659_v57  ;;  %v928_v54 = vadd.f32 %v927_v52, %v6426_v41  ;;  %v5953_v23 = vld [vmem:[%s6047_s16 + $0x60] sm:$0xff]  ;;  %v5707_v41 = vld [vmem:[%s8069_s4 + $0x150] sm:$0xff] }
 0x13a   : > { %2693 = vmatpush.bf16.msra.mxu1 %v5707_v41 }
 0x13b   : > { %8127 = vst [vmem:[#allocation45_spill] sm:$0xff] %v6650_v10  ;;  %v6652_v60 = vpop.f32.mrf.mxu0  ;;  %966 = vmatmul.bf16.gmra.mxu1 %v573_v37  ;;  %1524 = vmatmul.bf16.gmra.mxu2 %v6521_v4  ;;  %v574_v37 = vshrl.u32 %v5953_v23, 16  ;;  %v2335_v23 = vor.u32 %v2334_v2, %v2333_v39  ;;  %v5657_v2 = vld [vmem:[%s6047_s16 + $0x88] sm:$0xff] }
 0x13c   : > { %8128 = vst [vmem:[#allocation46_spill] sm:$0xff] %v6652_v60  ;;  %v6674_v31 = vpop.f32.mrf.mxu3  ;;  %v1326_v60 = vrot.slane %v5656_v1, 1  ;;  %v6690_v1 = vld [vmem:[%s6047_s16 + $0x80] sm:$0xff] }
 0x13d   : > { %8129 = vst [vmem:[#allocation47_spill] sm:$0xff] %v6669_v59  ;;  %v576_v52 = vor.u32 %v574_v37, %v572_v63  ;;  %v5772_v37 = vld [vmem:[%s8069_s4 + $0x210] sm:$0xff] }
 0x13e   : > { %2638 = vmatmul.bf16.gmra.mxu0 %v2323_v30  ;;  %v1485_v4 = vpop.f32.mrf.mxu2  ;;  %v5954_v30 = vld [vmem:[%s6047_s16 + $0x68] sm:$0xff] }
 0x13f   : > { %v1599_v9 = vadd.f32 %v6569_v28, %v1485_v4  ;;  %v578_v5 = vshll.u32 %v5954_v30, 16  ;;  %v6686_v28 = vsel %vm1292_vm0, %v1324_v49, %v1326_v60  ;;  %4123 = vmatpush.bf16.msra.mxu0 %v5772_v37  ;;  %v2346_v37 = vrot.slane %v2077_v24, 1 }
 0x140   : > { %v929_v12 = vpop.f32.mrf.mxu1  ;;  %1652 = vmatmul.bf16.gmra.mxu3 %v6686_v28 }
 0x141   : > { %v6678_v10 = vadd.f32 %v1599_v9, %v928_v54  ;;  %v580_v4 = vrot.slane %v578_v5, 1  ;;  %v930_v9 = vadd.f32 %v929_v12, %v6442_v58  ;;  %v2336_v5 = vsel %vm2160_vm2, %v2322_v35, %v2335_v23 }
 0x142   : > { %v2081_v58 = vshll.u32 %v6690_v1, 16  ;;  %v2085_v12 = vshrl.u32 %v6690_v1, 16 }
 0x143   : > { %8130 = vst [vmem:[#allocation48_spill] sm:$0xff] %v6678_v10  ;;  %v6680_v59 = vpop.f32.mrf.mxu0  ;;  %v581_v49 = vsel %vm473_vm1, %v576_v52, %v580_v4 }
 0x144   : > { %8131 = vst [vmem:[#allocation49_spill] sm:$0xff] %v6680_v59  ;;  %v6694_v32 = vpop.f32.mrf.mxu3 }
 0x146   : > { %v1487_v54 = vpop.f32.mrf.mxu2 }
 0x147   : > { %v1601_v46 = vadd.f32 %v6594_v62, %v1487_v54  ;;  %v6707_v62 = vrot.slane %v2081_v58, 1 }
 0x148   : > { %v932_v59 = vpop.f32.mrf.mxu1 }
 0x149   : > { %v6697_v10 = vadd.f32 %v1601_v46, %v930_v9  ;;  %8134 = vst [vmem:[#allocation52_spill] sm:$0xff] %v6707_v62  ;;  %v6711_v39 = vor.u32 %v2085_v12, %v6707_v62  ;;  %v933_v41 = vadd.f32 %v932_v59, %v6456_v14  ;;  %v5955_v46 = vld [vmem:[%s6047_s16 + $0x70] sm:$0xff] }
 0x14b   : > { %8132 = vst [vmem:[#allocation50_spill] sm:$0xff] %v6697_v10  ;;  %v6699_v63 = vpop.f32.mrf.mxu0  ;;  %971 = vmatmul.bf16.gmra.mxu1 %v581_v49  ;;  %1529 = vmatmul.bf16.gmra.mxu2 %v6561_v48  ;;  %v582_v48 = vshrl.u32 %v5954_v30, 16  ;;  %v586_v49 = vshll.u32 %v5955_v46, 16  ;;  %v8137_v10 = vshll.u32 %v6643_v36, 16  ;;  %v6730_v30 = vld [vmem:[%s6047_s16 + $0x88] sm:$0xff] }
 0x14c   : > { %8133 = vst [vmem:[#allocation51_spill] sm:$0xff] %v6699_v63  ;;  %v6716_v54 = vpop.f32.mrf.mxu3  ;;  %v1328_v63 = vrot.slane %v5657_v2, 1 }
 0x14d   : > { %8135 = vst [vmem:[#allocation53_spill] sm:$0xff] %v6711_v39  ;;  %v2347_v39 = vrot.slane %v8137_v10, 2  ;;  %v588_v59 = vrot.slane %v586_v49, 1 }
 0x14e   : > { %2643 = vmatmul.bf16.gmra.mxu0 %v2336_v5  ;;  %v1490_v35 = vpop.f32.mrf.mxu2  ;;  %v6726_v14 = vsel %vm1292_vm0, %v1326_v60, %v1328_v63 }
 0x14f   : > { %v1604_v52 = vadd.f32 %v6611_v45, %v1490_v35  ;;  %v584_v45 = vor.u32 %v582_v48, %v580_v4  ;;  %v2348_v35 = vor.u32 %v2347_v39, %v2346_v37  ;;  %v5658_v48 = vld [vmem:[%s6047_s16 + $0x90] sm:$0xff] }
 0x150   : > { %v934_v9 = vpop.f32.mrf.mxu1  ;;  %1657 = vmatmul.bf16.gmra.mxu3 %v6726_v14 }
 0x151   : > { %v6719_v1 = vadd.f32 %v1604_v52, %v933_v41  ;;  %v935_v2 = vadd.f32 %v934_v9, %v6483_v27  ;;  %v589_v10 = vsel %vm473_vm1, %v584_v45, %v588_v59  ;;  %v2349_v39 = vsel %vm2160_vm2, %v2335_v23, %v2348_v35 }
 0x152   : > { %v2089_v52 = vshll.u32 %v6730_v30, 16 }
 0x153   : > { %v6721_v5 = vpop.f32.mrf.mxu0 }
 0x154   : > { %8136 = vst [vmem:[#allocation54_spill] sm:$0xff] %v6721_v5  ;;  %v6734_v24 = vpop.f32.mrf.mxu3  ;;  %v6744_v27 = vrot.slane %v2089_v52, 1 }
 0x156   : > { %v1492_v62 = vpop.f32.mrf.mxu2 }
 0x157   : > { %v1606_v41 = vadd.f32 %v6630_v26, %v1492_v62  ;;  %v2093_v26 = vshrl.u32 %v6730_v30, 16 }
 0x158   : > { %v937_v36 = vpop.f32.mrf.mxu1 }
 0x159   : > { %v6737_v60 = vadd.f32 %v1606_v41, %v935_v2  ;;  %v6748_v62 = vor.u32 %v2093_v26, %v6744_v27  ;;  %v938_v49 = vadd.f32 %v937_v36, %v6500_v61  ;;  %v590_v2 = vshrl.u32 %v5955_v46, 16 }
 0x15b   : > { %8138 = vst [vmem:[#allocation55_spill] sm:$0xff] %v6737_v60  ;;  %v6739_v4 = vpop.f32.mrf.mxu0  ;;  %976 = vmatmul.bf16.gmra.mxu1 %v589_v10  ;;  %1534 = vmatmul.bf16.gmra.mxu2 %v6603_v13  ;;  %v5956_v13 = vld [vmem:[%s6047_s16 + $0x78] sm:$0xff]  ;;  %v1330_v10 = vrot.slane %v5658_v48, 1  ;;  %v2360_v60 = vrot.slane %v2081_v58, 2  ;;  %v592_v61 = vor.u32 %v590_v2, %v588_v59 }
 0x15c   : > { %8139 = vst [vmem:[#allocation56_spill] sm:$0xff] %v6739_v4  ;;  %v6753_v23 = vpop.f32.mrf.mxu3  ;;  %v594_v41 = vshll.u32 %v5956_v13, 16 }
 0x15d   : > { %8140 = vst [vmem:[#allocation57_spill] sm:$0xff] %v6748_v62  ;;  %v6761_v62 = vsel %vm1292_vm0, %v1328_v63, %v1330_v10 }
 0x15e   : > { %2648 = vmatmul.bf16.gmra.mxu0 %v2349_v39  ;;  %v1495_v9 = vpop.f32.mrf.mxu2  ;;  %v2359_v39 = vrot.slane %v2085_v12, 1  ;;  %v596_v36 = vrot.slane %v594_v41, 1 }
 0x15f   : > { %v1609_v37 = vadd.f32 %v6647_v17, %v1495_v9  ;;  %v6765_v9 = vld [vmem:[%s6047_s16 + $0x90] sm:$0xff] }
 0x160   : > { %v939_v45 = vpop.f32.mrf.mxu1  ;;  %1662 = vmatmul.bf16.gmra.mxu3 %v6761_v62  ;;  %v2361_v17 = vor.u32 %v2360_v60, %v2359_v39  ;;  %v597_v58 = vsel %vm473_vm1, %v592_v61, %v596_v36  ;;  %v5734_v60 = vld [vmem:[%s8069_s4 + $0x188] sm:$0xff]  ;;  %v5659_v39 = vld [vmem:[%s6047_s16 + $0x98] sm:$0xff] }
 0x161   : > { %v6756_v4 = vadd.f32 %v1609_v37, %v938_v49  ;;  %v940_v5 = vadd.f32 %v939_v45, %v6518_v3  ;;  %v5742_v3 = vld [vmem:[%s8069_s4 + $0x1c8] sm:$0xff]  ;;  %3501 = vmatpush.bf16.msra.mxu2 %v5734_v60 }
 0x162   : > { %v2362_v59 = vsel %vm2160_vm2, %v2348_v35, %v2361_v17  ;;  %v2101_v35 = vshrl.u32 %v6765_v9, 16  ;;  %3614 = vmatpush.bf16.msra.mxu3 %v5742_v3 }
 0x163   : > { %v6758_v30 = vpop.f32.mrf.mxu0 }
 0x164   : > { %v6769_v49 = vpop.f32.mrf.mxu3 }
 0x166   : > { %v1497_v46 = vpop.f32.mrf.mxu2 }
 0x167   : > { %v1611_v48 = vadd.f32 %v6674_v31, %v1497_v46  ;;  %v2097_v31 = vshll.u32 %v6765_v9, 16 }
 0x168   : > { %v942_v37 = vpop.f32.mrf.mxu1 }
 0x169   : > { %v6772_v12 = vadd.f32 %v1611_v48, %v940_v5  ;;  %v5706_v5 = vld [vmem:[%s8069_s4 + $0x148] sm:$0xff]  ;;  %v6788_v45 = vrot.slane %v2097_v31, 1 }
 0x16a   : > { %2694 = vmatpush.bf16.msra.mxu1 %v5706_v5  ;;  %v2372_v5 = vrot.slane %v2093_v26, 1 }
 0x16b   : > { %8141 = vst [vmem:[#allocation58_spill] sm:$0xff] %v6772_v12  ;;  %v6774_v63 = vpop.f32.mrf.mxu0  ;;  %981 = vmatmul.bf16.gmra.mxu1 %v597_v58  ;;  %1539 = vmatmul.bf16.gmra.mxu2 %v6639_v15  ;;  %v6792_v2 = vor.u32 %v2101_v35, %v6788_v45  ;;  %v943_v15 = vadd.f32 %v942_v37, %v6319_v0  ;;  %v598_v58 = vshrl.u32 %v5956_v13, 16  ;;  %v2373_v12 = vrot.slane %v2089_v52, 2  ;;  %v5771_v0 = vld [vmem:[%s8069_s4 + $0x208] sm:$0xff] }
 0x16c   : > { %8142 = vst [vmem:[#allocation59_spill] sm:$0xff] %v6774_v63  ;;  %v6797_v46 = vpop.f32.mrf.mxu3  ;;  %v5957_v63 = vld [vmem:[%s6047_s16 + $0x80] sm:$0xff]  ;;  %4124 = vmatpush.bf16.msra.mxu0 %v5771_v0 }
 0x16d   : > { %8143 = vst [vmem:[#allocation60_spill] sm:$0xff] %v6792_v2  ;;  %v602_v9 = vshll.u32 %v5957_v63, 16  ;;  %v600_v13 = vor.u32 %v598_v58, %v596_v36 }
 0x16e   : > { %2653 = vmatmul.bf16.gmra.mxu0 %v2362_v59  ;;  %v1500_v41 = vpop.f32.mrf.mxu2  ;;  %v6800_v59 = vrot.slane %v5659_v39, 1  ;;  %v6815_v39 = vld [vmem:[%s6047_s16 + $0x98] sm:$0xff] }
 0x16f   : > { %v1614_v61 = vadd.f32 %v6694_v32, %v1500_v41  ;;  %v604_v37 = vrot.slane %v602_v9, 1  ;;  %v2374_v41 = vor.u32 %v2373_v12, %v2372_v5  ;;  %v2105_v58 = vshll.u32 %v6815_v39, 16 }
 0x170   : > { %v944_v48 = vpop.f32.mrf.mxu1  ;;  %v6811_v32 = vsel %vm1292_vm0, %v1330_v10, %v6800_v59 }
 0x171   : > { %v6802_v60 = vadd.f32 %v1614_v61, %v943_v15  ;;  %1667 = vmatmul.bf16.gmra.mxu3 %v6811_v32  ;;  %v945_v26 = vadd.f32 %v944_v48, %v6337_v20  ;;  %v605_v10 = vsel %vm473_vm1, %v600_v13, %v604_v37  ;;  %v2375_v12 = vsel %vm2160_vm2, %v2361_v17, %v2374_v41  ;;  %v5887_v17 = vld [vmem:[%s6047_s16 + $0xa0] sm:$0xff]  }
 0x172   : > { %v6829_v20 = vrot.slane %v2105_v58, 1 }
 0x173   : > { %8144 = vst [vmem:[#allocation61_spill] sm:$0xff] %v6802_v60  ;;  %v6804_v3 = vpop.f32.mrf.mxu0 }
 0x174   : > { %8145 = vst [vmem:[#allocation62_spill] sm:$0xff] %v6804_v3  ;;  %v6819_v61 = vpop.f32.mrf.mxu3 }
 0x176   : > { %v1502_v15 = vpop.f32.mrf.mxu2 }
 0x177   : > { %v1616_v52 = vadd.f32 %v6716_v54, %v1502_v15  ;;  %v2109_v54 = vshrl.u32 %v6815_v39, 16 }
 0x178   : > { %v947_v3 = vpop.f32.mrf.mxu1 }
 0x179   : > { %v6822_v60 = vadd.f32 %v1616_v52, %v945_v26  ;;  %v6833_v48 = vor.u32 %v2109_v54, %v6829_v20  ;;  %v948_v5 = vadd.f32 %v947_v3, %v6350_v40  ;;  %v606_v26 = vshrl.u32 %v5957_v63, 16 }
 0x17b   : > { %8146 = vst [vmem:[#allocation63_spill] sm:$0xff] %v6822_v60  ;;  %v6824_v36 = vpop.f32.mrf.mxu0  ;;  %986 = vmatmul.bf16.gmra.mxu1 %v605_v10  ;;  %1544 = vmatmul.bf16.gmra.mxu2 %v6686_v28  ;;  %v5958_v28 = vld [vmem:[%s6047_s16 + $0x88] sm:$0xff]  ;;  %v1334_v10 = vrot.slane %v5887_v17, 1  ;;  %v2386_v60 = vrot.slane %v2097_v31, 2  ;;  %v608_v3 = vor.u32 %v606_v26, %v604_v37 }
 0x17c   : > { %8147 = vst [vmem:[#allocation64_spill] sm:$0xff] %v6824_v36  ;;  %v6837_v13 = vpop.f32.mrf.mxu3  ;;  %v610_v52 = vshll.u32 %v5958_v28, 16 }
 0x17d   : > { %8148 = vst [vmem:[#allocation65_spill] sm:$0xff] %v6833_v48  ;;  %v1335_v40 = vsel %vm1292_vm0, %v6800_v59, %v1334_v10  ;;  %v6848_v48 = vld [vmem:[%s6047_s16 + $0xa0] sm:$0xff] }
 0x17e   : > { %2658 = vmatmul.bf16.gmra.mxu0 %v2375_v12  ;;  %v1505_v9 = vpop.f32.mrf.mxu2  ;;  %v2385_v12 = vrot.slane %v2101_v35, 1  ;;  %v2113_v26 = vshll.u32 %v6848_v48, 16 }
 0x17f   : > { %v1619_v0 = vadd.f32 %v6734_v24, %v1505_v9  ;;  %v612_v24 = vrot.slane %v610_v52, 1  ;;  %v5660_v52 = vld [vmem:[%s6047_s16 + $0xa8] sm:$0x10] }
 0x180   : > { %v949_v15 = vpop.f32.mrf.mxu1  ;;  %v2387_v9 = vor.u32 %v2386_v60, %v2385_v12 }
 0x181   : > { %v6841_v36 = vadd.f32 %v1619_v0, %v948_v5  ;;  %1672 = vmatmul.bf16.gmra.mxu3 %v1335_v40  ;;  %v950_v63 = vadd.f32 %v949_v15, %v6372_v53  ;;  %v613_v31 = vsel %vm473_vm1, %v608_v3, %v612_v24  ;;  %v6862_v53 = vrot.slane %v2113_v26, 1  ;;  %v5133_v15 = vld [vmem:[%s6047_s16 + $0xa8] sm:$0xf] }
 0x182   : > { %v2388_v60 = vsel %vm2160_vm2, %v2374_v41, %v2387_v9  ;;  %v5134_v40 = vor.u32 %v5660_v52, %v5133_v15  ;;  %v5733_v15 = vld [vmem:[%s8069_s4 + $0x180] sm:$0xff] }
 0x183   : > { %v6843_v39 = vpop.f32.mrf.mxu0  ;;  %3502 = vmatpush.bf16.msra.mxu2 %v5733_v15 }
 0x184   : > { %8149 = vst [vmem:[#allocation66_spill] sm:$0xff] %v6843_v39  ;;  %v6852_v0 = vpop.f32.mrf.mxu3  ;;  %v2399_v39 = vrot.slane %v2105_v58, 2 }
 0x186   : > { %v1507_v2 = vpop.f32.mrf.mxu2 }
 0x187   : > { %v1621_v5 = vadd.f32 %v6753_v23, %v1507_v2  ;;  %v2117_v23 = vshrl.u32 %v6848_v48, 16 }
 0x188   : > { %v952_v35 = vpop.f32.mrf.mxu1 }
 0x189   : > { %v6855_v17 = vadd.f32 %v1621_v5, %v950_v63  ;;  %v6866_v2 = vor.u32 %v2117_v23, %v6862_v53  ;;  %v953_v41 = vadd.f32 %v952_v35, %v6388_v16  ;;  %v5741_v16 = vld [vmem:[%s8069_s4 + $0x1c0] sm:$0xff] }
 0x18a   : > { %3615 = vmatpush.bf16.msra.mxu3 %v5741_v16 }
 0x18b   : > { %8150 = vst [vmem:[#allocation67_spill] sm:$0xff] %v6855_v17  ;;  %v6857_v37 = vpop.f32.mrf.mxu0  ;;  %991 = vmatmul.bf16.gmra.mxu1 %v613_v31  ;;  %1549 = vmatmul.bf16.gmra.mxu2 %v6726_v14  ;;  %v614_v14 = vshrl.u32 %v5958_v28, 16  ;;  %v5959_v31 = vld [vmem:[%s6047_s16 + $0x90] sm:$0xff]  ;;  %v1338_v17 = vrot.slane %v5134_v40, 1 }
 0x18c   : > { %8151 = vst [vmem:[#allocation68_spill] sm:$0xff] %v6857_v37  ;;  %v6872_v63 = vpop.f32.mrf.mxu3  ;;  %v618_v37 = vshll.u32 %v5959_v31, 16 }
 0x18d   : > { %8152 = vst [vmem:[#allocation69_spill] sm:$0xff] %v6866_v2  ;;  %v2398_v2 = vrot.slane %v2109_v54, 1  ;;  %v1339_v28 = vsel %vm1292_vm0, %v1334_v10, %v1338_v17  ;;  %v616_v35 = vor.u32 %v614_v14, %v612_v24  ;;  %v622_v14 = vshrl.u32 %v5959_v31, 16  ;;  %v5277_v31 = vld [vmem:[%s6047_s16 + $0xa8] sm:$0xf] }
 0x18e   : > { %2663 = vmatmul.bf16.gmra.mxu0 %v2388_v60  ;;  %v1510_v12 = vpop.f32.mrf.mxu2  ;;  %v620_v52 = vrot.slane %v618_v37, 1 }
 0x18f   : > { %v1624_v3 = vadd.f32 %v6769_v49, %v1510_v12  ;;  %v5705_v49 = vld [vmem:[%s8069_s4 + $0x140] sm:$0xff]  ;;  %v2400_v58 = vor.u32 %v2399_v39, %v2398_v2  ;;  %v1852_v39 = vld [vmem:[%s6047_s16 + $0x8] sm:$0xc] }
 0x190   : > { %v954_v5 = vpop.f32.mrf.mxu1  ;;  %2695 = vmatpush.bf16.msra.mxu1 %v5705_v49 }
 0x191   : > { %v6875_v48 = vadd.f32 %v1624_v3, %v953_v41  ;;  %1677 = vmatmul.bf16.gmra.mxu3 %v1339_v28  ;;  %v955_v12 = vadd.f32 %v954_v5, %v6407_v56  ;;  %v2401_v24 = vsel %vm2160_vm2, %v2387_v9, %v2400_v58  ;;  %v5770_v56 = vld [vmem:[%s8069_s4 + $0x200] sm:$0xff]  ;;  %v2411_v28 = vrot.slane %v2117_v23, 1 }
 0x192   : > { %4125 = vmatpush.bf16.msra.mxu0 %v5770_v56  ;;  %v8158_v56 = vunpack.c.l.b16 %v6231_v25 }
 0x193   : > { %v6877_v60 = vpop.f32.mrf.mxu0 }
 0x194   : > { %8153 = vst [vmem:[#allocation70_spill] sm:$0xff] %v6877_v60  ;;  %v6891_v41 = vpop.f32.mrf.mxu3  ;;  %v621_v60 = vsel %vm473_vm1, %v616_v35, %v620_v52  ;;  %v1959_v35 = vunpack.c.l.b16 %v1852_v39 }
 0x196   : > { %v1512_v54 = vpop.f32.mrf.mxu2 }
 0x197   : > { %v1626_v40 = vadd.f32 %v6797_v46, %v1512_v54  ;;  %v624_v54 = vor.u32 %v622_v14, %v620_v52  ;;  %v6930_v52 = vld [vmem:[%s6047_s16 + $0x18] sm:$0xff] }
 0x198   : > { %v957_v3 = vpop.f32.mrf.mxu1 }
 0x199   : > { %v6894_v10 = vadd.f32 %v1626_v40, %v955_v12  ;;  %v958_v37 = vadd.f32 %v957_v3, %v6423_v51  ;;  %v2412_v51 = vrot.slane %v2113_v26, 2  ;;  %v5696_v3 = vld [vmem:[%s6047_s16 + $0xa8] sm:$0x30] }
 0x19b   : > { %8154 = vst [vmem:[#allocation71_spill] sm:$0xff] %v6894_v10  ;;  %v6896_v15 = vpop.f32.mrf.mxu0  ;;  %996 = vmatmul.bf16.gmra.mxu1 %v621_v60  ;;  %1554 = vmatmul.bf16.gmra.mxu2 %v6761_v62  ;;  %v6909_v62 = vld [vmem:[%s6047_s16 + $0x98] sm:$0xff]  ;;  %v6917_v40 = vor.u32 %v2412_v51, %v2411_v28  ;;  %v6935_v28 = vor.u32 %v5696_v3, %v5277_v31  ;;  %v3087_v3 = vshrl.u32 %v6930_v52, 16 }
 0x19c   : > { %8155 = vst [vmem:[#allocation72_spill] sm:$0xff] %v6896_v15  ;;  %v6906_v5 = vpop.f32.mrf.mxu3  ;;  %v626_v60 = vshll.u32 %v6909_v62, 16 }
 0x19e   : > { %2668 = vmatmul.bf16.gmra.mxu0 %v2401_v24  ;;  %v1515_v46 = vpop.f32.mrf.mxu2  ;;  %v628_v12 = vrot.slane %v626_v60, 1 }
 0x19f   : > { %v1629_v2 = vadd.f32 %v6819_v61, %v1515_v46  ;;  %v345_v61 = vld [vmem:[%s6047_s16 + $0xa4] sm:$0x1]  ;;  %v1960_v46 = vpack.c.b16 %v8158_v56, %v1959_v35 }
 0x1a0   : > { %v959_v9 = vpop.f32.mrf.mxu1  ;;  %v471_v24 = vunpack.c.l.b16 %v345_v61  ;;  %v629_v60 = vsel %vm473_vm1, %v624_v54, %v628_v12  ;;  %v3083_v61 = vshll.u32 %v6930_v52, 16 }
 0x1a1   : > { %v6912_v16 = vadd.f32 %v1629_v2, %v958_v37  ;;  %1682 = vmatmul.bf16.gmra.mxu3 %v1338_v17  ;;  %v5345_v2 = vld [vmem:[%s6047_s16 + $0x10] sm:$0xc]  ;;  %v960_v26 = vadd.f32 %v959_v9, %v6438_v33  ;;  %v2414_v33 = vsel %vm2160_vm2, %v2400_v58, %v6917_v40  ;;  %v1964_v35 = vshll.u32 %v1960_v46, 16 }
 0x1a3   : > { %8156 = vst [vmem:[#allocation73_spill] sm:$0xff] %v6912_v16  ;;  %v6914_v49 = vpop.f32.mrf.mxu0 }
 0x1a4   : > { %8157 = vst [vmem:[#allocation74_spill] sm:$0xff] %v6914_v49  ;;  %v5713_v49 = vld [vmem:[%s6047_s16 + $0x10] sm:$0xf0]  ;;  %v6927_v39 = vpop.f32.mrf.mxu3 }
 0x1a5   : > { %v6932_v17 = vor.u32 %v5713_v49, %v5345_v2  ;;  %v6948_v49 = vpack.c.b16 %v471_v24, %v6148_v42  ;;  %v5912_v2 = vld [vmem:[%s6047_s16 + $0xa0] sm:$0xf]   ;;  %v5938_v42 = vld [vmem:[%s6047_s16 + $0xa0] sm:$0x10] }
 0x1a6   : > { %v1517_v37 = vpop.f32.mrf.mxu2  ;;  %v5913_v24 = vor.u32 %v5938_v42, %v5912_v2  ;;  %v1980_v42 = vsel %vm473_vm1, %v6226_v18, %v6253_v38 }
 0x1a7   : > { %v1631_v23 = vadd.f32 %v6837_v13, %v1517_v37  ;;  %v6944_v13 = vld [vmem:[%s6047_s16 + $0x20] sm:$0xff]  ;;  %v3078_v9 = vshll.u32 %v6932_v17, 16  ;;  %v3076_v54 = vshrl.u32 %v6932_v17, 16  ;;  %v3085_v37 = vrot.slane %v3083_v61, 1 }
 0x1a8   : > { %v962_v14 = vpop.f32.mrf.mxu1  ;;  %v3091_v58 = vshll.u32 %v6944_v13, 16 }
 0x1a9   : > { %v6937_v25 = vadd.f32 %v1631_v23, %v960_v26  ;;  %v3080_v31 = vrot.slane %v3078_v9, 1  ;;  %v3089_v9 = vor.u32 %v3087_v3, %v3085_v37  ;;  %v963_v16 = vadd.f32 %v962_v14, %v6453_v11 }
 0x1aa   : > { %v3093_v23 = vrot.slane %v3091_v58, 1  ;;  %v8162_v11 = vshrl.u32 %v6935_v28, 16 }
 0x1ab   : > { %8159 = vst [vmem:[#allocation75_spill] sm:$0xff] %v6937_v25  ;;  %v6939_v51 = vpop.f32.mrf.mxu0  ;;  %1001 = vmatmul.bf16.gmra.mxu1 %v629_v60  ;;  %1559 = vmatmul.bf16.gmra.mxu2 %v6811_v32  ;;  %v3081_v26 = vor.u32 %v3080_v31, %v3076_v54  ;;  %v1962_v60 = vshrl.u32 %v1960_v46, 16  ;;  %v630_v25 = vshrl.u32 %v6909_v62, 16  ;;  %v8161_v54 = vshll.u32 %v6935_v28, 16 }
 0x1ac   : > { %8160 = vst [vmem:[#allocation76_spill] sm:$0xff] %v6939_v51  ;;  %v1966_v51 = vrot.slane %v1964_v35, 1  ;;  %v6963_v56 = vpop.f32.mrf.mxu3  ;;  %v3094_v35 = vsel %vm473_vm1, %v3089_v9, %v3093_v23  ;;  %v2185_v9 = vshll.u32 %v1980_v42, 16 }
 0x1ad   : > { %v3086_v61 = vsel %vm473_vm1, %v3081_v26, %v3085_v37  ;;  %v2425_v46 = vrot.slane %v8161_v54, 2  ;;  %v3279_v14 = vrot.slane %v3094_v35, 2  ;;  %v1336_v26 = vrot.slane %v5913_v24, 1 }
 0x1ae   : > { %2673 = vmatmul.bf16.gmra.mxu0 %v2414_v33  ;;  %v1520_v32 = vpop.f32.mrf.mxu2  ;;  %v634_v33 = vshll.u32 %v6948_v49, 16  ;;  %v3278_v31 = vrot.slane %v3086_v61, 2  ;;  %v1967_v58 = vor.u32 %v1966_v51, %v1962_v60 }
 0x1af   : > { %v1634_v15 = vadd.f32 %v6852_v0, %v1520_v32  ;;  %v2424_v0 = vrot.slane %v8162_v11, 1  ;;  %v632_v32 = vor.u32 %v630_v25, %v628_v12  ;;  %v2187_v25 = vrot.slane %v2185_v9, 2 }
 0x1b0   : > { %v964_v10 = vpop.f32.mrf.mxu1  ;;  %v636_v37 = vrot.slane %v634_v33, 1  ;;  %v3280_v2 = vsel %vm3274_vm3, %v3278_v31, %v3279_v14 }
 0x1b1   : > { %v6969_v62 = vadd.f32 %v1634_v15, %v963_v16  ;;  %3616 = vmatmul.bf16.vlgmr.msra.gmra.mxu3 %v3280_v2  ;;  %v1972_v15 = vsel %vm473_vm1, %v1967_v58, %v6214_v8  ;;  %v2182_v16 = vshrl.u32 %v1980_v42, 16  ;;  %v2426_v61 = vor.u32 %v2425_v46, %v2424_v0 }
 0x1b2   : > { %v2174_v54 = vshrl.u32 %v1972_v15, 16  ;;  %v2177_v11 = vshll.u32 %v1972_v15, 16  ;;  %v965_v51 = vadd.f32 %v964_v10, %v6479_v22  ;;  %v637_v8 = vsel %vm473_vm1, %v632_v32, %v636_v37 }
 0x1b3   : > { %v6971_v3 = vpop.f32.mrf.mxu0  ;;  %v2184_v12 = vrot.slane %v2182_v16, 1  ;;  %v1337_v46 = vsel %vm1292_vm0, %v6800_v59, %v1336_v26  ;;  %v2427_v22 = vsel %vm2160_vm2, %v6917_v40, %v2426_v61  ;;  %v3095_v32 = vshrl.u32 %v6944_v13, 16 }
 0x1b4   : > { %v6983_v33 = vpop.f32.mrf.mxu3  ;;  %v2176_v18 = vrot.slane %v2174_v54, 1  ;;  %v2179_v38 = vrot.slane %v2177_v11, 2 }
 0x1b5   : > { %v2188_v31 = vor.u32 %v2187_v25, %v2184_v12  ;;  %v3097_v42 = vor.u32 %v3095_v32, %v3093_v23  ;;  %v638_v23 = vshrl.u32 %v6948_v49, 16 }
 0x1b6   : > { %v1522_v35 = vpop.f32.mrf.mxu2  ;;  %v2180_v10 = vor.u32 %v2179_v38, %v2176_v18 }
 0x1b7   : > { %v1636_v60 = vadd.f32 %v6872_v63, %v1522_v35  ;;  %v6995_v63 = vld [vmem:[%s6047_s16 + $0x28] sm:$0xff] }
 0x1b8   : > { %v967_v24 = vpop.f32.mrf.mxu1  ;;  %v6998_v2 = vsel %vm2160_vm2, %v2180_v10, %v2188_v31  ;;  %v3099_v59 = vshll.u32 %v6995_v63, 16  ;;  %v640_v10 = vor.u32 %v638_v23, %v636_v37 }
 0x1b9   : > { %v6988_v0 = vadd.f32 %v1636_v60, %v965_v51  ;;  %v968_v9 = vadd.f32 %v967_v24, %v6497_v34  ;;  %v1988_v34 = vsel %vm473_vm1, %v6261_v47, %v6276_v19  ;;  %v7025_v19 = vld [vmem:[%s6047_s16 + $0x30] sm:$0xff] }
 0x1ba   : > { %v3101_v15 = vrot.slane %v3099_v59, 1  ;;  %v2198_v18 = vshll.u32 %v1988_v34, 16 }
 0x1bb   : > { %v6990_v58 = vpop.f32.mrf.mxu0  ;;  %1006 = vmatmul.bf16.gmra.mxu1 %v637_v8  ;;  %1564 = vmatmul.bf16.gmra.mxu2 %v1337_v46 }
 0x1bc   : > { %v7004_v54 = vpop.f32.mrf.mxu3  ;;  %v3102_v11 = vsel %vm473_vm1, %v3097_v42, %v3101_v15  ;;  %v2200_v8 = vrot.slane %v2198_v18, 2 }
 0x1bd   : > { %v3283_v12 = vrot.slane %v3102_v11, 2  ;;  %v5749_v11 = vld [vmem:[%s6047_s16 + $0x10] sm:$0xf0] }
 0x1be   : > { %2678 = vmatmul.bf16.gmra.mxu0 %v2427_v22  ;;  %v1525_v16 = vpop.f32.mrf.mxu2 }
 0x1bf   : > { %v1639_v40 = vadd.f32 %v6891_v41, %v1525_v16  ;;  %v3284_v60 = vsel %vm3274_vm3, %v3279_v14, %v3283_v12  ;;  %v2195_v41 = vshrl.u32 %v1988_v34, 16 }
 0x1c0   : > { %v969_v35 = vpop.f32.mrf.mxu1 }
 0x1c1   : > { %v7007_v25 = vadd.f32 %v1639_v40, %v968_v9  ;;  %3621 = vmatmul.bf16.gmra.mxu3 %v3284_v60  ;;  %v2197_v24 = vrot.slane %v2195_v41, 1  ;;  %v970_v46 = vadd.f32 %v969_v35, %v6514_v6  ;;  %v3103_v6 = vshrl.u32 %v6995_v63, 16  ;;  %v5489_v40 = vld [vmem:[%s6047_s16 + $0x10] sm:$0x8]  ;;  %v8163_v35 = vld [vmem:[#allocation8_spill] sm:$0xff] }
 0x1c3   : > { %v7009_v51 = vpop.f32.mrf.mxu0  ;;  %v2201_v32 = vor.u32 %v2200_v8, %v2197_v24  ;;  %v3105_v37 = vor.u32 %v3103_v6, %v3101_v15  ;;  %v5490_v15 = vor.u32 %v5749_v11, %v5489_v40  ;;  %v5969_v24 = vmov 0   ;;  %v263_v8 = vld [vmem:[%s8066_s1] sm:$0xff] }
 0x1c4   : > { %v7018_v14 = vpop.f32.mrf.mxu3  ;;  %5950 = vset.pattern.permute.xlu0 %v5969_v24  ;;  %5951 = vset.pattern.permute.xlu1 %v5969_v24  ;;  %v3276_v6 = vrot.slane %v6930_v52, 2 }
 0x1c5   : > { %v7028_v42 = vsel %vm2160_vm2, %v2188_v31, %v2201_v32  ;;  %4356 = vperm.xlu0 %5950, %v263_v8   ;;  %5952 = vset.pattern.permute.xlu2 %v5969_v24 }
 0x1c6   : > { %v1527_v38 = vpop.f32.mrf.mxu2 }
 0x1c7   : > { %v1641_v22 = vadd.f32 %v6906_v5, %v1527_v38  ;;  %v3107_v5 = vshll.u32 %v7025_v19, 16 }
 0x1c8   : > { %v972_v49 = vpop.f32.mrf.mxu1 }
 0x1c9   : > { %v7020_v59 = vadd.f32 %v1641_v22, %v970_v46  ;;  %v3109_v16 = vrot.slane %v3107_v5, 1  ;;  %v973_v60 = vadd.f32 %v972_v49, %v8163_v35  ;;  %v8165_v46 = vld [vmem:[#allocation4_spill] sm:$0xff]  ;;  %v8166_v22 = vld [vmem:[#allocation3_spill] sm:$0xff]  ;;  %v3275_v49 = vrot.slane %v6932_v17, 2 }
 0x1cb   : > { %v7022_v47 = vpop.f32.mrf.mxu0  ;;  %1011 = vmatmul.bf16.gmra.mxu1 %v640_v10  ;;  %1569 = vmatmul.bf16.gmra.mxu2 %v1336_v26  ;;  %v3110_v31 = vsel %vm473_vm1, %v3105_v37, %v3109_v16  ;;  %v1996_v10 = vsel %vm473_vm1, %v8166_v22, %v8165_v46  ;;  %v3277_v52 = vsel %vm3274_vm3, %v3275_v49, %v3276_v6  ;;  %v264_v46 = vld [vmem:[%s8066_s1 + $0x8] sm:$0xff]  ;;  %v7070_v22 = vld [vmem:[%s6047_s16 + $0x38] sm:$0xff] }
 0x1cc   : > { %v7036_v34 = vpop.f32.mrf.mxu3  ;;  %v3287_v41 = vrot.slane %v3110_v31, 2  ;;  %v2208_v5 = vshrl.u32 %v1996_v10, 16  ;;  %v2211_v37 = vshll.u32 %v1996_v10, 16  ;;  %v3115_v10 = vshll.u32 %v7070_v22, 16 }
 0x1cd   : > { %4361 = vperm.xlu0 %5950, %v264_v46  }
 0x1ce   : > { %2683 = vmatmul.bf16.gmra.mxu0 %v2426_v61  ;;  %v1530_v9 = vpop.f32.mrf.mxu2  ;;  %v7044_v61 = vld [vmem:[%s6047_s16 + $0x18] sm:$0xff]  ;;  %v2210_v35 = vrot.slane %v2208_v5, 1  ;;  %v3117_v5 = vrot.slane %v3115_v10, 1 }
 0x1cf   : > { %v1644_v23 = vadd.f32 %v6927_v39, %v1530_v9  ;;  %v3288_v39 = vsel %vm3274_vm3, %v3283_v12, %v3287_v41  ;;  %v4008_v9 = vrot.slane %v5490_v15, 3  ;;  %v4009_v40 = vrot.slane %v7044_v61, 3 }
 0x1d0   : > { %v974_v26 = vpop.f32.mrf.mxu1  ;;  %v2213_v12 = vrot.slane %v2211_v37, 2 }
 0x1d1   : > { %v7039_v18 = vadd.f32 %v1644_v23, %v973_v60  ;;  %3626 = vmatmul.bf16.gmra.mxu3 %v3288_v39  ;;  %v8167_v60 = vld [vmem:[#allocation9_spill] sm:$0xff]  ;;  %v4010_v61 = vsel %vm4007_vm4, %v4008_v9, %v4009_v40 }
 0x1d2   : > { %v975_v23 = vadd.f32 %v974_v26, %v8167_v60  ;;  %v2214_v8 = vor.u32 %v2213_v12, %v2210_v35  ;;  %v3111_v26 = vshrl.u32 %v7025_v19, 16  ;;  %v8170_v9 = vld [vmem:[#allocation13_spill] sm:$0xff] }
 0x1d3   : > { %v7041_v38 = vpop.f32.mrf.mxu0 }
 0x1d4   : > { %8164 = vst [vmem:[#allocation8_spill] sm:$0xff] %v7041_v38  ;;  %v7058_v24 = vpop.f32.mrf.mxu3  ;;  %v3113_v49 = vor.u32 %v3111_v26, %v3109_v16  ;;  %v265_v16 = vld [vmem:[%s8066_s1 + $0x10] sm:$0xff]  ;;  %v3281_v26 = vrot.slane %v6944_v13, 2 }
 0x1d5   : > { %4366 = vperm.xlu1 %5951, %v265_v16  }
 0x1d6   : > { %v1532_v11 = vpop.f32.mrf.mxu2 }
 0x1d7   : > { %v1646_v31 = vadd.f32 %v6963_v56, %v1532_v11  ;;  %v7073_v56 = vsel %vm2160_vm2, %v2201_v32, %v2214_v8  ;;  %v3118_v32 = vsel %vm473_vm1, %v3113_v49, %v3117_v5 }
 0x1d8   : > { %v977_v17 = vpop.f32.mrf.mxu1 }
 0x1d9   : > { %v7061_v39 = vadd.f32 %v1646_v31, %v975_v23  ;;  %v978_v11 = vadd.f32 %v977_v17, %v8170_v9 }
 0x1db   : > { %8168 = vst [vmem:[#allocation4_spill] sm:$0xff] %v7061_v39  ;;  %v7063_v15 = vpop.f32.mrf.mxu0  ;;  %2696 = vmatmul.bf16.vlgmr.msra.gmra.mxu1 %v6998_v2  ;;  %3503 = vmatmul.bf16.vlgmr.msra.gmra.mxu2 %v3277_v52  ;;  %v3291_v2 = vrot.slane %v3118_v32, 2  ;;  %v7088_v52 = vld [vmem:[%s6047_s16 + $0x20] sm:$0xff] }
 0x1dc   : > { %8169 = vst [vmem:[#allocation3_spill] sm:$0xff] %v7063_v15  ;;  %v7080_v12 = vpop.f32.mrf.mxu3  ;;  %v8175_v32 = vld [vmem:[#allocation15_spill] sm:$0xff] }
 0x1dd   : > { %v3292_v17 = vsel %vm3274_vm3, %v3287_v41, %v3291_v2 }
 0x1de   : > { %4126 = vmatmul.bf16.vlgmr.msra.gmra.mxu0 %v4010_v61  ;;  %v1535_v37 = vpop.f32.mrf.mxu2  ;;  %v8174_v61 = vld [vmem:[#allocation5_spill] sm:$0xff] }
 0x1df   : > { %v1649_v35 = vadd.f32 %v6983_v33, %v1535_v37  ;;  %v8173_v33 = vld [vmem:[#allocation6_spill] sm:$0xff]  ;;  %v4011_v37 = vrot.slane %v7088_v52, 3 }
 0x1e0   : > { %v979_v60 = vpop.f32.mrf.mxu1  ;;  %v2004_v46 = vsel %vm473_vm1, %v8174_v61, %v8173_v33  ;;  %v3282_v33 = vsel %vm3274_vm3, %v3276_v6, %v3281_v26  ;;  %v266_v52 = vld [vmem:[%s8066_s1 + $0x18] sm:$0xff]  ;;  %v3119_v6 = vshrl.u32 %v7070_v22, 16 }
 0x1e1   : > { %v7083_v23 = vadd.f32 %v1649_v35, %v978_v11  ;;  %3631 = vmatmul.bf16.gmra.mxu3 %v3292_v17  ;;  %v2221_v10 = vshrl.u32 %v2004_v46, 16  ;;  %v2224_v49 = vshll.u32 %v2004_v46, 16  ;;  %v4012_v46 = vsel %vm4007_vm4, %v4009_v40, %v4011_v37  ;;  %4371 = vperm.xlu1 %5951, %v266_v52  }
 0x1e2   : > { %v3121_v40 = vor.u32 %v3119_v6, %v3117_v5  ;;  %v8181_v5 = vld [vmem:[#allocation11_spill] sm:$0xff] }
 0x1e3   : > { %8171 = vst [vmem:[#allocation9_spill] sm:$0xff] %v7083_v23  ;;  %v7085_v31 = vpop.f32.mrf.mxu0  ;;  %v2223_v11 = vrot.slane %v2221_v10, 1  ;;  %v2226_v35 = vrot.slane %v2224_v49, 2  ;;  %v7113_v10 = vld [vmem:[%s6047_s16 + $0x40] sm:$0xff] }
 0x1e4   : > { %8172 = vst [vmem:[#allocation13_spill] sm:$0xff] %v7085_v31  ;;  %v980_v31 = vadd.f32 %v979_v60, %v8175_v32  ;;  %v7101_v41 = vpop.f32.mrf.mxu3  ;;  %v3123_v60 = vshll.u32 %v7113_v10, 16  ;;  %v8182_v6 = vld [vmem:[#allocation7_spill] sm:$0xff] }
 0x1e5   : > { %v2227_v61 = vor.u32 %v2226_v35, %v2223_v11 }
 0x1e6   : > { %v1537_v9 = vpop.f32.mrf.mxu2 }
 0x1e7   : > { %v1651_v16 = vadd.f32 %v7004_v54, %v1537_v9  ;;  %v7116_v54 = vsel %vm2160_vm2, %v2214_v8, %v2227_v61  ;;  %v8178_v9 = vld [vmem:[#allocation19_spill] sm:$0xff] }
 0x1e8   : > { %v982_v23 = vpop.f32.mrf.mxu1 }
 0x1e9   : > { %v7104_v13 = vadd.f32 %v1651_v16, %v980_v31  ;;  %v3125_v31 = vrot.slane %v3123_v60, 1  ;;  %v983_v11 = vadd.f32 %v982_v23, %v8178_v9  ;;  %v2012_v60 = vsel %vm473_vm1, %v8182_v6, %v8181_v5 }
 0x1ea   : > { %v3285_v23 = vrot.slane %v6995_v63, 2 }
 0x1eb   : > { %8176 = vst [vmem:[#allocation6_spill] sm:$0xff] %v7104_v13  ;;  %v7106_v17 = vpop.f32.mrf.mxu0  ;;  %2701 = vmatmul.bf16.gmra.mxu1 %v7028_v42  ;;  %3508 = vmatmul.bf16.gmra.mxu2 %v3282_v33  ;;  %v3126_v8 = vsel %vm473_vm1, %v3121_v40, %v3125_v31 }
 0x1ec   : > { %8177 = vst [vmem:[#allocation5_spill] sm:$0xff] %v7106_v17  ;;  %v7123_v32 = vpop.f32.mrf.mxu3  ;;  %v3295_v42 = vrot.slane %v3126_v8, 2  ;;  %v5752_v17 = vld [vmem:[%s6047_s16 + $0x28] sm:$0xff]  ;;  %v3286_v15 = vsel %vm3274_vm3, %v3281_v26, %v3285_v23 }
 0x1ed   : > { %v4013_v40 = vrot.slane %v5752_v17, 3  ;;  %v7147_v17 = vld [vmem:[%s6047_s16 + $0x48] sm:$0xff] }
 0x1ee   : > { %4131 = vmatmul.bf16.gmra.mxu0 %v4012_v46  ;;  %v1540_v49 = vpop.f32.mrf.mxu2  ;;  %v3296_v46 = vsel %vm3274_vm3, %v3291_v2, %v3295_v42  ;;  %v3131_v26 = vshll.u32 %v7147_v17, 16 }
 0x1ef   : > { %v1654_v35 = vadd.f32 %v7018_v14, %v1540_v49  ;;  %v2234_v14 = vshrl.u32 %v2012_v60, 16  ;;  %v2237_v49 = vshll.u32 %v2012_v60, 16 }
 0x1f0   : > { %v984_v16 = vpop.f32.mrf.mxu1 }
 0x1f1   : > { %v7126_v52 = vadd.f32 %v1654_v35, %v983_v11  ;;  %3636 = vmatmul.bf16.gmra.mxu3 %v3296_v46  ;;  %v2236_v8 = vrot.slane %v2234_v14, 1  ;;  %v2239_v11 = vrot.slane %v2237_v49, 2  ;;  %v8183_v35 = vld [vmem:[#allocation21_spill] sm:$0xff]  ;;  %v4014_v46 = vsel %vm4007_vm4, %v4011_v37, %v4013_v40 }
 0x1f2   : > { %v8186_v14 = vld [vmem:[#allocation25_spill] sm:$0xff] }
 0x1f3   : > { %8179 = vst [vmem:[#allocation15_spill] sm:$0xff] %v7126_v52  ;;  %v7128_v33 = vpop.f32.mrf.mxu0  ;;  %v985_v52 = vadd.f32 %v984_v16, %v8183_v35  ;;  %v2240_v5 = vor.u32 %v2239_v11, %v2236_v8  ;;  %v7165_v35 = vld [vmem:[%s6047_s16 + $0x30] sm:$0xff] }
 0x1f4   : > { %8180 = vst [vmem:[#allocation19_spill] sm:$0xff] %v7128_v33  ;;  %v7138_v13 = vpop.f32.mrf.mxu3 }
 0x1f5   : > { %v7150_v60 = vsel %vm2160_vm2, %v2227_v61, %v2240_v5 }
 0x1f6   : > { %v1542_v9 = vpop.f32.mrf.mxu2 }
 0x1f7   : > { %v1656_v33 = vadd.f32 %v7036_v34, %v1542_v9  ;;  %v3127_v34 = vshrl.u32 %v7113_v10, 16 }
 0x1f8   : > { %v987_v2 = vpop.f32.mrf.mxu1 }
 0x1f9   : > { %v7141_v6 = vadd.f32 %v1656_v33, %v985_v52  ;;  %v3129_v16 = vor.u32 %v3127_v34, %v3125_v31  ;;  %v3133_v52 = vrot.slane %v3131_v26, 1  ;;  %v988_v49 = vadd.f32 %v987_v2, %v8186_v14  ;;  %v269_v31 = vld [vmem:[%s8066_s1 + $0x30] sm:$0xff] }
 0x1fa   : > { %4386 = vperm.xlu0 %5950, %v269_v31   ;;  %v3289_v26 = vrot.slane %v7025_v19, 2  ;;  %v4015_v14 = vrot.slane %v7165_v35, 3  ;;  %v267_v35 = vld [vmem:[%s8066_s1 + $0x20] sm:$0xff] }
 0x1fb   : > { %8184 = vst [vmem:[#allocation11_spill] sm:$0xff] %v7141_v6  ;;  %v7143_v63 = vpop.f32.mrf.mxu0  ;;  %2706 = vmatmul.bf16.gmra.mxu1 %v7073_v56  ;;  %3513 = vmatmul.bf16.gmra.mxu2 %v3286_v15  ;;  %v3134_v61 = vsel %vm473_vm1, %v3129_v16, %v3133_v52  ;;  %v7413_v6 = vld [vmem:[%s6047_s16 + $0x60] sm:$0xff] }
 0x1fc   : > { %8185 = vst [vmem:[#allocation7_spill] sm:$0xff] %v7143_v63  ;;  %v7157_v9 = vpop.f32.mrf.mxu3  ;;  %v3299_v56 = vrot.slane %v3134_v61, 2  ;;  %4376 = vperm.xlu2 %5952, %v267_v35  }
 0x1fe   : > { %4136 = vmatmul.bf16.gmra.mxu0 %v4014_v46  ;;  %v1545_v33 = vpop.f32.mrf.mxu2  ;;  %v3300_v2 = vsel %vm3274_vm3, %v3295_v42, %v3299_v56  ;;  %v8190_v46 = vld [vmem:[#allocation12_spill] sm:$0xff] }
 0x1ff   : > { %v1659_v37 = vadd.f32 %v7058_v24, %v1545_v33  ;;  %v8189_v24 = vld [vmem:[#allocation17_spill] sm:$0xff] }
 0x200   : > { %v989_v8 = vpop.f32.mrf.mxu1  ;;  %v2020_v34 = vsel %vm473_vm1, %v8190_v46, %v8189_v24  ;;  %v3290_v24 = vsel %vm3274_vm3, %v3285_v23, %v3289_v26 }
 0x201   : > { %v7160_v11 = vadd.f32 %v1659_v37, %v988_v49  ;;  %3641 = vmatmul.bf16.gmra.mxu3 %v3300_v2  ;;  %v2247_v16 = vshrl.u32 %v2020_v34, 16  ;;  %v2250_v33 = vshll.u32 %v2020_v34, 16  ;;  %v4016_v34 = vsel %vm4007_vm4, %v4013_v40, %v4015_v14 }
 0x202   : > { %v3135_v40 = vshrl.u32 %v7147_v17, 16 }
 0x203   : > { %8187 = vst [vmem:[#allocation21_spill] sm:$0xff] %v7160_v11  ;;  %v7162_v15 = vpop.f32.mrf.mxu0  ;;  %v2249_v37 = vrot.slane %v2247_v16, 1  ;;  %v2252_v61 = vrot.slane %v2250_v33, 2 }
 0x204   : > { %8188 = vst [vmem:[#allocation25_spill] sm:$0xff] %v7162_v15  ;;  %v8191_v15 = vld [vmem:[#allocation26_spill] sm:$0xff]  ;;  %v7178_v42 = vpop.f32.mrf.mxu3 }
 0x205   : > { %v990_v11 = vadd.f32 %v989_v8, %v8191_v15  ;;  %v2253_v46 = vor.u32 %v2252_v61, %v2249_v37  ;;  %v7193_v8 = vld [vmem:[%s6047_s16 + $0x50] sm:$0xff]  ;;  %v3137_v15 = vor.u32 %v3135_v40, %v3133_v52  ;;  %v268_v52 = vld [vmem:[%s8066_s1 + $0x28] sm:$0xff] }
 0x206   : > { %v1547_v49 = vpop.f32.mrf.mxu2  ;;  %4381 = vperm.xlu2 %5952, %v268_v52  }
 0x207   : > { %v1661_v31 = vadd.f32 %v7080_v12, %v1547_v49  ;;  %v270_v12 = vld [vmem:[%s8066_s1 + $0x38] sm:$0xff]  ;;  %v7196_v23 = vsel %vm2160_vm2, %v2240_v5, %v2253_v46  ;;  %v8194_v49 = vld [vmem:[#allocation29_spill] sm:$0xff] }
 0x208   : > { %v992_v63 = vpop.f32.mrf.mxu1  ;;  %4391 = vperm.xlu1 %5951, %v270_v12  }
 0x209   : > { %v7181_v19 = vadd.f32 %v1661_v31, %v990_v11  ;;  %v3139_v11 = vshll.u32 %v7193_v8, 16  ;;  %v993_v37 = vadd.f32 %v992_v63, %v8194_v49 }
 0x20b   : > { %8192 = vst [vmem:[#allocation17_spill] sm:$0xff] %v7181_v19  ;;  %v7183_v2 = vpop.f32.mrf.mxu0  ;;  %2711 = vmatmul.bf16.gmra.mxu1 %v7116_v54  ;;  %3518 = vmatmul.bf16.gmra.mxu2 %v3290_v24  ;;  %v3141_v16 = vrot.slane %v3139_v11, 1  ;;  %v3293_v11 = vrot.slane %v7070_v22, 2 }
 0x20c   : > { %8193 = vst [vmem:[#allocation12_spill] sm:$0xff] %v7183_v2  ;;  %v7203_v31 = vpop.f32.mrf.mxu3  ;;  %v7211_v2 = vld [vmem:[%s6047_s16 + $0x38] sm:$0xff] }
 0x20d   : > { %v3142_v5 = vsel %vm473_vm1, %v3137_v15, %v3141_v16  ;;  %v4017_v49 = vrot.slane %v7211_v2, 3  ;;  %v272_v2 = vld [vmem:[%s8066_s1 + $0x48] sm:$0xff] }
 0x20e   : > { %4141 = vmatmul.bf16.gmra.mxu0 %v4016_v34  ;;  %v1550_v33 = vpop.f32.mrf.mxu2  ;;  %v3303_v54 = vrot.slane %v3142_v5, 2  ;;  %v8198_v34 = vld [vmem:[#allocation18_spill] sm:$0xff]  ;;  %4401 = vperm.xlu0 %5950, %v272_v2  }
 0x20f   : > { %v1664_v61 = vadd.f32 %v7101_v41, %v1550_v33  ;;  %v8197_v41 = vld [vmem:[#allocation23_spill] sm:$0xff] }
 0x210   : > { %v994_v35 = vpop.f32.mrf.mxu1  ;;  %v3304_v63 = vsel %vm3274_vm3, %v3299_v56, %v3303_v54  ;;  %v2028_v40 = vsel %vm473_vm1, %v8198_v34, %v8197_v41  ;;  %v3294_v41 = vsel %vm3274_vm3, %v3289_v26, %v3293_v11  ;;  %v3143_v26 = vshrl.u32 %v7193_v8, 16 }
 0x211   : > { %v7206_v12 = vadd.f32 %v1664_v61, %v993_v37  ;;  %3646 = vmatmul.bf16.gmra.mxu3 %v3304_v63  ;;  %v2260_v15 = vshrl.u32 %v2028_v40, 16  ;;  %v2263_v33 = vshll.u32 %v2028_v40, 16  ;;  %v4018_v40 = vsel %vm4007_vm4, %v4015_v14, %v4017_v49 }
 0x212   : > { %v3145_v14 = vor.u32 %v3143_v26, %v3141_v16  ;;  %v273_v16 = vld [vmem:[%s8066_s1 + $0x50] sm:$0xff] }
 0x213   : > { %8195 = vst [vmem:[#allocation26_spill] sm:$0xff] %v7206_v12  ;;  %v7208_v24 = vpop.f32.mrf.mxu0  ;;  %v2262_v61 = vrot.slane %v2260_v15, 1  ;;  %v2265_v5 = vrot.slane %v2263_v33, 2  ;;  %v7236_v15 = vld [vmem:[%s6047_s16 + $0x58] sm:$0xff]  ;;  %v8202_v33 = vld [vmem:[#allocation33_spill] sm:$0xff]  ;;  %4406 = vperm.xlu1 %5951, %v273_v16  }
 0x214   : > { %8196 = vst [vmem:[#allocation29_spill] sm:$0xff] %v7208_v24  ;;  %v8199_v24 = vld [vmem:[#allocation30_spill] sm:$0xff]  ;;  %v7224_v56 = vpop.f32.mrf.mxu3 }
 0x215   : > { %v995_v12 = vadd.f32 %v994_v35, %v8199_v24  ;;  %v2266_v34 = vor.u32 %v2265_v5, %v2262_v61  ;;  %v3147_v35 = vshll.u32 %v7236_v15, 16 }
 0x216   : > { %v1552_v37 = vpop.f32.mrf.mxu2 }
 0x217   : > { %v1666_v52 = vadd.f32 %v7123_v32, %v1552_v37  ;;  %v7239_v32 = vsel %vm2160_vm2, %v2253_v46, %v2266_v34 }
 0x218   : > { %v997_v19 = vpop.f32.mrf.mxu1 }
 0x219   : > { %v7227_v22 = vadd.f32 %v1666_v52, %v995_v12  ;;  %v3149_v12 = vrot.slane %v3147_v35, 1  ;;  %v998_v37 = vadd.f32 %v997_v19, %v8202_v33  ;;  %v3297_v35 = vrot.slane %v7113_v10, 2 }
 0x21b   : > { %8200 = vst [vmem:[#allocation23_spill] sm:$0xff] %v7227_v22  ;;  %v7229_v63 = vpop.f32.mrf.mxu0  ;;  %2716 = vmatmul.bf16.gmra.mxu1 %v7150_v60  ;;  %3523 = vmatmul.bf16.gmra.mxu2 %v3294_v41  ;;  %v3150_v46 = vsel %vm473_vm1, %v3145_v14, %v3149_v12 }
 0x21c   : > { %8201 = vst [vmem:[#allocation18_spill] sm:$0xff] %v7229_v63  ;;  %v7246_v5 = vpop.f32.mrf.mxu3  ;;  %v3307_v60 = vrot.slane %v3150_v46, 2  ;;  %v7254_v63 = vld [vmem:[%s6047_s16 + $0x40] sm:$0xff] }
 0x21d   : > { %v4019_v33 = vrot.slane %v7254_v63, 3  ;;  %v271_v63 = vld [vmem:[%s8066_s1 + $0x40] sm:$0xff] }
 0x21e   : > { %4146 = vmatmul.bf16.gmra.mxu0 %v4018_v40  ;;  %v1555_v24 = vpop.f32.mrf.mxu2  ;;  %v3308_v19 = vsel %vm3274_vm3, %v3303_v54, %v3307_v60  ;;  %v8206_v40 = vld [vmem:[#allocation24_spill] sm:$0xff]  ;;  %4396 = vperm.xlu2 %5952, %v271_v63  }
 0x21f   : > { %v1669_v61 = vadd.f32 %v7138_v13, %v1555_v24  ;;  %v8205_v13 = vld [vmem:[#allocation27_spill] sm:$0xff] }
 0x220   : > { %v999_v52 = vpop.f32.mrf.mxu1  ;;  %v2036_v26 = vsel %vm473_vm1, %v8206_v40, %v8205_v13  ;;  %v3298_v13 = vsel %vm3274_vm3, %v3293_v11, %v3297_v35  ;;  %v3151_v11 = vshrl.u32 %v7236_v15, 16 }
 0x221   : > { %v7249_v2 = vadd.f32 %v1669_v61, %v998_v37  ;;  %3651 = vmatmul.bf16.gmra.mxu3 %v3308_v19  ;;  %v2273_v14 = vshrl.u32 %v2036_v26, 16  ;;  %v2276_v24 = vshll.u32 %v2036_v26, 16  ;;  %v4020_v26 = vsel %vm4007_vm4, %v4017_v49, %v4019_v33 }
 0x222   : > { %v3153_v49 = vor.u32 %v3151_v11, %v3149_v12  ;;  %v275_v12 = vld [vmem:[%s8066_s1 + $0x60] sm:$0xff] }
 0x223   : > { %8203 = vst [vmem:[#allocation30_spill] sm:$0xff] %v7249_v2  ;;  %v7251_v41 = vpop.f32.mrf.mxu0  ;;  %v2275_v61 = vrot.slane %v2273_v14, 1  ;;  %v2278_v46 = vrot.slane %v2276_v24, 2  ;;  %v7279_v14 = vld [vmem:[%s6047_s16 + $0x60] sm:$0xff]  ;;  %v8210_v24 = vld [vmem:[#allocation10_spill] sm:$0xff]  ;;  %4416 = vperm.xlu0 %5950, %v275_v12  }
 0x224   : > { %8204 = vst [vmem:[#allocation33_spill] sm:$0xff] %v7251_v41  ;;  %v8207_v41 = vld [vmem:[#allocation34_spill] sm:$0xff]  ;;  %v7267_v54 = vpop.f32.mrf.mxu3 }
 0x225   : > { %v1000_v2 = vadd.f32 %v999_v52, %v8207_v41  ;;  %v2279_v40 = vor.u32 %v2278_v46, %v2275_v61  ;;  %v3155_v52 = vshll.u32 %v7279_v14, 16 }
 0x226   : > { %v1557_v37 = vpop.f32.mrf.mxu2 }
 0x227   : > { %v1671_v16 = vadd.f32 %v7157_v9, %v1557_v37  ;;  %v7282_v9 = vsel %vm2160_vm2, %v2266_v34, %v2279_v40 }
 0x228   : > { %v1002_v22 = vpop.f32.mrf.mxu1 }
 0x229   : > { %v7270_v10 = vadd.f32 %v1671_v16, %v1000_v2  ;;  %v3157_v2 = vrot.slane %v3155_v52, 1  ;;  %v1003_v37 = vadd.f32 %v1002_v22, %v8210_v24  ;;  %v3301_v52 = vrot.slane %v7147_v17, 2 }
 0x22b   : > { %8208 = vst [vmem:[#allocation27_spill] sm:$0xff] %v7270_v10  ;;  %v7272_v19 = vpop.f32.mrf.mxu0  ;;  %2721 = vmatmul.bf16.gmra.mxu1 %v7196_v23  ;;  %3528 = vmatmul.bf16.gmra.mxu2 %v3298_v13  ;;  %v3158_v34 = vsel %vm473_vm1, %v3153_v49, %v3157_v2 }
 0x22c   : > { %8209 = vst [vmem:[#allocation24_spill] sm:$0xff] %v7272_v19  ;;  %v1685_v46 = vpop.f32.mrf.mxu3  ;;  %v3311_v63 = vrot.slane %v3158_v34, 2  ;;  %v7295_v19 = vld [vmem:[%s6047_s16 + $0x48] sm:$0xff]  ;;  %v8215_v34 = vld [vmem:[#allocation14_spill] sm:$0xff] }
 0x22d   : > { %v4021_v24 = vrot.slane %v7295_v19, 3  ;;  %v276_v19 = vld [vmem:[%s8066_s1 + $0x68] sm:$0xff] }
 0x22e   : > { %4151 = vmatmul.bf16.gmra.mxu0 %v4020_v26  ;;  %v1560_v41 = vpop.f32.mrf.mxu2  ;;  %v3312_v22 = vsel %vm3274_vm3, %v3307_v60, %v3311_v63  ;;  %v8213_v26 = vld [vmem:[#allocation31_spill] sm:$0xff]  ;;  %4421 = vperm.xlu1 %5951, %v276_v19  }
 0x22f   : > { %v1674_v61 = vadd.f32 %v7178_v42, %v1560_v41  ;;  %v8214_v42 = vld [vmem:[#allocation28_spill] sm:$0xff] }
 0x230   : > { %v1004_v16 = vpop.f32.mrf.mxu1  ;;  %v2044_v11 = vsel %vm473_vm1, %v8214_v42, %v8213_v26  ;;  %v3302_v26 = vsel %vm3274_vm3, %v3297_v35, %v3301_v52  ;;  %v3159_v35 = vshrl.u32 %v7279_v14, 16 }
 0x231   : > { %v7290_v23 = vadd.f32 %v1674_v61, %v1003_v37  ;;  %3656 = vmatmul.bf16.gmra.mxu3 %v3312_v22  ;;  %v2286_v49 = vshrl.u32 %v2044_v11, 16  ;;  %v2289_v41 = vshll.u32 %v2044_v11, 16  ;;  %v4022_v11 = vsel %vm4007_vm4, %v4019_v33, %v4021_v24 }
 0x232   : > { %v3161_v33 = vor.u32 %v3159_v35, %v3157_v2  ;;  %v274_v2 = vld [vmem:[%s8066_s1 + $0x58] sm:$0xff] }
 0x233   : > { %8211 = vst [vmem:[#allocation34_spill] sm:$0xff] %v7290_v23  ;;  %v7292_v13 = vpop.f32.mrf.mxu0  ;;  %v2288_v61 = vrot.slane %v2286_v49, 1  ;;  %v2291_v46 = vrot.slane %v2289_v41, 2  ;;  %v7320_v49 = vld [vmem:[%s6047_s16 + $0x68] sm:$0xff]  ;;  %4411 = vperm.xlu2 %5952, %v274_v2  }
 0x234   : > { %8212 = vst [vmem:[#allocation10_spill] sm:$0xff] %v7292_v13  ;;  %v1005_v13 = vadd.f32 %v1004_v16, %v8215_v34  ;;  %v7308_v60 = vpop.f32.mrf.mxu3  ;;  %v3163_v16 = vshll.u32 %v7320_v49, 16 }
 0x235   : > { %v2292_v42 = vor.u32 %v2291_v46, %v2288_v61 }
 0x236   : > { %v1562_v37 = vpop.f32.mrf.mxu2 }
 0x237   : > { %v1676_v12 = vadd.f32 %v7203_v31, %v1562_v37  ;;  %v7323_v31 = vsel %vm2160_vm2, %v2279_v40, %v2292_v42  ;;  %v8218_v37 = vld [vmem:[#allocation16_spill] sm:$0xff] }
 0x238   : > { %v1007_v23 = vpop.f32.mrf.mxu1 }
 0x239   : > { %v7311_v17 = vadd.f32 %v1676_v12, %v1005_v13  ;;  %v3165_v13 = vrot.slane %v3163_v16, 1  ;;  %v1008_v61 = vadd.f32 %v1007_v23, %v8218_v37  ;;  %v3305_v16 = vrot.slane %v7193_v8, 2 }
 0x23b   : > { %8216 = vst [vmem:[#allocation31_spill] sm:$0xff] %v7311_v17  ;;  %v7313_v22 = vpop.f32.mrf.mxu0  ;;  %2726 = vmatmul.bf16.gmra.mxu1 %v7239_v32  ;;  %3533 = vmatmul.bf16.gmra.mxu2 %v3302_v26  ;;  %v3166_v40 = vsel %vm473_vm1, %v3161_v33, %v3165_v13  ;;  %v3306_v10 = vsel %vm3274_vm3, %v3301_v52, %v3305_v16  ;;  %v3167_v52 = vshrl.u32 %v7320_v49, 16 }
 0x23c   : > { %8217 = vst [vmem:[#allocation28_spill] sm:$0xff] %v7313_v22  ;;  %v7330_v34 = vpop.f32.mrf.mxu3  ;;  %v3315_v32 = vrot.slane %v3166_v40, 2  ;;  %v5757_v22 = vld [vmem:[%s6047_s16 + $0x50] sm:$0xff] }
 0x23d   : > { %v4023_v37 = vrot.slane %v5757_v22, 3  ;;  %v278_v22 = vld [vmem:[%s8066_s1 + $0x78] sm:$0xff] }
 0x23e   : > { %4156 = vmatmul.bf16.gmra.mxu0 %v4022_v11  ;;  %v1565_v41 = vpop.f32.mrf.mxu2  ;;  %v3316_v23 = vsel %vm3274_vm3, %v3311_v63, %v3315_v32  ;;  %v8221_v11 = vld [vmem:[#allocation36_spill] sm:$0xff]  ;;  %4431 = vperm.xlu0 %5950, %v278_v22   ;;  %v7376_v22 = vld [vmem:[%s6047_s16 + $0x58] sm:$0xff] }
 0x23f   : > { %v1679_v46 = vadd.f32 %v7224_v56, %v1565_v41  ;;  %v8222_v56 = vld [vmem:[#allocation32_spill] sm:$0xff] }
 0x240   : > { %v1009_v12 = vpop.f32.mrf.mxu1  ;;  %v2052_v35 = vsel %vm473_vm1, %v8222_v56, %v8221_v11 }
 0x241   : > { %v7333_v19 = vadd.f32 %v1679_v46, %v1008_v61  ;;  %3661 = vmatmul.bf16.gmra.mxu3 %v3316_v23  ;;  %v2299_v33 = vshrl.u32 %v2052_v35, 16  ;;  %v2302_v41 = vshll.u32 %v2052_v35, 16  ;;  %v4024_v23 = vsel %vm4007_vm4, %v4021_v24, %v4023_v37  ;;  %v7360_v35 = vld [vmem:[%s6047_s16 + $0x70] sm:$0xff] }
 0x242   : > { %v3169_v24 = vor.u32 %v3167_v52, %v3165_v13  ;;  %v279_v13 = vld [vmem:[%s8066_s1 + $0x80] sm:$0xff]  ;;  %v3309_v52 = vrot.slane %v7236_v15, 2  ;;  %v277_v15 = vld [vmem:[%s8066_s1 + $0x70] sm:$0xff] }
 0x243   : > { %8219 = vst [vmem:[#allocation14_spill] sm:$0xff] %v7333_v19  ;;  %v7335_v26 = vpop.f32.mrf.mxu0  ;;  %v2301_v46 = vrot.slane %v2299_v33, 1  ;;  %v2304_v40 = vrot.slane %v2302_v41, 2  ;;  %v8226_v33 = vld [vmem:[#allocation22_spill] sm:$0xff]  ;;  %4436 = vperm.xlu1 %5951, %v279_v13   ;;  %4426 = vperm.xlu2 %5952, %v277_v15  }
 0x244   : > { %8220 = vst [vmem:[#allocation16_spill] sm:$0xff] %v7335_v26  ;;  %v8223_v26 = vld [vmem:[#allocation20_spill] sm:$0xff]  ;;  %v7348_v17 = vpop.f32.mrf.mxu3 }
 0x245   : > { %v1010_v19 = vadd.f32 %v1009_v12, %v8223_v26  ;;  %v2305_v11 = vor.u32 %v2304_v40, %v2301_v46  ;;  %v3171_v12 = vshll.u32 %v7360_v35, 16 }
 0x246   : > { %v1567_v61 = vpop.f32.mrf.mxu2 }
 0x247   : > { %v1681_v2 = vadd.f32 %v7246_v5, %v1567_v61  ;;  %v7363_v5 = vsel %vm2160_vm2, %v2292_v42, %v2305_v11 }
 0x248   : > { %v1012_v63 = vpop.f32.mrf.mxu1 }
 0x249   : > { %v7351_v56 = vadd.f32 %v1681_v2, %v1010_v19  ;;  %v3173_v19 = vrot.slane %v3171_v12, 1  ;;  %v1013_v41 = vadd.f32 %v1012_v63, %v8226_v33 }
 0x24b   : > { %8224 = vst [vmem:[#allocation36_spill] sm:$0xff] %v7351_v56  ;;  %v7353_v8 = vpop.f32.mrf.mxu0  ;;  %2731 = vmatmul.bf16.gmra.mxu1 %v7282_v9  ;;  %3538 = vmatmul.bf16.gmra.mxu2 %v3306_v10  ;;  %v3174_v42 = vsel %vm473_vm1, %v3169_v24, %v3173_v19 }
 0x24c   : > { %8225 = vst [vmem:[#allocation32_spill] sm:$0xff] %v7353_v8  ;;  %v7370_v46 = vpop.f32.mrf.mxu3  ;;  %v3319_v9 = vrot.slane %v3174_v42, 2 }
 0x24e   : > { %4161 = vmatmul.bf16.gmra.mxu0 %v4024_v23  ;;  %v1570_v26 = vpop.f32.mrf.mxu2  ;;  %v3320_v63 = vsel %vm3274_vm3, %v3315_v32, %v3319_v9  ;;  %v3310_v32 = vsel %vm3274_vm3, %v3305_v16, %v3309_v52  ;;  %v3175_v16 = vshrl.u32 %v7360_v35, 16 }
 0x24f   : > { %v1684_v61 = vadd.f32 %v7267_v54, %v1570_v26  ;;  %v8228_v54 = vld [vmem:[#allocation37_spill] sm:$0xff]  ;;  %v4025_v26 = vrot.slane %v7376_v22, 3 }
 0x250   : > { %v1014_v40 = vpop.f32.mrf.mxu1  ;;  %v2060_v23 = vsel %vm473_vm1, %v8228_v54, %v6582_v21 }
 0x251   : > { %v7373_v2 = vadd.f32 %v1684_v61, %v1013_v41  ;;  %3666 = vmatmul.bf16.gmra.mxu3 %v3320_v63  ;;  %v2312_v12 = vshrl.u32 %v2060_v23, 16  ;;  %v2315_v24 = vshll.u32 %v2060_v23, 16  ;;  %v4026_v21 = vsel %vm4007_vm4, %v4023_v37, %v4025_v26  ;;  %v7395_v63 = vld [vmem:[%s6047_s16 + $0x78] sm:$0xff]  ;;  %v8229_v23 = vld [vmem:[#allocation35_spill] sm:$0xff] }
 0x252   : > { %v3179_v54 = vshll.u32 %v7395_v63, 16 }
 0x253   : > { %8227 = vst [vmem:[#allocation20_spill] sm:$0xff] %v7373_v2  ;;  %v2686_v10 = vpop.f32.mrf.mxu0  ;;  %v2314_v41 = vrot.slane %v2312_v12, 1  ;;  %v2317_v61 = vrot.slane %v2315_v24, 2  ;;  %v3177_v12 = vor.u32 %v3175_v16, %v3173_v19  ;;  %v4357_v2 = vpop.permute.xlu0 %4356  ;;  %v281_v19 = vld [vmem:[%s8066_s1 + $0x90] sm:$0xff] }
 0x254   : > { %v7387_v42 = vpop.f32.mrf.mxu3  ;;  %v3181_v24 = vrot.slane %v3179_v54, 1  ;;  %4446 = vperm.xlu0 %5950, %v281_v19   ;;  %v8232_v54 = vld [vmem:[#allocation42_spill] sm:$0xff] }
 0x255   : > { %v2318_v10 = vor.u32 %v2317_v61, %v2314_v41 }
 0x256   : > { %v1572_v33 = vpop.f32.mrf.mxu2 }
 0x257   : > { %v7398_v22 = vsel %vm2160_vm2, %v2305_v11, %v2318_v10  ;;  %v7408_v11 = vsel %vm473_vm1, %v3177_v12, %v3181_v24 }
 0x258   : > { %v2697_v40 = vpop.f32.mrf.mxu1  ;;  %v8083_v8 = vrot.slane %v7408_v11, 2 }
 0x259   : > { %v2698_v37 = vadd.f32 %v2697_v40, %v8229_v23  ;;  %v2068_v23 = vsel %vm473_vm1, %v8232_v54, %v6621_v55 }
 0x25a   : > { %v2325_v12 = vshrl.u32 %v2068_v23, 16 }
 0x25b   : > { %v4127_v13 = vpop.f32.mrf.mxu0  ;;  %2736 = vmatmul.bf16.gmra.mxu1 %v7323_v31  ;;  %3543 = vmatmul.bf16.gmra.mxu2 %v3310_v32  ;;  %v8230_v31 = vld [vmem:[#allocation38_spill] sm:$0xff] }
 0x25c   : > { %v7405_v61 = vpop.f32.mrf.mxu3  ;;  %v2801_v32 = vadd.f32 %v2698_v37, %v8230_v31  ;;  %v3313_v37 = vrot.slane %v7279_v14, 2  ;;  %v8084_v31 = vrot.slane %v7413_v6, 3  ;;  %v2327_v19 = vrot.slane %v2325_v12, 1  ;;  %v8234_v12 = vld [vmem:[#allocation41_spill] sm:$0xff]  ;;  %v8238_v14 = vld [vmem:[#allocation44_spill] sm:$0xff] }
 0x25e   : > { %4166 = vmatmul.bf16.gmra.mxu0 %v4026_v21  ;;  %v3504_v33 = vpop.f32.mrf.mxu2  ;;  %v8231_v21 = vld [vmem:[#allocation39_spill] sm:$0xff]  ;;  %v3314_v55 = vsel %vm3274_vm3, %v3309_v52, %v3313_v37  ;;  %v3183_v52 = vshrl.u32 %v7395_v63, 16 }
 0x25f   : > { %v3618_v41 = vadd.f32 %v7308_v60, %v3504_v33  ;;  %v3324_v60 = vsel %vm3274_vm3, %v3319_v9, %v8083_v8  ;;  %v2328_v33 = vshll.u32 %v2068_v23, 16  ;;  %v8233_v9 = vld [vmem:[#allocation40_spill] sm:$0xff] }
 0x260   : > { %v2699_v15 = vpop.f32.mrf.mxu1 }
 0x261   : > { %v3721_v40 = vadd.f32 %v3618_v41, %v2801_v32  ;;  %v2700_v16 = vadd.f32 %v2699_v15, %v8231_v21  ;;  %3671 = vmatmul.bf16.gmra.mxu3 %v3324_v60  ;;  %v2330_v39 = vrot.slane %v2328_v33, 2 }
 0x263   : > { %v4129_v56 = vpop.f32.mrf.mxu0  ;;  %v4231_v41 = vadd.f32 %v4127_v13, %v3721_v40  ;;  %v2802_v8 = vadd.f32 %v2700_v16, %v8233_v9  ;;  %v7435_v60 = vor.u32 %v2330_v39, %v2327_v19  ;;  %v4028_v13 = vsel %vm4007_vm4, %v4025_v26, %v8084_v31  ;;  %v7444_v40 = vld [vmem:[%s6047_s16 + $0x80] sm:$0xff]  ;;  %v7469_v31 = vld [vmem:[%s6047_s16 + $0x68] sm:$0xff] }
 0x264   : > { %v7429_v21 = vpop.f32.mrf.mxu3  ;;  %v3187_v26 = vshll.u32 %v7444_v40, 16  ;;  %v3185_v19 = vor.u32 %v3183_v52, %v3181_v24 }
 0x265   : > { %v4559_v16 = vmul.f32 %v4357_v2, %v4231_v41  ;;  %v7449_v39 = vsel %vm2160_vm2, %v2318_v10, %v7435_v60 }
 0x266   : > { %v3506_v32 = vpop.f32.mrf.mxu2  ;;  %v3189_v10 = vrot.slane %v3187_v26, 1 }
 0x267   : > { %v3620_v15 = vadd.f32 %v7330_v34, %v3506_v32  ;;  %v282_v34 = vld [vmem:[%s8066_s1 + $0x98] sm:$0xff]  ;;  %v4362_v32 = vpop.permute.xlu0 %4361  ;;  %v4647_v9 = vmul.f32 %v4559_v16, %v4231_v41 }
 0x268   : > { %v2702_v38 = vpop.f32.mrf.mxu1  ;;  %4451 = vperm.xlu1 %5951, %v282_v34  }
 0x269   : > { %v3722_v54 = vadd.f32 %v3620_v15, %v2802_v8  ;;  %v2703_v33 = vadd.f32 %v2702_v38, %v8234_v12  ;;  %v7465_v12 = vsel %vm473_vm1, %v3185_v19, %v3189_v10 }
 0x26a   : > { %v3327_v24 = vrot.slane %v7465_v12, 2 }
 0x26b   : > { %v4132_v23 = vpop.f32.mrf.mxu0  ;;  %2741 = vmatmul.bf16.gmra.mxu1 %v7363_v5  ;;  %3548 = vmatmul.bf16.gmra.mxu2 %v3314_v55  ;;  %v4232_v8 = vadd.f32 %v4129_v56, %v3722_v54  ;;  %v2803_v5 = vadd.f32 %v2703_v33, %v6598_v50  ;;  %v280_v50 = vld [vmem:[%s8066_s1 + $0x88] sm:$0xff] }
 0x26c   : > { %v7462_v34 = vpop.f32.mrf.mxu3  ;;  %4441 = vperm.xlu2 %5952, %v280_v50   ;;  %v8236_v50 = vld [vmem:[#allocation43_spill] sm:$0xff] }
 0x26d   : > { %v4560_v38 = vmul.f32 %v4362_v32, %v4232_v8  ;;  %v5789_v2 = vpack.c.bf16 %v4232_v8, %v4231_v41  ;;  %v4367_v32 = vpop.permute.xlu1 %4366 }
 0x26e   : > { %4171 = vmatmul.bf16.gmra.mxu0 %v4028_v13  ;;  %v3509_v56 = vpop.f32.mrf.mxu2 }
 0x26f   : > { %v4600_v15 = vadd.f32 %v4560_v38, %v4559_v16  ;;  %v4648_v55 = vmul.f32 %v4560_v38, %v4232_v8  ;;  %5790 = vst [vmem:[%s7457_s25] sm:$0xff] %v5789_v2   ;;  %v3623_v54 = vadd.f32 %v7348_v17, %v3509_v56  ;;  %v8235_v17 = vrot.slane %v7408_v11, 2 }
 0x270   : > { %v2704_v13 = vpop.f32.mrf.mxu1  ;;  %v2076_v38 = vsel %vm473_vm1, %v6625_v43, %v6659_v57  ;;  %v3317_v2 = vrot.slane %v7320_v49, 2  ;;  %v4029_v56 = vrot.slane %v7469_v31, 3  ;;  %v284_v43 = vld [vmem:[%s8066_s1 + $0xa8] sm:$0xff]  ;;  %v291_v49 = vld [vmem:[%s8066_s1 + $0xe0] sm:$0xff] }
 0x271   : > { %v4688_v52 = vadd.f32 %v4648_v55, %v4647_v9  ;;  %v3723_v26 = vadd.f32 %v3623_v54, %v2803_v5  ;;  %v3328_v16 = vsel %vm3274_vm3, %v8235_v17, %v3327_v24  ;;  %v2705_v8 = vadd.f32 %v2704_v13, %v6600_v29  ;;  %4461 = vperm.xlu0 %5950, %v284_v43  }
 0x272   : > { %3676 = vmatmul.bf16.gmra.mxu3 %v3328_v16  ;;  %v2338_v19 = vshrl.u32 %v2076_v38, 16  ;;  %v2341_v9 = vshll.u32 %v2076_v38, 16 }
 0x273   : > { %v4134_v41 = vpop.f32.mrf.mxu0  ;;  %v4233_v33 = vadd.f32 %v4132_v23, %v3723_v26  ;;  %v2804_v23 = vadd.f32 %v2705_v8, %v8236_v50 }
 0x274   : > { %v2340_v54 = vrot.slane %v2338_v19, 1  ;;  %v2343_v11 = vrot.slane %v2341_v9, 2  ;;  %v7487_v17 = vpop.f32.mrf.mxu3  ;;  %v285_v9 = vld [vmem:[%s8066_s1 + $0xb0] sm:$0xff] }
 0x275   : > { %v4561_v5 = vmul.f32 %v4367_v32, %v4233_v33  ;;  %v3318_v32 = vsel %vm3274_vm3, %v3313_v37, %v3317_v2  ;;  %4466 = vperm.xlu1 %5951, %v285_v9  }
 0x276   : > { %v3511_v55 = vpop.f32.mrf.mxu2  ;;  %v7497_v16 = vor.u32 %v2343_v11, %v2340_v54  ;;  %v3191_v54 = vshrl.u32 %v7444_v40, 16 }
 0x277   : > { %v4601_v26 = vadd.f32 %v4600_v15, %v4561_v5  ;;  %v4649_v29 = vmul.f32 %v4561_v5, %v4233_v33  ;;  %v3625_v13 = vadd.f32 %v7370_v46, %v3511_v55  ;;  %v8237_v46 = vrot.slane %v7413_v6, 3  ;;  %v7508_v5 = vld [vmem:[%s6047_s16 + $0x88] sm:$0xff]  ;;  %v4372_v55 = vpop.permute.xlu1 %4371 }
 0x278   : > { %v2707_v57 = vpop.f32.mrf.mxu1  ;;  %v3195_v11 = vshll.u32 %v7508_v5, 16 }
 0x279   : > { %v4689_v15 = vadd.f32 %v4688_v52, %v4649_v29  ;;  %v3724_v8 = vadd.f32 %v3625_v13, %v2804_v23  ;;  %v4030_v19 = vsel %vm4007_vm4, %v8237_v46, %v4029_v56  ;;  %v2708_v37 = vadd.f32 %v2707_v57, %v8238_v14  ;;  %v7535_v14 = vld [vmem:[%s6047_s16 + $0x70] sm:$0xff] }
 0x27a   : > { %v7514_v52 = vsel %vm2160_vm2, %v7435_v60, %v7497_v16  ;;  %v3193_v29 = vor.u32 %v3191_v54, %v3189_v10  ;;  %v7519_v13 = vrot.slane %v3195_v11, 1  ;;  %v8239_v54 = vld [vmem:[#allocation52_spill] sm:$0xff] }
 0x27b   : > { %v4137_v38 = vpop.f32.mrf.mxu0  ;;  %2746 = vmatmul.bf16.gmra.mxu1 %v7398_v22  ;;  %3553 = vmatmul.bf16.gmra.mxu2 %v3318_v32  ;;  %v4234_v6 = vadd.f32 %v4134_v41, %v3724_v8  ;;  %v2805_v43 = vadd.f32 %v2708_v37, %v6634_v7  ;;  %v287_v32 = vld [vmem:[%s8066_s1 + $0xc0] sm:$0xff]  ;;  %v4377_v8 = vpop.permute.xlu2 %4376 }
 0x27c   : > { %v7524_v41 = vpop.f32.mrf.mxu3  ;;  %v7531_v10 = vsel %vm473_vm1, %v3193_v29, %v7519_v13  ;;  %4476 = vperm.xlu0 %5950, %v287_v32   ;;  %v8241_v32 = vld [vmem:[#allocation45_spill] sm:$0xff] }
 0x27d   : > { %v4562_v50 = vmul.f32 %v4372_v55, %v4234_v6  ;;  %v5794_v23 = vpack.c.bf16 %v4234_v6, %v4233_v33  ;;  %v3331_v7 = vrot.slane %v7531_v10, 2 }
 0x27e   : > { %4176 = vmatmul.bf16.gmra.mxu0 %v4030_v19  ;;  %v3514_v57 = vpop.f32.mrf.mxu2 }
 0x27f   : > { %v4602_v60 = vadd.f32 %v4601_v26, %v4562_v50  ;;  %v4650_v46 = vmul.f32 %v4562_v50, %v4234_v6  ;;  %5891 = vst [vmem:[%s7457_s25 + $0x8] sm:$0xff] %v5794_v23   ;;  %v3628_v22 = vadd.f32 %v7387_v42, %v3514_v57  ;;  %v288_v42 = vld [vmem:[%s8066_s1 + $0xc8] sm:$0xff]  ;;  %v3332_v37 = vsel %vm3274_vm3, %v3327_v24, %v3331_v7 }
 0x280   : > { %v2709_v33 = vpop.f32.mrf.mxu1  ;;  %4481 = vperm.xlu1 %5951, %v288_v42   ;;  %v3321_v50 = vrot.slane %v7360_v35, 2  ;;  %v4031_v57 = vrot.slane %v7535_v14, 3  ;;  %v290_v42 = vld [vmem:[%s8066_s1 + $0xd8] sm:$0xff]  ;;  %v8247_v35 = vld [vmem:[#allocation51_spill] sm:$0xff] }
 0x281   : > { %v4690_v26 = vadd.f32 %v4689_v15, %v4650_v46  ;;  %v3725_v19 = vadd.f32 %v3628_v22, %v2805_v43  ;;  %v2710_v6 = vadd.f32 %v2709_v33, %v6636_v44  ;;  %v8240_v15 = vld [vmem:[#allocation47_spill] sm:$0xff] }
 0x282   : > { %v2084_v11 = vsel %vm473_vm1, %v8240_v15, %v8239_v54  ;;  %3681 = vmatmul.bf16.gmra.mxu3 %v3332_v37 }
 0x283   : > { %v4139_v9 = vpop.f32.mrf.mxu0  ;;  %v4235_v55 = vadd.f32 %v4137_v38, %v3725_v19  ;;  %v2351_v23 = vshrl.u32 %v2084_v11, 16  ;;  %v2354_v29 = vshll.u32 %v2084_v11, 16  ;;  %v2806_v24 = vadd.f32 %v2710_v6, %v8241_v32  ;;  %v283_v11 = vld [vmem:[%s8066_s1 + $0xa0] sm:$0xff] }
 0x284   : > { %v7553_v19 = vpop.f32.mrf.mxu3  ;;  %4491 = vperm.xlu0 %5950, %v290_v42   ;;  %4456 = vperm.xlu2 %5952, %v283_v11  }
 0x285   : > { %v4563_v43 = vmul.f32 %v4377_v8, %v4235_v55  ;;  %v2353_v22 = vrot.slane %v2351_v23, 1  ;;  %v2356_v12 = vrot.slane %v2354_v29, 2  ;;  %v3322_v8 = vsel %vm3274_vm3, %v3317_v2, %v3321_v50  ;;  %v7577_v2 = vld [vmem:[%s6047_s16 + $0x90] sm:$0xff]  ;;  %v8242_v23 = vld [vmem:[#allocation46_spill] sm:$0xff]  ;;  %v4382_v29 = vpop.permute.xlu2 %4381 }
 0x286   : > { %v3516_v46 = vpop.f32.mrf.mxu2 }
 0x287   : > { %v4603_v38 = vadd.f32 %v4602_v60, %v4563_v43  ;;  %v4651_v44 = vmul.f32 %v4563_v43, %v4235_v55  ;;  %v3630_v33 = vadd.f32 %v7405_v61, %v3516_v46  ;;  %v7563_v6 = vor.u32 %v2356_v12, %v2353_v22 }
 0x288   : > { %v2712_v37 = vpop.f32.mrf.mxu1  ;;  %v4032_v61 = vsel %vm4007_vm4, %v4029_v56, %v4031_v57  ;;  %4496 = vperm.xlu1 %5951, %v291_v49   ;;  %v3199_v43 = vshrl.u32 %v7508_v5, 16  ;;  %v3203_v46 = vshll.u32 %v7577_v2, 16  ;;  %v7602_v49 = vld [vmem:[%s6047_s16 + $0x78] sm:$0xff] }
 0x289   : > { %v4691_v60 = vadd.f32 %v4690_v26, %v4651_v44  ;;  %v3726_v54 = vadd.f32 %v3630_v33, %v2806_v24  ;;  %v2713_v26 = vadd.f32 %v2712_v37, %v8242_v23  ;;  %v7583_v31 = vsel %vm2160_vm2, %v7497_v16, %v7563_v6  ;;  %v8243_v44 = vld [vmem:[#allocation48_spill] sm:$0xff]  ;;  %v4387_v23 = vpop.permute.xlu0 %4386 }
 0x28a   : > { %v3201_v32 = vor.u32 %v3199_v43, %v7519_v13  ;;  %v3205_v24 = vrot.slane %v3203_v46, 1 }
 0x28b   : > { %v4142_v15 = vpop.f32.mrf.mxu0  ;;  %2751 = vmatmul.bf16.gmra.mxu1 %v7449_v39  ;;  %3558 = vmatmul.bf16.gmra.mxu2 %v3322_v8  ;;  %v4236_v56 = vadd.f32 %v4139_v9, %v3726_v54  ;;  %v2807_v33 = vadd.f32 %v2713_v26, %v8243_v44  ;;  %v293_v8 = vld [vmem:[%s8066_s1 + $0xf0] sm:$0xff] }
 0x28c   : > { %v7592_v9 = vpop.f32.mrf.mxu3  ;;  %4506 = vperm.xlu0 %5950, %v293_v8  }
 0x28d   : > { %v4564_v22 = vmul.f32 %v4382_v29, %v4236_v56  ;;  %v5799_v12 = vpack.c.bf16 %v4236_v56, %v4235_v55  ;;  %v7598_v55 = vsel %vm473_vm1, %v3201_v32, %v3205_v24 }
 0x28e   : > { %4181 = vmatmul.bf16.gmra.mxu0 %v4032_v61  ;;  %v3519_v42 = vpop.f32.mrf.mxu2  ;;  %v3335_v54 = vrot.slane %v7598_v55, 2  ;;  %v289_v55 = vld [vmem:[%s8066_s1 + $0xd0] sm:$0xff] }
 0x28f   : > { %v4604_v16 = vadd.f32 %v4603_v38, %v4564_v22  ;;  %v4652_v37 = vmul.f32 %v4564_v22, %v4236_v56  ;;  %5892 = vst [vmem:[%s7457_s25 + $0x10] sm:$0xff] %v5799_v12   ;;  %v3633_v39 = vadd.f32 %v7429_v21, %v3519_v42  ;;  %v294_v21 = vld [vmem:[%s8066_s1 + $0xf8] sm:$0xff]  ;;  %v8244_v56 = vld [vmem:[#allocation49_spill] sm:$0xff]  ;;  %v3325_v22 = vrot.slane %v7395_v63, 2  ;;  %v8251_v63 = vld [vmem:[#allocation56_spill] sm:$0xff] }
 0x290   : > { %v2714_v13 = vpop.f32.mrf.mxu1  ;;  %4511 = vperm.xlu1 %5951, %v294_v21   ;;  %v3336_v26 = vsel %vm3274_vm3, %v3331_v7, %v3335_v54 }
 0x291   : > { %v4692_v61 = vadd.f32 %v4691_v60, %v4652_v37  ;;  %v3727_v11 = vadd.f32 %v3633_v39, %v2807_v33  ;;  %v2715_v43 = vadd.f32 %v2714_v13, %v8244_v56  ;;  %v8245_v60 = vld [vmem:[#allocation53_spill] sm:$0xff]  ;;  %v4033_v33 = vrot.slane %v7602_v49, 3  ;;  %v8246_v39 = vld [vmem:[#allocation50_spill] sm:$0xff] }
 0x292   : > { %v2092_v46 = vsel %vm473_vm1, %v8245_v60, %v6744_v27  ;;  %3686 = vmatmul.bf16.gmra.mxu3 %v3336_v26  ;;  %v296_v27 = vld [vmem:[%s8066_s1 + $0x108] sm:$0xff]  ;;  %v297_v60 = vld [vmem:[%s8066_s1 + $0x110] sm:$0xff] }
 0x293   : > { %v4144_v38 = vpop.f32.mrf.mxu0  ;;  %v4237_v29 = vadd.f32 %v4142_v15, %v3727_v11  ;;  %v2364_v12 = vshrl.u32 %v2092_v46, 16  ;;  %v2367_v32 = vshll.u32 %v2092_v46, 16  ;;  %v2808_v7 = vadd.f32 %v2715_v43, %v8246_v39  ;;  %v7641_v46 = vld [vmem:[%s6047_s16 + $0x98] sm:$0xff] }
 0x294   : > { %v7620_v11 = vpop.f32.mrf.mxu3  ;;  %4521 = vperm.xlu0 %5950, %v296_v27  }
 0x295   : > { %v4565_v44 = vmul.f32 %v4387_v23, %v4237_v29  ;;  %v2366_v37 = vrot.slane %v2364_v12, 1  ;;  %v2369_v10 = vrot.slane %v2367_v32, 2  ;;  %v3326_v23 = vsel %vm3274_vm3, %v3321_v50, %v3325_v22  ;;  %v4392_v12 = vpop.permute.xlu1 %4391 }
 0x296   : > { %v3521_v42 = vpop.f32.mrf.mxu2  ;;  %v3211_v32 = vshll.u32 %v7641_v46, 16 }
 0x297   : > { %v4605_v15 = vadd.f32 %v4604_v16, %v4565_v44  ;;  %v4653_v8 = vmul.f32 %v4565_v44, %v4237_v29  ;;  %v3635_v13 = vadd.f32 %v7462_v34, %v3521_v42  ;;  %v7630_v26 = vor.u32 %v2369_v10, %v2366_v37  ;;  %v286_v37 = vld [vmem:[%s8066_s1 + $0xb8] sm:$0xff] }
 0x298   : > { %v2717_v21 = vpop.f32.mrf.mxu1  ;;  %v4034_v34 = vsel %vm4007_vm4, %v4031_v57, %v4033_v33  ;;  %4526 = vperm.xlu1 %5951, %v297_v60   ;;  %v3207_v57 = vshrl.u32 %v7577_v2, 16  ;;  %v7655_v39 = vrot.slane %v3211_v32, 1  ;;  %4471 = vperm.xlu2 %5952, %v286_v37  }
 0x299   : > { %v4693_v16 = vadd.f32 %v4692_v61, %v4653_v8  ;;  %v3728_v56 = vadd.f32 %v3635_v13, %v2808_v7  ;;  %v2718_v50 = vadd.f32 %v2717_v21, %v8247_v35  ;;  %v7647_v61 = vsel %vm2160_vm2, %v7563_v6, %v7630_v26 }
 0x29a   : > { %v3209_v10 = vor.u32 %v3207_v57, %v3205_v24  ;;  %v3329_v57 = vrot.slane %v7444_v40, 2 }
 0x29b   : > { %v4147_v43 = vpop.f32.mrf.mxu0  ;;  %2756 = vmatmul.bf16.gmra.mxu1 %v7514_v52  ;;  %3563 = vmatmul.bf16.gmra.mxu2 %v3326_v23  ;;  %v4238_v14 = vadd.f32 %v4144_v38, %v3728_v56  ;;  %v2809_v6 = vadd.f32 %v2718_v50, %v6719_v1  ;;  %v7671_v56 = vld [vmem:[%s6047_s16 + $0x80] sm:$0xff]  ;;  %v8248_v50 = vld [vmem:[#allocation54_spill] sm:$0xff] }
 0x29c   : > { %v7660_v13 = vpop.f32.mrf.mxu3  ;;  %v7667_v24 = vsel %vm473_vm1, %v3209_v10, %v7655_v39  ;;  %v4035_v37 = vrot.slane %v7671_v56, 3 }
 0x29d   : > { %v4566_v44 = vmul.f32 %v4392_v12, %v4238_v14  ;;  %v5804_v42 = vpack.c.bf16 %v4238_v14, %v4237_v29  ;;  %v299_v29 = vld [vmem:[%s8066_s1 + $0x120] sm:$0xff]  ;;  %v3339_v1 = vrot.slane %v7667_v24, 2 }
 0x29e   : > { %4186 = vmatmul.bf16.gmra.mxu0 %v4034_v34  ;;  %v3524_v52 = vpop.f32.mrf.mxu2  ;;  %4536 = vperm.xlu0 %5950, %v299_v29   ;;  %v4397_v34 = vpop.permute.xlu2 %4396  ;;  %v295_v24 = vld [vmem:[%s8066_s1 + $0x100] sm:$0xff] }
 0x29f   : > { %v4606_v38 = vadd.f32 %v4605_v15, %v4566_v44  ;;  %v4654_v7 = vmul.f32 %v4566_v44, %v4238_v14  ;;  %5893 = vst [vmem:[%s7457_s25 + $0x18] sm:$0xff] %v5804_v42   ;;  %v3638_v8 = vadd.f32 %v7487_v17, %v3524_v52  ;;  %v300_v17 = vld [vmem:[%s8066_s1 + $0x128] sm:$0xff]  ;;  %v3340_v60 = vsel %vm3274_vm3, %v3335_v54, %v3339_v1 }
 0x2a0   : > { %v2719_v27 = vpop.f32.mrf.mxu1  ;;  %4541 = vperm.xlu1 %5951, %v300_v17   ;;  %4486 = vperm.xlu2 %5952, %v289_v55   ;;  %v3330_v17 = vsel %vm3274_vm3, %v3325_v22, %v3329_v57  ;;  %v292_v55 = vld [vmem:[%s8066_s1 + $0xe8] sm:$0xff] }
 0x2a1   : > { %v4694_v21 = vadd.f32 %v4693_v16, %v4654_v7  ;;  %v3729_v15 = vadd.f32 %v3638_v8, %v2809_v6  ;;  %v2720_v12 = vadd.f32 %v2719_v27, %v8248_v50  ;;  %v8249_v16 = vld [vmem:[#allocation57_spill] sm:$0xff]  ;;  %v8250_v6 = vld [vmem:[#allocation55_spill] sm:$0xff]  ;;  %v302_v27 = vld [vmem:[%s8066_s1 + $0x138] sm:$0xff] }
 0x2a2   : > { %v2100_v14 = vsel %vm473_vm1, %v8249_v16, %v6788_v45  ;;  %3691 = vmatmul.bf16.gmra.mxu3 %v3340_v60  ;;  %v7713_v16 = vld [vmem:[%s6047_s16 + $0xa0] sm:$0xff] }
 0x2a3   : > { %v4149_v23 = vpop.f32.mrf.mxu0  ;;  %v4239_v35 = vadd.f32 %v4147_v43, %v3729_v15  ;;  %v2377_v32 = vshrl.u32 %v2100_v14, 16  ;;  %v2380_v44 = vshll.u32 %v2100_v14, 16  ;;  %v2810_v52 = vadd.f32 %v2720_v12, %v8250_v6  ;;  %v303_v12 = vld [vmem:[%s8066_s1 + $0x140] sm:$0xff]  ;;  %v4402_v14 = vpop.permute.xlu0 %4401 }
 0x2a4   : > { %v7692_v29 = vpop.f32.mrf.mxu3 }
 0x2a5   : > { %v4567_v42 = vmul.f32 %v4397_v34, %v4239_v35  ;;  %v2379_v43 = vrot.slane %v2377_v32, 1  ;;  %v2382_v10 = vrot.slane %v2380_v44, 2  ;;  %v3219_v32 = vshll.u32 %v7713_v16, 16 }
 0x2a6   : > { %v3526_v54 = vpop.f32.mrf.mxu2  ;;  %4551 = vperm.xlu0 %5950, %v302_v27  }
 0x2a7   : > { %v4607_v45 = vadd.f32 %v4606_v38, %v4567_v42  ;;  %v4655_v7 = vmul.f32 %v4567_v42, %v4239_v35  ;;  %v3640_v8 = vadd.f32 %v7524_v41, %v3526_v54  ;;  %v7702_v34 = vor.u32 %v2382_v10, %v2379_v43 }
 0x2a8   : > { %v2722_v15 = vpop.f32.mrf.mxu1  ;;  %v4036_v41 = vsel %vm4007_vm4, %v4033_v33, %v4035_v37  ;;  %4556 = vperm.xlu1 %5951, %v303_v12   ;;  %v3215_v33 = vshrl.u32 %v7641_v46, 16  ;;  %4501 = vperm.xlu2 %5952, %v292_v55  }
 0x2a9   : > { %v4695_v38 = vadd.f32 %v4694_v21, %v4655_v7  ;;  %v3730_v60 = vadd.f32 %v3640_v8, %v2810_v52  ;;  %v2723_v22 = vadd.f32 %v2722_v15, %v8251_v63  ;;  %v7719_v21 = vsel %vm2160_vm2, %v7630_v26, %v7702_v34 }
 0x2aa   : > { %v3217_v54 = vor.u32 %v3215_v33, %v7655_v39  ;;  %v3221_v26 = vrot.slane %v3219_v32, 1  ;;  %v8253_v33 = vld [vmem:[#allocation58_spill] sm:$0xff] }
 0x2ab   : > { %v4152_v50 = vpop.f32.mrf.mxu0  ;;  %2761 = vmatmul.bf16.gmra.mxu1 %v7583_v31  ;;  %3568 = vmatmul.bf16.gmra.mxu2 %v3330_v17  ;;  %v4240_v49 = vadd.f32 %v4149_v23, %v3730_v60  ;;  %v2811_v31 = vadd.f32 %v2723_v22, %v6756_v4  ;;  %v7738_v17 = vld [vmem:[%s6047_s16 + $0x88] sm:$0xff]  ;;  %v4407_v4 = vpop.permute.xlu1 %4406 }
 0x2ac   : > { %v7731_v52 = vpop.f32.mrf.mxu3 }
 0x2ad   : > { %v4568_v44 = vmul.f32 %v4402_v14, %v4240_v49  ;;  %v5809_v42 = vpack.c.bf16 %v4240_v49, %v4239_v35  ;;  %v7734_v35 = vsel %vm473_vm1, %v3217_v54, %v3221_v26 }
 0x2ae   : > { %4191 = vmatmul.bf16.gmra.mxu0 %v4036_v41  ;;  %v3529_v43 = vpop.f32.mrf.mxu2  ;;  %v3343_v8 = vrot.slane %v7734_v35, 2  ;;  %v8252_v41 = vld [vmem:[#allocation60_spill] sm:$0xff]  ;;  %v301_v35 = vld [vmem:[%s8066_s1 + $0x130] sm:$0xff] }
 0x2af   : > { %v4608_v23 = vadd.f32 %v4607_v45, %v4568_v44  ;;  %v4656_v10 = vmul.f32 %v4568_v44, %v4240_v49  ;;  %5894 = vst [vmem:[%s7457_s25 + $0x20] sm:$0xff] %v5809_v42   ;;  %v3643_v6 = vadd.f32 %v7553_v19, %v3529_v43  ;;  %v2108_v12 = vsel %vm473_vm1, %v8252_v41, %v6829_v20  ;;  %v298_v41 = vld [vmem:[%s8066_s1 + $0x118] sm:$0xff] }
 0x2b0   : > { %v2724_v7 = vpop.f32.mrf.mxu1  ;;  %v3344_v19 = vsel %vm3274_vm3, %v3339_v1, %v3343_v8  ;;  %v2390_v63 = vshrl.u32 %v2108_v12, 16  ;;  %v2393_v22 = vshll.u32 %v2108_v12, 16  ;;  %v4037_v49 = vrot.slane %v7738_v17, 3  ;;  %4516 = vperm.xlu2 %5952, %v295_v24  }
 0x2b1   : > { %v4696_v39 = vadd.f32 %v4695_v38, %v4656_v10  ;;  %v3731_v27 = vadd.f32 %v3643_v6, %v2811_v31  ;;  %v2725_v60 = vadd.f32 %v2724_v7, %v6758_v30  ;;  %v3333_v38 = vrot.slane %v7508_v5, 2 }
 0x2b2   : > { %3696 = vmatmul.bf16.gmra.mxu3 %v3344_v19  ;;  %v2392_v30 = vrot.slane %v2390_v63, 1  ;;  %v4412_v19 = vpop.permute.xlu2 %4411  ;;  %v8255_v63 = vld [vmem:[#allocation61_spill] sm:$0xff] }
 0x2b3   : > { %v4154_v15 = vpop.f32.mrf.mxu0  ;;  %v4241_v45 = vadd.f32 %v4152_v50, %v3731_v27  ;;  %v2395_v50 = vrot.slane %v2393_v22, 2  ;;  %v2812_v32 = vadd.f32 %v2725_v60, %v8253_v33  ;;  %v3334_v31 = vsel %vm3274_vm3, %v3329_v57, %v3333_v38  ;;  %v8254_v27 = vld [vmem:[#allocation59_spill] sm:$0xff] }
 0x2b4   : > { %v7756_v55 = vpop.f32.mrf.mxu3 }
 0x2b5   : > { %v4569_v14 = vmul.f32 %v4407_v4, %v4241_v45  ;;  %v7763_v43 = vor.u32 %v2395_v50, %v2392_v30 }
 0x2b6   : > { %v3531_v1 = vpop.f32.mrf.mxu2 }
 0x2b7   : > { %v4609_v20 = vadd.f32 %v4608_v23, %v4569_v14  ;;  %v4657_v44 = vmul.f32 %v4569_v14, %v4241_v45  ;;  %v3645_v42 = vadd.f32 %v7592_v9, %v3531_v1  ;;  %v4038_v9 = vsel %vm4007_vm4, %v4035_v37, %v4037_v49  ;;  %v7771_v23 = vld [vmem:[%s6047_s16 + $0xa8] sm:$0xff] }
 0x2b8   : > { %v2727_v54 = vpop.f32.mrf.mxu1  ;;  %v7777_v40 = vsel %vm2160_vm2, %v7702_v34, %v7763_v43  ;;  %v3227_v56 = vshll.u32 %v7771_v23, 16  ;;  %4531 = vperm.xlu2 %5952, %v298_v41   ;;  %v3231_v17 = vshrl.u32 %v7771_v23, 16 }
 0x2b9   : > { %v4697_v10 = vadd.f32 %v4696_v39, %v4657_v44  ;;  %v3732_v6 = vadd.f32 %v3645_v42, %v2812_v32  ;;  %v2728_v4 = vadd.f32 %v2727_v54, %v8254_v27  ;;  %v3223_v39 = vshrl.u32 %v7713_v16, 16  ;;  %v7795_v44 = vld [vmem:[%s6047_s16 + $0x90] sm:$0xff]  ;;  %v8256_v42 = vld [vmem:[#allocation62_spill] sm:$0xff] }
 0x2ba   : > { %v3229_v34 = vrot.slane %v3227_v56, 1 }
 0x2bb   : > { %v4157_v7 = vpop.f32.mrf.mxu0  ;;  %2766 = vmatmul.bf16.gmra.mxu1 %v7647_v61  ;;  %3573 = vmatmul.bf16.gmra.mxu2 %v3334_v31  ;;  %v4242_v57 = vadd.f32 %v4154_v15, %v3732_v6  ;;  %v3225_v12 = vor.u32 %v3223_v39, %v3221_v26  ;;  %v2813_v22 = vadd.f32 %v2728_v4, %v8255_v63  ;;  %v8257_v6 = vld [vmem:[#allocation65_spill] sm:$0xff]  ;;  %v8258_v39 = vld [vmem:[#allocation63_spill] sm:$0xff] }
 0x2bc   : > { %v7788_v1 = vpop.f32.mrf.mxu3 }
 0x2bd   : > { %v4570_v37 = vmul.f32 %v4412_v19, %v4242_v57  ;;  %v5814_v60 = vpack.c.bf16 %v4242_v57, %v4241_v45  ;;  %v7791_v45 = vsel %vm473_vm1, %v3225_v12, %v3229_v34 }
 0x2be   : > { %4196 = vmatmul.bf16.gmra.mxu0 %v4038_v9  ;;  %v3534_v61 = vpop.f32.mrf.mxu2  ;;  %v3347_v50 = vrot.slane %v7791_v45, 2  ;;  %v3337_v9 = vrot.slane %v7577_v2, 2 }
 0x2bf   : > { %v4610_v14 = vadd.f32 %v4609_v20, %v4570_v37  ;;  %v4658_v15 = vmul.f32 %v4570_v37, %v4242_v57  ;;  %5895 = vst [vmem:[%s7457_s25 + $0x28] sm:$0xff] %v5814_v60   ;;  %v3648_v24 = vadd.f32 %v7620_v11, %v3534_v61  ;;  %v4417_v20 = vpop.permute.xlu0 %4416  ;;  %v4039_v57 = vrot.slane %v7795_v44, 3  ;;  %v7813_v60 = vld [vmem:[%s6047_s16 + $0xb0] sm:$0xf] }
 0x2c0   : > { %v2729_v30 = vpop.f32.mrf.mxu1  ;;  %v3348_v11 = vsel %vm3274_vm3, %v3343_v8, %v3347_v50  ;;  %4546 = vperm.xlu2 %5952, %v301_v35   ;;  %v3049_v61 = vunpack.c.l.b16 %v7813_v60 }
 0x2c1   : > { %v4698_v26 = vadd.f32 %v4697_v10, %v4658_v15  ;;  %v3733_v33 = vadd.f32 %v3648_v24, %v2813_v22  ;;  %v2730_v54 = vadd.f32 %v2729_v30, %v8256_v42  ;;  %v2116_v10 = vsel %vm473_vm1, %v8257_v6, %v6862_v53  ;;  %v2966_v53 = vld [vmem:[%s6047_s16 + $0xb4] sm:$0x7] }
 0x2c2   : > { %3701 = vmatmul.bf16.gmra.mxu3 %v3348_v11  ;;  %v2403_v27 = vshrl.u32 %v2116_v10, 16  ;;  %v2406_v4 = vshll.u32 %v2116_v10, 16  ;;  %v3338_v24 = vsel %vm3274_vm3, %v3333_v38, %v3337_v9  ;;  %v8259_v38 = vld [vmem:[#allocation64_spill] sm:$0xff] }
 0x2c3   : > { %v4159_v32 = vpop.f32.mrf.mxu0  ;;  %v4243_v31 = vadd.f32 %v4157_v7, %v3733_v33  ;;  %v2814_v8 = vadd.f32 %v2730_v54, %v8258_v39  ;;  %v3073_v33 = vunpack.c.l.b16 %v2966_v53 }
 0x2c4   : > { %v2405_v7 = vrot.slane %v2403_v27, 1  ;;  %v2408_v37 = vrot.slane %v2406_v4, 2  ;;  %v7817_v22 = vpop.f32.mrf.mxu3  ;;  %v8260_v4 = vshll.u32 %v6935_v28, 16 }
 0x2c5   : > { %v4571_v19 = vmul.f32 %v4417_v20, %v4243_v31  ;;  %v4422_v20 = vpop.permute.xlu1 %4421  ;;  %v7839_v5 = vpack.c.b16 %v3073_v33, %v3049_v61 }
 0x2c6   : > { %v3536_v56 = vpop.f32.mrf.mxu2  ;;  %v7825_v30 = vor.u32 %v2408_v37, %v2405_v7 }
 0x2c7   : > { %v4611_v41 = vadd.f32 %v4610_v14, %v4571_v19  ;;  %v4659_v12 = vmul.f32 %v4571_v19, %v4243_v31  ;;  %v3650_v63 = vadd.f32 %v7660_v13, %v3536_v56  ;;  %v4040_v13 = vsel %vm4007_vm4, %v4037_v49, %v4039_v57 }
 0x2c8   : > { %v2732_v15 = vpop.f32.mrf.mxu1  ;;  %v7835_v11 = vsel %vm2160_vm2, %v7763_v43, %v7825_v30  ;;  %v3235_v49 = vshll.u32 %v7839_v5, 16  ;;  %v3233_v43 = vor.u32 %v3231_v17, %v3229_v34  ;;  %v7847_v19 = vrot.slane %v8260_v4, 1 }
 0x2c9   : > { %v4699_v42 = vadd.f32 %v4698_v26, %v4659_v12  ;;  %v3734_v54 = vadd.f32 %v3650_v63, %v2814_v8  ;;  %v2733_v26 = vadd.f32 %v2732_v15, %v8259_v38  ;;  %v7856_v63 = vld [vmem:[%s6047_s16 + $0x98] sm:$0xff] }
 0x2ca   : > { %v3237_v39 = vrot.slane %v3235_v49, 1 }
 0x2cb   : > { %v4162_v14 = vpop.f32.mrf.mxu0  ;;  %2771 = vmatmul.bf16.gmra.mxu1 %v7719_v21  ;;  %3578 = vmatmul.bf16.gmra.mxu2 %v3338_v24  ;;  %v4244_v6 = vadd.f32 %v4159_v32, %v3734_v54  ;;  %v2815_v8 = vadd.f32 %v2733_v26, %v6841_v36  ;;  %v4427_v24 = vpop.permute.xlu2 %4426  ;;  %v8261_v54 = vld [vmem:[#allocation66_spill] sm:$0xff] }
 0x2cc   : > { %v7852_v7 = vpop.f32.mrf.mxu3 }
 0x2cd   : > { %v4572_v10 = vmul.f32 %v4422_v20, %v4244_v6  ;;  %v5819_v27 = vpack.c.bf16 %v4244_v6, %v4243_v31  ;;  %v3238_v31 = vsel %vm473_vm1, %v3233_v43, %v3237_v39  ;;  %v3341_v20 = vrot.slane %v7641_v46, 2 }
 0x2ce   : > { %4201 = vmatmul.bf16.gmra.mxu0 %v4040_v13  ;;  %v3539_v35 = vpop.f32.mrf.mxu2  ;;  %v3351_v15 = vrot.slane %v3238_v31, 2 }
 0x2cf   : > { %v4612_v21 = vadd.f32 %v4611_v41, %v4572_v10  ;;  %v4660_v56 = vmul.f32 %v4572_v10, %v4244_v6  ;;  %5896 = vst [vmem:[%s7457_s25 + $0x30] sm:$0xff] %v5819_v27   ;;  %v3653_v32 = vadd.f32 %v7692_v29, %v3539_v35  ;;  %v8262_v29 = vld [vmem:[#allocation69_spill] sm:$0xff]  ;;  %v4041_v6 = vrot.slane %v7856_v63, 3  ;;  %v8263_v10 = vld [vmem:[#allocation67_spill] sm:$0xff] }
 0x2d0   : > { %v2734_v37 = vpop.f32.mrf.mxu1  ;;  %v3352_v41 = vsel %vm3274_vm3, %v3347_v50, %v3351_v15  ;;  %v2124_v13 = vsel %vm473_vm1, %v8262_v29, %v7847_v19 }
 0x2d1   : > { %v4700_v53 = vadd.f32 %v4699_v42, %v4660_v56  ;;  %v3735_v34 = vadd.f32 %v3653_v32, %v2815_v8  ;;  %v2735_v36 = vadd.f32 %v2734_v37, %v8261_v54  ;;  %v2416_v42 = vshrl.u32 %v2124_v13, 16 }
 0x2d2   : > { %3706 = vmatmul.bf16.gmra.mxu3 %v3352_v41  ;;  %v2419_v38 = vshll.u32 %v2124_v13, 16  ;;  %v3342_v8 = vsel %vm3274_vm3, %v3337_v9, %v3341_v20 }
 0x2d3   : > { %v4164_v12 = vpop.f32.mrf.mxu0  ;;  %v4245_v33 = vadd.f32 %v4162_v14, %v3735_v34  ;;  %v2418_v14 = vrot.slane %v2416_v42, 1  ;;  %v2816_v27 = vadd.f32 %v2735_v36, %v8263_v10  ;;  %v8266_v10 = vld [vmem:[#allocation70_spill] sm:$0xff] }
 0x2d4   : > { %v2421_v49 = vrot.slane %v2419_v38, 2  ;;  %v7869_v4 = vpop.f32.mrf.mxu3 }
 0x2d5   : > { %v4573_v26 = vmul.f32 %v4427_v24, %v4245_v33  ;;  %v8264_v24 = vld [vmem:[#allocation68_spill] sm:$0xff] }
 0x2d6   : > { %v3541_v17 = vpop.f32.mrf.mxu2  ;;  %v2422_v56 = vor.u32 %v2421_v49, %v2418_v14 }
 0x2d7   : > { %v4613_v45 = vadd.f32 %v4612_v21, %v4573_v26  ;;  %v4661_v43 = vmul.f32 %v4573_v26, %v4245_v33  ;;  %v3655_v50 = vadd.f32 %v7731_v52, %v3541_v17  ;;  %v4042_v21 = vsel %vm4007_vm4, %v4039_v57, %v4041_v6  ;;  %v4432_v52 = vpop.permute.xlu0 %4431  ;;  %v7897_v17 = vld [vmem:[%s6047_s16 + $0xa0] sm:$0xff] }
 0x2d8   : > { %v2737_v35 = vpop.f32.mrf.mxu1  ;;  %v7883_v34 = vsel %vm2160_vm2, %v7825_v30, %v2422_v56 }
 0x2d9   : > { %v4701_v32 = vadd.f32 %v4700_v53, %v4661_v43  ;;  %v3736_v37 = vadd.f32 %v3655_v50, %v2816_v27  ;;  %v2738_v2 = vadd.f32 %v2737_v35, %v8264_v24  ;;  %v3239_v53 = vshrl.u32 %v7839_v5, 16 }
 0x2da   : > { %v3345_v27 = vrot.slane %v7713_v16, 2  ;;  %v4043_v35 = vrot.slane %v7897_v17, 3 }
 0x2db   : > { %v4167_v31 = vpop.f32.mrf.mxu0  ;;  %2776 = vmatmul.bf16.gmra.mxu1 %v7777_v40  ;;  %3583 = vmatmul.bf16.gmra.mxu2 %v3342_v8  ;;  %v4246_v9 = vadd.f32 %v4164_v12, %v3736_v37  ;;  %v7888_v57 = vor.u32 %v3239_v53, %v3237_v39  ;;  %v2817_v41 = vadd.f32 %v2738_v2, %v6875_v48  ;;  %v8265_v48 = vshrl.u32 %v6935_v28, 16 }
 0x2dc   : > { %v7893_v42 = vpop.f32.mrf.mxu3  ;;  %v3346_v16 = vsel %vm3274_vm3, %v3341_v20, %v3345_v27 }
 0x2dd   : > { %v4574_v54 = vmul.f32 %v4432_v52, %v4246_v9  ;;  %v5824_v44 = vpack.c.bf16 %v4246_v9, %v4245_v33  ;;  %v3355_v12 = vrot.slane %v7888_v57, 2  ;;  %v4437_v33 = vpop.permute.xlu1 %4436  ;;  %v2127_v14 = vor.u32 %v8265_v48, %v7847_v19  ;;  %v8268_v57 = vld [vmem:[#allocation72_spill] sm:$0xff] }
 0x2de   : > { %4206 = vmatmul.bf16.gmra.mxu0 %v4042_v21  ;;  %v3544_v36 = vpop.f32.mrf.mxu2  ;;  %v8267_v21 = vld [vmem:[#allocation71_spill] sm:$0xff] }
 0x2df   : > { %v4614_v29 = vadd.f32 %v4613_v45, %v4574_v54  ;;  %v4662_v30 = vmul.f32 %v4574_v54, %v4246_v9  ;;  %5897 = vst [vmem:[%s7457_s25 + $0x38] sm:$0xff] %v5824_v44   ;;  %v3658_v13 = vadd.f32 %v7756_v55, %v3544_v36  ;;  %v3356_v39 = vsel %vm3274_vm3, %v3351_v15, %v3355_v12  ;;  %v4442_v36 = vpop.permute.xlu2 %4441 }
 0x2e0   : > { %v2739_v40 = vpop.f32.mrf.mxu1  ;;  %v2429_v45 = vshrl.u32 %v2127_v14, 16  ;;  %v2432_v43 = vshll.u32 %v2127_v14, 16  ;;  %v4044_v44 = vsel %vm4007_vm4, %v4041_v6, %v4043_v35  ;;  %v8270_v14 = vld [vmem:[#allocation74_spill] sm:$0xff] }
 0x2e1   : > { %v4702_v38 = vadd.f32 %v4701_v32, %v4662_v30  ;;  %v3737_v5 = vadd.f32 %v3658_v13, %v2817_v41  ;;  %v2740_v55 = vadd.f32 %v2739_v40, %v8266_v10  ;;  %v8269_v13 = vld [vmem:[#allocation73_spill] sm:$0xff]  ;;  %v3349_v10 = vrot.slane %v7771_v23, 2 }
 0x2e2   : > { %3711 = vmatmul.bf16.gmra.mxu3 %v3356_v39  ;;  %v2431_v32 = vrot.slane %v2429_v45, 1  ;;  %v2434_v37 = vrot.slane %v2432_v43, 2  ;;  %v7930_v39 = vld [vmem:[%s6047_s16 + $0xa8] sm:$0xff]  ;;  %v8271_v43 = vld [vmem:[#allocation75_spill] sm:$0xff] }
 0x2e3   : > { %v4169_v26 = vpop.f32.mrf.mxu0  ;;  %v4247_v49 = vadd.f32 %v4167_v31, %v3737_v5  ;;  %v2818_v15 = vadd.f32 %v2740_v55, %v8267_v21  ;;  %v4045_v45 = vrot.slane %v7930_v39, 3 }
 0x2e4   : > { %v7908_v19 = vpop.f32.mrf.mxu3  ;;  %v7913_v2 = vor.u32 %v2434_v37, %v2431_v32 }
 0x2e5   : > { %v4575_v50 = vmul.f32 %v4437_v33, %v4247_v49 }
 0x2e6   : > { %v3546_v8 = vpop.f32.mrf.mxu2 }
 0x2e7   : > { %v4615_v52 = vadd.f32 %v4614_v29, %v4575_v50  ;;  %v4663_v24 = vmul.f32 %v4575_v50, %v4247_v49  ;;  %v3660_v28 = vadd.f32 %v7788_v1, %v3546_v8  ;;  %v7920_v1 = vsel %vm2160_vm2, %v2422_v56, %v7913_v2 }
 0x2e8   : > { %v2742_v31 = vpop.f32.mrf.mxu1 }
 0x2e9   : > { %v4703_v9 = vadd.f32 %v4702_v38, %v4663_v24  ;;  %v3738_v53 = vadd.f32 %v3660_v28, %v2818_v15  ;;  %v2743_v41 = vadd.f32 %v2742_v31, %v8268_v57  ;;  %v4046_v28 = vsel %vm4007_vm4, %v4043_v35, %v4045_v45  ;;  %v2965_v31 = vld [vmem:[%s6047_s16 + $0xb4] sm:$0x3]  ;;  %v5569_v57 = vld [vmem:[%s6047_s16 + $0xb0] sm:$0xf] }
 0x2eb   : > { %v4172_v54 = vpop.f32.mrf.mxu0  ;;  %2781 = vmatmul.bf16.gmra.mxu1 %v7835_v11  ;;  %3588 = vmatmul.bf16.gmra.mxu2 %v3346_v16  ;;  %v4248_v46 = vadd.f32 %v4169_v26, %v3738_v53  ;;  %v2819_v63 = vadd.f32 %v2743_v41, %v8269_v13  ;;  %v4447_v26 = vpop.permute.xlu0 %4446  ;;  %v8272_v53 = vld [vmem:[#allocation76_spill] sm:$0xff]  ;;  %v5769_v41 = vld [vmem:[%s6047_s16 + $0xb0] sm:$0x70]  ;;  %s4910_s16 = sshll.u32 %s8306_s2, 1 }
 0x2ec   : > { %v7927_v56 = vpop.f32.mrf.mxu3  ;;  %v4452_v16 = vpop.permute.xlu1 %4451  ;;  %s262_s28 = scalar_lea.vmem %s8071_s6, %s4910_s16 }
 0x2ed   : > { %v4576_v20 = vmul.f32 %v4442_v36, %v4248_v46  ;;  %v5829_v29 = vpack.c.bf16 %v4248_v46, %v4247_v49 }
 0x2ee   : > { %4211 = vmatmul.bf16.gmra.mxu0 %v4044_v44  ;;  %v3549_v30 = vpop.f32.mrf.mxu2 }
 0x2ef   : > { %v4616_v40 = vadd.f32 %v4615_v52, %v4576_v20  ;;  %v4664_v6 = vmul.f32 %v4576_v20, %v4248_v46  ;;  %5898 = vst [vmem:[%s7457_s25 + $0x40] sm:$0xff] %v5829_v29   ;;  %v3663_v38 = vadd.f32 %v7817_v22, %v3549_v30  ;;  %v3350_v52 = vsel %vm3274_vm3, %v3345_v27, %v3349_v10 }
 0x2f0   : > { %v2744_v5 = vpop.f32.mrf.mxu1 }
 0x2f1   : > { %v4704_v17 = vadd.f32 %v4703_v9, %v4664_v6  ;;  %v3739_v33 = vadd.f32 %v3663_v38, %v2819_v63  ;;  %v2745_v49 = vadd.f32 %v2744_v5, %v8270_v14  ;;  %v5570_v38 = vor.u32 %v5769_v41, %v5569_v57  ;;  %v4457_v5 = vpop.permute.xlu2 %4456 }
 0x2f2   : > { %3716 = vmatmul.bf16.gmra.mxu3 %v3355_v12 }
 0x2f3   : > { %v4174_v11 = vpop.f32.mrf.mxu0  ;;  %v4249_v48 = vadd.f32 %v4172_v54, %v3739_v33  ;;  %v2820_v50 = vadd.f32 %v2745_v49, %v8271_v43  ;;  %v4047_v39 = vrot.slane %v5570_v38, 3 }
 0x2f5   : > { %v4577_v55 = vmul.f32 %v4447_v26, %v4249_v48  ;;  %v7937_v21 = vpop.f32.mrf.mxu3 }
 0x2f6   : > { %v3551_v22 = vpop.f32.mrf.mxu2 }
 0x2f7   : > { %v4617_v8 = vadd.f32 %v4616_v40, %v4577_v55  ;;  %v4665_v32 = vmul.f32 %v4577_v55, %v4249_v48  ;;  %v3665_v37 = vadd.f32 %v7852_v7, %v3551_v22  ;;  %v3050_v7 = vunpack.c.l.b16 %v2965_v31 }
 0x2f8   : > { %v2747_v15 = vpop.f32.mrf.mxu1 }
 0x2f9   : > { %v4705_v24 = vadd.f32 %v4704_v17, %v4665_v32  ;;  %v3740_v23 = vadd.f32 %v3665_v37, %v2820_v50  ;;  %v2748_v54 = vadd.f32 %v2747_v15, %v8272_v53 }
 0x2fb   : > { %v4177_v12 = vpop.f32.mrf.mxu0  ;;  %v4250_v9 = vadd.f32 %v4174_v11, %v3740_v23  ;;  %2786 = vmatmul.bf16.gmra.mxu1 %v7883_v34  ;;  %3593 = vmatmul.bf16.gmra.mxu2 %v3350_v52  ;;  %v2821_v46 = vadd.f32 %v2748_v54, %v6969_v62  ;;  %v3071_v34 = vpack.c.b16 %v3050_v7, %v3049_v61 }
 0x2fd   : > { %v5834_v44 = vpack.c.bf16 %v4250_v9, %v4249_v48  ;;  %v4578_v27 = vmul.f32 %v4452_v16, %v4250_v9  ;;  %v7949_v30 = vpop.f32.mrf.mxu3  ;;  %v3353_v11 = vrot.slane %v3071_v34, 2 }
 0x2fe   : > { %4216 = vmatmul.bf16.gmra.mxu0 %v4046_v28  ;;  %v3554_v36 = vpop.f32.mrf.mxu2 }
 0x2ff   : > { %5899 = vst [vmem:[%s7457_s25 + $0x48] sm:$0xff] %v5834_v44   ;;  %v4618_v20 = vadd.f32 %v4617_v8, %v4578_v27  ;;  %v4666_v35 = vmul.f32 %v4578_v27, %v4250_v9  ;;  %v3668_v29 = vadd.f32 %v7869_v4, %v3554_v36  ;;  %v3354_v55 = vsel %vm3274_vm3, %v3349_v10, %v3353_v11  ;;  %v4467_v9 = vpop.permute.xlu1 %4466 }
 0x300   : > { %v2749_v13 = vpop.f32.mrf.mxu1 }
 0x301   : > { %v4706_v63 = vadd.f32 %v4705_v24, %v4666_v35  ;;  %v3741_v40 = vadd.f32 %v3668_v29, %v2821_v46  ;;  %v2750_v33 = vadd.f32 %v2749_v13, %v6971_v3  ;;  %v4048_v3 = vsel %vm4007_vm4, %v4045_v45, %v4047_v39 }
 0x303   : > { %v4179_v6 = vpop.f32.mrf.mxu0  ;;  %v4251_v17 = vadd.f32 %v4177_v12, %v3741_v40  ;;  %v2822_v4 = vadd.f32 %v2750_v33, %v6988_v0  ;;  %v4462_v0 = vpop.permute.xlu0 %4461  ;;  %v8273_v33 = vld [vmem:[#allocation8_spill] sm:$0xff] }
 0x305   : > { %v4579_v62 = vmul.f32 %v4457_v5, %v4251_v17  ;;  %v7956_v60 = vpop.f32.mrf.mxu3 }
 0x306   : > { %v3556_v26 = vpop.f32.mrf.mxu2 }
 0x307   : > { %v4619_v48 = vadd.f32 %v4618_v20, %v4579_v62  ;;  %v4667_v14 = vmul.f32 %v4579_v62, %v4251_v17  ;;  %v3670_v49 = vadd.f32 %v7893_v42, %v3556_v26 }
 0x308   : > { %v2752_v61 = vpop.f32.mrf.mxu1 }
 0x309   : > { %v4707_v22 = vadd.f32 %v4706_v63, %v4667_v14  ;;  %v3742_v43 = vadd.f32 %v3670_v49, %v2822_v4  ;;  %v2753_v32 = vadd.f32 %v2752_v61, %v6990_v58  ;;  %v8274_v14 = vld [vmem:[#allocation4_spill] sm:$0xff] }
 0x30b   : > { %v4182_v50 = vpop.f32.mrf.mxu0  ;;  %v4252_v8 = vadd.f32 %v4179_v6, %v3742_v43  ;;  %2791 = vmatmul.bf16.gmra.mxu1 %v7920_v1  ;;  %3598 = vmatmul.bf16.gmra.mxu2 %v3354_v55  ;;  %v2823_v52 = vadd.f32 %v2753_v32, %v7007_v25  ;;  %v4477_v62 = vpop.permute.xlu0 %4476 }
 0x30c   : > { %v4482_v32 = vpop.permute.xlu1 %4481 }
 0x30d   : > { %v5839_v42 = vpack.c.bf16 %v4252_v8, %v4251_v17  ;;  %v4580_v37 = vmul.f32 %v4462_v0, %v4252_v8  ;;  %v7965_v12 = vpop.f32.mrf.mxu3 }
 0x30e   : > { %4221 = vmatmul.bf16.gmra.mxu0 %v4048_v3  ;;  %v3559_v15 = vpop.f32.mrf.mxu2  ;;  %v8275_v3 = vld [vmem:[#allocation3_spill] sm:$0xff] }
 0x30f   : > { %5900 = vst [vmem:[%s7457_s25 + $0x50] sm:$0xff] %v5839_v42   ;;  %v4620_v10 = vadd.f32 %v4619_v48, %v4580_v37  ;;  %v4668_v24 = vmul.f32 %v4580_v37, %v4252_v8  ;;  %v3673_v23 = vadd.f32 %v7908_v19, %v3559_v15 }
 0x310   : > { %v2754_v45 = vpop.f32.mrf.mxu1 }
 0x311   : > { %v4708_v28 = vadd.f32 %v4707_v22, %v4668_v24  ;;  %v3743_v58 = vadd.f32 %v3673_v23, %v2823_v52  ;;  %v2755_v16 = vadd.f32 %v2754_v45, %v7009_v51  ;;  %v4472_v51 = vpop.permute.xlu2 %4471 }
 0x313   : > { %v4184_v31 = vpop.f32.mrf.mxu0  ;;  %v4253_v1 = vadd.f32 %v4182_v50, %v3743_v58  ;;  %v2824_v7 = vadd.f32 %v2755_v16, %v7020_v59  ;;  %v8277_v16 = vld [vmem:[#allocation13_spill] sm:$0xff] }
 0x315   : > { %v4581_v53 = vmul.f32 %v4467_v9, %v4253_v1  ;;  %v7970_v19 = vpop.f32.mrf.mxu3 }
 0x316   : > { %v3561_v54 = vpop.f32.mrf.mxu2 }
 0x317   : > { %v3675_v25 = vadd.f32 %v7927_v56, %v3561_v54  ;;  %v4621_v44 = vadd.f32 %v4620_v10, %v4581_v53  ;;  %v4669_v27 = vmul.f32 %v4581_v53, %v4253_v1  ;;  %v8276_v10 = vld [vmem:[#allocation9_spill] sm:$0xff] }
 0x318   : > { %v2757_v36 = vpop.f32.mrf.mxu1 }
 0x319   : > { %v3744_v57 = vadd.f32 %v3675_v25, %v2824_v7  ;;  %v4709_v41 = vadd.f32 %v4708_v28, %v4669_v27  ;;  %v2758_v35 = vadd.f32 %v2757_v36, %v7022_v47  ;;  %v4487_v53 = vpop.permute.xlu2 %4486  ;;  %v8278_v27 = vld [vmem:[#allocation6_spill] sm:$0xff] }
 0x31b   : > { %v4187_v46 = vpop.f32.mrf.mxu0  ;;  %v4254_v20 = vadd.f32 %v4184_v31, %v3744_v57  ;;  %2796 = vmatmul.bf16.gmra.mxu1 %v7913_v2  ;;  %3603 = vmatmul.bf16.gmra.mxu2 %v3353_v11  ;;  %v2825_v63 = vadd.f32 %v2758_v35, %v7039_v18 }
 0x31d   : > { %v5844_v59 = vpack.c.bf16 %v4254_v20, %v4253_v1  ;;  %v4582_v29 = vmul.f32 %v4472_v51, %v4254_v20  ;;  %v7977_v6 = vpop.f32.mrf.mxu3 }
 0x31e   : > { %4226 = vmatmul.bf16.gmra.mxu0 %v4047_v39  ;;  %v3564_v56 = vpop.f32.mrf.mxu2 }
 0x31f   : > { %5901 = vst [vmem:[%s7457_s25 + $0x58] sm:$0xff] %v5844_v59   ;;  %v4622_v13 = vadd.f32 %v4621_v44, %v4582_v29  ;;  %v4670_v34 = vmul.f32 %v4582_v29, %v4254_v20  ;;  %v3678_v40 = vadd.f32 %v7937_v21, %v3564_v56  ;;  %v8279_v59 = vld [vmem:[#allocation5_spill] sm:$0xff]  ;;  %v4492_v56 = vpop.permute.xlu0 %4491 }
 0x320   : > { %v2759_v38 = vpop.f32.mrf.mxu1 }
 0x321   : > { %v4710_v5 = vadd.f32 %v4709_v41, %v4670_v34  ;;  %v3745_v47 = vadd.f32 %v3678_v40, %v2825_v63  ;;  %v2760_v11 = vadd.f32 %v2759_v38, %v8273_v33 }
 0x323   : > { %v4189_v17 = vpop.f32.mrf.mxu0  ;;  %v4255_v2 = vadd.f32 %v4187_v46, %v3745_v47  ;;  %v2826_v49 = vadd.f32 %v2760_v11, %v8274_v14 }
 0x325   : > { %v4583_v39 = vmul.f32 %v4477_v62, %v4255_v2  ;;  %v7982_v21 = vpop.f32.mrf.mxu3 }
 0x326   : > { %v3566_v26 = vpop.f32.mrf.mxu2 }
 0x327   : > { %v4623_v4 = vadd.f32 %v4622_v13, %v4583_v39  ;;  %v4671_v48 = vmul.f32 %v4583_v39, %v4255_v2  ;;  %v3680_v18 = vadd.f32 %v7949_v30, %v3566_v26  ;;  %v8281_v26 = vld [vmem:[#allocation19_spill] sm:$0xff] }
 0x328   : > { %v2762_v61 = vpop.f32.mrf.mxu1 }
 0x329   : > { %v4711_v55 = vadd.f32 %v4710_v5, %v4671_v48  ;;  %v3746_v22 = vadd.f32 %v3680_v18, %v2826_v49  ;;  %v2763_v8 = vadd.f32 %v2762_v61, %v8275_v3  ;;  %v8280_v5 = vld [vmem:[#allocation15_spill] sm:$0xff]  ;;  %v4497_v48 = vpop.permute.xlu1 %4496 }
 0x32b   : > { %v4192_v43 = vpop.f32.mrf.mxu0  ;;  %v4256_v50 = vadd.f32 %v4189_v17, %v3746_v22  ;;  %v2827_v24 = vadd.f32 %v2763_v8, %v8276_v10 }
 0x32d   : > { %v4584_v0 = vmul.f32 %v4482_v32, %v4256_v50  ;;  %v5849_v42 = vpack.c.bf16 %v4256_v50, %v4255_v2  ;;  %v7988_v23 = vpop.f32.mrf.mxu3 }
 0x32e   : > { %v3569_v37 = vpop.f32.mrf.mxu2 }
 0x32f   : > { %v4624_v15 = vadd.f32 %v4623_v4, %v4584_v0  ;;  %v4672_v52 = vmul.f32 %v4584_v0, %v4256_v50  ;;  %5902 = vst [vmem:[%s7457_s25 + $0x60] sm:$0xff] %v5849_v42   ;;  %v3683_v30 = vadd.f32 %v7956_v60, %v3569_v37  ;;  %v8283_v42 = vld [vmem:[#allocation7_spill] sm:$0xff] }
 0x330   : > { %v2764_v45 = vpop.f32.mrf.mxu1 }
 0x331   : > { %v4712_v28 = vadd.f32 %v4711_v55, %v4672_v52  ;;  %v3747_v58 = vadd.f32 %v3683_v30, %v2827_v24  ;;  %v2765_v9 = vadd.f32 %v2764_v45, %v8277_v16  ;;  %v8282_v55 = vld [vmem:[#allocation11_spill] sm:$0xff] }
 0x333   : > { %v4194_v31 = vpop.f32.mrf.mxu0  ;;  %v4257_v1 = vadd.f32 %v4192_v43, %v3747_v58  ;;  %v2828_v36 = vadd.f32 %v2765_v9, %v8278_v27 }
 0x335   : > { %v4585_v54 = vmul.f32 %v4487_v53, %v4257_v1  ;;  %v7993_v60 = vpop.f32.mrf.mxu3 }
 0x336   : > { %v3571_v7 = vpop.f32.mrf.mxu2 }
 0x337   : > { %v4625_v25 = vadd.f32 %v4624_v15, %v4585_v54  ;;  %v4673_v44 = vmul.f32 %v4585_v54, %v4257_v1  ;;  %v3685_v57 = vadd.f32 %v7965_v12, %v3571_v7  ;;  %v4502_v15 = vpop.permute.xlu2 %4501  ;;  %v8285_v7 = vld [vmem:[#allocation25_spill] sm:$0xff] }
 0x338   : > { %v2767_v41 = vpop.f32.mrf.mxu1 }
 0x339   : > { %v4713_v46 = vadd.f32 %v4712_v28, %v4673_v44  ;;  %v3748_v20 = vadd.f32 %v3685_v57, %v2828_v36  ;;  %v2768_v29 = vadd.f32 %v2767_v41, %v8279_v59  ;;  %v8284_v28 = vld [vmem:[#allocation21_spill] sm:$0xff]  ;;  %v4507_v44 = vpop.permute.xlu0 %4506 }
 0x33b   : > { %v4197_v35 = vpop.f32.mrf.mxu0  ;;  %v4258_v51 = vadd.f32 %v4194_v31, %v3748_v20  ;;  %v2829_v47 = vadd.f32 %v2768_v29, %v8280_v5 }
 0x33d   : > { %v4586_v13 = vmul.f32 %v4492_v56, %v4258_v51  ;;  %v5854_v34 = vpack.c.bf16 %v4258_v51, %v4257_v1  ;;  %v7999_v17 = vpop.f32.mrf.mxu3 }
 0x33e   : > { %v3574_v63 = vpop.f32.mrf.mxu2 }
 0x33f   : > { %v4626_v40 = vadd.f32 %v4625_v25, %v4586_v13  ;;  %v4674_v38 = vmul.f32 %v4586_v13, %v4258_v51  ;;  %5903 = vst [vmem:[%s7457_s25 + $0x68] sm:$0xff] %v5854_v34   ;;  %v3688_v12 = vadd.f32 %v7970_v19, %v3574_v63  ;;  %v8287_v34 = vld [vmem:[#allocation12_spill] sm:$0xff] }
 0x340   : > { %v2769_v2 = vpop.f32.mrf.mxu1 }
 0x341   : > { %v4714_v33 = vadd.f32 %v4713_v46, %v4674_v38  ;;  %v3749_v11 = vadd.f32 %v3688_v12, %v2829_v47  ;;  %v2770_v4 = vadd.f32 %v2769_v2, %v8281_v26  ;;  %v8286_v46 = vld [vmem:[#allocation17_spill] sm:$0xff] }
 0x343   : > { %v4199_v62 = vpop.f32.mrf.mxu0  ;;  %v4259_v39 = vadd.f32 %v4197_v35, %v3749_v11  ;;  %v2830_v22 = vadd.f32 %v2770_v4, %v8282_v55 }
 0x345   : > { %v4587_v14 = vmul.f32 %v4497_v48, %v4259_v39  ;;  %v8004_v19 = vpop.f32.mrf.mxu3 }
 0x346   : > { %v3576_v49 = vpop.f32.mrf.mxu2 }
 0x347   : > { %v4627_v18 = vadd.f32 %v4626_v40, %v4587_v14  ;;  %v4675_v61 = vmul.f32 %v4587_v14, %v4259_v39  ;;  %v3690_v43 = vadd.f32 %v7977_v6, %v3576_v49  ;;  %v4512_v40 = vpop.permute.xlu1 %4511  ;;  %v8289_v49 = vld [vmem:[#allocation29_spill] sm:$0xff] }
 0x348   : > { %v2772_v50 = vpop.f32.mrf.mxu1 }
 0x349   : > { %v4715_v3 = vadd.f32 %v4714_v33, %v4675_v61  ;;  %v3750_v8 = vadd.f32 %v3690_v43, %v2830_v22  ;;  %v2773_v37 = vadd.f32 %v2772_v50, %v8283_v42  ;;  %v8288_v33 = vld [vmem:[#allocation26_spill] sm:$0xff]  ;;  %v4517_v61 = vpop.permute.xlu2 %4516 }
 0x34b   : > { %v4202_v32 = vpop.f32.mrf.mxu0  ;;  %v4260_v0 = vadd.f32 %v4199_v62, %v3750_v8  ;;  %v2831_v58 = vadd.f32 %v2773_v37, %v8284_v28 }
 0x34d   : > { %v4588_v52 = vmul.f32 %v4502_v15, %v4260_v0  ;;  %v5859_v10 = vpack.c.bf16 %v4260_v0, %v4259_v39  ;;  %v8010_v31 = vpop.f32.mrf.mxu3 }
 0x34e   : > { %v3579_v24 = vpop.f32.mrf.mxu2 }
 0x34f   : > { %v4628_v30 = vadd.f32 %v4627_v18, %v4588_v52  ;;  %v4676_v45 = vmul.f32 %v4588_v52, %v4260_v0  ;;  %5904 = vst [vmem:[%s7457_s25 + $0x70] sm:$0xff] %v5859_v10   ;;  %v3693_v6 = vadd.f32 %v7982_v21, %v3579_v24  ;;  %v8291_v10 = vld [vmem:[#allocation18_spill] sm:$0xff] }
 0x350   : > { %v2774_v1 = vpop.f32.mrf.mxu1 }
 0x351   : > { %v4716_v16 = vadd.f32 %v4715_v3, %v4676_v45  ;;  %v3751_v9 = vadd.f32 %v3693_v6, %v2831_v58  ;;  %v2775_v25 = vadd.f32 %v2774_v1, %v8285_v7  ;;  %v8290_v3 = vld [vmem:[#allocation23_spill] sm:$0xff] }
 0x353   : > { %v4204_v53 = vpop.f32.mrf.mxu0  ;;  %v4261_v54 = vadd.f32 %v4202_v32, %v3751_v9  ;;  %v2832_v20 = vadd.f32 %v2775_v25, %v8286_v46 }
 0x355   : > { %v4589_v27 = vmul.f32 %v4507_v44, %v4261_v54  ;;  %v8015_v21 = vpop.f32.mrf.mxu3 }
 0x356   : > { %v3581_v36 = vpop.f32.mrf.mxu2 }
 0x357   : > { %v4629_v57 = vadd.f32 %v4628_v30, %v4589_v27  ;;  %v4677_v41 = vmul.f32 %v4589_v27, %v4261_v54  ;;  %v3695_v35 = vadd.f32 %v7988_v23, %v3581_v36  ;;  %v4522_v30 = vpop.permute.xlu0 %4521  ;;  %v8293_v36 = vld [vmem:[#allocation33_spill] sm:$0xff] }
 0x358   : > { %v2777_v51 = vpop.f32.mrf.mxu1 }
 0x359   : > { %v4717_v59 = vadd.f32 %v4716_v16, %v4677_v41  ;;  %v3752_v29 = vadd.f32 %v3695_v35, %v2832_v20  ;;  %v2778_v63 = vadd.f32 %v2777_v51, %v8287_v34  ;;  %v8292_v16 = vld [vmem:[#allocation30_spill] sm:$0xff]  ;;  %v4527_v41 = vpop.permute.xlu1 %4526 }
 0x35b   : > { %v4207_v56 = vpop.f32.mrf.mxu0  ;;  %v4262_v13 = vadd.f32 %v4204_v53, %v3752_v29  ;;  %v2833_v11 = vadd.f32 %v2778_v63, %v8288_v33 }
 0x35d   : > { %v4590_v38 = vmul.f32 %v4512_v40, %v4262_v13  ;;  %v5864_v5 = vpack.c.bf16 %v4262_v13, %v4261_v54  ;;  %v8021_v62 = vpop.f32.mrf.mxu3 }
 0x35e   : > { %v3584_v47 = vpop.f32.mrf.mxu2 }
 0x35f   : > { %v4630_v12 = vadd.f32 %v4629_v57, %v4590_v38  ;;  %v4678_v2 = vmul.f32 %v4590_v38, %v4262_v13  ;;  %5905 = vst [vmem:[%s7457_s25 + $0x78] sm:$0xff] %v5864_v5   ;;  %v3698_v23 = vadd.f32 %v7993_v60, %v3584_v47  ;;  %v8295_v5 = vld [vmem:[#allocation24_spill] sm:$0xff] }
 0x360   : > { %v2779_v39 = vpop.f32.mrf.mxu1 }
 0x361   : > { %v4718_v26 = vadd.f32 %v4717_v59, %v4678_v2  ;;  %v3753_v4 = vadd.f32 %v3698_v23, %v2833_v11  ;;  %v2780_v18 = vadd.f32 %v2779_v39, %v8289_v49  ;;  %v8294_v59 = vld [vmem:[#allocation27_spill] sm:$0xff] }
 0x363   : > { %v4209_v48 = vpop.f32.mrf.mxu0  ;;  %v4263_v14 = vadd.f32 %v4207_v56, %v3753_v4  ;;  %v2834_v8 = vadd.f32 %v2780_v18, %v8290_v3 }
 0x365   : > { %v4591_v55 = vmul.f32 %v4517_v61, %v4263_v14  ;;  %v8026_v60 = vpop.f32.mrf.mxu3 }
 0x366   : > { %v3586_v22 = vpop.f32.mrf.mxu2 }
 0x367   : > { %v4631_v43 = vadd.f32 %v4630_v12, %v4591_v55  ;;  %v4679_v50 = vmul.f32 %v4591_v55, %v4263_v14  ;;  %v3700_v32 = vadd.f32 %v7999_v17, %v3586_v22  ;;  %v4532_v12 = vpop.permute.xlu2 %4531  ;;  %v8297_v22 = vld [vmem:[#allocation10_spill] sm:$0xff] }
 0x368   : > { %v2782_v0 = vpop.f32.mrf.mxu1 }
 0x369   : > { %v4719_v42 = vadd.f32 %v4718_v26, %v4679_v50  ;;  %v3754_v37 = vadd.f32 %v3700_v32, %v2834_v8  ;;  %v2783_v24 = vadd.f32 %v2782_v0, %v8291_v10  ;;  %v8296_v26 = vld [vmem:[#allocation34_spill] sm:$0xff]  ;;  %v4537_v50 = vpop.permute.xlu0 %4536 }
 0x36b   : > { %v4212_v15 = vpop.f32.mrf.mxu0  ;;  %v4264_v52 = vadd.f32 %v4209_v48, %v3754_v37  ;;  %v2835_v9 = vadd.f32 %v2783_v24, %v8292_v16 }
 0x36d   : > { %v4592_v45 = vmul.f32 %v4522_v30, %v4264_v52  ;;  %v5869_v28 = vpack.c.bf16 %v4264_v52, %v4263_v14  ;;  %v8032_v53 = vpop.f32.mrf.mxu3 }
 0x36e   : > { %v3589_v58 = vpop.f32.mrf.mxu2 }
 0x36f   : > { %v4632_v6 = vadd.f32 %v4631_v43, %v4592_v45  ;;  %v4680_v1 = vmul.f32 %v4592_v45, %v4264_v52  ;;  %5906 = vst [vmem:[%s7457_s25 + $0x80] sm:$0xff] %v5869_v28   ;;  %v3703_v17 = vadd.f32 %v8004_v19, %v3589_v58  ;;  %v8299_v45 = vld [vmem:[#allocation28_spill] sm:$0xff]  ;;  %v4542_v58 = vpop.permute.xlu1 %4541 }
 0x370   : > { %v2784_v54 = vpop.f32.mrf.mxu1 }
 0x371   : > { %v4720_v7 = vadd.f32 %v4719_v42, %v4680_v1  ;;  %v3755_v25 = vadd.f32 %v3703_v17, %v2835_v9  ;;  %v2785_v57 = vadd.f32 %v2784_v54, %v8293_v36  ;;  %v8298_v42 = vld [vmem:[#allocation31_spill] sm:$0xff]  ;;  %v8300_v54 = vld [vmem:[#allocation14_spill] sm:$0xff] }
 0x373   : > { %v4214_v44 = vpop.f32.mrf.mxu0  ;;  %v4265_v27 = vadd.f32 %v4212_v15, %v3755_v25  ;;  %v2836_v29 = vadd.f32 %v2785_v57, %v8294_v59 }
 0x375   : > { %v4593_v46 = vmul.f32 %v4527_v41, %v4265_v27  ;;  %v8037_v19 = vpop.f32.mrf.mxu3  ;;  %v8301_v41 = vld [vmem:[#allocation16_spill] sm:$0xff] }
 0x376   : > { %v3591_v20 = vpop.f32.mrf.mxu2 }
 0x377   : > { %v4633_v35 = vadd.f32 %v4632_v6, %v4593_v46  ;;  %v4681_v51 = vmul.f32 %v4593_v46, %v4265_v27  ;;  %v3705_v56 = vadd.f32 %v8010_v31, %v3591_v20  ;;  %v4547_v20 = vpop.permute.xlu2 %4546 }
 0x378   : > { %v2787_v13 = vpop.f32.mrf.mxu1 }
 0x379   : > { %v4721_v34 = vadd.f32 %v4720_v7, %v4681_v51  ;;  %v3756_v63 = vadd.f32 %v3705_v56, %v2836_v29  ;;  %v2788_v47 = vadd.f32 %v2787_v13, %v8295_v5  ;;  %v8302_v56 = vld [vmem:[#allocation36_spill] sm:$0xff] }
 0x37b   : > { %v4217_v40 = vpop.f32.mrf.mxu0  ;;  %v4266_v38 = vadd.f32 %v4214_v44, %v3756_v63  ;;  %v2837_v4 = vadd.f32 %v2788_v47, %v8296_v26  ;;  %v8303_v47 = vld [vmem:[#allocation32_spill] sm:$0xff] }
 0x37d   : > { %v4594_v2 = vmul.f32 %v4532_v12, %v4266_v38  ;;  %v5874_v33 = vpack.c.bf16 %v4266_v38, %v4265_v27  ;;  %v3719_v48 = vpop.f32.mrf.mxu3 }
 0x37e   : > { %v3594_v11 = vpop.f32.mrf.mxu2 }
 0x37f   : > { %v4634_v23 = vadd.f32 %v4633_v35, %v4594_v2  ;;  %v4682_v39 = vmul.f32 %v4594_v2, %v4266_v38  ;;  %5907 = vst [vmem:[%s7457_s25 + $0x88] sm:$0xff] %v5874_v33   ;;  %v3708_v31 = vadd.f32 %v8015_v21, %v3594_v11  ;;  %v4552_v2 = vpop.permute.xlu0 %4551 }
 0x380   : > { %v2789_v14 = vpop.f32.mrf.mxu1 }
 0x381   : > { %v4722_v49 = vadd.f32 %v4721_v34, %v4682_v39  ;;  %v3757_v18 = vadd.f32 %v3708_v31, %v2837_v4  ;;  %v2790_v43 = vadd.f32 %v2789_v14, %v8297_v22  ;;  %v8304_v4 = vld [vmem:[#allocation20_spill] sm:$0xff] }
 0x383   : > { %v4219_v61 = vpop.f32.mrf.mxu0  ;;  %v4267_v55 = vadd.f32 %v4217_v40, %v3757_v18  ;;  %v2838_v37 = vadd.f32 %v2790_v43, %v8298_v42 }
 0x385   : > { %v4595_v3 = vmul.f32 %v4537_v50, %v4267_v55 }
 0x386   : > { %v3596_v8 = vpop.f32.mrf.mxu2 }
 0x387   : > { %v4635_v32 = vadd.f32 %v4634_v23, %v4595_v3  ;;  %v4683_v0 = vmul.f32 %v4595_v3, %v4267_v55  ;;  %v3710_v15 = vadd.f32 %v8021_v62, %v3596_v8 }
 0x388   : > { %v2792_v52 = vpop.f32.mrf.mxu1 }
 0x389   : > { %v4723_v21 = vadd.f32 %v4722_v49, %v4683_v0  ;;  %v3758_v10 = vadd.f32 %v3710_v15, %v2838_v37  ;;  %v2793_v28 = vadd.f32 %v2792_v52, %v8299_v45 }
 0x38b   : > { %v4222_v24 = vpop.f32.mrf.mxu0  ;;  %v4268_v30 = vadd.f32 %v4219_v61, %v3758_v10  ;;  %v2839_v7 = vadd.f32 %v2793_v28, %v8300_v54 }
 0x38d   : > { %v4596_v6 = vmul.f32 %v4542_v58, %v4268_v30  ;;  %v5879_v1 = vpack.c.bf16 %v4268_v30, %v4267_v55  ;;  %v4557_v55 = vpop.permute.xlu1 %4556 }
 0x38e   : > { %v3599_v16 = vpop.f32.mrf.mxu2 }
 0x38f   : > { %v4636_v9 = vadd.f32 %v4635_v32, %v4596_v6  ;;  %v4684_v17 = vmul.f32 %v4596_v6, %v4268_v30  ;;  %5908 = vst [vmem:[%s7457_s25 + $0x90] sm:$0xff] %v5879_v1   ;;  %v3713_v25 = vadd.f32 %v8026_v60, %v3599_v16 }
 0x390   : > { %v2794_v44 = vpop.f32.mrf.mxu1 }
 0x391   : > { %v4724_v62 = vadd.f32 %v4723_v21, %v4684_v17  ;;  %v3759_v27 = vadd.f32 %v3713_v25, %v2839_v7  ;;  %v2795_v46 = vadd.f32 %v2794_v44, %v8301_v41 }
 0x393   : > { %v4224_v36 = vpop.f32.mrf.mxu0  ;;  %v4269_v57 = vadd.f32 %v4222_v24, %v3759_v27  ;;  %v2840_v13 = vadd.f32 %v2795_v46, %v8302_v56 }
 0x395   : > { %v4597_v35 = vmul.f32 %v4547_v20, %v4269_v57 }
 0x396   : > { %v3601_v51 = vpop.f32.mrf.mxu2 }
 0x397   : > { %v4637_v59 = vadd.f32 %v4636_v9, %v4597_v35  ;;  %v4685_v29 = vmul.f32 %v4597_v35, %v4269_v57  ;;  %v3715_v34 = vadd.f32 %v8032_v53, %v3601_v51 }
 0x398   : > { %v2797_v63 = vpop.f32.mrf.mxu1 }
 0x399   : > { %v4725_v40 = vadd.f32 %v4724_v62, %v4685_v29  ;;  %v3760_v60 = vadd.f32 %v3715_v34, %v2840_v13  ;;  %v2798_v12 = vadd.f32 %v2797_v63, %v8303_v47 }
 0x39b   : > { %v4227_v38 = vpop.f32.mrf.mxu0  ;;  %v4270_v5 = vadd.f32 %v4224_v36, %v3760_v60  ;;  %v2841_v31 = vadd.f32 %v2798_v12, %v8304_v4 }
 0x39d   : > { %v4598_v33 = vmul.f32 %v4552_v2, %v4270_v5  ;;  %v5884_v11 = vpack.c.bf16 %v4270_v5, %v4269_v57 }
 0x39e   : > { %v3604_v23 = vpop.f32.mrf.mxu2 }
 0x39f   : > { %v4638_v39 = vadd.f32 %v4637_v59, %v4598_v33  ;;  %v4686_v26 = vmul.f32 %v4598_v33, %v4270_v5  ;;  %5909 = vst [vmem:[%s7457_s25 + $0x98] sm:$0xff] %v5884_v11   ;;  %v3718_v48 = vadd.f32 %v8037_v19, %v3604_v23 }
 0x3a0   : > { %v2799_v53 = vpop.f32.mrf.mxu1 }
 0x3a1   : > { %v4726_v14 = vadd.f32 %v4725_v40, %v4686_v26  ;;  %v3761_v49 = vadd.f32 %v3718_v48, %v2841_v31 }
 0x3a3   : > { %v4229_v18 = vpop.f32.mrf.mxu0  ;;  %v4271_v61 = vadd.f32 %v4227_v38, %v3761_v49 }
 0x3a5   : > { %v4599_v22 = vmul.f32 %v4557_v55, %v4271_v61  ;;  %v4775_v43 = vpack.c.bf16 %v4271_v61, %v4271_v61 }
 0x3a6   : > { %v3606_v50 = vpop.f32.mrf.mxu2 }
 0x3a7   : > { %v4639_v3 = vadd.f32 %v4638_v39, %v4599_v22  ;;  %v4687_v8 = vmul.f32 %v4599_v22, %v4271_v61  ;;  %4816 = vst [vmem:[%s7457_s25 + $0xa0] sm:$0xf] %v4775_v43 }
 0x3a9   : > { %v4640_v32 = vrot.slane %v4639_v3, 4  ;;  %v4727_v0 = vadd.f32 %v4726_v14, %v4687_v8 }
 0x3ab   : > { %v4641_v42 = vadd.f32 %v4640_v32, %v4639_v3  ;;  %v4728_v37 = vrot.slane %v4727_v0, 4 }
 0x3ad   : > { %v4642_v15 = vrot.slane %v4641_v42, 2  ;;  %v4729_v52 = vadd.f32 %v4728_v37, %v4727_v0 }
 0x3af   : > { %v4643_v19 = vadd.f32 %v4642_v15, %v4641_v42  ;;  %v4730_v21 = vrot.slane %v4729_v52, 2 }
 0x3b1   : > { %v4644_v10 = vrot.slane %v4643_v19, 1  ;;  %v4731_v24 = vadd.f32 %v4730_v21, %v4729_v52 }
 0x3b3   : > { %v4645_v30 = vadd.f32 %v4644_v10, %v4643_v19  ;;  %v4732_v45 = vrot.slane %v4731_v24, 1 }
 0x3b5   : > { %4646 = vst [vmem:[%s262_s28] sm:$0x1] %v4645_v30  ;;  %v4733_v28 = vadd.f32 %v4732_v45, %v4731_v24 }
 0x3b7   : > { %4734 = vst [vmem:[%s262_s28 + $0x1] sm:$0x1] %v4733_v28 }
 0x3b8 PF: > { %s17_s21 = sadd.s32 1, %s5967_s21  }
 0x3b9   : > { %p14_p4 = scmp.ge.s32.totalorder %s17_s21, 4  }
 0x3bb   :  { %16 = sbr.rel (!%p14_p4) target bundleno = 1 (0x1), region = 82 }

// kernel: basic_block_forward.4
= control target key start
LH: loop header
LB: loop body
LE: loop exit
PB: predicated region body
PF: predicated region fallthrough
CT: control target
= control target key end

     0   :  { %s6927_s21 = smov 0   ;;  %s9328_s0 = inlined_call_operand.vmem [shape: bf16[2,328,128], index: 0, kind: input, shape index: {}]   ;;  %s9329_s1 = inlined_call_operand.vmem [shape: f32[328,1], index: 1, kind: input, shape index: {}]   ;;  %s9330_s2 = inlined_call_operand.vmem [shape: f32[1,128], index: 2, kind: input, shape index: {}]   ;;  %s9331_s3 = inlined_call_operand.vmem [shape: f32[1,128], index: 3, kind: input, shape index: {}]   ;;  %s9332_s4 = inlined_call_operand.vmem [shape: bf16[1152,128], index: 4, kind: input, shape index: {}]   ;;  %s9333_s5 = inlined_call_operand.vmem [shape: bf16[2,328,128], index: 5, kind: output, shape index: {0}]   ;;  %s9334_s6 = inlined_call_operand.vmem [shape: f32[2,2,128], index: 6, kind: output, shape index: {1}]  }
   0x1 LB: > { %s5714_s22 = sadd.s32 4294967295, %s6889_s21   ;;  %p5718_p0 = scmp.ge.s32.totalorder %s6889_s21, 1  ;;  %s6889_s21 = sphi %s6927_s21, %s17_s21  }
   0x2   : > { %p215_p1 = scmp.lt.s32.totalorder %s6889_s21, 3 }
   0x4   : > { %p216_p2 = pnand %p5718_p0, %p215_p1 }
   0x6   : > { %219 = sbr.rel (%p216_p2) target bundleno = 1080 (0x438), region = 40 }
   0xb   : > { %v287_v0 = vld [vmem:[%s9329_s1 + $0xb8] sm:$0xff]  ;;  %v285_v1 = vld [vmem:[%s9329_s1 + $0xa8] sm:$0xff]  ;;  %v274_v2 = vld [vmem:[%s9329_s1 + $0x50] sm:$0xff]  ;;  %v6891_v3 = vmov 0   ;;  %p249_p3 = scmp.lt.s32.totalorder %s5714_s22, 1  ;;  %vm766_vm3 = vcmask 1041408  }
   0xc   : > { %6861 = vset.pattern.permute.xlu2 %v6891_v3  ;;  %764 = vst [vmem:[#allocation3] sm:$0xf] %v6891_v3  ;;  %6860 = vset.pattern.permute.xlu1 %v6891_v3  ;;  %v273_v4 = vld [vmem:[%s9329_s1 + $0x48] sm:$0xff]  ;;  %v286_v5 = vld [vmem:[%s9329_s1 + $0xb0] sm:$0xff]  ;;  %v275_v6 = vld [vmem:[%s9329_s1 + $0x58] sm:$0xff]  ;;  %vm1266_vm5 = vcmask 1043457  }
   0xd   : > { %765 = vst [vmem:[#allocation3 + $0x4] sm:$0xf] %v6891_v3  ;;  %6859 = vset.pattern.permute.xlu0 %v6891_v3  ;;  %635 = vperm.xlu1 %6860, %v287_v0   ;;  %v289_v7 = vld [vmem:[%s9329_s1 + $0xc8] sm:$0xff]  ;;  %v288_v8 = vld [vmem:[%s9329_s1 + $0xc0] sm:$0xff]  ;;  %v291_v13 = vld [vmem:[%s9329_s1 + $0xd8] sm:$0xff]  ;;  %s9774_s22 = smov (!%p249_p3, %s5714_s22), 1 }
   0xe   : > { %1318 = vst [vmem:[#allocation3 + $0xb0] sm:$0xf] %v6891_v3  ;;  %625 = vperm.xlu0 %6859, %v285_v1   ;;  %570 = vperm.xlu2 %6861, %v274_v2   ;;  %v276_v9 = vld [vmem:[%s9329_s1 + $0x60] sm:$0xff]  ;;  %v277_v11 = vld [vmem:[%s9329_s1 + $0x68] sm:$0xff]  ;;  %v290_v14 = vld [vmem:[%s9329_s1 + $0xd0] sm:$0xff]  ;;  %s6849_s9 = smul.u32 164, %s9774_s22 }
   0xf   : > { %1319 = vst [vmem:[#allocation3 + $0xb4] sm:$0x7] %v6891_v3  ;;  %v264_v10 = vld [vmem:[%s9329_s1] sm:$0xff]  ;;  %v265_v12 = vld [vmem:[%s9329_s1 + $0x8] sm:$0xff]  ;;  %v278_v15 = vld [vmem:[%s9329_s1 + $0x70] sm:$0xff]  ;;  %vm2308_vm8 = vcmask 1046528  }
  0x10   : > { %v266_v16 = vld [vmem:[%s9329_s1 + $0x10] sm:$0xff]  ;;  %v279_v17 = vld [vmem:[%s9329_s1 + $0x78] sm:$0xff]  ;;  %v297_v19 = vld [vmem:[%s9329_s1 + $0x108] sm:$0xff]  ;;  %s7037_s18 = scalar_lea.vmem %s9328_s0, %s6849_s9  ;;  %vm767_vm0 = vsmask.f32 1280  ;;  %vm4290_vm11 = vcmask 1045504   ;;  %s9021_s8 = scalar_lea.vmem %s9333_s5, %s6849_s9 }
  0x11   : > { %v267_v18 = vld [vmem:[%s9329_s1 + $0x18] sm:$0xff]  ;;  %v292_v20 = vld [vmem:[%s9329_s1 + $0xe0] sm:$0xff]  ;;  %v298_v21 = vld [vmem:[%s9329_s1 + $0x110] sm:$0xff]  ;;  %vm813_vm1 = vsmask.f32 5392  ;;  %vm5023_vm12 = vcmask 1044480  }
  0x12   : > { %v299_v22 = vld [vmem:[%s9329_s1 + $0x118] sm:$0xff]  ;;  %v293_v23 = vld [vmem:[%s9329_s1 + $0xe8] sm:$0xff]  ;;  %v280_v24 = vld [vmem:[%s9329_s1 + $0x80] sm:$0xff]  ;;  %vm1267_vm6 = vsmask.f32 7942  ;;  %s5721_s9 = sshll.u32 %s9774_s22, 1 }
  0x13   : > { %v268_v25 = vld [vmem:[%s9329_s1 + $0x20] sm:$0xff]  ;;  %v281_v26 = vld [vmem:[%s9329_s1 + $0x88] sm:$0xff]  ;;  %v294_v29 = vld [vmem:[%s9329_s1 + $0xf0] sm:$0xff]  ;;  %vm1489_vm9 = vsmask.f32 7424  ;;  %s262_s12 = scalar_lea.vmem %s9334_s6, %s5721_s9 }
  0x14   : > { %v269_v27 = vld [vmem:[%s9329_s1 + $0x28] sm:$0xff]  ;;  %v300_v28 = vld [vmem:[%s9329_s1 + $0x120] sm:$0xff]  ;;  %v295_v30 = vld [vmem:[%s9329_s1 + $0xf8] sm:$0xff]  ;;  %vm3176_vm10 = vsmask.f32 6400 }
  0x15   : > { %565 = vperm.xlu1 %6860, %v273_v4   ;;  %v6781_v31 = vld [vmem:[%s7037_s18 + $0x28] sm:$0xff]   ;;  %v282_v33 = vld [vmem:[%s9329_s1 + $0x90] sm:$0xff]  ;;  %v283_v35 = vld [vmem:[%s9329_s1 + $0x98] sm:$0xff] }
  0x16   : > { %630 = vperm.xlu0 %6859, %v286_v5   ;;  %575 = vperm.xlu2 %6861, %v275_v6   ;;  %v6611_v32 = vunpack.c.l.bf16 %v6781_v31  ;;  %v301_v34 = vld [vmem:[%s9329_s1 + $0x128] sm:$0xff]  ;;  %v7052_v36 = vld [vmem:[%s9330_s2] ss:$0 sm:$0xff]  ;;  %v6443_v38 = vld [vmem:[%s9332_s4 + $0x38] sm:$0xff]  ;;  %v6612_v41 = vunpack.c.h.bf16 %v6781_v31 }
  0x17   : > { %v7061_v39 = vld [vmem:[%s9331_s3] ss:$0 sm:$0xff]  ;;  %1806 = vmatpush.bf16.msra.mxu0 %v6443_v38  ;;  %6824 = vmatpush.bf16.msra.mxu1 %v6443_v38  ;;  %v271_v42 = vld [vmem:[%s9329_s1 + $0x38] sm:$0xff]  ;;  %v6442_v43 = vld [vmem:[%s9332_s4 + $0x30] sm:$0xff] }
  0x18   : > { %v401_v37 = vmul.f32 %v7052_v36, %v6611_v32  ;;  %6825 = vmatpush.bf16.msra.mxu2 %v6443_v38  ;;  %6826 = vmatpush.bf16.msra.mxu3 %v6443_v38  ;;  %v270_v44 = vld [vmem:[%s9329_s1 + $0x30] sm:$0xff]  ;;  %v296_v45 = vld [vmem:[%s9329_s1 + $0x100] sm:$0xff]  ;;  %v402_v49 = vmul.f32 %v7052_v36, %v6612_v41  ;;  %v6787_v50 = vld [vmem:[%s7037_s18 + $0x58] sm:$0xff]  }
  0x19   : > { %v6786_v46 = vld [vmem:[%s7037_s18 + $0x50] sm:$0xff]   ;;  %v6441_v52 = vld [vmem:[%s9332_s4 + $0x28] sm:$0xff]  ;;  %v6636_v57 = vunpack.c.h.bf16 %v6787_v50  ;;  %v7091_v58 = vld [vmem:[%s7037_s18] sm:$0xff]   ;;  %v6635_v4 = vunpack.c.l.bf16 %v6787_v50 }
  0x1a   : > { %v446_v40 = vadd.f32 %v7061_v39, %v401_v37  ;;  %v7078_v47 = vld [vmem:[%s7037_s18 + $0x30] sm:$0xff]   ;;  %v6632_v51 = vunpack.c.h.bf16 %v6786_v46  ;;  %v447_v56 = vadd.f32 %v7061_v39, %v402_v49  ;;  %v284_v59 = vld [vmem:[%s9329_s1 + $0xa0] sm:$0xff]  ;;  %v6592_v3 = vunpack.c.h.bf16 %v7091_v58  ;;  %v7112_v5 = vld [vmem:[%s7037_s18 + $0x38] sm:$0xff]  }
  0x1b   : > { %1807 = vmatpush.bf16.msra.mxu0 %v6442_v43  ;;  %6827 = vmatpush.bf16.msra.mxu1 %v6442_v43  ;;  %v6615_v53 = vunpack.c.l.bf16 %v7078_v47  ;;  %v6440_v61 = vld [vmem:[%s9332_s4 + $0x20] sm:$0xff]  ;;  %v302_v63 = vld [vmem:[%s9329_s1 + $0x130] sm:$0xff]  ;;  %v303_v32 = vld [vmem:[%s9329_s1 + $0x138] sm:$0xff]  ;;  %v6616_v41 = vunpack.c.h.bf16 %v7078_v47  ;;  %v6591_v50 = vunpack.c.l.bf16 %v7091_v58 }
  0x1c   : > { %v487_v48 = vmax.f32 %v446_v40, 0.0  ;;  %6828 = vmatpush.bf16.msra.mxu2 %v6442_v43  ;;  %6829 = vmatpush.bf16.msra.mxu3 %v6442_v43  ;;  %v412_v60 = vmul.f32 %v7052_v36, %v6632_v51  ;;  %v272_v0 = vld [vmem:[%s9329_s1 + $0x40] sm:$0xff]  ;;  %vm7178_vm2 = vmor %vm767_vm0, %vm813_vm1 }
  0x1d   : > { %645 = vperm.xlu1 %6860, %v289_v7   ;;  %v403_v1 = vmul.f32 %v7052_v36, %v6615_v53  ;;  %v7108_v2 = vld [vmem:[%s7037_s18 + $0x20] sm:$0xff]   ;;  %vm7201_vm4 = vmand %vm766_vm3, %vm767_vm0 }
  0x1e   : > { %640 = vperm.xlu0 %6859, %v288_v8   ;;  %580 = vperm.xlu2 %6861, %v276_v9   ;;  %v488_v8 = vmax.f32 %v447_v56, 0.0  ;;  %v414_v9 = vmul.f32 %v7052_v36, %v6636_v57  ;;  %vm7403_vm7 = vmand %vm1266_vm5, %vm1267_vm6 }
  0x1f   : > { %1808 = vmatpush.bf16.msra.mxu0 %v6441_v52  ;;  %6830 = vmatpush.bf16.msra.mxu1 %v6441_v52 }
  0x20   : > { %6831 = vmatpush.bf16.msra.mxu2 %v6441_v52  ;;  %6832 = vmatpush.bf16.msra.mxu3 %v6441_v52 }
  0x23   : > { %1809 = vmatpush.bf16.msra.mxu0 %v6440_v61  ;;  %6833 = vmatpush.bf16.msra.mxu1 %v6440_v61 }
  0x24   : > { %6834 = vmatpush.bf16.msra.mxu2 %v6440_v61  ;;  %6835 = vmatpush.bf16.msra.mxu3 %v6440_v61  ;;  %v404_v61 = vmul.f32 %v7052_v36, %v6616_v41 }
  0x25   : > { %520 = vperm.xlu1 %6860, %v264_v10   ;;  %v7116_v10 = vadd.f32 %v7061_v39, %v412_v60 }
  0x26   : > { %585 = vperm.xlu0 %6859, %v277_v11   ;;  %525 = vperm.xlu2 %6861, %v265_v12   ;;  %v6608_v11 = vunpack.c.h.bf16 %v7108_v2 }
  0x2d   : > { %655 = vperm.xlu1 %6860, %v291_v13  }
  0x2e   : > { %650 = vperm.xlu0 %6859, %v290_v14   ;;  %590 = vperm.xlu2 %6861, %v278_v15   ;;  %v448_v14 = vadd.f32 %v7061_v39, %v403_v1  ;;  %v6619_v15 = vunpack.c.l.bf16 %v7112_v5  ;;  %v6789_v1 = vld [vmem:[%s7037_s18 + $0x68] sm:$0xff]  }
  0x35   : > { %530 = vperm.xlu1 %6860, %v266_v16   ;;  %v6788_v16 = vld [vmem:[%s7037_s18 + $0x60] sm:$0xff]  }
  0x36   : > { %595 = vperm.xlu0 %6859, %v279_v17   ;;  %535 = vperm.xlu2 %6861, %v267_v18   ;;  %v6439_v17 = vld [vmem:[%s9332_s4 + $0x18] sm:$0xff] }
  0x37   : > { %1810 = vmatpush.bf16.msra.mxu0 %v6439_v17  ;;  %6836 = vmatpush.bf16.msra.mxu1 %v6439_v17 }
  0x38   : > { %6837 = vmatpush.bf16.msra.mxu2 %v6439_v17  ;;  %6838 = vmatpush.bf16.msra.mxu3 %v6439_v17 }
  0x3d   : > { %685 = vperm.xlu1 %6860, %v297_v19   ;;  %v392_v19 = vmul.f32 %v7052_v36, %v6592_v3  ;;  %v7192_v3 = vld [vmem:[%s7037_s18 + $0x40] sm:$0xff]  }
  0x3e   : > { %660 = vperm.xlu0 %6859, %v292_v20   ;;  %690 = vperm.xlu2 %6861, %v298_v21   ;;  %v413_v20 = vmul.f32 %v7052_v36, %v6635_v4 }
  0x3f   : > { %v7154_v37 = vadd.f32 %v7061_v39, %v392_v19 }
  0x40   : > { %v7157_v38 = vadd.f32 %v7061_v39, %v413_v20  ;;  %v7219_v20 = vadd.f32 %v7061_v39, %v404_v61 }
  0x41   : > { %v478_v58 = vmax.f32 %v7154_v37, 0.0 }
  0x45   : > { %695 = vperm.xlu1 %6860, %v299_v22   ;;  %v7131_v22 = vadd.f32 %v7061_v39, %v414_v9  ;;  %v391_v9 = vmul.f32 %v7052_v36, %v6591_v50 }
  0x46   : > { %665 = vperm.xlu0 %6859, %v293_v23   ;;  %600 = vperm.xlu2 %6861, %v280_v24   ;;  %v7134_v23 = vld [vmem:[%s7037_s18 + $0x8] sm:$0xff]   ;;  %v304_v24 = vld [vmem:[%s9329_s1 + $0x140] sm:$0xff] }
  0x47   : > { %v6596_v40 = vunpack.c.h.bf16 %v7134_v23 }
  0x49   : > { %v394_v60 = vmul.f32 %v7052_v36, %v6596_v40 }
  0x4b   : > { %v7216_v19 = vadd.f32 %v7061_v39, %v394_v60 }
  0x4d   : > { %540 = vperm.xlu1 %6860, %v268_v25   ;;  %v498_v25 = vmax.f32 %v7116_v10, 0.0  ;;  %v480_v50 = vmax.f32 %v7216_v19, 0.0 }
  0x4e   : > { %605 = vperm.xlu0 %6859, %v281_v26   ;;  %545 = vperm.xlu2 %6861, %v269_v27   ;;  %v400_v26 = vmul.f32 %v7052_v36, %v6608_v11  ;;  %v6639_v27 = vunpack.c.l.bf16 %v6788_v16  ;;  %v6643_v11 = vunpack.c.l.bf16 %v6789_v1 }
  0x50   : > { %v7164_v46 = vadd.f32 %v7061_v39, %v400_v26 }
  0x52   : > { %v486_v17 = vmax.f32 %v7164_v46, 0.0 }
  0x55   : > { %700 = vperm.xlu1 %6860, %v300_v28   ;;  %v6640_v28 = vunpack.c.h.bf16 %v6788_v16  ;;  %v6623_v16 = vunpack.c.l.bf16 %v7192_v3 }
  0x56   : > { %670 = vperm.xlu0 %6859, %v294_v29   ;;  %675 = vperm.xlu2 %6861, %v295_v30   ;;  %v7142_v29 = vld [vmem:[%s7037_s18 + $0x88] sm:$0xff]  }
  0x57   : > { %v416_v49 = vmul.f32 %v7052_v36, %v6640_v28 }
  0x5d   : > { %610 = vperm.xlu1 %6860, %v282_v33   ;;  %v489_v33 = vmax.f32 %v448_v14, 0.0 }
  0x5e   : > { %705 = vperm.xlu0 %6859, %v301_v34   ;;  %615 = vperm.xlu2 %6861, %v283_v35   ;;  %v405_v34 = vmul.f32 %v7052_v36, %v6619_v15  ;;  %v6438_v35 = vld [vmem:[%s9332_s4 + $0x10] sm:$0xff]  ;;  %v6436_v15 = vld [vmem:[%s9332_s4] sm:$0xff] }
  0x5f   : > { %1811 = vmatpush.bf16.msra.mxu0 %v6438_v35  ;;  %6839 = vmatpush.bf16.msra.mxu1 %v6438_v35 }
  0x60   : > { %v7171_v53 = vadd.f32 %v7061_v39, %v405_v34  ;;  %6840 = vmatpush.bf16.msra.mxu2 %v6438_v35  ;;  %6841 = vmatpush.bf16.msra.mxu3 %v6438_v35  ;;  %v6416_v34 = vld [vmem:[#allocation3] sm:$0xff]  ;;  %v417_v35 = vmul.f32 %v7052_v36, %v6643_v11 }
  0x65   : > { %555 = vperm.xlu1 %6860, %v271_v42  }
  0x66   : > { %550 = vperm.xlu0 %6859, %v270_v44   ;;  %680 = vperm.xlu2 %6861, %v296_v45   ;;  %v500_v44 = vmax.f32 %v7131_v22, 0.0  ;;  %v6659_v45 = vunpack.c.l.bf16 %v7142_v29 }
  0x68   : > { %v7086_v54 = vpop.permute.xlu2 %570 }
  0x69   : > { %9437 = vst [vmem:[#allocation4_spill] sm:$0xff] %v7086_v54  ;;  %v733_v55 = vmul.f32 %v7086_v54, %v487_v48  ;;  %v415_v48 = vmul.f32 %v7052_v36, %v6639_v27  ;;  %v491_v27 = vmax.f32 %v7171_v53, 0.0 }
  0x6b   : > { %v782_v62 = vpack.c.bf16 %v733_v55, %v733_v55  ;;  %v6437_v55 = vld [vmem:[%s9332_s4 + $0x8] sm:$0xff]  ;;  %v7195_v4 = vadd.f32 %v7061_v39, %v415_v48 }
  0x6c   : > { %1812 = vmatpush.bf16.msra.mxu0 %v6437_v55  ;;  %6842 = vmatpush.bf16.msra.mxu1 %v6437_v55 }
  0x6d   : > { %v915_v6 = vshrl.u32 %v782_v62, 16  ;;  %v918_v7 = vshll.u32 %v782_v62, 16  ;;  %620 = vperm.xlu1 %6860, %v284_v59   ;;  %v499_v59 = vmax.f32 %v7157_v38, 0.0  ;;  %6843 = vmatpush.bf16.msra.mxu2 %v6437_v55 }
  0x6e   : > { %710 = vperm.xlu0 %6859, %v302_v63   ;;  %560 = vperm.xlu2 %6861, %v272_v0   ;;  %v425_v0 = vmul.f32 %v7052_v36, %v6659_v45 }
  0x6f   : > { %v917_v12 = vrot.slane %v915_v6, 6  ;;  %v920_v13 = vrot.slane %v918_v7, 7  ;;  %v7198_v6 = vadd.f32 %v7061_v39, %v416_v49  ;;  %6844 = vmatpush.bf16.msra.mxu3 %v6437_v55 }
  0x70   : > { %v7125_v18 = vpop.permute.xlu2 %575  ;;  %v7223_v28 = vadd.f32 %v7061_v39, %v425_v0  ;;  %1813 = vmatpush.bf16.msra.mxu0 %v6436_v15  ;;  %6845 = vmatpush.bf16.msra.mxu1 %v6436_v15 }
  0x71   : > { %9438 = vst [vmem:[#allocation5_spill] sm:$0xff] %v7125_v18  ;;  %v734_v21 = vmul.f32 %v7125_v18, %v488_v8  ;;  %v7144_v30 = vor.u32 %v920_v13, %v917_v12  ;;  %v769_v8 = vld [vmem:[#allocation3 + $0x8] sm:$0x3]  ;;  %6846 = vmatpush.bf16.msra.mxu2 %v6436_v15 }
  0x72   : > { %v770_v14 = vsel %vm7201_vm4, 0, %v769_v8  ;;  %v511_v55 = vmax.f32 %v7223_v28, 0.0 }
  0x73   : > { %v783_v31 = vpack.c.bf16 %v734_v21, %v734_v21  ;;  %v923_v47 = vrot.slane %v7144_v30, 4  ;;  %v6644_v21 = vunpack.c.h.bf16 %v6789_v1  ;;  %771 = vst [vmem:[#allocation3 + $0x8] sm:$0x3] %v770_v14  ;;  %6847 = vmatpush.bf16.msra.mxu3 %v6436_v15  ;;  %1814 = vmatmul.bf16.vlgmr.msra.gmra.mxu0 %v6416_v34 }
  0x75   : > { %v925_v42 = vshrl.u32 %v783_v31, 16  ;;  %v928_v43 = vshll.u32 %v783_v31, 16  ;;  %720 = vperm.xlu1 %6860, %v304_v24   ;;  %v501_v31 = vmax.f32 %v7195_v4, 0.0 }
  0x76   : > { %715 = vperm.xlu0 %6859, %v303_v32   ;;  %v502_v32 = vmax.f32 %v7198_v6, 0.0 }
  0x77   : > { %v927_v51 = vrot.slane %v925_v42, 6  ;;  %v930_v52 = vrot.slane %v928_v43, 7  ;;  %v407_v43 = vmul.f32 %v7052_v36, %v6623_v16 }
  0x78   : > { %v7182_v57 = vpop.permute.xlu2 %580 }
  0x79   : > { %9441 = vst [vmem:[#allocation6_spill] sm:$0xff] %v7182_v57  ;;  %v931_v62 = vor.u32 %v930_v52, %v927_v51  ;;  %v735_v63 = vmul.f32 %v7182_v57, %v489_v33  ;;  %v7228_v33 = vadd.f32 %v7061_v39, %v391_v9  ;;  %v418_v51 = vmul.f32 %v7052_v36, %v6644_v21 }
  0x7b   : > { %v932_v12 = vsel %vm7178_vm2, %v923_v47, %v931_v62  ;;  %v784_v13 = vpack.c.bf16 %v735_v63, %v735_v63  ;;  %v933_v37 = vrot.slane %v931_v62, 4  ;;  %v490_v47 = vmax.f32 %v7219_v20, 0.0 }
  0x7c   : > { %1282 = vst [vmem:[#allocation3 + $0x34] sm:$0xf] %v932_v12  ;;  %v477_v61 = vmax.f32 %v7228_v33, 0.0  ;;  %v7253_v62 = vadd.f32 %v7061_v39, %v417_v35  ;;  %v6620_v63 = vunpack.c.h.bf16 %v7112_v5  ;;  %v7266_v11 = vadd.f32 %v7061_v39, %v418_v51 }
  0x7d   : > { %v935_v24 = vshrl.u32 %v784_v13, 16  ;;  %v938_v26 = vshll.u32 %v784_v13, 16 }
  0x7e   : > { %v406_v12 = vmul.f32 %v7052_v36, %v6620_v63 }
  0x7f   : > { %v937_v40 = vrot.slane %v935_v24, 6  ;;  %v940_v41 = vrot.slane %v938_v26, 7  ;;  %v7231_v42 = vpop.permute.xlu1 %635 }
  0x80   : > { %9444 = vst [vmem:[#allocation7_spill] sm:$0xff] %v7231_v42  ;;  %v746_v45 = vmul.f32 %v7231_v42, %v500_v44  ;;  %v7237_v48 = vpop.permute.xlu0 %625  ;;  %v7239_v49 = vpop.permute.xlu2 %525  ;;  %v7270_v24 = vadd.f32 %v7061_v39, %v406_v12 }
  0x81   : > { %9445 = vst [vmem:[#allocation8_spill] sm:$0xff] %v7237_v48  ;;  %v7244_v52 = vor.u32 %v940_v41, %v937_v40  ;;  %v744_v22 = vmul.f32 %v7237_v48, %v498_v25  ;;  %v724_v44 = vmul.f32 %v7239_v49, %v478_v58  ;;  %v7260_v25 = vadd.f32 %v7061_v39, %v407_v43  ;;  %v7263_v58 = vld [vmem:[%s7037_s18 + $0x10] sm:$0xff]  }
  0x82   : > { %9446 = vst [vmem:[#allocation9_spill] sm:$0xff] %v7239_v49  ;;  %v795_v60 = vpack.c.bf16 %v746_v45, %v746_v45  ;;  %v6600_v26 = vunpack.c.h.bf16 %v7263_v58 }
  0x83   : > { %v942_v0 = vsel %vm7178_vm2, %v933_v37, %v7244_v52  ;;  %v793_v1 = vpack.c.bf16 %v744_v22, %v744_v22  ;;  %v773_v10 = vpack.c.bf16 %v724_v44, %v724_v44 }
  0x84   : > { %1283 = vst [vmem:[#allocation3 + $0x38] sm:$0xf] %v942_v0  ;;  %v1045_v8 = vshrl.u32 %v795_v60, 16  ;;  %v1048_v9 = vshll.u32 %v795_v60, 16 }
  0x85   : > { %v1025_v5 = vshrl.u32 %v793_v1, 16  ;;  %v1028_v13 = vshll.u32 %v793_v1, 16  ;;  %v825_v14 = vshrl.u32 %v773_v10, 16  ;;  %v828_v15 = vshll.u32 %v773_v10, 16 }
  0x86   : > { %v1047_v16 = vrot.slane %v1045_v8, 6  ;;  %v1050_v21 = vrot.slane %v1048_v9, 7  ;;  %v396_v8 = vmul.f32 %v7052_v36, %v6600_v26  ;;  %v6595_v9 = vunpack.c.l.bf16 %v7134_v23 }
  0x87   : > { %v1027_v34 = vrot.slane %v1025_v5, 6  ;;  %v1030_v35 = vrot.slane %v1028_v13, 7  ;;  %v827_v37 = vrot.slane %v825_v14, 6  ;;  %v830_v40 = vrot.slane %v828_v15, 7  ;;  %v7273_v41 = vpop.permute.xlu1 %565 }
  0x88   : > { %9447 = vst [vmem:[#allocation10_spill] sm:$0xff] %v7273_v41  ;;  %v7275_v43 = vor.u32 %v1050_v21, %v1047_v16  ;;  %v7277_v45 = vpop.permute.xlu0 %630  ;;  %v732_v51 = vmul.f32 %v7273_v41, %v486_v17  ;;  %v7282_v22 = vpop.permute.xlu2 %590  ;;  %v393_v15 = vmul.f32 %v7052_v36, %v6595_v9 }
  0x89   : > { %9448 = vst [vmem:[#allocation11_spill] sm:$0xff] %v7277_v45  ;;  %v745_v0 = vmul.f32 %v7277_v45, %v499_v59  ;;  %v737_v1 = vmul.f32 %v7282_v22, %v491_v27  ;;  %v7297_v12 = vor.u32 %v1030_v35, %v1027_v34  ;;  %v7299_v5 = vor.u32 %v830_v40, %v827_v37  ;;  %v7302_v59 = vld [vmem:[%s7037_s18 + $0x70] sm:$0xff]   ;;  %v6479_v34 = vld [vmem:[%s9332_s4 + $0xb8] sm:$0xff] }
  0x8a   : > { %9449 = vst [vmem:[#allocation12_spill] sm:$0xff] %v7282_v22  ;;  %v781_v17 = vpack.c.bf16 %v732_v51, %v732_v51  ;;  %v1053_v53 = vrot.slane %v7275_v43, 4  ;;  %v7310_v35 = vadd.f32 %v7061_v39, %v396_v8  ;;  %v6647_v37 = vunpack.c.l.bf16 %v7302_v59  ;;  %2477 = vmatpush.bf16.msrb.mxu2 %v6479_v34 }
  0x8b   : > { %v794_v38 = vpack.c.bf16 %v745_v0, %v745_v0  ;;  %v786_v13 = vpack.c.bf16 %v737_v1, %v737_v1 }
  0x8c   : > { %v905_v27 = vshrl.u32 %v781_v17, 16  ;;  %v908_v14 = vshll.u32 %v781_v17, 16  ;;  %v419_v34 = vmul.f32 %v7052_v36, %v6647_v37 }
  0x8d   : > { %v1035_v16 = vshrl.u32 %v794_v38, 16  ;;  %v1038_v21 = vshll.u32 %v794_v38, 16  ;;  %v955_v51 = vshrl.u32 %v786_v13, 16  ;;  %v958_v26 = vshll.u32 %v786_v13, 16 }
  0x8e   : > { %v907_v10 = vrot.slane %v905_v27, 6  ;;  %v910_v23 = vrot.slane %v908_v14, 7  ;;  %v1033_v38 = vrot.slane %v7297_v12, 4 }
  0x8f   : > { %v1037_v40 = vrot.slane %v1035_v16, 6  ;;  %v1040_v0 = vrot.slane %v1038_v21, 7  ;;  %v957_v1 = vrot.slane %v955_v51, 6  ;;  %v960_v17 = vrot.slane %v958_v26, 7  ;;  %v7313_v9 = vpop.permute.xlu1 %645  ;;  %v7327_v16 = vld [vmem:[%s7037_s18 + $0x78] sm:$0xff]  }
  0x90   : > { %9450 = vst [vmem:[#allocation13_spill] sm:$0xff] %v7313_v9  ;;  %v7317_v27 = vor.u32 %v910_v23, %v907_v10  ;;  %v7319_v14 = vpop.permute.xlu0 %640  ;;  %v748_v8 = vmul.f32 %v7313_v9, %v502_v32  ;;  %v7324_v63 = vpop.permute.xlu2 %535  ;;  %v7336_v26 = vadd.f32 %v7061_v39, %v393_v15  ;;  %v6652_v19 = vunpack.c.h.bf16 %v7327_v16 }
  0x91   : > { %9451 = vst [vmem:[#allocation14_spill] sm:$0xff] %v7319_v14  ;;  %v1041_v21 = vor.u32 %v1040_v0, %v1037_v40  ;;  %v747_v51 = vmul.f32 %v7319_v14, %v501_v31  ;;  %v726_v10 = vmul.f32 %v7324_v63, %v480_v50  ;;  %v7339_v32 = vor.u32 %v960_v17, %v957_v1  ;;  %v7349_v17 = vld [vmem:[%s7037_s18 + $0x80] sm:$0xff]  }
  0x92   : > { %9452 = vst [vmem:[#allocation15_spill] sm:$0xff] %v7324_v63  ;;  %v913_v6 = vrot.slane %v7317_v27, 4  ;;  %v797_v23 = vpack.c.bf16 %v748_v8, %v748_v8 }
  0x93   : > { %v1042_v4 = vsel %vm7178_vm2, %v1033_v38, %v1041_v21  ;;  %v1043_v40 = vrot.slane %v1041_v21, 4  ;;  %v796_v31 = vpack.c.bf16 %v747_v51, %v747_v51  ;;  %v775_v1 = vpack.c.bf16 %v726_v10, %v726_v10 }
  0x94   : > { %1293 = vst [vmem:[#allocation3 + $0x60] sm:$0xf] %v1042_v4  ;;  %v922_v50 = vsel %vm7178_vm2, %v913_v6, %v7144_v30  ;;  %v1065_v15 = vshrl.u32 %v797_v23, 16  ;;  %v1068_v0 = vshll.u32 %v797_v23, 16 }
  0x95   : > { %v1052_v37 = vsel %vm7178_vm2, %v1043_v40, %v7275_v43  ;;  %1281 = vst [vmem:[#allocation3 + $0x30] sm:$0xf] %v922_v50  ;;  %v1055_v38 = vshrl.u32 %v796_v31, 16  ;;  %v1058_v8 = vshll.u32 %v796_v31, 16  ;;  %v845_v13 = vshrl.u32 %v775_v1, 16  ;;  %v6451_v40 = vld [vmem:[%s9332_s4 + $0x78] sm:$0xff] }
  0x96   : > { %1294 = vst [vmem:[#allocation3 + $0x64] sm:$0xf] %v1052_v37  ;;  %v1067_v51 = vrot.slane %v1065_v15, 6  ;;  %v1070_v4 = vrot.slane %v1068_v0, 7  ;;  %v848_v60 = vshll.u32 %v775_v1, 16  ;;  %v6656_v50 = vunpack.c.h.bf16 %v7349_v17  ;;  %1919 = vmatpush.bf16.msrb.mxu1 %v6451_v40 }
  0x97   : > { %v1057_v30 = vrot.slane %v1055_v38, 6  ;;  %v1060_v6 = vrot.slane %v1058_v8, 7  ;;  %v7355_v23 = vpop.permute.xlu1 %520  ;;  %v7371_v1 = vadd.f32 %v7061_v39, %v419_v34  ;;  %v422_v37 = vmul.f32 %v7052_v36, %v6652_v19 }
  0x98   : > { %9453 = vst [vmem:[#allocation16_spill] sm:$0xff] %v7355_v23  ;;  %v7363_v21 = vpop.permute.xlu0 %585  ;;  %v7365_v15 = vpop.permute.xlu2 %690  ;;  %v723_v0 = vmul.f32 %v7355_v23, %v477_v61  ;;  %v7374_v8 = vor.u32 %v1070_v4, %v1067_v51  ;;  %v847_v33 = vrot.slane %v845_v13, 6  ;;  %v850_v44 = vrot.slane %v848_v60, 7 }
  0x99   : > { %9454 = vst [vmem:[#allocation17_spill] sm:$0xff] %v7363_v21  ;;  %v1061_v38 = vor.u32 %v1060_v6, %v1057_v30  ;;  %v736_v31 = vmul.f32 %v7363_v21, %v490_v47  ;;  %v757_v10 = vmul.f32 %v7365_v15, %v511_v55  ;;  %v424_v34 = vmul.f32 %v7052_v36, %v6656_v50  ;;  %v6478_v50 = vld [vmem:[%s9332_s4 + $0xb0] sm:$0xff]  ;;  %v1269_v55 = vld [vmem:[#allocation3 + $0x8] sm:$0xe] }
  0x9a   : > { %9455 = vst [vmem:[#allocation18_spill] sm:$0xff] %v7365_v15  ;;  %v772_v61 = vpack.c.bf16 %v723_v0, %v723_v0  ;;  %v7389_v13 = vadd.f32 %v7061_v39, %v422_v37  ;;  %2478 = vmatpush.bf16.msrb.mxu2 %v6478_v50  ;;  %v9463_v15 = vmax.f32 %v7260_v25, 0.0  ;;  %v9464_v50 = vrot.slane %v7244_v52, 4  ;;  %v6514_v52 = vld [vmem:[%s9332_s4 + $0x130] sm:$0xff] }
  0x9b   : > { %v1062_v19 = vsel %vm7178_vm2, %v1053_v53, %v1061_v38  ;;  %v1063_v51 = vrot.slane %v1061_v38, 4  ;;  %v785_v4 = vpack.c.bf16 %v736_v31, %v736_v31  ;;  %v806_v20 = vpack.c.bf16 %v757_v10, %v757_v10  ;;  %v6515_v10 = vld [vmem:[%s9332_s4 + $0x138] sm:$0xff]  ;;  %v7418_v31 = vld [vmem:[%s7037_s18 + $0x48] sm:$0xff]  }
  0x9c   : > { %1295 = vst [vmem:[#allocation3 + $0x68] sm:$0xf] %v1062_v19  ;;  %v816_v47 = vshrl.u32 %v772_v61, 16  ;;  %v819_v30 = vshll.u32 %v772_v61, 16  ;;  %v6422_v28 = vld [vmem:[#allocation3 + $0x30] sm:$0xff]  ;;  %v7407_v19 = vor.u32 %v850_v44, %v847_v33  ;;  %3591 = vmatpush.bf16.msrb.mxu0 %v6515_v10 }
  0x9d   : > { %v1072_v60 = vsel %vm7178_vm2, %v1063_v51, %v7374_v8  ;;  %v945_v43 = vshrl.u32 %v785_v4, 16  ;;  %v948_v6 = vshll.u32 %v785_v4, 16  ;;  %v1155_v40 = vshrl.u32 %v806_v20, 16  ;;  %v6428_v53 = vld [vmem:[#allocation3 + $0x60] sm:$0xff]  ;;  %1844 = vmatmul.bf16.vlgmr.msra.gmra.mxu1 %v6422_v28 }
  0x9e   : > { %1296 = vst [vmem:[#allocation3 + $0x6c] sm:$0xf] %v1072_v60  ;;  %v1158_v0 = vshll.u32 %v806_v20, 16  ;;  %v818_v38 = vrot.slane %v816_v47, 6  ;;  %v821_v61 = vrot.slane %v819_v30, 7  ;;  %1874 = vmatmul.bf16.vlgmr.msra.gmra.mxu2 %v6428_v53  ;;  %v7412_v60 = vadd.f32 %v7061_v39, %v424_v34  ;;  %v6450_v20 = vld [vmem:[%s9332_s4 + $0x70] sm:$0xff] }
  0x9f   : > { %v947_v51 = vrot.slane %v945_v43, 6  ;;  %v950_v4 = vrot.slane %v948_v6, 7  ;;  %v7409_v46 = vpop.permute.xlu1 %655  ;;  %v1157_v47 = vrot.slane %v1155_v40, 6  ;;  %v9461_v43 = vmax.f32 %v7266_v11, 0.0  ;;  %1920 = vmatpush.bf16.msrb.mxu1 %v6450_v20 }
  0xa0   : > { %9458 = vst [vmem:[#allocation19_spill] sm:$0xff] %v7409_v46  ;;  %v1160_v30 = vrot.slane %v1158_v0, 7  ;;  %v822_v44 = vor.u32 %v821_v61, %v818_v38  ;;  %v7420_v33 = vpop.permute.xlu0 %650  ;;  %v7422_v28 = vpop.permute.xlu2 %600  ;;  %v9462_v53 = vmax.f32 %v7253_v62, 0.0  ;;  %v6648_v0 = vunpack.c.h.bf16 %v7302_v59  ;;  %3592 = vmatpush.bf16.msrb.mxu0 %v6514_v52 }
  0xa1   : > { %9459 = vst [vmem:[#allocation20_spill] sm:$0xff] %v7420_v33  ;;  %v750_v6 = vmul.f32 %v7409_v46, %v9461_v43  ;;  %v951_v34 = vor.u32 %v950_v4, %v947_v51  ;;  %v739_v40 = vmul.f32 %v7422_v28, %v9463_v15  ;;  %v6628_v43 = vunpack.c.h.bf16 %v7418_v31 }
  0xa2   : > { %9460 = vst [vmem:[#allocation21_spill] sm:$0xff] %v7422_v28  ;;  %v749_v10 = vmul.f32 %v7420_v33, %v9462_v53  ;;  %v823_v38 = vrot.slane %v822_v44, 4  ;;  %v1270_v61 = vsel %vm7403_vm7, %v822_v44, %v1269_v55  ;;  %v7441_v15 = vor.u32 %v1160_v30, %v1157_v47 }
  0xa3   : > { %v799_v11 = vpack.c.bf16 %v750_v6, %v750_v6  ;;  %v952_v62 = vsel %vm7178_vm2, %v9464_v50, %v951_v34  ;;  %v953_v51 = vrot.slane %v951_v34, 4  ;;  %1271 = vst [vmem:[#allocation3 + $0x8] sm:$0xe] %v1270_v61  ;;  %v788_v4 = vpack.c.bf16 %v739_v40, %v739_v40 }
  0xa4   : > { %v798_v25 = vpack.c.bf16 %v749_v10, %v749_v10  ;;  %1284 = vst [vmem:[#allocation3 + $0x3c] sm:$0xf] %v952_v62  ;;  %v832_v59 = vsel %vm7178_vm2, %v823_v38, %v7299_v5  ;;  %v420_v40 = vmul.f32 %v7052_v36, %v6648_v0  ;;  %v6477_v38 = vld [vmem:[%s9332_s4 + $0xa8] sm:$0xff]  ;;  %v9468_v0 = vmax.f32 %v7336_v26, 0.0 }
  0xa5   : > { %v1085_v55 = vshrl.u32 %v799_v11, 16  ;;  %v1088_v20 = vshll.u32 %v799_v11, 16  ;;  %v962_v44 = vsel %vm7178_vm2, %v953_v51, %v7339_v32  ;;  %1272 = vst [vmem:[#allocation3 + $0xc] sm:$0xf] %v832_v59  ;;  %v975_v53 = vshrl.u32 %v788_v4, 16  ;;  %2479 = vmatpush.bf16.msrb.mxu2 %v6477_v38 }
  0xa6   : > { %v1075_v6 = vshrl.u32 %v798_v25, 16  ;;  %v1078_v34 = vshll.u32 %v798_v25, 16  ;;  %1285 = vst [vmem:[#allocation3 + $0x40] sm:$0xf] %v962_v44  ;;  %v978_v47 = vshll.u32 %v788_v4, 16  ;;  %v508_v51 = vmax.f32 %v7389_v13, 0.0 }
  0xa7   : > { %v1087_v30 = vrot.slane %v1085_v55, 6  ;;  %v1090_v10 = vrot.slane %v1088_v20, 7  ;;  %v7457_v62 = vpop.permute.xlu1 %530  ;;  %v977_v25 = vrot.slane %v975_v53, 6  ;;  %v510_v20 = vmax.f32 %v7412_v60, 0.0 }
  0xa8   : > { %v1077_v11 = vrot.slane %v1075_v6, 6  ;;  %v1080_v50 = vrot.slane %v1078_v34, 7  ;;  %9465 = vst [vmem:[#allocation22_spill] sm:$0xff] %v7457_v62  ;;  %v7460_v59 = vpop.permute.xlu0 %595  ;;  %v7462_v4 = vpop.permute.xlu2 %545  ;;  %v725_v55 = vmul.f32 %v7457_v62, %v9468_v0  ;;  %v410_v52 = vmul.f32 %v7052_v36, %v6628_v43 }
  0xa9   : > { %9466 = vst [vmem:[#allocation23_spill] sm:$0xff] %v7460_v59  ;;  %v980_v6 = vrot.slane %v978_v47, 7  ;;  %v9469_v34 = vmax.f32 %v7270_v24, 0.0  ;;  %v9470_v53 = vmax.f32 %v7310_v35, 0.0  ;;  %v7476_v26 = vor.u32 %v1090_v10, %v1087_v30 }
  0xaa   : > { %9467 = vst [vmem:[#allocation24_spill] sm:$0xff] %v7462_v4  ;;  %v1081_v44 = vor.u32 %v1080_v50, %v1077_v11  ;;  %v774_v0 = vpack.c.bf16 %v725_v55, %v725_v55  ;;  %v7479_v60 = vadd.f32 %v7061_v39, %v420_v40  ;;  %v9471_v43 = vrot.slane %v7374_v8, 4 }
  0xab   : > { %v738_v13 = vmul.f32 %v7460_v59, %v9469_v34  ;;  %v728_v61 = vmul.f32 %v7462_v4, %v9470_v53  ;;  %v6423_v53 = vld [vmem:[#allocation3 + $0x38] sm:$0xff]  ;;  %v7488_v30 = vadd.f32 %v7061_v39, %v410_v52  ;;  %v6660_v10 = vunpack.c.h.bf16 %v7142_v29 }
  0xac   : > { %v1082_v47 = vsel %vm7178_vm2, %v9471_v43, %v1081_v44  ;;  %v1083_v24 = vrot.slane %v1081_v44, 4  ;;  %v835_v35 = vshrl.u32 %v774_v0, 16  ;;  %v838_v50 = vshll.u32 %v774_v0, 16  ;;  %v7485_v34 = vld [vmem:[#allocation3 + $0x8] sm:$0xff] }
  0xad   : > { %v787_v38 = vpack.c.bf16 %v738_v13, %v738_v13  ;;  %v777_v11 = vpack.c.bf16 %v728_v61, %v728_v61  ;;  %1297 = vst [vmem:[#allocation3 + $0x70] sm:$0xf] %v1082_v47  ;;  %v7491_v40 = vor.u32 %v980_v6, %v977_v25  ;;  %v6429_v61 = vld [vmem:[#allocation3 + $0x68] sm:$0xff]  ;;  %1819 = vmatmul.bf16.gmra.mxu0 %v7485_v34  ;;  %v506_v52 = vmax.f32 %v7479_v60, 0.0 }
  0xae   : > { %v1092_v8 = vsel %vm7178_vm2, %v1083_v24, %v7476_v26  ;;  %v837_v0 = vrot.slane %v835_v35, 6  ;;  %v840_v43 = vrot.slane %v838_v50, 7  ;;  %1849 = vmatmul.bf16.gmra.mxu1 %v6423_v53  ;;  %1879 = vmatmul.bf16.gmra.mxu2 %v6429_v61  ;;  %v426_v24 = vmul.f32 %v7052_v36, %v6660_v10  ;;  %v7845_v56 = vld [vmem:[#allocation3 + $0x8] sm:$0xff]  }
  0xaf   : > { %v965_v55 = vshrl.u32 %v787_v38, 16  ;;  %v968_v44 = vshll.u32 %v787_v38, 16  ;;  %1298 = vst [vmem:[#allocation3 + $0x74] sm:$0xf] %v1092_v8  ;;  %v865_v6 = vshrl.u32 %v777_v11, 16  ;;  %v7499_v47 = vpop.permute.xlu1 %685  ;;  %v868_v38 = vshll.u32 %v777_v11, 16 }
  0xb0   : > { %9472 = vst [vmem:[#allocation25_spill] sm:$0xff] %v7499_v47  ;;  %v841_v46 = vor.u32 %v840_v43, %v837_v0  ;;  %v7502_v33 = vpop.permute.xlu0 %660  ;;  %v7504_v8 = vpop.permute.xlu2 %675  ;;  %v756_v35 = vmul.f32 %v7499_v47, %v510_v20  ;;  %v496_v50 = vmax.f32 %v7488_v30, 0.0  ;;  %v9475_v60 = vmax.f32 %v7371_v1, 0.0  ;;  %v6868_v59 = vld [vmem:[#allocation3 + $0x8] sm:$0xff] }
  0xb1   : > { %v967_v29 = vrot.slane %v965_v55, 6  ;;  %v970_v25 = vrot.slane %v968_v44, 7  ;;  %9473 = vst [vmem:[#allocation26_spill] sm:$0xff] %v7502_v33  ;;  %v754_v44 = vmul.f32 %v7504_v8, %v508_v51  ;;  %v6624_v61 = vunpack.c.h.bf16 %v7192_v3 }
  0xb2   : > { %9474 = vst [vmem:[#allocation27_spill] sm:$0xff] %v7504_v8  ;;  %v751_v55 = vmul.f32 %v7502_v33, %v9475_v60  ;;  %v9476_v11 = vrot.slane %v7299_v5, 4  ;;  %v843_v0 = vrot.slane %v841_v46, 4  ;;  %v805_v43 = vpack.c.bf16 %v756_v35, %v756_v35 }
  0xb3   : > { %v971_v53 = vor.u32 %v970_v25, %v967_v29  ;;  %v471_v20 = vadd.f32 %v7061_v39, %v426_v24  ;;  %v9477_v30 = vrot.slane %v7339_v32, 4  ;;  %v803_v51 = vpack.c.bf16 %v754_v44, %v754_v44 }
  0xb4   : > { %v842_v10 = vsel %vm7178_vm2, %v9476_v11, %v841_v46  ;;  %v800_v25 = vpack.c.bf16 %v751_v55, %v751_v55  ;;  %v867_v3 = vrot.slane %v865_v6, 6  ;;  %v852_v5 = vsel %vm7178_vm2, %v843_v0, %v7407_v19 }
  0xb5   : > { %v972_v1 = vsel %vm7178_vm2, %v9477_v30, %v971_v53  ;;  %v973_v29 = vrot.slane %v971_v53, 4  ;;  %1273 = vst [vmem:[#allocation3 + $0x10] sm:$0xf] %v842_v10  ;;  %v1145_v60 = vshrl.u32 %v805_v43, 16  ;;  %v1148_v46 = vshll.u32 %v805_v43, 16  ;;  %v6449_v43 = vld [vmem:[%s9332_s4 + $0x68] sm:$0xff] }
  0xb6   : > { %1286 = vst [vmem:[#allocation3 + $0x44] sm:$0xf] %v972_v1  ;;  %v1095_v32 = vshrl.u32 %v800_v25, 16  ;;  %v1098_v35 = vshll.u32 %v800_v25, 16  ;;  %v1125_v11 = vshrl.u32 %v803_v51, 16  ;;  %v1128_v53 = vshll.u32 %v803_v51, 16  ;;  %1921 = vmatpush.bf16.msrb.mxu1 %v6449_v43 }
  0xb7   : > { %v982_v24 = vsel %vm7178_vm2, %v973_v29, %v7491_v40  ;;  %1274 = vst [vmem:[#allocation3 + $0x14] sm:$0xf] %v852_v5  ;;  %v1147_v55 = vrot.slane %v1145_v60, 6  ;;  %v1150_v44 = vrot.slane %v1148_v46, 7  ;;  %v512_v10 = vmax.f32 %v471_v20, 0.0  ;;  %v7528_v13 = vpop.permute.xlu1 %695 }
  0xb8   : > { %1287 = vst [vmem:[#allocation3 + $0x48] sm:$0xf] %v982_v24  ;;  %v870_v6 = vrot.slane %v868_v38, 7  ;;  %v1097_v30 = vrot.slane %v1095_v32, 6  ;;  %v1100_v1 = vrot.slane %v1098_v35, 7  ;;  %v408_v0 = vmul.f32 %v7052_v36, %v6624_v61  ;;  %v7536_v25 = vpop.permute.xlu0 %665  ;;  %v7538_v51 = vpop.permute.xlu2 %615 }
  0xb9   : > { %9478 = vst [vmem:[#allocation28_spill] sm:$0xff] %v7528_v13  ;;  %v1127_v29 = vrot.slane %v1125_v11, 6  ;;  %v7534_v5 = vor.u32 %v1150_v44, %v1147_v55  ;;  %v758_v20 = vmul.f32 %v7528_v13, %v512_v10  ;;  %v6655_v38 = vunpack.c.l.bf16 %v7349_v17  ;;  %v6513_v44 = vld [vmem:[%s9332_s4 + $0x128] sm:$0xff]  ;;  %v6476_v17 = vld [vmem:[%s9332_s4 + $0xa0] sm:$0xff] }
  0xba   : > { %9479 = vst [vmem:[#allocation29_spill] sm:$0xff] %v7536_v25  ;;  %v1101_v60 = vor.u32 %v1100_v1, %v1097_v30  ;;  %v1130_v46 = vrot.slane %v1128_v53, 7  ;;  %v752_v24 = vmul.f32 %v7536_v25, %v506_v52  ;;  %v742_v61 = vmul.f32 %v7538_v51, %v496_v50  ;;  %v6448_v52 = vld [vmem:[%s9332_s4 + $0x60] sm:$0xff]  ;;  %3593 = vmatpush.bf16.msrb.mxu0 %v6513_v44 }
  0xbb   : > { %9480 = vst [vmem:[#allocation30_spill] sm:$0xff] %v7538_v51  ;;  %v1153_v32 = vrot.slane %v7534_v5, 4  ;;  %v807_v35 = vpack.c.bf16 %v758_v20, %v758_v20  ;;  %v453_v11 = vadd.f32 %v7061_v39, %v408_v0  ;;  %v423_v55 = vmul.f32 %v7052_v36, %v6655_v38  ;;  %2480 = vmatpush.bf16.msrb.mxu2 %v6476_v17 }
  0xbc   : > { %v9481_v53 = vrot.slane %v7476_v26, 4  ;;  %v801_v36 = vpack.c.bf16 %v752_v24, %v752_v24  ;;  %v791_v30 = vpack.c.bf16 %v742_v61, %v742_v61  ;;  %v7561_v1 = vor.u32 %v870_v6, %v867_v3  ;;  %v6430_v3 = vld [vmem:[#allocation3 + $0x70] sm:$0xff]  ;;  %1922 = vmatpush.bf16.msrb.mxu1 %v6448_v52 }
  0xbd   : > { %v1162_v0 = vsel %vm7178_vm2, %v1153_v32, %v7441_v15  ;;  %v1165_v43 = vshrl.u32 %v807_v35, 16  ;;  %v1168_v20 = vshll.u32 %v807_v35, 16  ;;  %v6424_v13 = vld [vmem:[#allocation3 + $0x40] sm:$0xff]  ;;  %v7568_v26 = vor.u32 %v1130_v46, %v1127_v29 }
  0xbe   : > { %v1102_v10 = vsel %vm7178_vm2, %v9481_v53, %v1101_v60  ;;  %v7566_v38 = vld [vmem:[#allocation3 + $0x10] sm:$0xff]  ;;  %1305 = vst [vmem:[#allocation3 + $0x90] sm:$0xf] %v1162_v0  ;;  %v1105_v53 = vshrl.u32 %v801_v36, 16  ;;  %v1108_v24 = vshll.u32 %v801_v36, 16  ;;  %v1005_v61 = vshrl.u32 %v791_v30, 16  ;;  %1854 = vmatmul.bf16.gmra.mxu1 %v6424_v13  ;;  %1884 = vmatmul.bf16.gmra.mxu2 %v6430_v3 }
  0xbf   : > { %1299 = vst [vmem:[#allocation3 + $0x78] sm:$0xf] %v1102_v10  ;;  %v1167_v6 = vrot.slane %v1165_v43, 6  ;;  %v1170_v10 = vrot.slane %v1168_v20, 7  ;;  %v494_v50 = vmax.f32 %v453_v11, 0.0  ;;  %v468_v32 = vadd.f32 %v7061_v39, %v423_v55  ;;  %1824 = vmatmul.bf16.gmra.mxu0 %v7566_v38  ;;  %v7572_v29 = vpop.permute.xlu1 %540  ;;  %v6512_v3 = vld [vmem:[%s9332_s4 + $0x120] sm:$0xff] }
  0xc0   : > { %v1103_v35 = vrot.slane %v1101_v60, 4  ;;  %v1107_v47 = vrot.slane %v1105_v53, 6  ;;  %v1110_v44 = vrot.slane %v1108_v24, 7  ;;  %v1008_v17 = vshll.u32 %v791_v30, 16  ;;  %9482 = vst [vmem:[#allocation31_spill] sm:$0xff] %v7572_v29  ;;  %v7576_v36 = vpop.permute.xlu0 %605  ;;  %v7578_v52 = vpop.permute.xlu2 %680  ;;  %3594 = vmatpush.bf16.msrb.mxu0 %v6512_v3 }
  0xc1   : > { %v7574_v46 = vor.u32 %v1170_v10, %v1167_v6  ;;  %9483 = vst [vmem:[#allocation32_spill] sm:$0xff] %v7576_v36  ;;  %v509_v11 = vmax.f32 %v468_v32, 0.0  ;;  %v6599_v39 = vunpack.c.l.bf16 %v7263_v58  ;;  %v6651_v55 = vunpack.c.l.bf16 %v7327_v16  ;;  %v7598_v16 = vld [vmem:[%s9330_s2] ss:$0 sm:$0xff]  ;;  %v6475_v6 = vld [vmem:[%s9332_s4 + $0x98] sm:$0xff] }
  0xc2   : > { %9484 = vst [vmem:[#allocation33_spill] sm:$0xff] %v7578_v52  ;;  %v1133_v13 = vrot.slane %v7568_v26, 4  ;;  %v7583_v60 = vor.u32 %v1110_v44, %v1107_v47  ;;  %v740_v30 = vmul.f32 %v7576_v36, %v494_v50  ;;  %v6607_v0 = vunpack.c.l.bf16 %v7108_v2  ;;  %v6794_v50 = vld [vmem:[%s7037_s18 + $0x90] sm:$0xff]   ;;  %v7617_v32 = vld [vmem:[%s9331_s3] ss:$0 sm:$0xff]  ;;  %2481 = vmatpush.bf16.msrb.mxu2 %v6475_v6 }
  0xc3   : > { %v7587_v43 = vrot.slane %v1005_v61, 6  ;;  %v9485_v20 = vrot.slane %v7441_v15, 4  ;;  %v755_v58 = vmul.f32 %v7578_v52, %v509_v11  ;;  %v395_v47 = vmul.f32 %v7598_v16, %v6599_v39  ;;  %v6487_v11 = vld [vmem:[%s9332_s4 + $0xf8] sm:$0xff] }
  0xc4   : > { %v1112_v2 = vsel %vm7178_vm2, %v1103_v35, %v7583_v60  ;;  %v7605_v24 = vrot.slane %v1008_v17, 7  ;;  %v789_v61 = vpack.c.bf16 %v740_v30, %v740_v30  ;;  %v421_v44 = vmul.f32 %v7598_v16, %v6651_v55  ;;  %2590 = vmatpush.bf16.msrb.mxu3 %v6487_v11 }
  0xc5   : > { %v1172_v53 = vsel %vm7178_vm2, %v9485_v20, %v7574_v46  ;;  %1300 = vst [vmem:[#allocation3 + $0x7c] sm:$0xf] %v1112_v2  ;;  %v804_v10 = vpack.c.bf16 %v755_v58, %v755_v58  ;;  %v440_v35 = vadd.f32 %v7617_v32, %v395_v47  ;;  %v399_v17 = vmul.f32 %v7598_v16, %v6607_v0 }
  0xc6   : > { %1306 = vst [vmem:[#allocation3 + $0x94] sm:$0xf] %v1172_v53  ;;  %v985_v39 = vshrl.u32 %v789_v61, 16  ;;  %v988_v30 = vshll.u32 %v789_v61, 16  ;;  %v6663_v20 = vunpack.c.l.bf16 %v6794_v50  ;;  %v6664_v53 = vunpack.c.h.bf16 %v6794_v50 }
  0xc7   : > { %v1135_v58 = vshrl.u32 %v804_v10, 16  ;;  %v1138_v2 = vshll.u32 %v804_v10, 16  ;;  %v481_v15 = vmax.f32 %v440_v35, 0.0  ;;  %v466_v52 = vadd.f32 %v7617_v32, %v421_v44  ;;  %v7627_v8 = vpop.permute.xlu1 %700 }
  0xc8   : > { %v987_v47 = vrot.slane %v985_v39, 6  ;;  %v990_v55 = vrot.slane %v988_v30, 7  ;;  %v444_v0 = vadd.f32 %v7617_v32, %v399_v17  ;;  %9486 = vst [vmem:[#allocation34_spill] sm:$0xff] %v7627_v8  ;;  %v427_v25 = vmul.f32 %v7598_v16, %v6663_v20  ;;  %v7631_v3 = vpop.permute.xlu0 %670  ;;  %v7633_v10 = vpop.permute.xlu2 %560 }
  0xc9   : > { %v1137_v33 = vrot.slane %v1135_v58, 6  ;;  %v1140_v61 = vrot.slane %v1138_v2, 7  ;;  %v727_v50 = vmul.f32 %v7572_v29, %v481_v15  ;;  %9487 = vst [vmem:[#allocation35_spill] sm:$0xff] %v7631_v3  ;;  %v507_v6 = vmax.f32 %v466_v52, 0.0 }
  0xca   : > { %9488 = vst [vmem:[#allocation36_spill] sm:$0xff] %v7633_v10  ;;  %v7635_v35 = vor.u32 %v990_v55, %v987_v47  ;;  %v485_v44 = vmax.f32 %v444_v0, 0.0  ;;  %v472_v11 = vadd.f32 %v7617_v32, %v427_v25  ;;  %v428_v17 = vmul.f32 %v7598_v16, %v6664_v53 }
  0xcb   : > { %v1141_v39 = vor.u32 %v1140_v61, %v1137_v33  ;;  %v776_v30 = vpack.c.bf16 %v727_v50, %v727_v50  ;;  %v753_v20 = vmul.f32 %v7631_v3, %v507_v6  ;;  %v6627_v2 = vunpack.c.l.bf16 %v7418_v31  ;;  %v6447_v31 = vld [vmem:[%s9332_s4 + $0x58] sm:$0xff] }
  0xcc   : > { %v9489_v52 = vrot.slane %v7491_v40, 4  ;;  %v731_v55 = vmul.f32 %v7633_v10, %v485_v44  ;;  %v513_v25 = vmax.f32 %v472_v11, 0.0  ;;  %v473_v44 = vadd.f32 %v7617_v32, %v428_v17  ;;  %v6431_v11 = vld [vmem:[#allocation3 + $0x78] sm:$0xff]  ;;  %1923 = vmatpush.bf16.msrb.mxu1 %v6447_v31 }
  0xcd   : > { %v6434_v58 = vld [vmem:[#allocation3 + $0x90] sm:$0xff]  ;;  %v1142_v33 = vsel %vm7178_vm2, %v1133_v13, %v1141_v39  ;;  %v1143_v53 = vrot.slane %v1141_v39, 4  ;;  %v855_v0 = vshrl.u32 %v776_v30, 16  ;;  %v858_v61 = vshll.u32 %v776_v30, 16  ;;  %v8040_v18 = vld [vmem:[#allocation3 + $0x78] sm:$0xff] }
  0xce   : > { %v992_v47 = vsel %vm7178_vm2, %v9489_v52, %v7635_v35  ;;  %1904 = vmatmul.bf16.vlgmr.msra.gmra.mxu3 %v6434_v58  ;;  %1303 = vst [vmem:[#allocation3 + $0x88] sm:$0xf] %v1142_v33  ;;  %v802_v40 = vpack.c.bf16 %v753_v20, %v753_v20  ;;  %v780_v50 = vpack.c.bf16 %v731_v55, %v731_v55  ;;  %v6486_v13 = vld [vmem:[%s9332_s4 + $0xf0] sm:$0xff]  ;;  %v9388_v54 = vshll.u32 %v8040_v18, 16 }
  0xcf   : > { %1288 = vst [vmem:[#allocation3 + $0x4c] sm:$0xf] %v992_v47  ;;  %v759_v6 = vmul.f32 %v7627_v8, %v513_v25  ;;  %v1152_v39 = vsel %vm7178_vm2, %v1143_v53, %v7534_v5  ;;  %v857_v30 = vrot.slane %v855_v0, 6  ;;  %v860_v58 = vrot.slane %v858_v61, 7  ;;  %v7662_v25 = vpop.permute.xlu1 %610  ;;  %1889 = vmatmul.bf16.gmra.mxu2 %v6431_v11  ;;  %2591 = vmatpush.bf16.msrb.mxu3 %v6486_v13  ;;  %v6779_v0 = vld [vmem:[%s7037_s18 + $0x18] sm:$0xff]  }
  0xd0   : > { %v409_v52 = vmul.f32 %v7598_v16, %v6627_v2  ;;  %1304 = vst [vmem:[#allocation3 + $0x8c] sm:$0xf] %v1152_v39  ;;  %v1115_v20 = vshrl.u32 %v802_v40, 16  ;;  %v1118_v47 = vshll.u32 %v802_v40, 16  ;;  %v895_v55 = vshrl.u32 %v780_v50, 16  ;;  %v7664_v8 = vpop.permute.xlu0 %705  ;;  %v6511_v40 = vld [vmem:[%s9332_s4 + $0x118] sm:$0xff] }
  0xd1   : > { %v898_v17 = vshll.u32 %v780_v50, 16  ;;  %9490 = vst [vmem:[#allocation37_spill] sm:$0xff] %v7662_v25  ;;  %v861_v33 = vor.u32 %v860_v58, %v857_v30  ;;  %v808_v15 = vpack.c.bf16 %v759_v6, %v759_v6  ;;  %v514_v5 = vmax.f32 %v473_v44, 0.0  ;;  %v6474_v50 = vld [vmem:[%s9332_s4 + $0x90] sm:$0xff]  ;;  %v6485_v58 = vld [vmem:[%s9332_s4 + $0xe8] sm:$0xff]  ;;  %3595 = vmatpush.bf16.msrb.mxu0 %v6511_v40 }
  0xd2   : > { %9491 = vst [vmem:[#allocation38_spill] sm:$0xff] %v7664_v8  ;;  %v454_v53 = vadd.f32 %v7617_v32, %v409_v52  ;;  %v1117_v61 = vrot.slane %v1115_v20, 6  ;;  %v1120_v2 = vrot.slane %v1118_v47, 7  ;;  %v897_v31 = vrot.slane %v895_v55, 6  ;;  %v6446_v52 = vld [vmem:[%s9332_s4 + $0x50] sm:$0xff]  ;;  %2482 = vmatpush.bf16.msrb.mxu2 %v6474_v50  ;;  %v6795_v50 = vld [vmem:[%s7037_s18 + $0x98] sm:$0xff]  }
  0xd3   : > { %v900_v39 = vrot.slane %v898_v17, 7  ;;  %v9492_v6 = vrot.slane %v7407_v19, 4  ;;  %v863_v11 = vrot.slane %v861_v33, 4  ;;  %v1175_v13 = vshrl.u32 %v808_v15, 16  ;;  %2592 = vmatpush.bf16.msrb.mxu3 %v6485_v58  ;;  %1924 = vmatpush.bf16.msrb.mxu1 %v6446_v52  ;;  %9513 = vst [vmem:[#allocation49_spill] sm:$0xff] %v8040_v18 }
  0xd4   : > { %v1178_v30 = vshll.u32 %v808_v15, 16  ;;  %v1121_v20 = vor.u32 %v1120_v2, %v1117_v61  ;;  %v760_v19 = vmul.f32 %v7664_v8, %v514_v5  ;;  %v495_v55 = vmax.f32 %v454_v53, 0.0 }
  0xd5   : > { %v862_v44 = vsel %vm7178_vm2, %v9492_v6, %v861_v33  ;;  %v7684_v47 = vor.u32 %v900_v39, %v897_v31  ;;  %v872_v15 = vsel %vm7178_vm2, %v863_v11, %v7561_v1  ;;  %v1177_v33 = vrot.slane %v1175_v13, 6 }
  0xd6   : > { %1275 = vst [vmem:[#allocation3 + $0x18] sm:$0xf] %v862_v44  ;;  %v6425_v17 = vld [vmem:[#allocation3 + $0x48] sm:$0xff]  ;;  %v1180_v6 = vrot.slane %v1178_v30, 7  ;;  %v6603_v3 = vunpack.c.l.bf16 %v6779_v0  ;;  %v9493_v61 = vrot.slane %v7583_v60, 4  ;;  %v1123_v5 = vrot.slane %v1121_v20, 4 }
  0xd7   : > { %1276 = vst [vmem:[#allocation3 + $0x1c] sm:$0xf] %v872_v15  ;;  %v903_v53 = vrot.slane %v7684_v47, 4  ;;  %v809_v31 = vpack.c.bf16 %v760_v19, %v760_v19  ;;  %1859 = vmatmul.bf16.gmra.mxu1 %v6425_v17  ;;  %v741_v40 = vmul.f32 %v7662_v25, %v495_v55  ;;  %v6604_v11 = vunpack.c.h.bf16 %v6779_v0 }
  0xd8   : > { %v1122_v2 = vsel %vm7178_vm2, %v9493_v61, %v1121_v20  ;;  %v1181_v39 = vor.u32 %v1180_v6, %v1177_v33  ;;  %v397_v44 = vmul.f32 %v7598_v16, %v6603_v3  ;;  %v1132_v60 = vsel %vm7178_vm2, %v1123_v5, %v7568_v26  ;;  %v7704_v20 = vpop.permute.xlu1 %555  ;;  %v7710_v55 = vpop.permute.xlu0 %550 }
  0xd9   : > { %1301 = vst [vmem:[#allocation3 + $0x80] sm:$0xf] %v1122_v2  ;;  %v912_v13 = vsel %vm7178_vm2, %v903_v53, %v7317_v27  ;;  %v1185_v30 = vshrl.u32 %v809_v31, 16  ;;  %v1188_v58 = vshll.u32 %v809_v31, 16  ;;  %v9495_v19 = vrot.slane %v7574_v46, 4  ;;  %v6866_v2 = vld [vmem:[%s7037_s18 + $0x50] sm:$0xff]  }
  0xda   : > { %9494 = vst [vmem:[#allocation39_spill] sm:$0xff] %v7704_v20  ;;  %v1183_v0 = vrot.slane %v1181_v39, 4  ;;  %v790_v52 = vpack.c.bf16 %v741_v40, %v741_v40  ;;  %v442_v26 = vadd.f32 %v7617_v32, %v397_v44  ;;  %v398_v15 = vmul.f32 %v7598_v16, %v6604_v11  ;;  %v6484_v53 = vld [vmem:[%s9332_s4 + $0xe0] sm:$0xff] }
  0xdb   : > { %1302 = vst [vmem:[#allocation3 + $0x84] sm:$0xf] %v1132_v60  ;;  %v1182_v3 = vsel %vm7178_vm2, %v9495_v19, %v1181_v39  ;;  %v1187_v27 = vrot.slane %v1185_v30, 6  ;;  %v1190_v17 = vrot.slane %v1188_v58, 7  ;;  %v6667_v33 = vunpack.c.l.bf16 %v6795_v50  ;;  %v345_v60 = vld [vmem:[%s7037_s18 + $0xa0] sm:$0xf]  ;;  %2593 = vmatpush.bf16.msrb.mxu3 %v6484_v53 }
  0xdc   : > { %9496 = vst [vmem:[#allocation40_spill] sm:$0xff] %v7710_v55  ;;  %v995_v6 = vshrl.u32 %v790_v52, 16  ;;  %v998_v61 = vshll.u32 %v790_v52, 16  ;;  %v483_v46 = vmax.f32 %v442_v26, 0.0  ;;  %v6631_v5 = vunpack.c.l.bf16 %v6866_v2 }
  0xdd   : > { %1280 = vst [vmem:[#allocation3 + $0x2c] sm:$0xf] %v912_v13  ;;  %v7718_v31 = vor.u32 %v1190_v17, %v1187_v27  ;;  %v443_v39 = vadd.f32 %v7617_v32, %v398_v15  ;;  %v429_v40 = vmul.f32 %v7598_v16, %v6667_v33  ;;  %v6668_v44 = vunpack.c.h.bf16 %v6795_v50  ;;  %v6473_v50 = vld [vmem:[%s9332_s4 + $0x88] sm:$0xff] }
  0xde   : > { %1307 = vst [vmem:[#allocation3 + $0x98] sm:$0xf] %v1182_v3  ;;  %v997_v11 = vrot.slane %v995_v6, 6  ;;  %v1000_v13 = vrot.slane %v998_v61, 7  ;;  %v729_v30 = vmul.f32 %v7710_v55, %v483_v46  ;;  %v7724_v58 = vld [vmem:[#allocation3 + $0x18] sm:$0xff]  ;;  %v411_v19 = vmul.f32 %v7598_v16, %v6631_v5  ;;  %v6445_v61 = vld [vmem:[%s9332_s4 + $0x48] sm:$0xff]  ;;  %2483 = vmatpush.bf16.msrb.mxu2 %v6473_v50 }
  0xdf   : > { %v993_v3 = vrot.slane %v7635_v35, 4  ;;  %v1192_v52 = vsel %vm7178_vm2, %v1183_v0, %v7718_v31  ;;  %v484_v26 = vmax.f32 %v443_v39, 0.0  ;;  %v474_v27 = vadd.f32 %v7617_v32, %v429_v40  ;;  %1829 = vmatmul.bf16.gmra.mxu0 %v7724_v58  ;;  %v6510_v35 = vld [vmem:[%s9332_s4 + $0x110] sm:$0xff]  ;;  %v6483_v0 = vld [vmem:[%s9332_s4 + $0xd8] sm:$0xff]  ;;  %1925 = vmatpush.bf16.msrb.mxu1 %v6445_v61 }
  0xe0   : > { %1308 = vst [vmem:[#allocation3 + $0x9c] sm:$0xf] %v1192_v52  ;;  %v1001_v17 = vor.u32 %v1000_v13, %v997_v11  ;;  %v778_v15 = vpack.c.bf16 %v729_v30, %v729_v30  ;;  %v456_v33 = vadd.f32 %v7617_v32, %v411_v19  ;;  %v386_v6 = vunpack.c.l.bf16 %v345_v60  ;;  %v7751_v53 = vpop.permute.xlu1 %620  ;;  %v7756_v19 = vpop.permute.xlu0 %710  ;;  %3596 = vmatpush.bf16.msrb.mxu0 %v6510_v35  ;;  %v7964_v48 = vld [vmem:[#allocation3 + $0x18] sm:$0xff] }
  0xe1   : > { %v7748_v46 = vor.u32 %v7605_v24, %v7587_v43  ;;  %v730_v2 = vmul.f32 %v7704_v20, %v484_v26  ;;  %v515_v5 = vmax.f32 %v474_v27, 0.0  ;;  %9497 = vst [vmem:[#allocation41_spill] sm:$0xff] %v7751_v53  ;;  %v430_v40 = vmul.f32 %v7598_v16, %v6668_v44  ;;  %2594 = vmatpush.bf16.msrb.mxu3 %v6483_v0  ;;  %v6482_v43 = vld [vmem:[%s9332_s4 + $0xd0] sm:$0xff]  ;;  %v6509_v24 = vld [vmem:[%s9332_s4 + $0x108] sm:$0xff]  ;;  %v6472_v44 = vld [vmem:[%s9332_s4 + $0x80] sm:$0xff] }
  0xe2   : > { %v6432_v39 = vld [vmem:[#allocation3 + $0x80] sm:$0xff]  ;;  %v1002_v60 = vsel %vm7178_vm2, %v993_v3, %v1001_v17  ;;  %v1003_v11 = vrot.slane %v1001_v17, 4  ;;  %v875_v13 = vshrl.u32 %v778_v15, 16  ;;  %v878_v30 = vshll.u32 %v778_v15, 16  ;;  %9498 = vst [vmem:[#allocation42_spill] sm:$0xff] %v7756_v19  ;;  %2484 = vmatpush.bf16.msrb.mxu2 %v6472_v44 }
  0xe3   : > { %1289 = vst [vmem:[#allocation3 + $0x50] sm:$0xf] %v1002_v60  ;;  %v779_v3 = vpack.c.bf16 %v730_v2, %v730_v2  ;;  %v761_v52 = vmul.f32 %v7756_v19, %v515_v5  ;;  %v497_v26 = vmax.f32 %v456_v33, 0.0  ;;  %1894 = vmatmul.bf16.gmra.mxu2 %v6432_v39  ;;  %v475_v27 = vadd.f32 %v7617_v32, %v430_v40  ;;  %v6444_v33 = vld [vmem:[%s9332_s4 + $0x40] sm:$0xff] }
  0xe4   : > { %v1012_v50 = vsel %vm7178_vm2, %v1003_v11, %v7748_v46  ;;  %v877_v17 = vrot.slane %v875_v13, 6  ;;  %v880_v15 = vrot.slane %v878_v30, 7  ;;  %v431_v35 = vmul.f32 %v7598_v16, %v386_v6  ;;  %3597 = vmatpush.bf16.msrb.mxu0 %v6509_v24  ;;  %v6481_v16 = vld [vmem:[%s9332_s4 + $0xc8] sm:$0xff]  ;;  %v6508_v6 = vld [vmem:[%s9332_s4 + $0x100] sm:$0xff]  ;;  %1926 = vmatpush.bf16.msrb.mxu1 %v6444_v33 }
  0xe5   : > { %1290 = vst [vmem:[#allocation3 + $0x54] sm:$0xf] %v1012_v50  ;;  %v885_v0 = vshrl.u32 %v779_v3, 16  ;;  %v888_v8 = vshll.u32 %v779_v3, 16  ;;  %v810_v60 = vpack.c.bf16 %v761_v52, %v761_v52  ;;  %v743_v2 = vmul.f32 %v7751_v53, %v497_v26  ;;  %2595 = vmatpush.bf16.msrb.mxu3 %v6482_v43 }
  0xe6   : > { %v873_v5 = vrot.slane %v7561_v1, 4  ;;  %v881_v39 = vor.u32 %v880_v15, %v877_v17  ;;  %v516_v40 = vmax.f32 %v475_v27, 0.0  ;;  %v476_v11 = vadd.f32 %v7617_v32, %v431_v35 }
  0xe7   : > { %v887_v61 = vrot.slane %v885_v0, 6  ;;  %v890_v13 = vrot.slane %v888_v8, 7  ;;  %v1195_v30 = vshrl.u32 %v810_v60, 16  ;;  %v1198_v44 = vshll.u32 %v810_v60, 16  ;;  %v6435_v3 = vld [vmem:[#allocation3 + $0x98] sm:$0xff]  ;;  %v6480_v60 = vld [vmem:[%s9332_s4 + $0xc0] sm:$0xff] }
  0xe8   : > { %v882_v1 = vsel %vm7178_vm2, %v873_v5, %v881_v39  ;;  %v883_v52 = vrot.slane %v881_v39, 4  ;;  %v792_v32 = vpack.c.bf16 %v743_v2, %v743_v2  ;;  %v517_v43 = vmax.f32 %v476_v11, 0.0  ;;  %1909 = vmatmul.bf16.gmra.mxu3 %v6435_v3  ;;  %v7787_v50 = vpop.permute.xlu1 %720  ;;  %v7790_v35 = vpop.permute.xlu0 %715  ;;  %3598 = vmatpush.bf16.msrb.mxu0 %v6508_v6 }
  0xe9   : > { %1277 = vst [vmem:[#allocation3 + $0x20] sm:$0xf] %v882_v1  ;;  %v891_v24 = vor.u32 %v890_v13, %v887_v61  ;;  %v1197_v26 = vrot.slane %v1195_v30, 6  ;;  %v1200_v27 = vrot.slane %v1198_v44, 7  ;;  %v1193_v17 = vrot.slane %v7718_v31, 4  ;;  %2596 = vmatpush.bf16.msrb.mxu3 %v6481_v16 }
  0xea   : > { %9499 = vst [vmem:[#allocation43_spill] sm:$0xff] %v7787_v50  ;;  %v1015_v8 = vshrl.u32 %v792_v32, 16  ;;  %v1018_v15 = vshll.u32 %v792_v32, 16  ;;  %v763_v0 = vmul.f32 %v7787_v50, %v517_v43  ;;  %v762_v39 = vmul.f32 %v7790_v35, %v516_v40  ;;  %v7896_v50 = vld [vmem:[#allocation3 + $0x40] sm:$0xff] }
  0xeb   : > { %9500 = vst [vmem:[#allocation44_spill] sm:$0xff] %v7790_v35  ;;  %v892_v2 = vsel %vm7178_vm2, %v883_v52, %v891_v24  ;;  %v893_v33 = vrot.slane %v891_v24, 4  ;;  %v1201_v5 = vor.u32 %v1200_v27, %v1197_v26  ;;  %v1013_v44 = vrot.slane %v7748_v46, 4  ;;  %v6551_v27 = vld [vmem:[%s9332_s4 + $0x1b8] sm:$0xff] }
  0xec   : > { %1278 = vst [vmem:[#allocation3 + $0x24] sm:$0xf] %v892_v2  ;;  %v1017_v31 = vrot.slane %v1015_v8, 6  ;;  %v1020_v11 = vrot.slane %v1018_v15, 7  ;;  %v812_v61 = vpack.c.bf16 %v763_v0, %v763_v0  ;;  %v6426_v13 = vld [vmem:[#allocation3 + $0x50] sm:$0xff]  ;;  %v811_v6 = vpack.c.bf16 %v762_v39, %v762_v39  ;;  %v6559_v46 = vld [vmem:[%s9332_s4 + $0x1f8] sm:$0xff]  ;;  %4511 = vmatpush.bf16.msra.mxu2 %v6551_v27 }
  0xed   : > { %v902_v16 = vsel %vm7178_vm2, %v893_v33, %v7684_v47  ;;  %v1202_v30 = vsel %vm7178_vm2, %v1193_v17, %v1201_v5  ;;  %1864 = vmatmul.bf16.gmra.mxu1 %v6426_v13  ;;  %2597 = vmatpush.bf16.msrb.mxu3 %v6480_v60  ;;  %v6523_v17 = vld [vmem:[%s9332_s4 + $0x178] sm:$0xff]  ;;  %v6433_v0 = vld [vmem:[#allocation3 + $0x88] sm:$0xff]  ;;  %v7819_v33 = vld [vmem:[#allocation3 + $0x10] sm:$0xff]  ;;  %v1203_v39 = vrot.slane %v1201_v5, 4  ;;  %v9519_v29 = vrot.slane %v7964_v48, 1 }
  0xee   : > { %1279 = vst [vmem:[#allocation3 + $0x28] sm:$0xf] %v902_v16  ;;  %v1021_v3 = vor.u32 %v1020_v11, %v1017_v31  ;;  %v1215_v1 = vshrl.u32 %v812_v61, 16  ;;  %v1218_v52 = vshll.u32 %v812_v61, 16  ;;  %v1205_v40 = vshrl.u32 %v811_v6, 16  ;;  %3704 = vmatpush.bf16.msra.mxu1 %v6523_v17  ;;  %v6588_v5 = vld [vmem:[%s9332_s4 + $0x238] sm:$0xff] }
  0xef   : > { %1309 = vst [vmem:[#allocation3 + $0xa0] sm:$0xf] %v1202_v30  ;;  %v1208_v32 = vshll.u32 %v811_v6, 16  ;;  %v1312_v11 = vld [vmem:[#allocation3 + $0xac] sm:$0x3]  ;;  %5134 = vmatpush.bf16.msra.mxu0 %v6588_v5  ;;  %v7868_v5 = vld [vmem:[#allocation3 + $0x18] sm:$0xff] }
  0xf0   : > { %v1022_v43 = vsel %vm7178_vm2, %v1013_v44, %v1021_v3  ;;  %v1023_v24 = vrot.slane %v1021_v3, 4  ;;  %v1217_v47 = vrot.slane %v1215_v1, 6  ;;  %v1220_v26 = vrot.slane %v1218_v52, 7  ;;  %v6452_v6 = vld [vmem:[#allocation3] sm:$0xf0]  ;;  %v8108_v62 = vld [vmem:[#allocation3 + $0x50] sm:$0xff] }
  0xf1   : > { %1291 = vst [vmem:[#allocation3 + $0x58] sm:$0xf] %v1022_v43  ;;  %v1207_v8 = vrot.slane %v1205_v40, 6  ;;  %v1210_v15 = vrot.slane %v1208_v32, 7  ;;  %4624 = vmatpush.bf16.msra.mxu3 %v6559_v46  ;;  %v9349_v1 = vshll.u32 %v7819_v33, 16  ;;  %v9351_v43 = vshrl.u32 %v7819_v33, 16 }
  0xf2   : > { %v1032_v60 = vsel %vm7178_vm2, %v1023_v24, %v7297_v12  ;;  %v1221_v2 = vor.u32 %v1220_v26, %v1217_v47  ;;  %v5868_v12 = vld [vmem:[#allocation3] sm:$0xe]  ;;  %v7841_v24 = vld [vmem:[#allocation3 + $0x30] sm:$0xff]  ;;  %v1506_v46 = vshll.u32 %v7566_v38, 16  ;;  %v9505_v14 = vshrl.u32 %v7819_v33, 16 }
  0xf3   : > { %1292 = vst [vmem:[#allocation3 + $0x5c] sm:$0xf] %v1032_v60  ;;  %v1211_v31 = vor.u32 %v1210_v15, %v1207_v8  ;;  %v7821_v61 = vld [vmem:[#allocation3 + $0x20] sm:$0xff]  ;;  %1899 = vmatmul.bf16.gmra.mxu2 %v6433_v0  ;;  %v7838_v32 = vrot.slane %v9349_v1, 1  ;;  %v5869_v47 = vor.u32 %v6452_v6, %v5868_v12  ;;  %v9347_v17 = vshll.u32 %v7841_v24, 16  ;;  %v7855_v0 = vld [vmem:[#allocation3 + $0x38] sm:$0xff] }
  0xf4   : > { %v1223_v13 = vrot.slane %v1221_v2, 4  ;;  %1834 = vmatmul.bf16.gmra.mxu0 %v7821_v61  ;;  %v9350_v15 = vrot.slane %v7845_v56, 1  ;;  %v7866_v6 = vrot.slane %v1506_v46, 1  ;;  %v9354_v46 = vshll.u32 %v7868_v5, 16 }
  0xf5   : > { %v1212_v16 = vsel %vm7178_vm2, %v1203_v39, %v1211_v31  ;;  %v1213_v30 = vrot.slane %v1211_v31, 4  ;;  %v7850_v27 = vor.u32 %v9351_v43, %v7838_v32  ;;  %v2309_v8 = vrot.slane %v5869_v47, 1  ;;  %v6799_v47 = vld [vmem:[#allocation3 + $0x8] sm:$0xe] }
  0xf6   : > { %1310 = vst [vmem:[#allocation3 + $0xa4] sm:$0xf] %v1212_v16  ;;  %v1313_v44 = vsel %vm7201_vm4, %v1223_v13, %v1312_v11  ;;  %v1360_v3 = vld [vmem:[#allocation3 + $0xa0] sm:$0xf]  ;;  %v7859_v39 = vrot.slane %v9347_v17, 1  ;;  %v9348_v31 = vshrl.u32 %v7841_v24, 16 }
  0xf7   : > { %v1222_v52 = vsel %vm7178_vm2, %v1213_v30, %v1221_v2  ;;  %1314 = vst [vmem:[#allocation3 + $0xac] sm:$0x3] %v1313_v44  ;;  %v7834_v40 = vunpack.c.l.b16 %v1360_v3  ;;  %v2826_v2 = vld [vmem:[#allocation3 + $0x8] sm:$0xe]  ;;  %v6798_v13 = vld [vmem:[#allocation3 + $0x8] sm:$0xf0]  ;;  %v2311_v37 = vsel %vm2308_vm8, %v2309_v8, %v9350_v15 }
  0xf8   : > { %1311 = vst [vmem:[#allocation3 + $0xa8] sm:$0xf] %v1222_v52  ;;  %v7864_v16 = vld [vmem:[#allocation3 + $0xc] sm:$0xf]  ;;  %v6867_v30 = vld [vmem:[#allocation3] sm:$0xff]  ;;  %v7873_v44 = vor.u32 %v9348_v31, %v7859_v39  ;;  %v6453_v52 = vld [vmem:[#allocation3 + $0x10] sm:$0xff]  ;;  %v6800_v31 = vor.u32 %v6799_v47, %v6798_v13  ;;  %v2911_v1 = vunpack.c.l.b16 %v2826_v2 }
  0xf9   : > { %9501 = vst [vmem:[#allocation45_spill] sm:$0xff] %v7834_v40  ;;  %v1464_v7 = vpack.c.b16 %v7834_v40, %v7834_v40  ;;  %v1493_v12 = vshll.u32 %v6867_v30, 16  ;;  %v1491_v3 = vshrl.u32 %v6867_v30, 16  ;;  %v7883_v17 = vld [vmem:[#allocation3 + $0x28] sm:$0xff]  ;;  %v9357_v30 = vshrl.u32 %v7855_v0, 16 }
  0xfa   : > { %v6427_v26 = vld [vmem:[#allocation3 + $0x58] sm:$0xff]  ;;  %v7892_v15 = vrot.slane %v9354_v46, 1  ;;  %v9359_v43 = vshrl.u32 %v7868_v5, 16  ;;  %v1498_v13 = vshll.u32 %v7485_v34, 16  ;;  %v7917_v34 = vld [vmem:[#allocation3 + $0x60] sm:$0xff]  ;;  %v9520_v63 = vunpack.c.l.b16 %v7864_v16 }
  0xfb   : > { %1914 = vmatmul.bf16.gmra.mxu3 %v1464_v7  ;;  %v9353_v7 = vshll.u32 %v7855_v0, 16  ;;  %v1495_v2 = vrot.slane %v1493_v12, 1  ;;  %v2312_v12 = vrot.slane %v6800_v31, 1  ;;  %9503 = vst [vmem:[#allocation46_spill] sm:$0xff] %v7917_v34  ;;  %v9365_v31 = vshll.u32 %v7917_v34, 16 }
  0xfc   : > { %v1500_v19 = vrot.slane %v1498_v13, 1 }
  0xfd   : > { %1869 = vmatmul.bf16.gmra.mxu1 %v6427_v26  ;;  %v7887_v8 = vrot.slane %v9353_v7, 1  ;;  %v9502_v7 = vunpack.c.l.b16 %v7864_v16  ;;  %v1496_v35 = vor.u32 %v1495_v2, %v1491_v3  ;;  %v3185_v3 = vrot.slane %v9505_v14, 1  ;;  %v7945_v14 = vld [vmem:[#allocation3 + $0x70] sm:$0xff]  ;;  %v8122_v16 = vld [vmem:[#allocation3 + $0x80] sm:$0xff] }
  0xfe   : > { %v1315_v60 = vld [vmem:[#allocation3 + $0xac] sm:$0xe]  ;;  %v9506_v2 = vshll.u32 %v7819_v33, 16  ;;  %9507 = vst [vmem:[#allocation48_spill] sm:$0xff] %v7945_v14 }
  0xff   : > { %v1316_v11 = vsel %vm7403_vm7, 0, %v1315_v60  ;;  %v1510_v60 = vshrl.u32 %v7566_v38, 16  ;;  %v7905_v47 = vor.u32 %v9357_v30, %v7887_v8  ;;  %v2953_v46 = vpack.c.b16 %v9502_v7, %v2911_v1  ;;  %9524 = vst [vmem:[#allocation56_spill] sm:$0xff] %v8122_v16 }
 0x100   : > { %1317 = vst [vmem:[#allocation3 + $0xac] sm:$0xe] %v1316_v11  ;;  %v1514_v11 = vshll.u32 %v7724_v58, 16  ;;  %v3186_v13 = vrot.slane %v9506_v2, 2 }
 0x101   : > { %v1512_v38 = vor.u32 %v1510_v60, %v7866_v6  ;;  %v7912_v60 = vor.u32 %v9359_v43, %v7892_v15  ;;  %v3178_v9 = vshrl.u32 %v2953_v46, 16  ;;  %v3181_v1 = vshll.u32 %v2953_v46, 16 }
 0x102   : > { %v1516_v26 = vrot.slane %v1514_v11, 1  ;;  %v9364_v43 = vshrl.u32 %v7896_v50, 16 }
 0x103   : > { %2485 = vmatmul.bf16.vlgmr.msrb.gmra.mxu2 %v2311_v37  ;;  %v7900_v37 = vrot.slane %v6453_v52, 1  ;;  %v9361_v52 = vshll.u32 %v7896_v50, 16  ;;  %v3180_v42 = vrot.slane %v3178_v9, 1  ;;  %v3183_v45 = vrot.slane %v3181_v1, 2 }
 0x104   : > { %1839 = vmatmul.bf16.gmra.mxu0 %v7883_v17  ;;  %v7915_v11 = vsel %vm1489_vm9, %v1512_v38, %v1516_v26  ;;  %v7928_v38 = vld [vmem:[#allocation3 + $0x68] sm:$0xff]  ;;  %v9508_v9 = vrot.slane %v7845_v56, 1 }
 0x105   : > { %v2314_v30 = vsel %vm2308_vm8, %v2312_v12, %v7900_v37  ;;  %v7924_v7 = vrot.slane %v9361_v52, 1  ;;  %9504 = vst [vmem:[#allocation47_spill] sm:$0xff] %v7928_v38  ;;  %v1501_v12 = vsel %vm1489_vm9, %v1496_v35, %v1500_v19  ;;  %v9367_v52 = vshrl.u32 %v7917_v34, 16 }
 0x106   : > { %v9368_v2 = vshll.u32 %v7928_v38, 16  ;;  %v2315_v1 = vsel %vm2308_vm8, %v9508_v9, %v7900_v37  ;;  %v6550_v9 = vld [vmem:[%s9332_s4 + $0x1b0] sm:$0xff] }
 0x107   : > { %v7937_v46 = vor.u32 %v9364_v43, %v7924_v7  ;;  %v7953_v43 = vor.u32 %v3186_v13, %v3185_v3  ;;  %v7967_v3 = vld [vmem:[#allocation3 + $0x20] sm:$0xff]  ;;  %4512 = vmatpush.bf16.msra.mxu2 %v6550_v9  ;;  %v9510_v9 = vrot.slane %v7964_v48, 1 }
 0x108   : > { %v7957_v35 = vrot.slane %v9368_v2, 1  ;;  %v9509_v53 = vshll.u32 %v7967_v3, 16  ;;  %v9379_v25 = vshrl.u32 %v7967_v3, 16  ;;  %v9522_v48 = vshrl.u32 %v7967_v3, 16 }
 0x109   : > { %v9523_v23 = vshll.u32 %v7967_v3, 16  ;;  %v6456_v3 = vld [vmem:[#allocation3 + $0x28] sm:$0xff] }
 0x10a   : > { %v8001_v51 = vrot.slane %v9509_v53, 1  ;;  %v8014_v53 = vld [vmem:[#allocation3 + $0x48] sm:$0xff] }
 0x10b   : > { %2598 = vmatmul.bf16.vlgmr.msrb.gmra.mxu3 %v2314_v30  ;;  %v7942_v30 = vrot.slane %v9365_v31, 1  ;;  %v9370_v31 = vshrl.u32 %v7928_v38, 16 }
 0x10d   : > { %1927 = vmatmul.bf16.vlgmr.msrb.gmra.mxu1 %v1501_v12  ;;  %v7950_v33 = vor.u32 %v9367_v52, %v7942_v30  ;;  %v3184_v12 = vor.u32 %v3183_v45, %v3180_v42  ;;  %v9369_v52 = vshll.u32 %v7945_v14, 16  ;;  %v7972_v13 = vor.u32 %v9370_v31, %v7957_v35 }
 0x10e   : > { %v9377_v42 = vshrl.u32 %v7945_v14, 16  ;;  %v1522_v31 = vshll.u32 %v7821_v61, 16 }
 0x10f   : > { %v3188_v2 = vsel %vm3176_vm10, %v3184_v12, %v7953_v43  ;;  %v7978_v56 = vrot.slane %v9369_v52, 1  ;;  %v6522_v12 = vld [vmem:[%s9332_s4 + $0x170] sm:$0xff]  ;;  %v1518_v52 = vshrl.u32 %v7724_v58, 16  ;;  %v8004_v58 = vld [vmem:[#allocation3 + $0x28] sm:$0xff] }
 0x110   : > { %v1524_v28 = vrot.slane %v1522_v31, 1  ;;  %3705 = vmatpush.bf16.msra.mxu1 %v6522_v12  ;;  %v1530_v12 = vshll.u32 %v7883_v17, 16 }
 0x111   : > { %v7997_v45 = vor.u32 %v9377_v42, %v7978_v56  ;;  %v1520_v36 = vor.u32 %v1518_v52, %v1516_v26  ;;  %v8009_v42 = vor.u32 %v9379_v25, %v8001_v51  ;;  %v2317_v26 = vsel %vm2308_vm8, %v7900_v37, %v9510_v9 }
 0x112   : > { %v9384_v52 = vshll.u32 %v8004_v58, 16  ;;  %v9383_v25 = vshll.u32 %v8014_v53, 16  ;;  %v9386_v37 = vshrl.u32 %v8004_v58, 16  ;;  %v1526_v9 = vshrl.u32 %v7821_v61, 16 }
 0x113   : > { %2490 = vmatmul.bf16.gmra.mxu2 %v2315_v1  ;;  %v6558_v1 = vld [vmem:[%s9332_s4 + $0x1f0] sm:$0xff]  ;;  %v8012_v22 = vsel %vm1489_vm9, %v1520_v36, %v1524_v28  ;;  %v9512_v36 = vshll.u32 %v7868_v5, 16 }
 0x114   : > { %3599 = vmatmul.bf16.vlgmr.msrb.gmra.mxu0 %v3188_v2  ;;  %4625 = vmatpush.bf16.msra.mxu3 %v6558_v1  ;;  %v1502_v2 = vshrl.u32 %v6868_v59, 16  ;;  %v9511_v59 = vshrl.u32 %v7868_v5, 16  ;;  %v8029_v57 = vrot.slane %v9384_v52, 1  ;;  %v6587_v5 = vld [vmem:[%s9332_s4 + $0x230] sm:$0xff] }
 0x115   : > { %v3207_v21 = vrot.slane %v9512_v36, 2  ;;  %v1528_v36 = vor.u32 %v1526_v9, %v1524_v28  ;;  %5135 = vmatpush.bf16.msra.mxu0 %v6587_v5  ;;  %v6455_v28 = vld [vmem:[#allocation3 + $0x20] sm:$0xff]  ;;  %v9393_v9 = vshrl.u32 %v8040_v18, 16 }
 0x116   : > { %v1504_v31 = vor.u32 %v1502_v2, %v1500_v19  ;;  %v3206_v1 = vrot.slane %v9511_v59, 1  ;;  %v8037_v2 = vrot.slane %v9383_v25, 1  ;;  %v9387_v59 = vshrl.u32 %v8014_v53, 16 }
 0x117   : > { %v8048_v61 = vor.u32 %v9386_v37, %v8029_v57  ;;  %v8064_v37 = vld [vmem:[#allocation3 + $0x90] sm:$0xff]  ;;  %v2318_v41 = vrot.slane %v6455_v28, 1 }
 0x118   : > { %v1509_v19 = vsel %vm1489_vm9, %v1504_v31, %v7866_v6  ;;  %v8050_v6 = vrot.slane %v1530_v12, 1  ;;  %v8057_v25 = vor.u32 %v9387_v59, %v8037_v2  ;;  %9515 = vst [vmem:[#allocation51_spill] sm:$0xff] %v8064_v37  ;;  %v8068_v12 = vrot.slane %v9388_v54, 1  ;;  %v2868_v59 = vld [vmem:[#allocation3 + $0x8] sm:$0xc]  ;;  %v8083_v54 = vpop.f32.mrf.mxu0 }
 0x119   : > { %v2975_v20 = vunpack.c.l.b16 %v2868_v59  ;;  %v2319_v28 = vsel %vm2308_vm8, %v9519_v29, %v2318_v41  ;;  %v3219_v29 = vrot.slane %v9522_v48, 1  ;;  %v9411_v48 = vshll.u32 %v8122_v16, 16 }
 0x11a   : > { %v8052_v31 = vpop.f32.mrf.mxu1  ;;  %v8061_v52 = vsel %vm1489_vm9, %v1528_v36, %v8050_v6  ;;  %v8078_v5 = vor.u32 %v9393_v9, %v8068_v12  ;;  %v8080_v36 = vld [vmem:[#allocation3 + $0x88] sm:$0xff] }
 0x11b   : > { %2603 = vmatmul.bf16.gmra.mxu3 %v2317_v26  ;;  %9514 = vst [vmem:[#allocation50_spill] sm:$0xff] %v8052_v31  ;;  %v9399_v10 = vshll.u32 %v8080_v36, 16  ;;  %v9403_v4 = vshrl.u32 %v8080_v36, 16  ;;  %v2976_v59 = vpack.c.b16 %v9520_v63, %v2975_v20 }
 0x11c   : > { %9517 = vst [vmem:[#allocation53_spill] sm:$0xff] %v8080_v36  ;;  %v9415_v36 = vshrl.u32 %v8122_v16, 16  ;;  %v9530_v16 = vshll.u32 %v8004_v58, 16 }
 0x11d   : > { %1932 = vmatmul.bf16.gmra.mxu1 %v1509_v19  ;;  %v3208_v19 = vor.u32 %v3207_v21, %v3206_v1  ;;  %v8095_v9 = vrot.slane %v9399_v10, 1  ;;  %v2980_v63 = vshll.u32 %v2976_v59, 16  ;;  %v2978_v31 = vshrl.u32 %v2976_v59, 16 }
 0x11f   : > { %v3209_v21 = vsel %vm3176_vm10, %v7953_v43, %v3208_v19  ;;  %v8113_v10 = vor.u32 %v9403_v4, %v8095_v9  ;;  %v9410_v4 = vshrl.u32 %v8108_v62, 16 }
 0x121   : > { %v8073_v1 = vpop.f32.mrf.mxu2 }
 0x122   : > { %9516 = vst [vmem:[#allocation52_spill] sm:$0xff] %v8073_v1  ;;  %v8091_v55 = vpop.f32.mrf.mxu1  ;;  %v9407_v1 = vshll.u32 %v8108_v62, 16 }
 0x123   : > { %2495 = vmatmul.bf16.gmra.mxu2 %v2317_v26  ;;  %v9396_v26 = vshll.u32 %v8064_v37, 16  ;;  %9518 = vst [vmem:[#allocation54_spill] sm:$0xff] %v8091_v55  ;;  %v8145_v55 = vld [vmem:[#allocation3 + $0x98] sm:$0xff] }
 0x124   : > { %3604 = vmatmul.bf16.gmra.mxu0 %v3209_v21  ;;  %v9402_v21 = vshrl.u32 %v8064_v37, 16  ;;  %v8127_v20 = vrot.slane %v9407_v1, 1  ;;  %v2982_v37 = vrot.slane %v2980_v63, 1  ;;  %v8142_v1 = vrot.slane %v9411_v48, 1  ;;  %9526 = vst [vmem:[#allocation58_spill] sm:$0xff] %v8145_v55 }
 0x125   : > { %v8088_v43 = vrot.slane %v9396_v26, 1  ;;  %v9420_v18 = vshrl.u32 %v8145_v55, 16 }
 0x126   : > { %v8153_v63 = vor.u32 %v9415_v36, %v8142_v1  ;;  %v2983_v48 = vor.u32 %v2982_v37, %v2978_v31  ;;  %v2996_v37 = vsel %vm1489_vm9, %v7850_v27, %v7892_v15  ;;  %v6549_v15 = vld [vmem:[%s9332_s4 + $0x1a8] sm:$0xff] }
 0x127   : > { %v8104_v26 = vor.u32 %v9402_v21, %v8088_v43  ;;  %v3220_v21 = vrot.slane %v9523_v23, 2  ;;  %v8136_v23 = vor.u32 %v9410_v4, %v8127_v20  ;;  %v9414_v4 = vshll.u32 %v8145_v55, 16  ;;  %4513 = vmatpush.bf16.msra.mxu2 %v6549_v15 }
 0x128   : > { %v3233_v55 = vrot.slane %v9530_v16, 2  ;;  %v3201_v14 = vshll.u32 %v2996_v37, 16  ;;  %v3028_v15 = vsel %vm1489_vm9, %v7873_v44, %v7887_v8  ;;  %v8235_v44 = vsel %vm1489_vm9, %v7950_v33, %v7957_v35 }
 0x129   : > { %v8115_v49 = vpop.f32.mrf.mxu2  ;;  %v3221_v40 = vor.u32 %v3220_v21, %v3219_v29  ;;  %v3250_v35 = vshrl.u32 %v3028_v15, 16 }
 0x12a   : > { %9521 = vst [vmem:[#allocation55_spill] sm:$0xff] %v8115_v49  ;;  %v8130_v49 = vpop.f32.mrf.mxu0 }
 0x12b   : > { %2608 = vmatmul.bf16.gmra.mxu3 %v2319_v28  ;;  %v3222_v21 = vsel %vm3176_vm10, %v3208_v19, %v3221_v40  ;;  %v2988_v19 = vsel %vm1489_vm9, %v2983_v48, %v7838_v32  ;;  %v9529_v48 = vshrl.u32 %v8004_v58, 16  ;;  %v3203_v58 = vrot.slane %v3201_v14, 2 }
 0x12c   : > { %v3190_v31 = vshrl.u32 %v2988_v19, 16  ;;  %v3193_v36 = vshll.u32 %v2988_v19, 16  ;;  %v6557_v19 = vld [vmem:[%s9332_s4 + $0x1e8] sm:$0xff] }
 0x12d   : > { %1937 = vmatmul.bf16.gmra.mxu1 %v7915_v11  ;;  %v8138_v11 = vpop.f32.mrf.mxu1  ;;  %4626 = vmatpush.bf16.msra.mxu3 %v6557_v19 }
 0x12e   : > { %9525 = vst [vmem:[#allocation57_spill] sm:$0xff] %v8138_v11  ;;  %v8158_v11 = vrot.slane %v9414_v4, 1  ;;  %v8174_v4 = vld [vmem:[#allocation3 + $0x58] sm:$0xff] }
 0x12f   : > { %v9427_v27 = vshll.u32 %v8174_v4, 16 }
 0x131   : > { %v8148_v29 = vpop.f32.mrf.mxu2  ;;  %v8194_v16 = vrot.slane %v9427_v27, 1 }
 0x132   : > { %9527 = vst [vmem:[#allocation59_spill] sm:$0xff] %v8148_v29  ;;  %v8163_v59 = vpop.f32.mrf.mxu0  ;;  %v3198_v29 = vshrl.u32 %v2996_v37, 16  ;;  %v9428_v37 = vshrl.u32 %v8174_v4, 16 }
 0x133   : > { %2500 = vmatmul.bf16.gmra.mxu2 %v2319_v28  ;;  %v2320_v28 = vrot.slane %v6456_v3, 1  ;;  %v8169_v3 = vor.u32 %v9420_v18, %v8158_v11  ;;  %v3192_v18 = vrot.slane %v3190_v31, 1 }
 0x134   : > { %3609 = vmatmul.bf16.gmra.mxu0 %v3222_v21  ;;  %v8202_v34 = vor.u32 %v9428_v37, %v8194_v16 }
 0x135   : > { %v2321_v21 = vsel %vm2308_vm8, %v2318_v41, %v2320_v28  ;;  %v3232_v41 = vrot.slane %v9529_v48, 1  ;;  %v8182_v38 = vpop.f32.mrf.mxu1  ;;  %v3195_v48 = vrot.slane %v3193_v36, 2 }
 0x136   : > { %9531 = vst [vmem:[#allocation61_spill] sm:$0xff] %v8182_v38 }
 0x137   : > { %v3234_v31 = vor.u32 %v3233_v55, %v3232_v41  ;;  %v6457_v41 = vld [vmem:[#allocation3 + $0x30] sm:$0xff] }
 0x139   : > { %v8176_v32 = vpop.f32.mrf.mxu2 }
 0x13a   : > { %9528 = vst [vmem:[#allocation60_spill] sm:$0xff] %v8176_v32  ;;  %v3200_v32 = vrot.slane %v3198_v29, 1  ;;  %v8208_v36 = vpop.f32.mrf.mxu0  ;;  %v3235_v29 = vsel %vm3176_vm10, %v3221_v40, %v3234_v31  ;;  %v6586_v40 = vld [vmem:[%s9332_s4 + $0x228] sm:$0xff] }
 0x13b   : > { %2613 = vmatmul.bf16.gmra.mxu3 %v2321_v21  ;;  %5136 = vmatpush.bf16.msra.mxu0 %v6586_v40  ;;  %v3253_v40 = vshll.u32 %v3028_v15, 16 }
 0x13c   : > { %v8197_v38 = vor.u32 %v3203_v58, %v3200_v32  ;;  %v8227_v58 = vld [vmem:[#allocation3 + $0xa0] sm:$0xff] }
 0x13d   : > { %1942 = vmatmul.bf16.gmra.mxu1 %v8012_v22  ;;  %v3196_v22 = vor.u32 %v3195_v48, %v3192_v18  ;;  %v6521_v18 = vld [vmem:[%s9332_s4 + $0x168] sm:$0xff]  ;;  %v8216_v32 = vpop.f32.mrf.mxu1  ;;  %9536 = vst [vmem:[#allocation66_spill] sm:$0xff] %v8227_v58  ;;  %v9429_v27 = vshll.u32 %v8227_v58, 16 }
 0x13e   : > { %9534 = vst [vmem:[#allocation64_spill] sm:$0xff] %v8216_v32  ;;  %3706 = vmatpush.bf16.msra.mxu1 %v6521_v18 }
 0x13f   : > { %v8206_v14 = vsel %vm3176_vm10, %v3196_v22, %v8197_v38  ;;  %v3036_v22 = vsel %vm1489_vm9, %v7905_v47, %v7924_v7  ;;  %v8247_v47 = vrot.slane %v9429_v27, 1  ;;  %v9432_v7 = vshrl.u32 %v8227_v58, 16 }
 0x140   : > { %9532 = vst [vmem:[#allocation62_spill] sm:$0xff] %v8206_v14  ;;  %v3263_v27 = vshrl.u32 %v3036_v22, 16  ;;  %v3266_v14 = vshll.u32 %v3036_v22, 16 }
 0x141   : > { %v8211_v55 = vpop.f32.mrf.mxu2 }
 0x142   : > { %9533 = vst [vmem:[#allocation63_spill] sm:$0xff] %v8211_v55  ;;  %v8237_v8 = vpop.f32.mrf.mxu0  ;;  %v3255_v55 = vrot.slane %v3253_v40, 2  ;;  %v3268_v58 = vrot.slane %v3266_v14, 2  ;;  %v9545_v14 = vshrl.u32 %v7855_v0, 16 }
 0x143   : > { %2505 = vmatmul.bf16.gmra.mxu2 %v2321_v21  ;;  %v2322_v21 = vrot.slane %v6457_v41, 1  ;;  %v9538_v41 = vshll.u32 %v7841_v24, 16 }
 0x144   : > { %3614 = vmatmul.bf16.gmra.mxu0 %v3235_v29 }
 0x145   : > { %v2323_v19 = vsel %vm2308_vm8, %v2320_v28, %v2322_v21  ;;  %v9537_v28 = vshrl.u32 %v7841_v24, 16  ;;  %v3246_v18 = vrot.slane %v9538_v41, 2  ;;  %v8250_v33 = vpop.f32.mrf.mxu1  ;;  %v8257_v24 = vor.u32 %v9432_v7, %v8247_v47 }
 0x146   : > { %9539 = vst [vmem:[#allocation67_spill] sm:$0xff] %v8250_v33  ;;  %v6869_v33 = vld [vmem:[#allocation3 + $0x30] sm:$0xff] }
 0x147   : > { %v3245_v29 = vrot.slane %v9537_v28, 1  ;;  %v1538_v32 = vshll.u32 %v6869_v33, 16 }
 0x149   : > { %v8225_v48 = vpop.f32.mrf.mxu2  ;;  %v3247_v37 = vor.u32 %v3246_v18, %v3245_v29  ;;  %v3265_v29 = vrot.slane %v3263_v27, 1  ;;  %v1534_v18 = vshrl.u32 %v7883_v17, 16  ;;  %v1540_v40 = vrot.slane %v1538_v32, 1 }
 0x14a   : > { %9535 = vst [vmem:[#allocation65_spill] sm:$0xff] %v8225_v48  ;;  %v3252_v48 = vrot.slane %v3250_v35, 1  ;;  %v8264_v7 = vpop.f32.mrf.mxu0  ;;  %v3044_v32 = vsel %vm1489_vm9, %v7937_v46, %v8037_v2 }
 0x14b   : > { %2618 = vmatmul.bf16.gmra.mxu3 %v2323_v19  ;;  %v3248_v28 = vsel %vm3176_vm10, %v3234_v31, %v3247_v37  ;;  %v1536_v31 = vor.u32 %v1534_v18, %v8050_v6  ;;  %v9546_v6 = vshll.u32 %v7855_v0, 16  ;;  %v3276_v18 = vshrl.u32 %v3044_v32, 16 }
 0x14d   : > { %1947 = vmatmul.bf16.gmra.mxu1 %v8061_v52  ;;  %v8252_v52 = vld [vmem:[#allocation3 + $0x38] sm:$0xff] }
 0x14e   : > { %v2324_v15 = vrot.slane %v8252_v52, 1  ;;  %v3258_v52 = vrot.slane %v9545_v14, 1  ;;  %v3331_v14 = vshll.u32 %v8235_v44, 16 }
 0x150   : > { %v2325_v22 = vsel %vm2308_vm8, %v2322_v21, %v2324_v15 }
 0x151   : > { %v8271_v35 = vpop.f32.mrf.mxu3 }
 0x152   : > { %v8260_v41 = vpop.f32.mrf.mxu2  ;;  %9542 = vst [vmem:[#allocation70_spill] sm:$0xff] %v8271_v35  ;;  %v3279_v35 = vshll.u32 %v3044_v32, 16 }
 0x153   : > { %2510 = vmatmul.bf16.gmra.mxu2 %v2323_v19  ;;  %9540 = vst [vmem:[#allocation68_spill] sm:$0xff] %v8260_v41  ;;  %v8269_v41 = vor.u32 %v3255_v55, %v3252_v48  ;;  %v3259_v55 = vrot.slane %v9546_v6, 2  ;;  %v1541_v48 = vsel %vm1489_vm9, %v1536_v31, %v1540_v40  ;;  %v3278_v31 = vrot.slane %v3276_v18, 1 }
 0x154   : > { %3619 = vmatmul.bf16.gmra.mxu0 %v3248_v28  ;;  %v8266_v19 = vpop.f32.mrf.mxu1  ;;  %v3269_v28 = vor.u32 %v3268_v58, %v3265_v29  ;;  %v3328_v29 = vshrl.u32 %v8235_v44, 16  ;;  %v3281_v6 = vrot.slane %v3279_v35, 2  ;;  %v3084_v44 = vsel %vm1489_vm9, %v7972_v13, %v7978_v56 }
 0x155   : > { %9541 = vst [vmem:[#allocation69_spill] sm:$0xff] %v8266_v19  ;;  %v8287_v21 = vor.u32 %v3259_v55, %v3258_v52  ;;  %v8302_v55 = vld [vmem:[#allocation3 + $0x38] sm:$0xff]  ;;  %v3341_v18 = vshrl.u32 %v3084_v44, 16  ;;  %v3344_v35 = vshll.u32 %v3084_v44, 16  ;;  %v1542_v19 = vshrl.u32 %v6869_v33, 16 }
 0x156   : > { %v8276_v17 = vsel %vm3176_vm10, %v8269_v41, %v3269_v28  ;;  %v1546_v46 = vshll.u32 %v8302_v55, 16  ;;  %v3330_v2 = vrot.slane %v3328_v29, 1  ;;  %v8308_v32 = vor.u32 %v3281_v6, %v3278_v31 }
 0x157   : > { %9543 = vst [vmem:[#allocation71_spill] sm:$0xff] %v8276_v17  ;;  %v8294_v17 = vld [vmem:[#allocation3 + $0x40] sm:$0xff]  ;;  %v3261_v52 = vsel %vm3176_vm10, %v3247_v37, %v8287_v21  ;;  %v3346_v29 = vrot.slane %v3344_v35, 2  ;;  %v3004_v35 = vsel %vm1489_vm9, %v7912_v60, %v8001_v51  ;;  %v3052_v51 = vsel %vm1489_vm9, %v8057_v25, %v8127_v20 }
 0x158   : > { %v8315_v37 = vsel %vm3176_vm10, %v3269_v28, %v8308_v32  ;;  %v6585_v25 = vld [vmem:[%s9332_s4 + $0x220] sm:$0xff] }
 0x159   : > { %9550 = vst [vmem:[#allocation76_spill] sm:$0xff] %v8315_v37  ;;  %5137 = vmatpush.bf16.msra.mxu0 %v6585_v25 }
 0x15a   : > { %v8278_v27 = vpop.f32.mrf.mxu2 }
 0x15b   : > { %2623 = vmatmul.bf16.gmra.mxu3 %v2325_v22  ;;  %9544 = vst [vmem:[#allocation72_spill] sm:$0xff] %v8278_v27 }
 0x15c   : > { %v8285_v58 = vpop.f32.mrf.mxu0  ;;  %v8296_v0 = vpop.f32.mrf.mxu1 }
 0x15d   : > { %1952 = vmatmul.bf16.gmra.mxu1 %v1541_v48  ;;  %9547 = vst [vmem:[#allocation73_spill] sm:$0xff] %v8285_v58  ;;  %v8298_v48 = vpop.f32.mrf.mxu3  ;;  %v8317_v58 = vrot.slane %v1546_v46, 1 }
 0x15e   : > { %9548 = vst [vmem:[#allocation74_spill] sm:$0xff] %v8296_v0  ;;  %v3343_v0 = vrot.slane %v3341_v18, 1 }
 0x15f   : > { %9549 = vst [vmem:[#allocation75_spill] sm:$0xff] %v8298_v48  ;;  %v9433_v48 = vrot.slane %v8294_v17, 1 }
 0x160   : > { %v8321_v56 = vor.u32 %v3346_v29, %v3343_v0  ;;  %v9553_v0 = vshrl.u32 %v7896_v50, 16  ;;  %v3211_v29 = vshrl.u32 %v3004_v35, 16 }
 0x161   : > { %v2327_v31 = vsel %vm2308_vm8, %v2324_v15, %v9433_v48  ;;  %v6548_v15 = vld [vmem:[%s9332_s4 + $0x1a0] sm:$0xff]  ;;  %v8367_v48 = vld [vmem:[#allocation3 + $0x48] sm:$0xff] }
 0x162   : > { %v3271_v46 = vrot.slane %v9553_v0, 1  ;;  %4514 = vmatpush.bf16.msra.mxu2 %v6548_v15  ;;  %v3214_v0 = vshll.u32 %v3004_v35, 16  ;;  %v3289_v35 = vshrl.u32 %v3052_v51, 16 }
 0x163   : > { %2515 = vmatmul.bf16.gmra.mxu2 %v2325_v22  ;;  %v3333_v22 = vrot.slane %v3331_v14, 2 }
 0x164   : > { %3624 = vmatmul.bf16.gmra.mxu0 %v3261_v52  ;;  %v8323_v14 = vpop.f32.mrf.mxu0  ;;  %v1544_v52 = vor.u32 %v1542_v19, %v1540_v40  ;;  %v6556_v19 = vld [vmem:[%s9332_s4 + $0x1e0] sm:$0xff]  ;;  %v3092_v40 = vsel %vm1489_vm9, %v7997_v45, %v8068_v12  ;;  %v3012_v45 = vsel %vm1489_vm9, %v8009_v42, %v8029_v57  ;;  %v3213_v12 = vrot.slane %v3211_v29, 1 }
 0x165   : > { %v8319_v13 = vor.u32 %v3333_v22, %v3330_v2  ;;  %v9554_v2 = vshll.u32 %v7896_v50, 16  ;;  %v6520_v50 = vld [vmem:[%s9332_s4 + $0x160] sm:$0xff]  ;;  %4627 = vmatpush.bf16.msra.mxu3 %v6556_v19  ;;  %v3224_v15 = vshrl.u32 %v3012_v45, 16  ;;  %v3354_v19 = vshrl.u32 %v3092_v40, 16 }
 0x166   : > { %v8310_v27 = vpop.f32.mrf.mxu2  ;;  %v1549_v22 = vsel %vm1489_vm9, %v1544_v52, %v8317_v58  ;;  %3707 = vmatpush.bf16.msra.mxu1 %v6520_v50  ;;  %v3216_v52 = vrot.slane %v3214_v0, 2  ;;  %v3357_v50 = vshll.u32 %v3092_v40, 16  ;;  %v3292_v29 = vshll.u32 %v3052_v51, 16  ;;  %v8377_v0 = vld [vmem:[#allocation3 + $0x40] sm:$0xff] }
 0x167   : > { %v8333_v33 = vsel %vm3176_vm10, %v8319_v13, %v8321_v56  ;;  %v3272_v44 = vrot.slane %v9554_v2, 2 }
 0x168   : > { %9551 = vst [vmem:[#allocation77_spill] sm:$0xff] %v8333_v33  ;;  %v3227_v33 = vshll.u32 %v3012_v45, 16  ;;  %v1554_v45 = vshll.u32 %v8377_v0, 16  ;;  %v3359_v51 = vrot.slane %v3357_v50, 2 }
 0x169   : > { %v8360_v2 = vor.u32 %v3272_v44, %v3271_v46  ;;  %v3217_v46 = vor.u32 %v3216_v52, %v3213_v12  ;;  %v3226_v44 = vrot.slane %v3224_v15, 1  ;;  %v3291_v12 = vrot.slane %v3289_v35, 1 }
 0x16a   : > { %v8328_v6 = vpop.f32.mrf.mxu1  ;;  %v3229_v42 = vrot.slane %v3227_v33, 2  ;;  %v3294_v52 = vrot.slane %v3292_v29, 2  ;;  %v3356_v15 = vrot.slane %v3354_v19, 1  ;;  %v8396_v37 = vrot.slane %v1554_v45, 1 }
 0x16b   : > { %2628 = vmatmul.bf16.gmra.mxu3 %v2327_v31  ;;  %v8335_v28 = vpop.f32.mrf.mxu3  ;;  %v3274_v57 = vsel %vm3176_vm10, %v8287_v21, %v8360_v2  ;;  %v8385_v20 = vsel %vm3176_vm10, %v8197_v38, %v3217_v46  ;;  %v2328_v21 = vrot.slane %v8367_v48, 1  ;;  %v9560_v45 = vshll.u32 %v8014_v53, 16 }
 0x16c   : > { %9552 = vst [vmem:[#allocation78_spill] sm:$0xff] %v8335_v28  ;;  %v3230_v33 = vor.u32 %v3229_v42, %v3226_v44  ;;  %v3295_v38 = vor.u32 %v3294_v52, %v3291_v12  ;;  %v9558_v44 = vrot.slane %v8294_v17, 1  ;;  %v9559_v17 = vshrl.u32 %v8014_v53, 16 }
 0x16d   : > { %1957 = vmatmul.bf16.gmra.mxu1 %v1549_v22  ;;  %v3285_v25 = vrot.slane %v9560_v45, 2 }
 0x16e   : > { %v8352_v18 = vpop.f32.mrf.mxu2  ;;  %v8394_v28 = vsel %vm3176_vm10, %v3217_v46, %v3230_v33  ;;  %v2329_v19 = vsel %vm2308_vm8, %v9558_v44, %v2328_v21  ;;  %v8413_v35 = vsel %vm3176_vm10, %v8308_v32, %v3295_v38  ;;  %v3284_v29 = vrot.slane %v9559_v17, 1 }
 0x16f   : > { %9555 = vst [vmem:[#allocation79_spill] sm:$0xff] %v8352_v18  ;;  %v3360_v18 = vor.u32 %v3359_v51, %v3356_v15 }
 0x170   : > { %v8432_v51 = vor.u32 %v3285_v25, %v3284_v29  ;;  %v8453_v25 = vld [vmem:[#allocation3 + $0x48] sm:$0xff] }
 0x171   : > { %v8365_v22 = vpop.f32.mrf.mxu0 }
 0x172   : > { %v8372_v60 = vpop.f32.mrf.mxu1 }
 0x173   : > { %2520 = vmatmul.bf16.gmra.mxu2 %v2327_v31  ;;  %v8387_v31 = vpop.f32.mrf.mxu3 }
 0x174   : > { %3629 = vmatmul.bf16.gmra.mxu0 %v3274_v57  ;;  %9556 = vst [vmem:[#allocation80_spill] sm:$0xff] %v8387_v31  ;;  %v1550_v57 = vshrl.u32 %v8302_v55, 16  ;;  %v3020_v55 = vsel %vm1489_vm9, %v8048_v61, %v7859_v39 }
 0x175   : > { %v3237_v50 = vshrl.u32 %v3020_v55, 16  ;;  %v3240_v42 = vshll.u32 %v3020_v55, 16  ;;  %v8439_v55 = vld [vmem:[#allocation3 + $0x50] sm:$0xff] }
 0x176   : > { %v8389_v40 = vpop.f32.mrf.mxu2 }
 0x177   : > { %9557 = vst [vmem:[#allocation81_spill] sm:$0xff] %v8389_v40  ;;  %v1552_v40 = vor.u32 %v1550_v57, %v8317_v58  ;;  %v8417_v58 = vsel %vm3176_vm10, %v8321_v56, %v3360_v18  ;;  %v3239_v61 = vrot.slane %v3237_v50, 1  ;;  %v3242_v12 = vrot.slane %v3240_v42, 2 }
 0x178   : > { %v3100_v56 = vsel %vm1489_vm9, %v8078_v5, %v8142_v1  ;;  %v3060_v50 = vsel %vm1489_vm9, %v8136_v23, %v8194_v16  ;;  %v1562_v23 = vshll.u32 %v8453_v25, 16 }
 0x179   : > { %v8398_v31 = vpop.f32.mrf.mxu0  ;;  %v1557_v39 = vsel %vm1489_vm9, %v1552_v40, %v8396_v37  ;;  %v3243_v15 = vor.u32 %v3242_v12, %v3239_v61  ;;  %v3367_v57 = vshrl.u32 %v3100_v56, 16  ;;  %v3370_v53 = vshll.u32 %v3100_v56, 16 }
 0x17a   : > { %v8409_v46 = vpop.f32.mrf.mxu1  ;;  %v3302_v5 = vshrl.u32 %v3060_v50, 16  ;;  %v3305_v29 = vshll.u32 %v3060_v50, 16  ;;  %v2330_v12 = vrot.slane %v8439_v55, 1 }
 0x17b   : > { %2633 = vmatmul.bf16.gmra.mxu3 %v2329_v19  ;;  %v8435_v44 = vsel %vm3176_vm10, %v3230_v33, %v3243_v15  ;;  %v3369_v42 = vrot.slane %v3367_v57, 1  ;;  %v8448_v1 = vsel %vm3176_vm10, %v3243_v15, %v8269_v41  ;;  %v3287_v33 = vsel %vm3176_vm10, %v8360_v2, %v8432_v51 }
 0x17c   : > { %v3372_v45 = vrot.slane %v3370_v53, 2  ;;  %v3304_v16 = vrot.slane %v3302_v5, 1  ;;  %v1558_v53 = vshrl.u32 %v8377_v0, 16 }
 0x17d   : > { %1962 = vmatmul.bf16.gmra.mxu1 %v1557_v39  ;;  %v3307_v39 = vrot.slane %v3305_v29, 2  ;;  %v8466_v29 = vrot.slane %v1562_v23, 1 }
 0x17e   : > { %v8425_v52 = vpop.f32.mrf.mxu2  ;;  %v8427_v32 = vpop.f32.mrf.mxu3  ;;  %v3373_v15 = vor.u32 %v3372_v45, %v3369_v42  ;;  %v3116_v42 = vsel %vm1489_vm9, %v8113_v10, %v8088_v43  ;;  %v9563_v10 = vshll.u32 %v8108_v62, 16 }
 0x17f   : > { %v8460_v57 = vor.u32 %v3307_v39, %v3304_v16  ;;  %v3393_v0 = vshrl.u32 %v3116_v42, 16  ;;  %v3396_v45 = vshll.u32 %v3116_v42, 16  ;;  %v1560_v16 = vor.u32 %v1558_v53, %v8396_v37 }
 0x180   : > { %v8464_v50 = vsel %vm3176_vm10, %v3360_v18, %v3373_v15  ;;  %v2331_v18 = vsel %vm2308_vm8, %v2328_v21, %v2330_v12  ;;  %v9562_v39 = vshrl.u32 %v8108_v62, 16  ;;  %v3298_v43 = vrot.slane %v9563_v10, 2 }
 0x181   : > { %v8437_v40 = vpop.f32.mrf.mxu0  ;;  %9561 = vst [vmem:[#allocation82_spill] sm:$0xff] %v8464_v50  ;;  %v1565_v48 = vsel %vm1489_vm9, %v1560_v16, %v8466_v29  ;;  %v3124_v53 = vsel %vm1489_vm9, %v8104_v26, %v8158_v11  ;;  %v8512_v11 = vld [vmem:[#allocation3 + $0x50] sm:$0xff] }
 0x182   : > { %v8444_v17 = vpop.f32.mrf.mxu1  ;;  %v3409_v16 = vshll.u32 %v3124_v53, 16 }
 0x183   : > { %2525 = vmatmul.bf16.gmra.mxu2 %v2329_v19  ;;  %v3108_v19 = vsel %vm1489_vm9, %v8153_v63, %v8095_v9  ;;  %v8470_v9 = vsel %vm3176_vm10, %v3295_v38, %v8460_v57 }
 0x184   : > { %3634 = vmatmul.bf16.gmra.mxu0 %v3287_v33  ;;  %v3380_v56 = vshrl.u32 %v3108_v19, 16  ;;  %v3383_v2 = vshll.u32 %v3108_v19, 16  ;;  %v3297_v19 = vrot.slane %v9562_v39, 1 }
 0x186   : > { %v1917_v41 = vpop.f32.mrf.mxu3  ;;  %v2486_v61 = vpop.f32.mrf.mxu2  ;;  %v3382_v5 = vrot.slane %v3380_v56, 1  ;;  %v3385_v63 = vrot.slane %v3383_v2, 2  ;;  %v3398_v56 = vrot.slane %v3396_v45, 2 }
 0x187   : > { %v3395_v41 = vrot.slane %v3393_v0, 1  ;;  %v8496_v0 = vor.u32 %v3298_v43, %v3297_v19 }
 0x188   : > { %v3386_v38 = vor.u32 %v3385_v63, %v3382_v5  ;;  %v3406_v63 = vshrl.u32 %v3124_v53, 16 }
 0x189   : > { %v8475_v33 = vpop.f32.mrf.mxu0  ;;  %v3399_v37 = vor.u32 %v3398_v56, %v3395_v41  ;;  %v8505_v41 = vld [vmem:[#allocation3 + $0x58] sm:$0xff]  ;;  %v3411_v56 = vrot.slane %v3409_v16, 2 }
 0x18a   : > { %v1928_v23 = vpop.f32.mrf.mxu1  ;;  %v8490_v21 = vsel %vm3176_vm10, %v3373_v15, %v3386_v38  ;;  %v3408_v39 = vrot.slane %v3406_v63, 1  ;;  %v2332_v43 = vrot.slane %v8505_v41, 1 }
 0x18b   : > { %2638 = vmatmul.bf16.gmra.mxu3 %v2331_v18  ;;  %9564 = vst [vmem:[#allocation83_spill] sm:$0xff] %v8490_v21  ;;  %v1929_v5 = vadd.f32 %v1928_v23, %v8083_v54  ;;  %v8499_v45 = vsel %vm3176_vm10, %v3386_v38, %v3399_v37  ;;  %v3300_v54 = vsel %vm3176_vm10, %v8432_v51, %v8496_v0  ;;  %v6547_v23 = vld [vmem:[%s9332_s4 + $0x198] sm:$0xff] }
 0x18c   : > { %9565 = vst [vmem:[#allocation84_spill] sm:$0xff] %v8499_v45  ;;  %v8510_v26 = vor.u32 %v3411_v56, %v3408_v39  ;;  %v6555_v38 = vld [vmem:[%s9332_s4 + $0x1d8] sm:$0xff]  ;;  %4515 = vmatpush.bf16.msra.mxu2 %v6547_v23  ;;  %v9568_v23 = vshll.u32 %v8174_v4, 16 }
 0x18d   : > { %1967 = vmatmul.bf16.gmra.mxu1 %v1565_v48  ;;  %4628 = vmatpush.bf16.msra.mxu3 %v6555_v38 }
 0x18e   : > { %v2488_v2 = vpop.f32.mrf.mxu2  ;;  %v2599_v42 = vpop.f32.mrf.mxu3  ;;  %v3311_v38 = vrot.slane %v9568_v23, 2 }
 0x18f   : > { %v2600_v62 = vadd.f32 %v2599_v42, %v2486_v61  ;;  %v1570_v61 = vshll.u32 %v8512_v11, 16 }
 0x191   : > { %v8501_v15 = vadd.f32 %v2600_v62, %v1929_v5  ;;  %v8503_v10 = vpop.f32.mrf.mxu0  ;;  %v8527_v5 = vsel %vm3176_vm10, %v3399_v37, %v8510_v26 }
 0x192   : > { %v1930_v48 = vpop.f32.mrf.mxu1  ;;  %9566 = vst [vmem:[#allocation85_spill] sm:$0xff] %v8527_v5 }
 0x193   : > { %2530 = vmatmul.bf16.gmra.mxu2 %v2331_v18  ;;  %v3068_v18 = vsel %vm1489_vm9, %v8202_v34, %v7942_v30  ;;  %v1931_v62 = vadd.f32 %v1930_v48, %v8130_v49  ;;  %v1566_v34 = vshrl.u32 %v8453_v25, 16  ;;  %v1572_v30 = vrot.slane %v1570_v61, 1 }
 0x194   : > { %3639 = vmatmul.bf16.gmra.mxu0 %v3300_v54  ;;  %v3315_v42 = vshrl.u32 %v3068_v18, 16  ;;  %v3318_v53 = vshll.u32 %v3068_v18, 16  ;;  %v6519_v54 = vld [vmem:[%s9332_s4 + $0x158] sm:$0xff]  ;;  %v2333_v49 = vsel %vm2308_vm8, %v2330_v12, %v2332_v43  ;;  %v9567_v25 = vshrl.u32 %v8174_v4, 16 }
 0x195   : > { %v1568_v48 = vor.u32 %v1566_v34, %v8466_v29  ;;  %3708 = vmatpush.bf16.msra.mxu1 %v6519_v54  ;;  %v6584_v29 = vld [vmem:[%s9332_s4 + $0x218] sm:$0xff] }
 0x196   : > { %v2491_v51 = vpop.f32.mrf.mxu2  ;;  %v2601_v19 = vpop.f32.mrf.mxu3  ;;  %v3317_v16 = vrot.slane %v3315_v42, 1  ;;  %v3320_v39 = vrot.slane %v3318_v53, 2  ;;  %v3310_v61 = vrot.slane %v9567_v25, 1  ;;  %5138 = vmatpush.bf16.msra.mxu0 %v6584_v29  ;;  %v6874_v25 = vld [vmem:[#allocation3 + $0x58] sm:$0xff] }
 0x197   : > { %v2602_v63 = vadd.f32 %v2601_v19, %v2488_v2  ;;  %v1573_v55 = vsel %vm1489_vm9, %v1568_v48, %v1572_v30  ;;  %v3132_v48 = vsel %vm1489_vm9, %v8169_v3, %v8247_v47 }
 0x198   : > { %v3321_v2 = vor.u32 %v3320_v39, %v3317_v16  ;;  %v3312_v16 = vor.u32 %v3311_v38, %v3310_v61  ;;  %v6088_v39 = vld [vmem:[#allocation3 + $0xa8] sm:$0xf]  ;;  %v1578_v61 = vshll.u32 %v6874_v25, 16 }
 0x199   : > { %v8530_v56 = vadd.f32 %v2602_v63, %v1931_v62  ;;  %v8536_v18 = vpop.f32.mrf.mxu0  ;;  %v6507_v63 = vld [vmem:[#allocation3 + $0xa8] sm:$0x30] }
 0x19a   : > { %v1933_v37 = vpop.f32.mrf.mxu1  ;;  %v8550_v19 = vsel %vm3176_vm10, %v8460_v57, %v3321_v2  ;;  %v8559_v4 = vsel %vm3176_vm10, %v3321_v2, %v8319_v13  ;;  %v8565_v54 = vor.u32 %v6507_v63, %v6088_v39  ;;  %v3313_v13 = vsel %vm3176_vm10, %v8496_v0, %v3312_v16  ;;  %v8572_v2 = vld [vmem:[#allocation3 + $0x60] sm:$0xff] }
 0x19b   : > { %2643 = vmatmul.bf16.gmra.mxu3 %v2333_v49  ;;  %v1934_v53 = vadd.f32 %v1933_v37, %v8163_v59  ;;  %v3422_v37 = vshll.u32 %v3132_v48, 16  ;;  %v1574_v0 = vshrl.u32 %v8512_v11, 16  ;;  %v1580_v63 = vrot.slane %v1578_v61, 1 }
 0x19c   : > { %v9434_v29 = vshll.u32 %v8565_v54, 16 }
 0x19d   : > { %1972 = vmatmul.bf16.gmra.mxu1 %v1573_v55  ;;  %v3424_v38 = vrot.slane %v3422_v37, 2  ;;  %v9435_v37 = vshrl.u32 %v8565_v54, 16 }
 0x19e   : > { %v2493_v12 = vpop.f32.mrf.mxu2  ;;  %v2604_v42 = vpop.f32.mrf.mxu3 }
 0x19f   : > { %v2605_v62 = vadd.f32 %v2604_v42, %v2491_v51  ;;  %v3419_v51 = vshrl.u32 %v3132_v48, 16 }
 0x1a1   : > { %v8561_v57 = vadd.f32 %v2605_v62, %v1934_v53  ;;  %v8563_v34 = vpop.f32.mrf.mxu0  ;;  %v3421_v23 = vrot.slane %v3419_v51, 1  ;;  %v2334_v53 = vrot.slane %v8572_v2, 1  ;;  %v9570_v2 = vld [vmem:[#allocation46_spill] sm:$0xff] }
 0x1a2   : > { %v1935_v59 = vpop.f32.mrf.mxu1  ;;  %v9571_v61 = vshrl.u32 %v9570_v2, 16  ;;  %v9572_v41 = vshll.u32 %v9570_v2, 16 }
 0x1a3   : > { %2535 = vmatmul.bf16.gmra.mxu2 %v2333_v49  ;;  %v1936_v3 = vadd.f32 %v1935_v59, %v8208_v36  ;;  %v3425_v49 = vor.u32 %v3424_v38, %v3421_v23  ;;  %v2335_v51 = vsel %vm2308_vm8, %v2332_v43, %v2334_v53  ;;  %v3139_v36 = vrot.slane %v9434_v29, 1 }
 0x1a4   : > { %3644 = vmatmul.bf16.gmra.mxu0 %v3313_v13  ;;  %v1576_v59 = vor.u32 %v1574_v0, %v1572_v30  ;;  %v3323_v23 = vrot.slane %v9571_v61, 1  ;;  %v3324_v38 = vrot.slane %v9572_v41, 2  ;;  %v6464_v41 = vld [vmem:[#allocation3 + $0x68] sm:$0xff] }
 0x1a5   : > { %v8582_v39 = vsel %vm3176_vm10, %v8510_v26, %v3425_v49  ;;  %v3140_v43 = vsel %vm1489_vm9, %v8257_v24, %v3139_v36  ;;  %v3143_v30 = vor.u32 %v9435_v37, %v3139_v36 }
 0x1a6   : > { %v2496_v55 = vpop.f32.mrf.mxu2  ;;  %v2606_v42 = vpop.f32.mrf.mxu3  ;;  %9569 = vst [vmem:[#allocation86_spill] sm:$0xff] %v8582_v39  ;;  %v1581_v11 = vsel %vm1489_vm9, %v1576_v59, %v1580_v63  ;;  %v3435_v0 = vshll.u32 %v3140_v43, 16  ;;  %v3325_v2 = vor.u32 %v3324_v38, %v3323_v23 }
 0x1a7   : > { %v2607_v47 = vadd.f32 %v2606_v42, %v2493_v12  ;;  %v3445_v59 = vshrl.u32 %v3143_v30, 16 }
 0x1a8   : > { %v3437_v61 = vrot.slane %v3435_v0, 2 }
 0x1a9   : > { %v8577_v62 = vadd.f32 %v2607_v47, %v1936_v3  ;;  %v8584_v48 = vpop.f32.mrf.mxu0  ;;  %v3432_v47 = vshrl.u32 %v3140_v43, 16  ;;  %v3447_v45 = vrot.slane %v3445_v59, 1 }
 0x1aa   : > { %v1938_v12 = vpop.f32.mrf.mxu1 }
 0x1ab   : > { %2648 = vmatmul.bf16.gmra.mxu3 %v2335_v51  ;;  %v1939_v42 = vadd.f32 %v1938_v12, %v8237_v8  ;;  %v3434_v39 = vrot.slane %v3432_v47, 1  ;;  %v3326_v8 = vsel %vm3176_vm10, %v3312_v16, %v3325_v2 }
 0x1ad   : > { %1977 = vmatmul.bf16.gmra.mxu1 %v1581_v11  ;;  %v3448_v11 = vshll.u32 %v3143_v30, 16  ;;  %v3438_v36 = vor.u32 %v3437_v61, %v3434_v39  ;;  %v2336_v30 = vrot.slane %v6464_v41, 1  ;;  %v6875_v39 = vld [vmem:[#allocation3 + $0x60] sm:$0xff] }
 0x1ae   : > { %v2498_v13 = vpop.f32.mrf.mxu2  ;;  %v2609_v26 = vpop.f32.mrf.mxu3 }
 0x1af   : > { %v2610_v3 = vadd.f32 %v2609_v26, %v2496_v55  ;;  %v3450_v24 = vrot.slane %v3448_v11, 2  ;;  %v8610_v12 = vsel %vm3176_vm10, %v3425_v49, %v3438_v36  ;;  %v2337_v49 = vsel %vm2308_vm8, %v2334_v53, %v2336_v30  ;;  %v9576_v11 = vld [vmem:[#allocation47_spill] sm:$0xff] }
 0x1b0   : > { %9574 = vst [vmem:[#allocation87_spill] sm:$0xff] %v8610_v12  ;;  %v9577_v61 = vshrl.u32 %v9576_v11, 16  ;;  %v6554_v53 = vld [vmem:[%s9332_s4 + $0x1d0] sm:$0xff] }
 0x1b1   : > { %v8602_v29 = vadd.f32 %v2610_v3, %v1939_v42  ;;  %v8604_v5 = vpop.f32.mrf.mxu0  ;;  %v8607_v55 = vor.u32 %v3450_v24, %v3447_v45  ;;  %v1586_v3 = vshll.u32 %v6875_v39, 16  ;;  %v9578_v24 = vshll.u32 %v9576_v11, 16  ;;  %4629 = vmatpush.bf16.msra.mxu3 %v6554_v53 }
 0x1b2   : > { %v1940_v21 = vpop.f32.mrf.mxu1  ;;  %v3336_v41 = vrot.slane %v9577_v61, 1  ;;  %v6518_v61 = vld [vmem:[%s9332_s4 + $0x150] sm:$0xff]  ;;  %v1590_v53 = vshrl.u32 %v6875_v39, 16 }
 0x1b3   : > { %2540 = vmatmul.bf16.gmra.mxu2 %v2335_v51  ;;  %9573 = vst [vmem:[#allocation46_spill] sm:$0xff] %v8607_v55  ;;  %v8614_v23 = vsel %vm3176_vm10, %v3438_v36, %v8607_v55  ;;  %v1941_v38 = vadd.f32 %v1940_v21, %v8264_v7  ;;  %v1582_v51 = vshrl.u32 %v6874_v25, 16  ;;  %v1588_v59 = vrot.slane %v1586_v3, 1  ;;  %v9579_v36 = vld [vmem:[#allocation73_spill] sm:$0xff]  ;;  %v6465_v3 = vld [vmem:[#allocation3 + $0x70] sm:$0xff]  ;;  %3709 = vmatpush.bf16.msra.mxu1 %v6518_v61 }
 0x1b4   : > { %3649 = vmatmul.bf16.gmra.mxu0 %v3326_v8  ;;  %9575 = vst [vmem:[#allocation88_spill] sm:$0xff] %v8614_v23  ;;  %v3337_v7 = vrot.slane %v9578_v24, 2  ;;  %v6876_v24 = vld [vmem:[#allocation3 + $0x68] sm:$0xff] }
 0x1b5   : > { %v1584_v45 = vor.u32 %v1582_v51, %v1580_v63  ;;  %v6546_v63 = vld [vmem:[%s9332_s4 + $0x190] sm:$0xff] }
 0x1b6   : > { %v2501_v26 = vpop.f32.mrf.mxu2  ;;  %v2611_v43 = vpop.f32.mrf.mxu3  ;;  %4516 = vmatpush.bf16.msra.mxu2 %v6546_v63 }
 0x1b7   : > { %v2612_v42 = vadd.f32 %v2611_v43, %v2498_v13  ;;  %v1589_v21 = vsel %vm1489_vm9, %v1584_v45, %v1588_v59 }
 0x1b9   : > { %v8617_v16 = vadd.f32 %v2612_v42, %v1941_v38  ;;  %v8619_v47 = vpop.f32.mrf.mxu0  ;;  %v3338_v38 = vor.u32 %v3337_v7, %v3336_v41  ;;  %v2338_v7 = vrot.slane %v6465_v3, 1  ;;  %v9580_v3 = vld [vmem:[#allocation48_spill] sm:$0xff] }
 0x1ba   : > { %v1943_v0 = vpop.f32.mrf.mxu1  ;;  %v9581_v61 = vshrl.u32 %v9580_v3, 16 }
 0x1bb   : > { %2653 = vmatmul.bf16.gmra.mxu3 %v2337_v49  ;;  %v1944_v8 = vadd.f32 %v1943_v0, %v9579_v36  ;;  %v3339_v11 = vsel %vm3176_vm10, %v3325_v2, %v3338_v38  ;;  %v1594_v0 = vshll.u32 %v6876_v24, 16  ;;  %v6583_v2 = vld [vmem:[%s9332_s4 + $0x210] sm:$0xff] }
 0x1bc   : > { %5139 = vmatpush.bf16.msra.mxu0 %v6583_v2 }
 0x1bd   : > { %1982 = vmatmul.bf16.gmra.mxu1 %v1589_v21 }
 0x1be   : > { %v2503_v25 = vpop.f32.mrf.mxu2  ;;  %v2614_v13 = vpop.f32.mrf.mxu3 }
 0x1bf   : > { %v2615_v43 = vadd.f32 %v2614_v13, %v2501_v26 }
 0x1c1   : > { %v8634_v42 = vadd.f32 %v2615_v43, %v1944_v8  ;;  %v8636_v51 = vpop.f32.mrf.mxu0  ;;  %v2339_v8 = vsel %vm2308_vm8, %v2336_v30, %v2338_v7 }
 0x1c2   : > { %v1945_v45 = vpop.f32.mrf.mxu1 }
 0x1c3   : > { %2545 = vmatmul.bf16.gmra.mxu2 %v2337_v49  ;;  %v1946_v21 = vadd.f32 %v1945_v45, %v8323_v14  ;;  %v1596_v49 = vrot.slane %v1594_v0, 1  ;;  %v3349_v14 = vrot.slane %v9581_v61, 1 }
 0x1c4   : > { %3654 = vmatmul.bf16.gmra.mxu0 %v3339_v11  ;;  %v1592_v11 = vor.u32 %v1590_v53, %v1588_v59  ;;  %v6466_v53 = vld [vmem:[#allocation3 + $0x78] sm:$0xff] }
 0x1c5   : > { %v2340_v55 = vrot.slane %v6466_v53, 1 }
 0x1c6   : > { %v2506_v26 = vpop.f32.mrf.mxu2  ;;  %v2616_v41 = vpop.f32.mrf.mxu3  ;;  %v1597_v39 = vsel %vm1489_vm9, %v1592_v11, %v1596_v49 }
 0x1c7   : > { %v2617_v13 = vadd.f32 %v2616_v41, %v2503_v25  ;;  %v9582_v25 = vshll.u32 %v9580_v3, 16  ;;  %v6877_v3 = vld [vmem:[#allocation3 + $0x70] sm:$0xff] }
 0x1c9   : > { %v8643_v63 = vadd.f32 %v2617_v13, %v1946_v21  ;;  %v8648_v36 = vpop.f32.mrf.mxu0  ;;  %v3350_v45 = vrot.slane %v9582_v25, 2  ;;  %v1602_v25 = vshll.u32 %v6877_v3, 16 }
 0x1ca   : > { %v1948_v43 = vpop.f32.mrf.mxu1 }
 0x1cb   : > { %2658 = vmatmul.bf16.gmra.mxu3 %v2339_v8  ;;  %v1949_v21 = vadd.f32 %v1948_v43, %v8365_v22  ;;  %v3351_v37 = vor.u32 %v3350_v45, %v3349_v14  ;;  %v1598_v43 = vshrl.u32 %v6876_v24, 16  ;;  %v1604_v14 = vrot.slane %v1602_v25, 1 }
 0x1cd   : > { %1987 = vmatmul.bf16.gmra.mxu1 %v1597_v39  ;;  %v3352_v61 = vsel %vm3176_vm10, %v3338_v38, %v3351_v37  ;;  %v9584_v38 = vld [vmem:[#allocation49_spill] sm:$0xff] }
 0x1ce   : > { %v2508_v0 = vpop.f32.mrf.mxu2  ;;  %v2619_v41 = vpop.f32.mrf.mxu3  ;;  %v9586_v12 = vshll.u32 %v9584_v38, 16 }
 0x1cf   : > { %v2620_v13 = vadd.f32 %v2619_v41, %v2506_v26  ;;  %v2341_v41 = vsel %vm2308_vm8, %v2338_v7, %v2340_v55 }
 0x1d0   : > { %v3363_v53 = vrot.slane %v9586_v12, 2  ;;  %v6878_v12 = vld [vmem:[#allocation3 + $0x78] sm:$0xff] }
 0x1d1   : > { %v8657_v30 = vadd.f32 %v2620_v13, %v1949_v21  ;;  %v8659_v59 = vpop.f32.mrf.mxu0  ;;  %v1600_v21 = vor.u32 %v1598_v43, %v1596_v49  ;;  %v9585_v13 = vshrl.u32 %v9584_v38, 16  ;;  %v6467_v49 = vld [vmem:[#allocation3 + $0x80] sm:$0xff]  ;;  %v1610_v38 = vshll.u32 %v6878_v12, 16 }
 0x1d2   : > { %v1950_v2 = vpop.f32.mrf.mxu1 }
 0x1d3   : > { %2550 = vmatmul.bf16.gmra.mxu2 %v2339_v8  ;;  %v1951_v23 = vadd.f32 %v1950_v2, %v8398_v31  ;;  %v1605_v31 = vsel %vm1489_vm9, %v1600_v21, %v1604_v14 }
 0x1d4   : > { %3659 = vmatmul.bf16.gmra.mxu0 %v3352_v61  ;;  %v3362_v61 = vrot.slane %v9585_v13, 1 }
 0x1d6   : > { %v2511_v11 = vpop.f32.mrf.mxu2  ;;  %v2621_v39 = vpop.f32.mrf.mxu3  ;;  %v3364_v25 = vor.u32 %v3363_v53, %v3362_v61  ;;  %v1612_v61 = vrot.slane %v1610_v38, 1  ;;  %v6545_v53 = vld [vmem:[%s9332_s4 + $0x188] sm:$0xff] }
 0x1d7   : > { %v2622_v22 = vadd.f32 %v2621_v39, %v2508_v0  ;;  %4517 = vmatpush.bf16.msra.mxu2 %v6545_v53 }
 0x1d8   : > { %v3365_v43 = vsel %vm3176_vm10, %v3351_v37, %v3364_v25  ;;  %v6553_v37 = vld [vmem:[%s9332_s4 + $0x1c8] sm:$0xff] }
 0x1d9   : > { %v8663_v26 = vadd.f32 %v2622_v22, %v1951_v23  ;;  %v8665_v45 = vpop.f32.mrf.mxu0  ;;  %4630 = vmatpush.bf16.msra.mxu3 %v6553_v37 }
 0x1da   : > { %v1953_v8 = vpop.f32.mrf.mxu1 }
 0x1db   : > { %9583 = vst [vmem:[#allocation47_spill] sm:$0xff] %v8663_v26  ;;  %2663 = vmatmul.bf16.gmra.mxu3 %v2341_v41  ;;  %v1954_v24 = vadd.f32 %v1953_v8, %v8437_v40  ;;  %v1606_v8 = vshrl.u32 %v6877_v3, 16 }
 0x1dd   : > { %1992 = vmatmul.bf16.gmra.mxu1 %v1605_v31  ;;  %v2342_v31 = vrot.slane %v6467_v49, 1 }
 0x1de   : > { %v2513_v23 = vpop.f32.mrf.mxu2  ;;  %v2624_v0 = vpop.f32.mrf.mxu3 }
 0x1df   : > { %v2625_v2 = vadd.f32 %v2624_v0, %v2511_v11  ;;  %v2343_v0 = vsel %vm2308_vm8, %v2340_v55, %v2342_v31  ;;  %v6517_v55 = vld [vmem:[%s9332_s4 + $0x148] sm:$0xff] }
 0x1e0   : > { %3710 = vmatpush.bf16.msra.mxu1 %v6517_v55 }
 0x1e1   : > { %v8674_v39 = vadd.f32 %v2625_v2, %v1954_v24  ;;  %v8676_v7 = vpop.f32.mrf.mxu0  ;;  %v1608_v2 = vor.u32 %v1606_v8, %v1604_v14 }
 0x1e2   : > { %9588 = vst [vmem:[#allocation48_spill] sm:$0xff] %v8676_v7  ;;  %v1955_v22 = vpop.f32.mrf.mxu1  ;;  %v6880_v7 = vld [vmem:[#allocation3 + $0x88] sm:$0xff] }
 0x1e3   : > { %9587 = vst [vmem:[#allocation73_spill] sm:$0xff] %v8674_v39  ;;  %2555 = vmatmul.bf16.gmra.mxu2 %v2341_v41  ;;  %v1956_v50 = vadd.f32 %v1955_v22, %v8475_v33  ;;  %v1613_v22 = vsel %vm1489_vm9, %v1608_v2, %v1612_v61  ;;  %v6468_v2 = vld [vmem:[#allocation3 + $0x88] sm:$0xff]  ;;  %v9600_v39 = vld [vmem:[#allocation53_spill] sm:$0xff] }
 0x1e4   : > { %3664 = vmatmul.bf16.gmra.mxu0 %v3365_v43  ;;  %v2344_v55 = vrot.slane %v6468_v2, 1  ;;  %v9602_v2 = vshll.u32 %v9600_v39, 16 }
 0x1e6   : > { %v2516_v21 = vpop.f32.mrf.mxu2  ;;  %v2626_v13 = vpop.f32.mrf.mxu3 }
 0x1e7   : > { %v2627_v40 = vadd.f32 %v2626_v13, %v2513_v23  ;;  %v9594_v13 = vld [vmem:[#allocation50_spill] sm:$0xff] }
 0x1e9   : > { %v8680_v11 = vadd.f32 %v2627_v40, %v1956_v50  ;;  %v8688_v41 = vpop.f32.mrf.mxu0  ;;  %v9591_v50 = vld [vmem:[#allocation56_spill] sm:$0xff] }
 0x1ea   : > { %9590 = vst [vmem:[#allocation89_spill] sm:$0xff] %v8688_v41  ;;  %v1958_v24 = vpop.f32.mrf.mxu1  ;;  %v9592_v33 = vshrl.u32 %v9591_v50, 16  ;;  %v9593_v23 = vshll.u32 %v9591_v50, 16 }
 0x1eb   : > { %9589 = vst [vmem:[#allocation49_spill] sm:$0xff] %v8680_v11  ;;  %2668 = vmatmul.bf16.gmra.mxu3 %v2343_v0  ;;  %v1959_v14 = vadd.f32 %v1958_v24, %v9594_v13 }
 0x1ec   : > { %v3375_v3 = vrot.slane %v9592_v33, 1  ;;  %v3376_v49 = vrot.slane %v9593_v23, 2  ;;  %v6582_v23 = vld [vmem:[%s9332_s4 + $0x208] sm:$0xff] }
 0x1ed   : > { %1997 = vmatmul.bf16.gmra.mxu1 %v1613_v22  ;;  %v6879_v22 = vld [vmem:[#allocation3 + $0x80] sm:$0xff]  ;;  %5140 = vmatpush.bf16.msra.mxu0 %v6582_v23 }
 0x1ee   : > { %v2518_v43 = vpop.f32.mrf.mxu2  ;;  %v2629_v38 = vpop.f32.mrf.mxu3  ;;  %v3377_v8 = vor.u32 %v3376_v49, %v3375_v3  ;;  %v1618_v11 = vshll.u32 %v6879_v22, 16  ;;  %v9597_v3 = vld [vmem:[#allocation54_spill] sm:$0xff] }
 0x1ef   : > { %v2630_v40 = vadd.f32 %v2629_v38, %v2516_v21 }
 0x1f0   : > { %v3378_v37 = vsel %vm3176_vm10, %v3364_v25, %v3377_v8 }
 0x1f1   : > { %v8700_v53 = vadd.f32 %v2630_v40, %v1959_v14  ;;  %v8702_v33 = vpop.f32.mrf.mxu0  ;;  %v1620_v14 = vrot.slane %v1618_v11, 1  ;;  %v2345_v40 = vsel %vm2308_vm8, %v2342_v31, %v2344_v55 }
 0x1f2   : > { %9596 = vst [vmem:[#allocation50_spill] sm:$0xff] %v8702_v33  ;;  %v1960_v50 = vpop.f32.mrf.mxu1 }
 0x1f3   : > { %9595 = vst [vmem:[#allocation56_spill] sm:$0xff] %v8700_v53  ;;  %2560 = vmatmul.bf16.gmra.mxu2 %v2343_v0  ;;  %v1961_v49 = vadd.f32 %v1960_v50, %v9597_v3  ;;  %v1614_v0 = vshrl.u32 %v6878_v12, 16  ;;  %v9601_v50 = vshrl.u32 %v9600_v39, 16  ;;  %v9603_v12 = vld [vmem:[#allocation57_spill] sm:$0xff] }
 0x1f4   : > { %3669 = vmatmul.bf16.gmra.mxu0 %v3378_v37 }
 0x1f5   : > { %v1616_v33 = vor.u32 %v1614_v0, %v1612_v61  ;;  %v6469_v0 = vld [vmem:[#allocation3 + $0x90] sm:$0xff] }
 0x1f6   : > { %v2521_v24 = vpop.f32.mrf.mxu2  ;;  %v2631_v21 = vpop.f32.mrf.mxu3 }
 0x1f7   : > { %v2632_v38 = vadd.f32 %v2631_v21, %v2518_v43  ;;  %v1621_v37 = vsel %vm1489_vm9, %v1616_v33, %v1620_v14  ;;  %v3388_v43 = vrot.slane %v9601_v50, 1  ;;  %v3389_v21 = vrot.slane %v9602_v2, 2  ;;  %v9606_v50 = vld [vmem:[#allocation61_spill] sm:$0xff] }
 0x1f8   : > { %v1622_v2 = vshrl.u32 %v6879_v22, 16 }
 0x1f9   : > { %v8709_v13 = vadd.f32 %v2632_v38, %v1961_v49  ;;  %v8711_v25 = vpop.f32.mrf.mxu0  ;;  %v3390_v61 = vor.u32 %v3389_v21, %v3388_v43 }
 0x1fa   : > { %9599 = vst [vmem:[#allocation90_spill] sm:$0xff] %v8711_v25  ;;  %v1963_v53 = vpop.f32.mrf.mxu1 }
 0x1fb   : > { %9598 = vst [vmem:[#allocation54_spill] sm:$0xff] %v8709_v13  ;;  %2673 = vmatmul.bf16.gmra.mxu3 %v2345_v40  ;;  %v1964_v11 = vadd.f32 %v1963_v53, %v9603_v12  ;;  %v3391_v33 = vsel %vm3176_vm10, %v3377_v8, %v3390_v61  ;;  %v1626_v53 = vshll.u32 %v6880_v7, 16  ;;  %v1624_v12 = vor.u32 %v1622_v2, %v1620_v14 }
 0x1fd   : > { %2002 = vmatmul.bf16.gmra.mxu1 %v1621_v37  ;;  %v1628_v8 = vrot.slane %v1626_v53, 1  ;;  %v6470_v53 = vld [vmem:[#allocation3 + $0x98] sm:$0xff] }
 0x1fe   : > { %v2523_v41 = vpop.f32.mrf.mxu2  ;;  %v2634_v23 = vpop.f32.mrf.mxu3 }
 0x1ff   : > { %v2635_v3 = vadd.f32 %v2634_v23, %v2521_v24  ;;  %v2346_v24 = vrot.slane %v6469_v0, 1  ;;  %v1629_v21 = vsel %vm1489_vm9, %v1624_v12, %v1628_v8  ;;  %v9612_v0 = vld [vmem:[#allocation64_spill] sm:$0xff] }
 0x201   : > { %v8720_v49 = vadd.f32 %v2635_v3, %v1964_v11  ;;  %v8722_v31 = vpop.f32.mrf.mxu0 }
 0x202   : > { %9605 = vst [vmem:[#allocation57_spill] sm:$0xff] %v8722_v31  ;;  %v1965_v38 = vpop.f32.mrf.mxu1  ;;  %v9624_v31 = vld [vmem:[#allocation74_spill] sm:$0xff] }
 0x203   : > { %9604 = vst [vmem:[#allocation53_spill] sm:$0xff] %v8720_v49  ;;  %2565 = vmatmul.bf16.gmra.mxu2 %v2345_v40  ;;  %v1966_v25 = vadd.f32 %v1965_v38, %v9606_v50  ;;  %v2347_v40 = vsel %vm2308_vm8, %v2344_v55, %v2346_v24 }
 0x204   : > { %3674 = vmatmul.bf16.gmra.mxu0 %v3391_v33 }
 0x206   : > { %v2526_v37 = vpop.f32.mrf.mxu2  ;;  %v2636_v13 = vpop.f32.mrf.mxu3 }
 0x207   : > { %v2637_v39 = vadd.f32 %v2636_v13, %v2523_v41  ;;  %v9609_v41 = vld [vmem:[#allocation51_spill] sm:$0xff] }
 0x208   : > { %v9610_v22 = vshrl.u32 %v9609_v41, 16  ;;  %v9611_v33 = vshll.u32 %v9609_v41, 16  ;;  %v6552_v41 = vld [vmem:[%s9332_s4 + $0x1c0] sm:$0xff] }
 0x209   : > { %v8726_v23 = vadd.f32 %v2637_v39, %v1966_v25  ;;  %v8728_v11 = vpop.f32.mrf.mxu0  ;;  %4631 = vmatpush.bf16.msra.mxu3 %v6552_v41 }
 0x20a   : > { %9608 = vst [vmem:[#allocation91_spill] sm:$0xff] %v8728_v11  ;;  %v1968_v43 = vpop.f32.mrf.mxu1  ;;  %v3401_v13 = vrot.slane %v9610_v22, 1  ;;  %v3402_v25 = vrot.slane %v9611_v33, 2  ;;  %v8751_v22 = vrot.slane %v6470_v53, 1  ;;  %v1630_v33 = vshrl.u32 %v6880_v7, 16 }
 0x20b   : > { %9607 = vst [vmem:[#allocation61_spill] sm:$0xff] %v8726_v23  ;;  %2678 = vmatmul.bf16.gmra.mxu3 %v2347_v40  ;;  %v1969_v14 = vadd.f32 %v1968_v43, %v9612_v0 }
 0x20c   : > { %v3403_v2 = vor.u32 %v3402_v25, %v3401_v13  ;;  %v6881_v25 = vld [vmem:[#allocation3 + $0x90] sm:$0xff] }
 0x20d   : > { %2007 = vmatmul.bf16.gmra.mxu1 %v1629_v21  ;;  %v6544_v21 = vld [vmem:[%s9332_s4 + $0x180] sm:$0xff]  ;;  %v1634_v0 = vshll.u32 %v6881_v25, 16 }
 0x20e   : > { %v2528_v3 = vpop.f32.mrf.mxu2  ;;  %v2639_v38 = vpop.f32.mrf.mxu3  ;;  %v3404_v12 = vsel %vm3176_vm10, %v3390_v61, %v3403_v2  ;;  %4518 = vmatpush.bf16.msra.mxu2 %v6544_v21  ;;  %v9615_v61 = vld [vmem:[#allocation67_spill] sm:$0xff]  ;;  %v9618_v21 = vld [vmem:[#allocation58_spill] sm:$0xff] }
 0x20f   : > { %v2640_v50 = vadd.f32 %v2639_v38, %v2526_v37  ;;  %v6516_v37 = vld [vmem:[%s9332_s4 + $0x140] sm:$0xff]  ;;  %v1636_v53 = vrot.slane %v1634_v0, 1  ;;  %v9619_v41 = vshrl.u32 %v9618_v21, 16 }
 0x210   : > { %3711 = vmatpush.bf16.msra.mxu1 %v6516_v37 }
 0x211   : > { %v8737_v39 = vadd.f32 %v2640_v50, %v1969_v14  ;;  %v8739_v55 = vpop.f32.mrf.mxu0  ;;  %v1632_v50 = vor.u32 %v1630_v33, %v1628_v8  ;;  %v3414_v11 = vrot.slane %v9619_v41, 1  ;;  %v6581_v8 = vld [vmem:[%s9332_s4 + $0x200] sm:$0xff] }
 0x212   : > { %9614 = vst [vmem:[#allocation64_spill] sm:$0xff] %v8739_v55  ;;  %v1970_v23 = vpop.f32.mrf.mxu1  ;;  %5141 = vmatpush.bf16.msra.mxu0 %v6581_v8  ;;  %v6797_v41 = vld [vmem:[#allocation3 + $0xa0] sm:$0xff]  }
 0x213   : > { %9613 = vst [vmem:[#allocation51_spill] sm:$0xff] %v8737_v39  ;;  %2570 = vmatmul.bf16.gmra.mxu2 %v2347_v40  ;;  %v1971_v40 = vadd.f32 %v1970_v23, %v9615_v61  ;;  %v2349_v39 = vsel %vm2308_vm8, %v2346_v24, %v8751_v22  ;;  %v9620_v23 = vshll.u32 %v9618_v21, 16  ;;  %v9621_v61 = vld [vmem:[#allocation69_spill] sm:$0xff]  ;;  %v2350_v49 = vrot.slane %v6797_v41, 1  ;;  %v9627_v41 = vld [vmem:[#allocation66_spill] sm:$0xff] }
 0x214   : > { %3679 = vmatmul.bf16.gmra.mxu0 %v3404_v12 }
 0x215   : > { %v3415_v7 = vrot.slane %v9620_v23, 2  ;;  %v6882_v23 = vld [vmem:[#allocation3 + $0x98] sm:$0xff] }
 0x216   : > { %v2531_v43 = vpop.f32.mrf.mxu2  ;;  %v2641_v38 = vpop.f32.mrf.mxu3 }
 0x217   : > { %v2642_v13 = vadd.f32 %v2641_v38, %v2528_v3  ;;  %v1637_v3 = vsel %vm1489_vm9, %v1632_v50, %v1636_v53 }
 0x219   : > { %v8754_v14 = vadd.f32 %v2642_v13, %v1971_v40  ;;  %v8756_v12 = vpop.f32.mrf.mxu0  ;;  %v3416_v13 = vor.u32 %v3415_v7, %v3414_v11  ;;  %v6848_v11 = vld [vmem:[#allocation3 + $0xa0] sm:$0x10] }
 0x21a   : > { %9617 = vst [vmem:[#allocation92_spill] sm:$0xff] %v8756_v12  ;;  %v1973_v55 = vpop.f32.mrf.mxu1 }
 0x21b   : > { %9616 = vst [vmem:[#allocation67_spill] sm:$0xff] %v8754_v14  ;;  %2683 = vmatmul.bf16.gmra.mxu3 %v2349_v39  ;;  %v1974_v24 = vadd.f32 %v1973_v55, %v9621_v61  ;;  %v3417_v50 = vsel %vm3176_vm10, %v3403_v2, %v3416_v13  ;;  %v6822_v61 = vld [vmem:[#allocation3 + $0xa0] sm:$0xf]   ;;  %v2351_v2 = vsel %vm2308_vm8, %v8751_v22, %v2350_v49 }
 0x21d   : > { %2012 = vmatmul.bf16.gmra.mxu1 %v1637_v3  ;;  %v1642_v3 = vshll.u32 %v6882_v23, 16 }
 0x21e   : > { %v2533_v37 = vpop.f32.mrf.mxu2  ;;  %v2644_v38 = vpop.f32.mrf.mxu3 }
 0x21f   : > { %v2645_v40 = vadd.f32 %v2644_v38, %v2531_v43  ;;  %v1638_v38 = vshrl.u32 %v6881_v25, 16  ;;  %v1644_v8 = vrot.slane %v1642_v3, 1 }
 0x221   : > { %v8769_v33 = vadd.f32 %v2645_v40, %v1974_v24  ;;  %v8771_v0 = vpop.f32.mrf.mxu0  ;;  %v1361_v24 = vld [vmem:[#allocation3 + $0xa4] sm:$0x1]  ;;  %v6823_v40 = vor.u32 %v6848_v11, %v6822_v61  ;;  %v5944_v11 = vld [vmem:[#allocation3 + $0xa8] sm:$0xf]  ;;  %v6471_v61 = vld [vmem:[#allocation3 + $0xa8] sm:$0x10] }
 0x222   : > { %9623 = vst [vmem:[#allocation69_spill] sm:$0xff] %v8771_v0  ;;  %v1975_v21 = vpop.f32.mrf.mxu1  ;;  %v9628_v0 = vshrl.u32 %v9627_v41, 16 }
 0x223   : > { %9622 = vst [vmem:[#allocation58_spill] sm:$0xff] %v8769_v33  ;;  %2575 = vmatmul.bf16.gmra.mxu2 %v2349_v39  ;;  %v1976_v55 = vadd.f32 %v1975_v21, %v9624_v31  ;;  %v1640_v33 = vor.u32 %v1638_v38, %v1636_v53  ;;  %v1487_v21 = vunpack.c.l.b16 %v1361_v24  ;;  %v9630_v38 = vld [vmem:[#allocation45_spill] sm:$0xff] }
 0x224   : > { %3684 = vmatmul.bf16.gmra.mxu0 %v3417_v50  ;;  %v3427_v31 = vrot.slane %v9628_v0, 1 }
 0x225   : > { %v1645_v25 = vsel %vm1489_vm9, %v1640_v33, %v1644_v8  ;;  %v5945_v33 = vor.u32 %v6471_v61, %v5944_v11 }
 0x226   : > { %v2536_v14 = vpop.f32.mrf.mxu2  ;;  %v2646_v12 = vpop.f32.mrf.mxu3 }
 0x227   : > { %v2647_v43 = vadd.f32 %v2646_v12, %v2533_v37  ;;  %v9629_v12 = vshll.u32 %v9627_v41, 16 }
 0x229   : > { %v8775_v7 = vadd.f32 %v2647_v43, %v1976_v55  ;;  %v8777_v39 = vpop.f32.mrf.mxu0  ;;  %v3428_v37 = vrot.slane %v9629_v12, 2  ;;  %v2352_v43 = vrot.slane %v6823_v40, 1  ;;  %v2354_v12 = vrot.slane %v5945_v33, 1 }
 0x22a   : > { %9626 = vst [vmem:[#allocation93_spill] sm:$0xff] %v8777_v39  ;;  %v1978_v50 = vpop.f32.mrf.mxu1 }
 0x22b   : > { %9625 = vst [vmem:[#allocation74_spill] sm:$0xff] %v8775_v7  ;;  %2688 = vmatmul.bf16.gmra.mxu3 %v2351_v2  ;;  %v1979_v7 = vadd.f32 %v1978_v50, %v8328_v6  ;;  %v3429_v53 = vor.u32 %v3428_v37, %v3427_v31  ;;  %v1488_v2 = vpack.c.b16 %v1487_v21, %v9630_v38  ;;  %v9632_v38 = vshll.u32 %v8565_v54, 16 }
 0x22c   : > { %v2353_v24 = vsel %vm2308_vm8, %v8751_v22, %v2352_v43  ;;  %v2355_v22 = vsel %vm2308_vm8, %v2350_v49, %v2354_v12 }
 0x22d   : > { %2017 = vmatmul.bf16.gmra.mxu1 %v1645_v25  ;;  %v3430_v40 = vsel %vm3176_vm10, %v3416_v13, %v3429_v53  ;;  %v1650_v6 = vshll.u32 %v1488_v2, 16  ;;  %v9631_v13 = vshrl.u32 %v8565_v54, 16  ;;  %v6156_v54 = vld [vmem:[#allocation3 + $0x10] sm:$0xc] }
 0x22e   : > { %v2538_v3 = vpop.f32.mrf.mxu2  ;;  %v2649_v55 = vpop.f32.mrf.mxu3 }
 0x22f   : > { %v2650_v39 = vadd.f32 %v2649_v55, %v2536_v14  ;;  %v1652_v21 = vrot.slane %v1650_v6, 1  ;;  %v3440_v61 = vrot.slane %v9631_v13, 1 }
 0x231   : > { %v8788_v26 = vadd.f32 %v2650_v39, %v1979_v7  ;;  %v8790_v0 = vpop.f32.mrf.mxu0  ;;  %v1646_v39 = vshrl.u32 %v6882_v23, 16 }
 0x232   : > { %v1980_v41 = vpop.f32.mrf.mxu1 }
 0x233   : > { %2580 = vmatmul.bf16.gmra.mxu2 %v2353_v24  ;;  %v1981_v31 = vadd.f32 %v1980_v41, %v8372_v60  ;;  %v1648_v11 = vor.u32 %v1646_v39, %v1644_v8  ;;  %v3441_v24 = vrot.slane %v9632_v38, 2  ;;  %v1654_v38 = vshrl.u32 %v1488_v2, 16 }
 0x234   : > { %3689 = vmatmul.bf16.gmra.mxu0 %v3430_v40 }
 0x235   : > { %v1653_v60 = vsel %vm1489_vm9, %v1648_v11, %v1652_v21  ;;  %v3442_v40 = vor.u32 %v3441_v24, %v3440_v61 }
 0x236   : > { %v2541_v14 = vpop.f32.mrf.mxu2  ;;  %v2651_v50 = vpop.f32.mrf.mxu3 }
 0x237   : > { %v2652_v37 = vadd.f32 %v2651_v50, %v2538_v3  ;;  %v6524_v50 = vld [vmem:[#allocation3 + $0x10] sm:$0xf0] }
 0x238   : > { %v6157_v11 = vor.u32 %v6524_v50, %v6156_v54  ;;  %v9636_v50 = vld [vmem:[#allocation52_spill] sm:$0xff] }
 0x239   : > { %v8796_v7 = vadd.f32 %v2652_v37, %v1981_v31  ;;  %v8798_v25 = vpop.f32.mrf.mxu0  ;;  %v3443_v31 = vsel %vm3176_vm10, %v3429_v53, %v3442_v40  ;;  %v8812_v37 = vld [vmem:[#allocation3 + $0x18] sm:$0xff] }
 0x23a   : > { %v1983_v55 = vpop.f32.mrf.mxu1  ;;  %v4099_v61 = vshll.u32 %v8812_v37, 16  ;;  %v4094_v53 = vshll.u32 %v6157_v11, 16  ;;  %v4291_v2 = vrot.slane %v6157_v11, 2 }
 0x23b   : > { %2693 = vmatmul.bf16.gmra.mxu3 %v2355_v22  ;;  %v1984_v23 = vadd.f32 %v1983_v55, %v8409_v46  ;;  %v8815_v55 = vld [vmem:[#allocation3 + $0x20] sm:$0xff] }
 0x23d   : > { %2022 = vmatmul.bf16.gmra.mxu1 %v1653_v60  ;;  %v4107_v60 = vshll.u32 %v8815_v55, 16 }
 0x23e   : > { %v2543_v3 = vpop.f32.mrf.mxu2  ;;  %v2654_v33 = vpop.f32.mrf.mxu3 }
 0x23f   : > { %v2655_v41 = vadd.f32 %v2654_v33, %v2541_v14  ;;  %v1656_v33 = vor.u32 %v1654_v38, %v1652_v21 }
 0x241   : > { %v8807_v6 = vadd.f32 %v2655_v41, %v1984_v23  ;;  %v8809_v49 = vpop.f32.mrf.mxu0  ;;  %v4101_v23 = vrot.slane %v4099_v61, 1 }
 0x242   : > { %v1985_v8 = vpop.f32.mrf.mxu1 }
 0x243   : > { %9633 = vst [vmem:[#allocation66_spill] sm:$0xff] %v8807_v6  ;;  %2585 = vmatmul.bf16.gmra.mxu2 %v2352_v43  ;;  %v1986_v46 = vadd.f32 %v1985_v8, %v8444_v17  ;;  %v4096_v8 = vrot.slane %v4094_v53, 1 }
 0x244   : > { %3694 = vmatmul.bf16.gmra.mxu0 %v3443_v31 }
 0x246   : > { %v2546_v39 = vpop.f32.mrf.mxu2  ;;  %v2656_v22 = vpop.f32.mrf.mxu3 }
 0x247   : > { %v2657_v14 = vadd.f32 %v2656_v22, %v2543_v3  ;;  %v4292_v3 = vrot.slane %v8812_v37, 2  ;;  %v4103_v22 = vshrl.u32 %v8812_v37, 16 }
 0x249   : > { %v8817_v13 = vadd.f32 %v2657_v14, %v1986_v46  ;;  %v8820_v43 = vpop.f32.mrf.mxu0  ;;  %v4109_v46 = vrot.slane %v4107_v60, 1  ;;  %v4293_v61 = vsel %vm4290_vm11, %v4291_v2, %v4292_v3 }
 0x24a   : > { %9635 = vst [vmem:[#allocation94_spill] sm:$0xff] %v8820_v43  ;;  %v1988_v24 = vpop.f32.mrf.mxu1 }
 0x24b   : > { %9634 = vst [vmem:[#allocation45_spill] sm:$0xff] %v8817_v13  ;;  %2698 = vmatmul.bf16.gmra.mxu3 %v2354_v12  ;;  %v1989_v31 = vadd.f32 %v1988_v24, %v9636_v50  ;;  %v4092_v12 = vshrl.u32 %v6157_v11, 16  ;;  %v4105_v13 = vor.u32 %v4103_v22, %v4101_v23  ;;  %v8836_v22 = vld [vmem:[#allocation3 + $0x28] sm:$0xff] }
 0x24d   : > { %2027 = vmatmul.bf16.gmra.mxu1 %v1656_v33  ;;  %v4097_v33 = vor.u32 %v4096_v8, %v4092_v12  ;;  %v4110_v53 = vsel %vm1489_vm9, %v4105_v13, %v4109_v46  ;;  %v6561_v13 = vld [vmem:[#allocation3 + $0x18] sm:$0xff] }
 0x24e   : > { %v2548_v41 = vpop.f32.mrf.mxu2  ;;  %v2659_v17 = vpop.f32.mrf.mxu3  ;;  %v4295_v60 = vrot.slane %v4110_v53, 2 }
 0x24f   : > { %v2660_v54 = vadd.f32 %v2659_v17, %v2546_v39  ;;  %v4102_v39 = vsel %vm1489_vm9, %v4097_v33, %v4101_v23  ;;  %v9639_v17 = vld [vmem:[#allocation55_spill] sm:$0xff]  ;;  %v4115_v33 = vshll.u32 %v8836_v22, 16 }
 0x250   : > { %v4294_v11 = vrot.slane %v4102_v39, 2  ;;  %v6300_v23 = vld [vmem:[#allocation3 + $0x10] sm:$0x8]  ;;  %v4297_v39 = vrot.slane %v8815_v55, 2 }
 0x251   : > { %v8826_v14 = vadd.f32 %v2660_v54, %v1989_v31  ;;  %v8828_v21 = vpop.f32.mrf.mxu0 }
 0x252   : > { %9638 = vst [vmem:[#allocation95_spill] sm:$0xff] %v8828_v21  ;;  %v1990_v38 = vpop.f32.mrf.mxu1  ;;  %v4296_v8 = vsel %vm4290_vm11, %v4294_v11, %v4295_v60  ;;  %v4298_v21 = vsel %vm4290_vm11, %v4292_v3, %v4297_v39 }
 0x253   : > { %9637 = vst [vmem:[#allocation52_spill] sm:$0xff] %v8826_v14  ;;  %4519 = vmatmul.bf16.vlgmr.msra.gmra.mxu2 %v4293_v61  ;;  %v1991_v50 = vadd.f32 %v1990_v38, %v9639_v17  ;;  %v4111_v61 = vshrl.u32 %v8815_v55, 16  ;;  %v9642_v38 = vld [vmem:[#allocation62_spill] sm:$0xff]  ;;  %v9643_v17 = vld [vmem:[#allocation59_spill] sm:$0xff] }
 0x254   : > { %3699 = vmatmul.bf16.gmra.mxu0 %v3442_v40  ;;  %v6560_v40 = vld [vmem:[#allocation3 + $0x10] sm:$0xf0] }
 0x255   : > { %v4113_v11 = vor.u32 %v4111_v61, %v4109_v46 }
 0x256   : > { %v2551_v37 = vpop.f32.mrf.mxu2  ;;  %v2661_v24 = vpop.f32.mrf.mxu3 }
 0x257   : > { %v2662_v31 = vadd.f32 %v2661_v24, %v2548_v41  ;;  %v6301_v24 = vor.u32 %v6560_v40, %v6300_v23  ;;  %v9644_v40 = vld [vmem:[#allocation60_spill] sm:$0xff] }
 0x259   : > { %v8834_v54 = vadd.f32 %v2662_v31, %v1991_v50  ;;  %v8838_v2 = vpop.f32.mrf.mxu0  ;;  %v5024_v43 = vrot.slane %v6301_v24, 3  ;;  %v6562_v24 = vld [vmem:[#allocation3 + $0x20] sm:$0xff] }
 0x25a   : > { %9641 = vst [vmem:[#allocation96_spill] sm:$0xff] %v8838_v2  ;;  %v1993_v12 = vpop.f32.mrf.mxu1  ;;  %v4117_v2 = vrot.slane %v4115_v33, 1  ;;  %v8856_v33 = vld [vmem:[#allocation3 + $0x30] sm:$0xff] }
 0x25b   : > { %9640 = vst [vmem:[#allocation55_spill] sm:$0xff] %v8834_v54  ;;  %4632 = vmatmul.bf16.vlgmr.msra.gmra.mxu3 %v4296_v8  ;;  %v1994_v50 = vadd.f32 %v1993_v12, %v9643_v17  ;;  %v5025_v54 = vrot.slane %v6561_v13, 3  ;;  %v4123_v17 = vshll.u32 %v8856_v33, 16 }
 0x25d   : > { %3712 = vmatmul.bf16.vlgmr.msra.gmra.mxu1 %v9642_v38  ;;  %v4118_v38 = vsel %vm1489_vm9, %v4113_v11, %v4117_v2  ;;  %v5026_v55 = vsel %vm5023_vm12, %v5024_v43, %v5025_v54  ;;  %v4119_v43 = vshrl.u32 %v8836_v22, 16 }
 0x25e   : > { %v2553_v41 = vpop.f32.mrf.mxu2  ;;  %v2664_v53 = vpop.f32.mrf.mxu3  ;;  %v4299_v46 = vrot.slane %v4118_v38, 2 }
 0x25f   : > { %v2665_v31 = vadd.f32 %v2664_v53, %v2551_v37 }
 0x261   : > { %v8846_v8 = vadd.f32 %v2665_v31, %v1994_v50  ;;  %v8848_v14 = vpop.f32.mrf.mxu0  ;;  %v9647_v31 = vld [vmem:[#allocation63_spill] sm:$0xff] }
 0x262   : > { %v1995_v6 = vpop.f32.mrf.mxu1 }
 0x263   : > { %4524 = vmatmul.bf16.gmra.mxu2 %v4298_v21  ;;  %v1996_v13 = vadd.f32 %v1995_v6, %v9644_v40  ;;  %v4300_v21 = vsel %vm4290_vm11, %v4295_v60, %v4299_v46  ;;  %v4125_v60 = vrot.slane %v4123_v17, 1  ;;  %v8876_v17 = vld [vmem:[#allocation3 + $0x38] sm:$0xff] }
 0x264   : > { %5142 = vmatmul.bf16.vlgmr.msra.gmra.mxu0 %v5026_v55  ;;  %v4121_v55 = vor.u32 %v4119_v43, %v4117_v2 }
 0x266   : > { %v2556_v12 = vpop.f32.mrf.mxu2  ;;  %v2666_v37 = vpop.f32.mrf.mxu3 }
 0x267   : > { %v2667_v23 = vadd.f32 %v2666_v37, %v2553_v41  ;;  %v4301_v41 = vrot.slane %v8836_v22, 2  ;;  %v5027_v37 = vrot.slane %v6562_v24, 3 }
 0x269   : > { %v8854_v61 = vadd.f32 %v2667_v23, %v1996_v13  ;;  %v8858_v3 = vpop.f32.mrf.mxu0  ;;  %v4302_v23 = vsel %vm4290_vm11, %v4297_v39, %v4301_v41 }
 0x26a   : > { %9646 = vst [vmem:[#allocation59_spill] sm:$0xff] %v8858_v3  ;;  %v1998_v53 = vpop.f32.mrf.mxu1 }
 0x26b   : > { %9645 = vst [vmem:[#allocation62_spill] sm:$0xff] %v8854_v61  ;;  %4637 = vmatmul.bf16.gmra.mxu3 %v4300_v21  ;;  %v1999_v11 = vadd.f32 %v1998_v53, %v9647_v31  ;;  %v5028_v61 = vsel %vm5023_vm12, %v5025_v54, %v5027_v37  ;;  %v4131_v54 = vshll.u32 %v8876_v17, 16 }
 0x26d   : > { %3717 = vmatmul.bf16.gmra.mxu1 %v8385_v20  ;;  %v4126_v20 = vsel %vm1489_vm9, %v4121_v55, %v4125_v60  ;;  %v9650_v55 = vld [vmem:[#allocation68_spill] sm:$0xff] }
 0x26e   : > { %v2558_v50 = vpop.f32.mrf.mxu2  ;;  %v2669_v6 = vpop.f32.mrf.mxu3  ;;  %v4303_v53 = vrot.slane %v4126_v20, 2 }
 0x26f   : > { %v2670_v38 = vadd.f32 %v2669_v6, %v2556_v12  ;;  %v9648_v12 = vld [vmem:[#allocation65_spill] sm:$0xff] }
 0x270   : > { %v4304_v39 = vsel %vm4290_vm11, %v4299_v46, %v4303_v53  ;;  %v4133_v46 = vrot.slane %v4131_v54, 1 }
 0x271   : > { %v8866_v40 = vadd.f32 %v2670_v38, %v1999_v11  ;;  %v8868_v13 = vpop.f32.mrf.mxu0  ;;  %v6563_v11 = vld [vmem:[#allocation3 + $0x28] sm:$0xff] }
 0x272   : > { %v2000_v21 = vpop.f32.mrf.mxu1 }
 0x273   : > { %4529 = vmatmul.bf16.gmra.mxu2 %v4302_v23  ;;  %v2001_v2 = vadd.f32 %v2000_v21, %v9648_v12  ;;  %v5029_v21 = vrot.slane %v6563_v11, 3  ;;  %v4127_v12 = vshrl.u32 %v8856_v33, 16  ;;  %v9652_v11 = vld [vmem:[#allocation72_spill] sm:$0xff] }
 0x274   : > { %5147 = vmatmul.bf16.gmra.mxu0 %v5028_v61 }
 0x276   : > { %v2561_v22 = vpop.f32.mrf.mxu2  ;;  %v2671_v3 = vpop.f32.mrf.mxu3 }
 0x277   : > { %v2672_v24 = vadd.f32 %v2671_v3, %v2558_v50  ;;  %v4305_v50 = vrot.slane %v8856_v33, 2 }
 0x279   : > { %v8874_v43 = vadd.f32 %v2672_v24, %v2001_v2  ;;  %v8878_v6 = vpop.f32.mrf.mxu0  ;;  %v4306_v24 = vsel %vm4290_vm11, %v4301_v41, %v4305_v50 }
 0x27a   : > { %v2003_v31 = vpop.f32.mrf.mxu1 }
 0x27b   : > { %9649 = vst [vmem:[#allocation60_spill] sm:$0xff] %v8874_v43  ;;  %4642 = vmatmul.bf16.gmra.mxu3 %v4304_v39  ;;  %v2004_v23 = vadd.f32 %v2003_v31, %v9650_v55  ;;  %v5030_v43 = vsel %vm5023_vm12, %v5027_v37, %v5029_v21 }
 0x27d   : > { %3722 = vmatmul.bf16.gmra.mxu1 %v8394_v28  ;;  %v4129_v28 = vor.u32 %v4127_v12, %v4125_v60 }
 0x27e   : > { %v2563_v61 = vpop.f32.mrf.mxu2  ;;  %v2674_v38 = vpop.f32.mrf.mxu3 }
 0x27f   : > { %v2675_v3 = vadd.f32 %v2674_v38, %v2561_v22  ;;  %v4134_v22 = vsel %vm1489_vm9, %v4129_v28, %v4133_v46 }
 0x280   : > { %v4307_v33 = vrot.slane %v4134_v22, 2  ;;  %v4135_v22 = vshrl.u32 %v8876_v17, 16 }
 0x281   : > { %v8885_v20 = vadd.f32 %v2675_v3, %v2004_v23  ;;  %v8888_v2 = vpop.f32.mrf.mxu0  ;;  %v8894_v3 = vld [vmem:[#allocation3 + $0x40] sm:$0xff] }
 0x282   : > { %v2005_v39 = vpop.f32.mrf.mxu1  ;;  %v4308_v41 = vsel %vm4290_vm11, %v4303_v53, %v4307_v33  ;;  %v4139_v37 = vshll.u32 %v8894_v3, 16  ;;  %v4137_v53 = vor.u32 %v4135_v22, %v4133_v46 }
 0x283   : > { %9651 = vst [vmem:[#allocation63_spill] sm:$0xff] %v8885_v20  ;;  %4534 = vmatmul.bf16.gmra.mxu2 %v4306_v24  ;;  %v2006_v55 = vadd.f32 %v2005_v39, %v9652_v11  ;;  %v4309_v24 = vrot.slane %v8876_v17, 2  ;;  %v9656_v17 = vld [vmem:[#allocation79_spill] sm:$0xff] }
 0x284   : > { %5152 = vmatmul.bf16.gmra.mxu0 %v5030_v43 }
 0x286   : > { %v2566_v31 = vpop.f32.mrf.mxu2  ;;  %v2676_v38 = vpop.f32.mrf.mxu3 }
 0x287   : > { %v2677_v23 = vadd.f32 %v2676_v38, %v2563_v61  ;;  %v6564_v61 = vld [vmem:[#allocation3 + $0x30] sm:$0xff]  ;;  %v4141_v38 = vrot.slane %v4139_v37, 1 }
 0x289   : > { %v8896_v54 = vadd.f32 %v2677_v23, %v2006_v55  ;;  %v8898_v20 = vpop.f32.mrf.mxu0  ;;  %v4310_v23 = vsel %vm4290_vm11, %v4305_v50, %v4309_v24 }
 0x28a   : > { %9654 = vst [vmem:[#allocation68_spill] sm:$0xff] %v8898_v20  ;;  %v2008_v60 = vpop.f32.mrf.mxu1 }
 0x28b   : > { %9653 = vst [vmem:[#allocation65_spill] sm:$0xff] %v8896_v54  ;;  %4647 = vmatmul.bf16.gmra.mxu3 %v4308_v41  ;;  %v2009_v39 = vadd.f32 %v2008_v60, %v8310_v27  ;;  %v5031_v41 = vrot.slane %v6564_v61, 3  ;;  %v4142_v54 = vsel %vm1489_vm9, %v4137_v53, %v4141_v38  ;;  %v4313_v53 = vrot.slane %v8894_v3, 2 }
 0x28c   : > { %v4311_v60 = vrot.slane %v4142_v54, 2 }
 0x28d   : > { %3727 = vmatmul.bf16.gmra.mxu1 %v8435_v44  ;;  %v5032_v20 = vsel %vm5023_vm12, %v5029_v21, %v5031_v41  ;;  %v6565_v21 = vld [vmem:[#allocation3 + $0x38] sm:$0xff] }
 0x28e   : > { %v2568_v43 = vpop.f32.mrf.mxu2  ;;  %v2679_v12 = vpop.f32.mrf.mxu3  ;;  %v4312_v50 = vsel %vm4290_vm11, %v4307_v33, %v4311_v60 }
 0x28f   : > { %v2680_v28 = vadd.f32 %v2679_v12, %v2566_v31 }
 0x291   : > { %v8906_v11 = vadd.f32 %v2680_v28, %v2009_v39  ;;  %v8908_v55 = vpop.f32.mrf.mxu0  ;;  %v8914_v39 = vld [vmem:[#allocation3 + $0x48] sm:$0xff] }
 0x292   : > { %v2010_v44 = vpop.f32.mrf.mxu1  ;;  %v4147_v22 = vshll.u32 %v8914_v39, 16 }
 0x293   : > { %9655 = vst [vmem:[#allocation72_spill] sm:$0xff] %v8906_v11  ;;  %4539 = vmatmul.bf16.gmra.mxu2 %v4310_v23  ;;  %v2011_v37 = vadd.f32 %v2010_v44, %v9656_v17 }
 0x294   : > { %5157 = vmatmul.bf16.gmra.mxu0 %v5032_v20  ;;  %v4149_v17 = vrot.slane %v4147_v22, 1 }
 0x296   : > { %v2571_v27 = vpop.f32.mrf.mxu2  ;;  %v2681_v31 = vpop.f32.mrf.mxu3 }
 0x297   : > { %v2682_v12 = vadd.f32 %v2681_v31, %v2568_v43  ;;  %v9659_v43 = vld [vmem:[#allocation81_spill] sm:$0xff]  ;;  %v4143_v31 = vshrl.u32 %v8894_v3, 16 }
 0x299   : > { %v8916_v46 = vadd.f32 %v2682_v12, %v2011_v37  ;;  %v8918_v28 = vpop.f32.mrf.mxu0  ;;  %v5033_v37 = vrot.slane %v6565_v21, 3  ;;  %v4145_v33 = vor.u32 %v4143_v31, %v4141_v38  ;;  %v8934_v21 = vld [vmem:[#allocation3 + $0x50] sm:$0xff] }
 0x29a   : > { %9658 = vst [vmem:[#allocation97_spill] sm:$0xff] %v8918_v28  ;;  %v2013_v61 = vpop.f32.mrf.mxu1 }
 0x29b   : > { %9657 = vst [vmem:[#allocation79_spill] sm:$0xff] %v8916_v46  ;;  %4652 = vmatmul.bf16.gmra.mxu3 %v4312_v50  ;;  %v2014_v23 = vadd.f32 %v2013_v61, %v9659_v43  ;;  %v4314_v46 = vsel %vm4290_vm11, %v4309_v24, %v4313_v53  ;;  %v5034_v11 = vsel %vm5023_vm12, %v5031_v41, %v5033_v37  ;;  %v6566_v41 = vld [vmem:[#allocation3 + $0x40] sm:$0xff] }
 0x29d   : > { %3732 = vmatmul.bf16.gmra.mxu1 %v8448_v1  ;;  %v4150_v1 = vsel %vm1489_vm9, %v4145_v33, %v4149_v17 }
 0x29e   : > { %v2573_v20 = vpop.f32.mrf.mxu2  ;;  %v2684_v54 = vpop.f32.mrf.mxu3 }
 0x29f   : > { %v2685_v44 = vadd.f32 %v2684_v54, %v2571_v27  ;;  %v4315_v54 = vrot.slane %v4150_v1, 2  ;;  %v4151_v1 = vshrl.u32 %v8914_v39, 16 }
 0x2a1   : > { %v8926_v12 = vadd.f32 %v2685_v44, %v2014_v23  ;;  %v8928_v50 = vpop.f32.mrf.mxu0  ;;  %v4316_v24 = vsel %vm4290_vm11, %v4311_v60, %v4315_v54  ;;  %v4155_v23 = vshll.u32 %v8934_v21, 16  ;;  %v4153_v60 = vor.u32 %v4151_v1, %v4149_v17 }
 0x2a2   : > { %v2015_v28 = vpop.f32.mrf.mxu1 }
 0x2a3   : > { %9660 = vst [vmem:[#allocation81_spill] sm:$0xff] %v8926_v12  ;;  %4544 = vmatmul.bf16.gmra.mxu2 %v4314_v46  ;;  %v2016_v3 = vadd.f32 %v2015_v28, %v8425_v52  ;;  %v4317_v52 = vrot.slane %v8914_v39, 2  ;;  %v9664_v28 = vld [vmem:[#allocation70_spill] sm:$0xff]  ;;  %v9667_v39 = vld [vmem:[#allocation75_spill] sm:$0xff] }
 0x2a4   : > { %5162 = vmatmul.bf16.gmra.mxu0 %v5034_v11  ;;  %v9663_v11 = vld [vmem:[#allocation71_spill] sm:$0xff] }
 0x2a6   : > { %v2576_v61 = vpop.f32.mrf.mxu2  ;;  %v2686_v27 = vpop.f32.mrf.mxu3 }
 0x2a7   : > { %v2687_v22 = vadd.f32 %v2686_v27, %v2573_v20  ;;  %v4157_v27 = vrot.slane %v4155_v23, 1 }
 0x2a9   : > { %v8936_v38 = vadd.f32 %v2687_v22, %v2016_v3  ;;  %v8938_v43 = vpop.f32.mrf.mxu0  ;;  %v5035_v3 = vrot.slane %v6566_v41, 3 }
 0x2aa   : > { %9662 = vst [vmem:[#allocation99_spill] sm:$0xff] %v8938_v43  ;;  %v2018_v46 = vpop.f32.mrf.mxu1 }
 0x2ab   : > { %9661 = vst [vmem:[#allocation98_spill] sm:$0xff] %v8936_v38  ;;  %4657 = vmatmul.bf16.gmra.mxu3 %v4316_v24  ;;  %v2019_v20 = vadd.f32 %v2018_v46, %v9664_v28  ;;  %v4318_v38 = vsel %vm4290_vm11, %v4313_v53, %v4317_v52  ;;  %v5036_v12 = vsel %vm5023_vm12, %v5033_v37, %v5035_v3  ;;  %v8954_v28 = vld [vmem:[#allocation3 + $0x58] sm:$0xff]  ;;  %v6567_v37 = vld [vmem:[#allocation3 + $0x48] sm:$0xff] }
 0x2ad   : > { %3737 = vmatmul.bf16.gmra.mxu1 %v9663_v11  ;;  %v4158_v11 = vsel %vm1489_vm9, %v4153_v60, %v4157_v27 }
 0x2ae   : > { %v2578_v44 = vpop.f32.mrf.mxu2  ;;  %v2689_v31 = vpop.f32.mrf.mxu3 }
 0x2af   : > { %v2690_v33 = vadd.f32 %v2689_v31, %v2576_v61  ;;  %v4319_v31 = vrot.slane %v4158_v11, 2 }
 0x2b1   : > { %v8946_v22 = vadd.f32 %v2690_v33, %v2019_v20  ;;  %v8948_v24 = vpop.f32.mrf.mxu0  ;;  %v4320_v53 = vsel %vm4290_vm11, %v4315_v54, %v4319_v31  ;;  %v4163_v33 = vshll.u32 %v8954_v28, 16 }
 0x2b2   : > { %9666 = vst [vmem:[#allocation70_spill] sm:$0xff] %v8948_v24  ;;  %v2020_v43 = vpop.f32.mrf.mxu1 }
 0x2b3   : > { %9665 = vst [vmem:[#allocation71_spill] sm:$0xff] %v8946_v22  ;;  %4549 = vmatmul.bf16.gmra.mxu2 %v4318_v38  ;;  %v2021_v23 = vadd.f32 %v2020_v43, %v9667_v39  ;;  %v4321_v43 = vrot.slane %v8934_v21, 2  ;;  %v4159_v39 = vshrl.u32 %v8934_v21, 16  ;;  %v9672_v21 = vld [vmem:[#allocation80_spill] sm:$0xff] }
 0x2b4   : > { %5167 = vmatmul.bf16.gmra.mxu0 %v5036_v12  ;;  %v9670_v12 = vld [vmem:[#allocation76_spill] sm:$0xff] }
 0x2b5   : > { %v4161_v54 = vor.u32 %v4159_v39, %v4157_v27  ;;  %v8976_v27 = vld [vmem:[#allocation3 + $0x60] sm:$0xff] }
 0x2b6   : > { %v2581_v46 = vpop.f32.mrf.mxu2  ;;  %v2691_v61 = vpop.f32.mrf.mxu3 }
 0x2b7   : > { %v2692_v41 = vadd.f32 %v2691_v61, %v2578_v44  ;;  %v9671_v44 = vld [vmem:[#allocation78_spill] sm:$0xff] }
 0x2b9   : > { %v8956_v17 = vadd.f32 %v2692_v41, %v2021_v23  ;;  %v8958_v20 = vpop.f32.mrf.mxu0  ;;  %v4165_v23 = vrot.slane %v4163_v33, 1  ;;  %v5037_v41 = vrot.slane %v6567_v37, 3 }
 0x2ba   : > { %9669 = vst [vmem:[#allocation100_spill] sm:$0xff] %v8958_v20  ;;  %v2023_v38 = vpop.f32.mrf.mxu1  ;;  %v4322_v20 = vsel %vm4290_vm11, %v4317_v52, %v4321_v43 }
 0x2bb   : > { %9668 = vst [vmem:[#allocation75_spill] sm:$0xff] %v8956_v17  ;;  %4662 = vmatmul.bf16.gmra.mxu3 %v4320_v53  ;;  %v2024_v11 = vadd.f32 %v2023_v38, %v9671_v44  ;;  %v5038_v24 = vsel %vm5023_vm12, %v5035_v3, %v5037_v41  ;;  %v4167_v3 = vshrl.u32 %v8954_v28, 16 }
 0x2bd   : > { %3742 = vmatmul.bf16.gmra.mxu1 %v9670_v12  ;;  %v4166_v12 = vsel %vm1489_vm9, %v4161_v54, %v4165_v23 }
 0x2be   : > { %v2583_v1 = vpop.f32.mrf.mxu2  ;;  %v2694_v60 = vpop.f32.mrf.mxu3 }
 0x2bf   : > { %v2695_v61 = vadd.f32 %v2694_v60, %v2581_v46  ;;  %v4323_v60 = vrot.slane %v4166_v12, 2 }
 0x2c1   : > { %v8966_v17 = vadd.f32 %v2695_v61, %v2024_v11  ;;  %v8968_v53 = vpop.f32.mrf.mxu0  ;;  %v4324_v52 = vsel %vm4290_vm11, %v4319_v31, %v4323_v60  ;;  %v6568_v61 = vld [vmem:[#allocation3 + $0x50] sm:$0xff] }
 0x2c2   : > { %v2025_v22 = vpop.f32.mrf.mxu1 }
 0x2c3   : > { %4554 = vmatmul.bf16.gmra.mxu2 %v4322_v20  ;;  %v2026_v33 = vadd.f32 %v2025_v22, %v9672_v21  ;;  %v5039_v21 = vrot.slane %v6568_v61, 3 }
 0x2c4   : > { %5172 = vmatmul.bf16.gmra.mxu0 %v5038_v24  ;;  %v4171_v24 = vshll.u32 %v8976_v27, 16 }
 0x2c6   : > { %v2586_v38 = vpop.f32.mrf.mxu2  ;;  %v2696_v46 = vpop.f32.mrf.mxu3  ;;  %v4173_v31 = vrot.slane %v4171_v24, 1 }
 0x2c7   : > { %v2697_v37 = vadd.f32 %v2696_v46, %v2583_v1  ;;  %v4325_v1 = vrot.slane %v8954_v28, 2  ;;  %v4169_v46 = vor.u32 %v4167_v3, %v4165_v23 }
 0x2c9   : > { %v8974_v44 = vadd.f32 %v2697_v37, %v2026_v33  ;;  %v8978_v11 = vpop.f32.mrf.mxu0 }
 0x2ca   : > { %9674 = vst [vmem:[#allocation78_spill] sm:$0xff] %v8978_v11  ;;  %v2028_v20 = vpop.f32.mrf.mxu1 }
 0x2cb   : > { %9673 = vst [vmem:[#allocation76_spill] sm:$0xff] %v8974_v44  ;;  %4667 = vmatmul.bf16.gmra.mxu3 %v4324_v52  ;;  %v2029_v54 = vadd.f32 %v2028_v20, %v8427_v32  ;;  %v4326_v52 = vsel %vm4290_vm11, %v4321_v43, %v4325_v1  ;;  %v8997_v43 = vld [vmem:[#allocation3 + $0x58] sm:$0xff] }
 0x2cd   : > { %3747 = vmatmul.bf16.gmra.mxu1 %v8413_v35  ;;  %v4174_v35 = vsel %vm1489_vm9, %v4169_v46, %v4173_v31  ;;  %v5041_v46 = vrot.slane %v8997_v43, 3 }
 0x2ce   : > { %v2588_v39 = vpop.f32.mrf.mxu2  ;;  %v2699_v22 = vpop.f32.mrf.mxu3  ;;  %v4327_v32 = vrot.slane %v4174_v35, 2 }
 0x2cf   : > { %v2700_v12 = vadd.f32 %v2699_v22, %v2586_v38  ;;  %v5040_v39 = vsel %vm5023_vm12, %v5037_v41, %v5039_v21  ;;  %v8993_v38 = vld [vmem:[#allocation3 + $0x68] sm:$0xff] }
 0x2d0   : > { %v4328_v20 = vsel %vm4290_vm11, %v4323_v60, %v4327_v32  ;;  %v4175_v60 = vshrl.u32 %v8976_v27, 16 }
 0x2d1   : > { %v8986_v33 = vadd.f32 %v2700_v12, %v2029_v54  ;;  %v8988_v37 = vpop.f32.mrf.mxu0  ;;  %v4329_v12 = vrot.slane %v8976_v27, 2  ;;  %v9009_v27 = vld [vmem:[#allocation3 + $0x70] sm:$0xff] }
 0x2d2   : > { %v2030_v44 = vpop.f32.mrf.mxu1 }
 0x2d3   : > { %9675 = vst [vmem:[#allocation80_spill] sm:$0xff] %v8986_v33  ;;  %4559 = vmatmul.bf16.gmra.mxu2 %v4326_v52  ;;  %v4179_v44 = vshll.u32 %v8993_v38, 16 }
 0x2d4   : > { %5177 = vmatmul.bf16.gmra.mxu0 %v5040_v39  ;;  %v4330_v39 = vsel %vm4290_vm11, %v4325_v1, %v4329_v12 }
 0x2d5   : > { %v4181_v52 = vrot.slane %v4179_v44, 1 }
 0x2d6   : > { %v2701_v28 = vpop.f32.mrf.mxu3  ;;  %v4520_v11 = vpop.f32.mrf.mxu2 }
 0x2d9   : > { %v3702_v23 = vpop.f32.mrf.mxu0 }
 0x2da   : > { %v3713_v61 = vpop.f32.mrf.mxu1  ;;  %v4177_v23 = vor.u32 %v4175_v60, %v4173_v31 }
 0x2db   : > { %4672 = vmatmul.bf16.gmra.mxu3 %v4328_v20  ;;  %v3714_v3 = vadd.f32 %v3713_v61, %v8503_v10 }
 0x2dd   : > { %3752 = vmatmul.bf16.gmra.mxu1 %v8470_v9  ;;  %v3817_v54 = vadd.f32 %v3714_v3, %v8501_v15  ;;  %v4182_v15 = vsel %vm1489_vm9, %v4177_v23, %v4181_v52 }
 0x2de   : > { %v4522_v41 = vpop.f32.mrf.mxu2  ;;  %v4633_v24 = vpop.f32.mrf.mxu3  ;;  %v4331_v1 = vrot.slane %v4182_v15, 2 }
 0x2df   : > { %v4634_v22 = vadd.f32 %v4633_v24, %v4520_v11  ;;  %v5042_v11 = vsel %vm5023_vm12, %v5039_v21, %v5041_v46  ;;  %v4187_v21 = vshll.u32 %v9009_v27, 16 }
 0x2e1   : > { %v4737_v35 = vadd.f32 %v4634_v22, %v3817_v54  ;;  %v5143_v10 = vpop.f32.mrf.mxu0  ;;  %v9676_v22 = vld [vmem:[#allocation16_spill] sm:$0xff]  ;;  %v4189_v15 = vrot.slane %v4187_v21, 1  ;;  %v9678_v21 = vld [vmem:[#allocation22_spill] sm:$0xff] }
 0x2e2   : > { %v3715_v28 = vpop.f32.mrf.mxu1 }
 0x2e3   : > { %4564 = vmatmul.bf16.gmra.mxu2 %v4330_v39  ;;  %v3716_v9 = vadd.f32 %v3715_v28, %v8536_v18  ;;  %v5247_v20 = vadd.f32 %v5143_v10, %v4737_v35  ;;  %v4332_v18 = vsel %vm4290_vm11, %v4327_v32, %v4331_v1 }
 0x2e4   : > { %5182 = vmatmul.bf16.gmra.mxu0 %v5042_v11  ;;  %v9026_v11 = vld [vmem:[#allocation3 + $0x60] sm:$0xff] }
 0x2e5   : > { %v3818_v43 = vadd.f32 %v3716_v9, %v8530_v56  ;;  %v5370_v31 = vmul.f32 %v5247_v20, %v9676_v22  ;;  %v9677_v56 = vld [vmem:[#allocation9_spill] sm:$0xff]  ;;  %v4333_v9 = vrot.slane %v8993_v38, 2 }
 0x2e6   : > { %v4525_v61 = vpop.f32.mrf.mxu2  ;;  %v4635_v3 = vpop.f32.mrf.mxu3 }
 0x2e7   : > { %v4636_v44 = vadd.f32 %v4635_v3, %v4522_v41  ;;  %v5458_v28 = vmul.f32 %v5370_v31, %v5247_v20 }
 0x2e9   : > { %v4738_v24 = vadd.f32 %v4636_v44, %v3818_v43  ;;  %v5145_v54 = vpop.f32.mrf.mxu0 }
 0x2ea   : > { %v3718_v60 = vpop.f32.mrf.mxu1 }
 0x2eb   : > { %v5248_v39 = vadd.f32 %v5145_v54, %v4738_v24  ;;  %4677 = vmatmul.bf16.gmra.mxu3 %v4332_v18  ;;  %v3719_v35 = vadd.f32 %v3718_v60, %v8563_v34  ;;  %v4183_v34 = vshrl.u32 %v8993_v38, 16  ;;  %v5043_v60 = vrot.slane %v9026_v11, 3 }
 0x2ed   : > { %v5371_v41 = vmul.f32 %v5248_v39, %v9677_v56  ;;  %v6680_v10 = vpack.c.bf16 %v5248_v39, %v5247_v20  ;;  %3757 = vmatmul.bf16.gmra.mxu1 %v8550_v19  ;;  %v3819_v3 = vadd.f32 %v3719_v35, %v8561_v57  ;;  %v4185_v20 = vor.u32 %v4183_v34, %v4181_v52 }
 0x2ee   : > { %v4527_v32 = vpop.f32.mrf.mxu2  ;;  %v4638_v23 = vpop.f32.mrf.mxu3  ;;  %v4334_v19 = vsel %vm4290_vm11, %v4329_v12, %v4333_v9  ;;  %v9040_v12 = vld [vmem:[#allocation3 + $0x78] sm:$0xff] }
 0x2ef   : > { %v5411_v43 = vadd.f32 %v5371_v41, %v5370_v31  ;;  %v5459_v44 = vmul.f32 %v5371_v41, %v5248_v39  ;;  %6681 = vst [vmem:[%s9021_s8] sm:$0xff] %v6680_v10   ;;  %v4639_v24 = vadd.f32 %v4638_v23, %v4525_v61  ;;  %v9034_v38 = vsel %vm1489_vm9, %v4185_v20, %v4189_v15  ;;  %v9046_v20 = vld [vmem:[#allocation3 + $0x68] sm:$0xff] }
 0x2f0   : > { %v5044_v31 = vsel %vm5023_vm12, %v5041_v46, %v5043_v60  ;;  %v4335_v35 = vrot.slane %v9034_v38, 2  ;;  %v4195_v46 = vshll.u32 %v9040_v12, 16 }
 0x2f1   : > { %v5499_v22 = vadd.f32 %v5459_v44, %v5458_v28  ;;  %v4739_v54 = vadd.f32 %v4639_v24, %v3819_v3  ;;  %v5148_v18 = vpop.f32.mrf.mxu0 }
 0x2f2   : > { %v3720_v56 = vpop.f32.mrf.mxu1 }
 0x2f3   : > { %v5249_v33 = vadd.f32 %v5148_v18, %v4739_v54  ;;  %4569 = vmatmul.bf16.gmra.mxu2 %v4334_v19  ;;  %v3721_v57 = vadd.f32 %v3720_v56, %v8584_v48  ;;  %v4336_v48 = vsel %vm4290_vm11, %v4331_v1, %v4335_v35  ;;  %v9679_v18 = vld [vmem:[#allocation15_spill] sm:$0xff]  ;;  %v4337_v19 = vrot.slane %v9009_v27, 2 }
 0x2f4   : > { %5187 = vmatmul.bf16.gmra.mxu0 %v5044_v31  ;;  %v4191_v1 = vshrl.u32 %v9009_v27, 16  ;;  %v4197_v56 = vrot.slane %v4195_v46, 1 }
 0x2f5   : > { %v5372_v61 = vmul.f32 %v5249_v33, %v9678_v21  ;;  %v3820_v41 = vadd.f32 %v3721_v57, %v8577_v62  ;;  %v5045_v21 = vrot.slane %v9046_v20, 3 }
 0x2f6   : > { %v4530_v39 = vpop.f32.mrf.mxu2  ;;  %v4640_v52 = vpop.f32.mrf.mxu3 }
 0x2f7   : > { %v5412_v10 = vadd.f32 %v5411_v43, %v5372_v61  ;;  %v5460_v28 = vmul.f32 %v5372_v61, %v5249_v33  ;;  %v4641_v23 = vadd.f32 %v4640_v52, %v4527_v32 }
 0x2f9   : > { %v5500_v11 = vadd.f32 %v5499_v22, %v5460_v28  ;;  %v4740_v34 = vadd.f32 %v4641_v23, %v3820_v41  ;;  %v5150_v3 = vpop.f32.mrf.mxu0 }
 0x2fa   : > { %v3723_v44 = vpop.f32.mrf.mxu1 }
 0x2fb   : > { %v5250_v24 = vadd.f32 %v5150_v3, %v4740_v34  ;;  %4682 = vmatmul.bf16.gmra.mxu3 %v4336_v48  ;;  %v3724_v54 = vadd.f32 %v3723_v44, %v8604_v5  ;;  %v9680_v34 = vld [vmem:[#allocation31_spill] sm:$0xff]  ;;  %v9063_v48 = vld [vmem:[#allocation3 + $0x80] sm:$0xff] }
 0x2fd   : > { %v5373_v62 = vmul.f32 %v5250_v24, %v9679_v18  ;;  %v6685_v43 = vpack.c.bf16 %v5250_v24, %v5249_v33  ;;  %3762 = vmatmul.bf16.gmra.mxu1 %v8559_v4  ;;  %v3821_v38 = vadd.f32 %v3724_v54, %v8602_v29  ;;  %v4193_v33 = vor.u32 %v4191_v1, %v4189_v15  ;;  %v9069_v1 = vld [vmem:[#allocation3 + $0x70] sm:$0xff] }
 0x2fe   : > { %v4532_v32 = vpop.f32.mrf.mxu2  ;;  %v4643_v22 = vpop.f32.mrf.mxu3  ;;  %v4338_v4 = vsel %vm4290_vm11, %v4333_v9, %v4337_v19 }
 0x2ff   : > { %v5413_v57 = vadd.f32 %v5412_v10, %v5373_v62  ;;  %v5461_v31 = vmul.f32 %v5373_v62, %v5250_v24  ;;  %6801 = vst [vmem:[%s9021_s8 + $0x8] sm:$0xff] %v6685_v43   ;;  %v4644_v5 = vadd.f32 %v4643_v22, %v4530_v39  ;;  %v9057_v27 = vsel %vm1489_vm9, %v4193_v33, %v4197_v56 }
 0x300   : > { %v5046_v10 = vsel %vm5023_vm12, %v5043_v60, %v5045_v21  ;;  %v4339_v15 = vrot.slane %v9057_v27, 2  ;;  %v4203_v60 = vshll.u32 %v9063_v48, 16 }
 0x301   : > { %v5501_v61 = vadd.f32 %v5500_v11, %v5461_v31  ;;  %v4741_v52 = vadd.f32 %v4644_v5, %v3821_v38  ;;  %v5153_v41 = vpop.f32.mrf.mxu0  ;;  %v9681_v38 = vld [vmem:[#allocation24_spill] sm:$0xff]  ;;  %v9682_v31 = vld [vmem:[#allocation77_spill] sm:$0xff] }
 0x302   : > { %v3725_v28 = vpop.f32.mrf.mxu1 }
 0x303   : > { %v5251_v23 = vadd.f32 %v5153_v41, %v4741_v52  ;;  %4574 = vmatmul.bf16.gmra.mxu2 %v4338_v4  ;;  %v3726_v29 = vadd.f32 %v3725_v28, %v8619_v47  ;;  %v4340_v47 = vsel %vm4290_vm11, %v4335_v35, %v4339_v15  ;;  %v4199_v35 = vshrl.u32 %v9040_v12, 16 }
 0x304   : > { %5192 = vmatmul.bf16.gmra.mxu0 %v5046_v10  ;;  %v4205_v52 = vrot.slane %v4203_v60, 1  ;;  %v5047_v28 = vrot.slane %v9069_v1, 3 }
 0x305   : > { %v5374_v39 = vmul.f32 %v5251_v23, %v9680_v34  ;;  %v3822_v9 = vadd.f32 %v3726_v29, %v8617_v16 }
 0x306   : > { %v4535_v3 = vpop.f32.mrf.mxu2  ;;  %v4645_v11 = vpop.f32.mrf.mxu3 }
 0x307   : > { %v5414_v46 = vadd.f32 %v5413_v57, %v5374_v39  ;;  %v5462_v44 = vmul.f32 %v5374_v39, %v5251_v23  ;;  %v4646_v24 = vadd.f32 %v4645_v11, %v4532_v32 }
 0x309   : > { %v5502_v54 = vadd.f32 %v5501_v61, %v5462_v44  ;;  %v4742_v20 = vadd.f32 %v4646_v24, %v3822_v9  ;;  %v5155_v18 = vpop.f32.mrf.mxu0  ;;  %v4341_v61 = vrot.slane %v9040_v12, 2 }
 0x30a   : > { %v3728_v62 = vpop.f32.mrf.mxu1 }
 0x30b   : > { %v5252_v43 = vadd.f32 %v5155_v18, %v4742_v20  ;;  %4687 = vmatmul.bf16.gmra.mxu3 %v4340_v47  ;;  %v3729_v22 = vadd.f32 %v3728_v62, %v8636_v51  ;;  %v4342_v34 = vsel %vm4290_vm11, %v4337_v19, %v4341_v61  ;;  %v9084_v62 = vld [vmem:[#allocation3 + $0x88] sm:$0xff] }
 0x30d   : > { %v5375_v16 = vmul.f32 %v5252_v43, %v9681_v38  ;;  %v6690_v57 = vpack.c.bf16 %v5252_v43, %v5251_v23  ;;  %3767 = vmatmul.bf16.gmra.mxu1 %v9682_v31  ;;  %v3823_v33 = vadd.f32 %v3729_v22, %v8634_v42  ;;  %v4201_v23 = vor.u32 %v4199_v35, %v4197_v56  ;;  %v9088_v38 = vld [vmem:[#allocation3 + $0x78] sm:$0xff] }
 0x30e   : > { %v4537_v32 = vpop.f32.mrf.mxu2  ;;  %v4648_v5 = vpop.f32.mrf.mxu3  ;;  %v5048_v42 = vsel %vm5023_vm12, %v5045_v21, %v5047_v28 }
 0x30f   : > { %v5415_v41 = vadd.f32 %v5414_v46, %v5375_v16  ;;  %v5463_v4 = vmul.f32 %v5375_v16, %v5252_v43  ;;  %6802 = vst [vmem:[%s9021_s8 + $0x10] sm:$0xff] %v6690_v57   ;;  %v4649_v51 = vadd.f32 %v4648_v5, %v4535_v3  ;;  %v4206_v12 = vsel %vm1489_vm9, %v4201_v23, %v4205_v52  ;;  %v9683_v46 = vld [vmem:[#allocation40_spill] sm:$0xff]  ;;  %v9684_v16 = vld [vmem:[#allocation39_spill] sm:$0xff] }
 0x311   : > { %v5503_v27 = vadd.f32 %v5502_v54, %v5463_v4  ;;  %v4743_v29 = vadd.f32 %v4649_v51, %v3823_v33  ;;  %v5158_v10 = vpop.f32.mrf.mxu0  ;;  %v4343_v54 = vrot.slane %v4206_v12, 2  ;;  %v9685_v12 = vld [vmem:[#allocation36_spill] sm:$0xff] }
 0x312   : > { %v3730_v39 = vpop.f32.mrf.mxu1 }
 0x313   : > { %v5253_v11 = vadd.f32 %v5158_v10, %v4743_v29  ;;  %4579 = vmatmul.bf16.gmra.mxu2 %v4342_v34  ;;  %v3731_v9 = vadd.f32 %v3730_v39, %v8648_v36  ;;  %v4344_v36 = vsel %vm4290_vm11, %v4339_v15, %v4343_v54  ;;  %v4345_v15 = vrot.slane %v9063_v48, 2 }
 0x314   : > { %5197 = vmatmul.bf16.gmra.mxu0 %v5048_v42 }
 0x315   : > { %v5376_v44 = vmul.f32 %v5253_v11, %v9683_v46  ;;  %v3824_v56 = vadd.f32 %v3731_v9, %v8643_v63  ;;  %v4207_v63 = vshrl.u32 %v9063_v48, 16  ;;  %v4346_v39 = vsel %vm4290_vm11, %v4341_v61, %v4345_v15 }
 0x316   : > { %v4540_v3 = vpop.f32.mrf.mxu2  ;;  %v4650_v24 = vpop.f32.mrf.mxu3 }
 0x317   : > { %v5416_v20 = vadd.f32 %v5415_v41, %v5376_v44  ;;  %v5464_v18 = vmul.f32 %v5376_v44, %v5253_v11  ;;  %v4651_v19 = vadd.f32 %v4650_v24, %v4537_v32  ;;  %v4211_v32 = vshll.u32 %v9084_v62, 16 }
 0x318   : > { %v4209_v33 = vor.u32 %v4207_v63, %v4205_v52 }
 0x319   : > { %v5504_v47 = vadd.f32 %v5503_v27, %v5464_v18  ;;  %v4744_v60 = vadd.f32 %v4651_v19, %v3824_v56  ;;  %v5160_v43 = vpop.f32.mrf.mxu0  ;;  %v5049_v27 = vrot.slane %v9088_v38, 3  ;;  %v4213_v10 = vrot.slane %v4211_v32, 1 }
 0x31a   : > { %v3733_v22 = vpop.f32.mrf.mxu1  ;;  %v4215_v32 = vshrl.u32 %v9084_v62, 16 }
 0x31b   : > { %v5254_v21 = vadd.f32 %v5160_v43, %v4744_v60  ;;  %4692 = vmatmul.bf16.gmra.mxu3 %v4344_v36  ;;  %v3734_v1 = vadd.f32 %v3733_v22, %v8659_v59  ;;  %v9100_v48 = vsel %vm1489_vm9, %v4209_v33, %v4213_v10  ;;  %v5050_v52 = vsel %vm5023_vm12, %v5047_v28, %v5049_v27  ;;  %v9687_v36 = vld [vmem:[#allocation48_spill] sm:$0xff] }
 0x31c   : > { %v4347_v44 = vrot.slane %v9100_v48, 2 }
 0x31d   : > { %v5377_v57 = vmul.f32 %v5254_v21, %v9684_v16  ;;  %v6695_v31 = vpack.c.bf16 %v5254_v21, %v5253_v11  ;;  %3772 = vmatmul.bf16.gmra.mxu1 %v8417_v58  ;;  %v3825_v41 = vadd.f32 %v3734_v1, %v8657_v30  ;;  %v9688_v1 = vld [vmem:[#allocation10_spill] sm:$0xff] }
 0x31e   : > { %v4542_v5 = vpop.f32.mrf.mxu2  ;;  %v4653_v35 = vpop.f32.mrf.mxu3  ;;  %v4348_v60 = vsel %vm4290_vm11, %v4343_v54, %v4347_v44  ;;  %v9689_v16 = vld [vmem:[#allocation82_spill] sm:$0xff] }
 0x31f   : > { %v5417_v4 = vadd.f32 %v5416_v20, %v5377_v57  ;;  %v5465_v59 = vmul.f32 %v5377_v57, %v5254_v21  ;;  %6803 = vst [vmem:[%s9021_s8 + $0x18] sm:$0xff] %v6695_v31   ;;  %v4654_v51 = vadd.f32 %v4653_v35, %v4540_v3  ;;  %v9686_v3 = vld [vmem:[#allocation47_spill] sm:$0xff]  ;;  %v9111_v21 = vld [vmem:[#allocation3 + $0x80] sm:$0xff] }
 0x321   : > { %v5505_v29 = vadd.f32 %v5504_v47, %v5465_v59  ;;  %v4745_v23 = vadd.f32 %v4654_v51, %v3825_v41  ;;  %v5163_v34 = vpop.f32.mrf.mxu0  ;;  %v4349_v59 = vrot.slane %v9084_v62, 2  ;;  %v5051_v51 = vrot.slane %v9111_v21, 3  ;;  %v9694_v21 = vld [vmem:[#allocation50_spill] sm:$0xff] }
 0x322   : > { %v3735_v58 = vpop.f32.mrf.mxu1 }
 0x323   : > { %v5255_v11 = vadd.f32 %v5163_v34, %v4745_v23  ;;  %4584 = vmatmul.bf16.gmra.mxu2 %v4346_v39  ;;  %v3736_v30 = vadd.f32 %v3735_v58, %v8665_v45  ;;  %v9108_v45 = vld [vmem:[#allocation3 + $0x90] sm:$0xff]  ;;  %v4217_v34 = vor.u32 %v4215_v32, %v4213_v10  ;;  %v4350_v58 = vsel %vm4290_vm11, %v4345_v15, %v4349_v59  ;;  %v9693_v10 = vld [vmem:[#allocation49_spill] sm:$0xff] }
 0x324   : > { %5202 = vmatmul.bf16.gmra.mxu0 %v5050_v52  ;;  %v4219_v54 = vshll.u32 %v9108_v45, 16  ;;  %v9691_v52 = vld [vmem:[#allocation89_spill] sm:$0xff] }
 0x325   : > { %v5378_v9 = vmul.f32 %v5255_v11, %v9685_v12  ;;  %v3826_v24 = vadd.f32 %v3736_v30, %v9686_v3 }
 0x326   : > { %v4545_v42 = vpop.f32.mrf.mxu2  ;;  %v4655_v46 = vpop.f32.mrf.mxu3  ;;  %v4221_v30 = vrot.slane %v4219_v54, 1  ;;  %v9134_v54 = vld [vmem:[#allocation3 + $0x88] sm:$0xff] }
 0x327   : > { %v5418_v61 = vadd.f32 %v5417_v4, %v5378_v9  ;;  %v5466_v56 = vmul.f32 %v5378_v9, %v5255_v11  ;;  %v4656_v20 = vadd.f32 %v4655_v46, %v4542_v5  ;;  %v9690_v5 = vld [vmem:[#allocation73_spill] sm:$0xff]  ;;  %v5052_v9 = vsel %vm5023_vm12, %v5049_v27, %v5051_v51  ;;  %v9692_v46 = vld [vmem:[#allocation4_spill] sm:$0xff] }
 0x328   : > { %v4222_v62 = vsel %vm1489_vm9, %v4217_v34, %v4221_v30 }
 0x329   : > { %v5506_v18 = vadd.f32 %v5505_v29, %v5466_v56  ;;  %v4746_v19 = vadd.f32 %v4656_v20, %v3826_v24  ;;  %v5165_v47 = vpop.f32.mrf.mxu0 }
 0x32a   : > { %v3738_v28 = vpop.f32.mrf.mxu1 }
 0x32b   : > { %v5256_v43 = vadd.f32 %v5165_v47, %v4746_v19  ;;  %4697 = vmatmul.bf16.gmra.mxu3 %v4348_v60  ;;  %v3739_v22 = vadd.f32 %v3738_v28, %v9687_v36  ;;  %v4351_v19 = vrot.slane %v4222_v62, 2 }
 0x32d   : > { %v5379_v38 = vmul.f32 %v5256_v43, %v9688_v1  ;;  %v6700_v63 = vpack.c.bf16 %v5256_v43, %v5255_v11  ;;  %3777 = vmatmul.bf16.gmra.mxu1 %v9689_v16  ;;  %v3827_v35 = vadd.f32 %v3739_v22, %v9690_v5  ;;  %v4352_v27 = vsel %vm4290_vm11, %v4347_v44, %v4351_v19 }
 0x32e   : > { %v4547_v57 = vpop.f32.mrf.mxu2  ;;  %v4658_v31 = vpop.f32.mrf.mxu3  ;;  %v4223_v5 = vshrl.u32 %v9108_v45, 16 }
 0x32f   : > { %v5419_v33 = vadd.f32 %v5418_v61, %v5379_v38  ;;  %v5467_v41 = vmul.f32 %v5379_v38, %v5256_v43  ;;  %6804 = vst [vmem:[%s9021_s8 + $0x20] sm:$0xff] %v6700_v63   ;;  %v4659_v4 = vadd.f32 %v4658_v31, %v4545_v42  ;;  %v9126_v61 = vld [vmem:[#allocation3 + $0x98] sm:$0xff]  ;;  %v9695_v38 = vld [vmem:[#allocation5_spill] sm:$0xff]  ;;  %v9696_v31 = vld [vmem:[#allocation83_spill] sm:$0xff] }
 0x330   : > { %v4227_v43 = vshll.u32 %v9126_v61, 16 }
 0x331   : > { %v5507_v29 = vadd.f32 %v5506_v18, %v5467_v41  ;;  %v4747_v23 = vadd.f32 %v4659_v4, %v3827_v35  ;;  %v5168_v39 = vpop.f32.mrf.mxu0  ;;  %v9697_v35 = vld [vmem:[#allocation56_spill] sm:$0xff] }
 0x332   : > { %v3740_v11 = vpop.f32.mrf.mxu1  ;;  %v4229_v44 = vrot.slane %v4227_v43, 1 }
 0x333   : > { %v5257_v48 = vadd.f32 %v5168_v39, %v4747_v23  ;;  %4589 = vmatmul.bf16.gmra.mxu2 %v4350_v58  ;;  %v3741_v12 = vadd.f32 %v3740_v11, %v9691_v52  ;;  %v4353_v23 = vrot.slane %v9108_v45, 2  ;;  %v4225_v58 = vor.u32 %v4223_v5, %v4221_v30 }
 0x334   : > { %5207 = vmatmul.bf16.gmra.mxu0 %v5052_v9  ;;  %v5053_v52 = vrot.slane %v9134_v54, 3  ;;  %v4357_v5 = vrot.slane %v9126_v61, 2 }
 0x335   : > { %v5380_v42 = vmul.f32 %v5257_v48, %v9692_v46  ;;  %v3828_v56 = vadd.f32 %v3741_v12, %v9693_v10  ;;  %v9143_v46 = vsel %vm1489_vm9, %v4225_v58, %v4229_v44 }
 0x336   : > { %v4550_v3 = vpop.f32.mrf.mxu2  ;;  %v4660_v24 = vpop.f32.mrf.mxu3 }
 0x337   : > { %v5420_v15 = vadd.f32 %v5419_v33, %v5380_v42  ;;  %v5468_v20 = vmul.f32 %v5380_v42, %v5257_v48  ;;  %v4661_v18 = vadd.f32 %v4660_v24, %v4547_v57  ;;  %v9698_v42 = vld [vmem:[#allocation90_spill] sm:$0xff] }
 0x338   : > { %v9699_v24 = vld [vmem:[#allocation6_spill] sm:$0xff] }
 0x339   : > { %v5508_v47 = vadd.f32 %v5507_v29, %v5468_v20  ;;  %v4748_v60 = vadd.f32 %v4661_v18, %v3828_v56  ;;  %v5170_v28 = vpop.f32.mrf.mxu0  ;;  %v4355_v56 = vrot.slane %v9143_v46, 2 }
 0x33a   : > { %v3743_v36 = vpop.f32.mrf.mxu1 }
 0x33b   : > { %v5258_v22 = vadd.f32 %v5170_v28, %v4748_v60  ;;  %4702 = vmatmul.bf16.gmra.mxu3 %v4352_v27  ;;  %v3744_v1 = vadd.f32 %v3743_v36, %v9694_v21  ;;  %v4356_v36 = vsel %vm4290_vm11, %v4351_v19, %v4355_v56  ;;  %v4231_v19 = vshrl.u32 %v9126_v61, 16 }
 0x33d   : > { %v5381_v63 = vmul.f32 %v5258_v22, %v9695_v38  ;;  %v6705_v16 = vpack.c.bf16 %v5258_v22, %v5257_v48  ;;  %3782 = vmatmul.bf16.gmra.mxu1 %v9696_v31  ;;  %v3829_v33 = vadd.f32 %v3744_v1, %v9697_v35  ;;  %v4354_v48 = vsel %vm4290_vm11, %v4349_v59, %v4353_v23  ;;  %v9149_v59 = vld [vmem:[#allocation3 + $0xa0] sm:$0xff]  ;;  %v9158_v35 = vld [vmem:[#allocation3 + $0x90] sm:$0xff] }
 0x33e   : > { %v4552_v57 = vpop.f32.mrf.mxu2  ;;  %v4663_v32 = vpop.f32.mrf.mxu3  ;;  %v9701_v1 = vld [vmem:[#allocation57_spill] sm:$0xff]  ;;  %v5055_v46 = vrot.slane %v9158_v35, 3 }
 0x33f   : > { %v5421_v41 = vadd.f32 %v5420_v15, %v5381_v63  ;;  %v5469_v4 = vmul.f32 %v5381_v63, %v5258_v22  ;;  %6805 = vst [vmem:[%s9021_s8 + $0x28] sm:$0xff] %v6705_v16   ;;  %v4664_v29 = vadd.f32 %v4663_v32, %v4550_v3  ;;  %v5054_v3 = vsel %vm5023_vm12, %v5051_v51, %v5053_v52  ;;  %v9700_v15 = vld [vmem:[#allocation54_spill] sm:$0xff]  ;;  %v9702_v63 = vld [vmem:[#allocation17_spill] sm:$0xff]  ;;  %v9703_v32 = vld [vmem:[#allocation84_spill] sm:$0xff] }
 0x340   : > { %v4235_v51 = vshll.u32 %v9149_v59, 16  ;;  %v9710_v35 = vld [vmem:[#allocation85_spill] sm:$0xff] }
 0x341   : > { %v5509_v34 = vadd.f32 %v5508_v47, %v5469_v4  ;;  %v4749_v39 = vadd.f32 %v4664_v29, %v3829_v33  ;;  %v5173_v11 = vpop.f32.mrf.mxu0 }
 0x342   : > { %v3745_v12 = vpop.f32.mrf.mxu1  ;;  %v4237_v33 = vrot.slane %v4235_v51, 1 }
 0x343   : > { %v5259_v9 = vadd.f32 %v5173_v11, %v4749_v39  ;;  %4594 = vmatmul.bf16.gmra.mxu2 %v4354_v48  ;;  %v3746_v62 = vadd.f32 %v3745_v12, %v9698_v42  ;;  %v4233_v48 = vor.u32 %v4231_v19, %v4229_v44 }
 0x344   : > { %5212 = vmatmul.bf16.gmra.mxu0 %v5054_v3  ;;  %v9705_v3 = vld [vmem:[#allocation91_spill] sm:$0xff] }
 0x345   : > { %v5382_v45 = vmul.f32 %v5259_v9, %v9699_v24  ;;  %v3830_v20 = vadd.f32 %v3746_v62, %v9700_v15  ;;  %v9166_v61 = vsel %vm1489_vm9, %v4233_v48, %v4237_v33  ;;  %v9186_v48 = vld [vmem:[#allocation3 + $0xb0] sm:$0xf] }
 0x346   : > { %v4555_v10 = vpop.f32.mrf.mxu2  ;;  %v4665_v30 = vpop.f32.mrf.mxu3 }
 0x347   : > { %v5422_v18 = vadd.f32 %v5421_v41, %v5382_v45  ;;  %v5470_v47 = vmul.f32 %v5382_v45, %v5259_v9  ;;  %v4666_v60 = vadd.f32 %v4665_v30, %v4552_v57  ;;  %v9704_v41 = vld [vmem:[#allocation53_spill] sm:$0xff]  ;;  %v5056_v45 = vsel %vm5023_vm12, %v5053_v52, %v5055_v46  ;;  %v9706_v30 = vld [vmem:[#allocation12_spill] sm:$0xff] }
 0x349   : > { %v5510_v28 = vadd.f32 %v5509_v34, %v5470_v47  ;;  %v4750_v27 = vadd.f32 %v4666_v60, %v3830_v20  ;;  %v5175_v43 = vpop.f32.mrf.mxu0  ;;  %v4359_v20 = vrot.slane %v9166_v61, 2 }
 0x34a   : > { %v3748_v22 = vpop.f32.mrf.mxu1 }
 0x34b   : > { %v5260_v21 = vadd.f32 %v5175_v43, %v4750_v27  ;;  %4707 = vmatmul.bf16.gmra.mxu3 %v4356_v36  ;;  %v3749_v38 = vadd.f32 %v3748_v22, %v9701_v1  ;;  %v4360_v22 = vsel %vm4290_vm11, %v4355_v56, %v4359_v20  ;;  %v4239_v56 = vshrl.u32 %v9149_v59, 16 }
 0x34d   : > { %v5383_v16 = vmul.f32 %v5260_v21, %v9702_v63  ;;  %v6710_v31 = vpack.c.bf16 %v5260_v21, %v5259_v9  ;;  %3787 = vmatmul.bf16.gmra.mxu1 %v9703_v32  ;;  %v3831_v4 = vadd.f32 %v3749_v38, %v9704_v41  ;;  %v4358_v9 = vsel %vm4290_vm11, %v4353_v23, %v4357_v5  ;;  %v9172_v23 = vld [vmem:[#allocation3 + $0xa8] sm:$0xff]  ;;  %v9708_v38 = vld [vmem:[#allocation64_spill] sm:$0xff] }
 0x34e   : > { %v4557_v54 = vpop.f32.mrf.mxu2  ;;  %v4668_v57 = vpop.f32.mrf.mxu3  ;;  %v4243_v52 = vshll.u32 %v9172_v23, 16  ;;  %v4361_v41 = vrot.slane %v9149_v59, 2  ;;  %v4241_v61 = vor.u32 %v4239_v56, %v4237_v33  ;;  %v9208_v56 = vld [vmem:[#allocation3 + $0xa0] sm:$0xff] }
 0x34f   : > { %v5423_v29 = vadd.f32 %v5422_v18, %v5383_v16  ;;  %v5471_v34 = vmul.f32 %v5383_v16, %v5260_v21  ;;  %6806 = vst [vmem:[%s9021_s8 + $0x30] sm:$0xff] %v6710_v31   ;;  %v4669_v39 = vadd.f32 %v4668_v57, %v4555_v10  ;;  %v9707_v18 = vld [vmem:[#allocation61_spill] sm:$0xff]  ;;  %v9178_v16 = vld [vmem:[#allocation3 + $0x98] sm:$0xff]  ;;  %v9709_v31 = vld [vmem:[#allocation23_spill] sm:$0xff] }
 0x351   : > { %v5511_v58 = vadd.f32 %v5510_v28, %v5471_v34  ;;  %v4751_v11 = vadd.f32 %v4669_v39, %v3831_v4  ;;  %v5178_v12 = vpop.f32.mrf.mxu0  ;;  %v4245_v4 = vrot.slane %v4243_v52, 1 }
 0x352   : > { %v3750_v42 = vpop.f32.mrf.mxu1 }
 0x353   : > { %v5261_v62 = vadd.f32 %v5178_v12, %v4751_v11  ;;  %4599 = vmatmul.bf16.gmra.mxu2 %v4358_v9  ;;  %v3751_v24 = vadd.f32 %v3750_v42, %v9705_v3  ;;  %v3982_v12 = vld [vmem:[#allocation3 + $0xb4] sm:$0x7]  ;;  %v5057_v9 = vrot.slane %v9178_v16, 3 }
 0x354   : > { %5217 = vmatmul.bf16.gmra.mxu0 %v5056_v45  ;;  %v4065_v45 = vunpack.c.l.b16 %v9186_v48 }
 0x355   : > { %v5384_v10 = vmul.f32 %v5261_v62, %v9706_v30  ;;  %v3832_v47 = vadd.f32 %v3751_v24, %v9707_v18  ;;  %v4362_v24 = vsel %vm4290_vm11, %v4357_v5, %v4361_v41  ;;  %v4089_v30 = vunpack.c.l.b16 %v3982_v12  ;;  %v9712_v18 = vld [vmem:[#allocation92_spill] sm:$0xff] }
 0x356   : > { %v4560_v15 = vpop.f32.mrf.mxu2  ;;  %v4670_v44 = vpop.f32.mrf.mxu3 }
 0x357   : > { %v5424_v60 = vadd.f32 %v5423_v29, %v5384_v10  ;;  %v5472_v28 = vmul.f32 %v5384_v10, %v5261_v62  ;;  %v4671_v27 = vadd.f32 %v4670_v44, %v4557_v54  ;;  %v9711_v29 = vld [vmem:[#allocation51_spill] sm:$0xff] }
 0x359   : > { %v5512_v43 = vadd.f32 %v5511_v58, %v5472_v28  ;;  %v4752_v36 = vadd.f32 %v4671_v27, %v3832_v47  ;;  %v5180_v51 = vpop.f32.mrf.mxu0  ;;  %v9713_v28 = vld [vmem:[#allocation21_spill] sm:$0xff] }
 0x35a   : > { %v3753_v21 = vpop.f32.mrf.mxu1 }
 0x35b   : > { %v5262_v1 = vadd.f32 %v5180_v51, %v4752_v36  ;;  %4712 = vmatmul.bf16.gmra.mxu3 %v4360_v22  ;;  %v3754_v63 = vadd.f32 %v3753_v21, %v9708_v38  ;;  %v9202_v36 = vpack.c.b16 %v4089_v30, %v4065_v45  ;;  %v9714_v51 = vld [vmem:[#allocation67_spill] sm:$0xff] }
 0x35d   : > { %v5385_v32 = vmul.f32 %v5262_v1, %v9709_v31  ;;  %v6715_v57 = vpack.c.bf16 %v5262_v1, %v5261_v62  ;;  %3792 = vmatmul.bf16.gmra.mxu1 %v9710_v35  ;;  %v3833_v34 = vadd.f32 %v3754_v63, %v9711_v29  ;;  %v4251_v31 = vshll.u32 %v9202_v36, 16  ;;  %v9715_v35 = vld [vmem:[#allocation69_spill] sm:$0xff] }
 0x35e   : > { %v4562_v54 = vpop.f32.mrf.mxu2  ;;  %v4673_v19 = vpop.f32.mrf.mxu3  ;;  %v4247_v29 = vshrl.u32 %v9172_v23, 16  ;;  %v4255_v48 = vshrl.u32 %v9202_v36, 16 }
 0x35f   : > { %v5425_v39 = vadd.f32 %v5424_v60, %v5385_v32  ;;  %v5473_v58 = vmul.f32 %v5385_v32, %v5262_v1  ;;  %6807 = vst [vmem:[%s9021_s8 + $0x38] sm:$0xff] %v6715_v57   ;;  %v4674_v11 = vadd.f32 %v4673_v19, %v4560_v15  ;;  %v9194_v15 = vsel %vm1489_vm9, %v4241_v61, %v4245_v4  ;;  %v9718_v61 = vld [vmem:[#allocation58_spill] sm:$0xff] }
 0x360   : > { %v5058_v60 = vsel %vm5023_vm12, %v5055_v46, %v5057_v9  ;;  %v4363_v5 = vrot.slane %v9194_v15, 2  ;;  %v5059_v15 = vrot.slane %v9208_v56, 3 }
 0x361   : > { %v5513_v42 = vadd.f32 %v5512_v43, %v5473_v58  ;;  %v4753_v62 = vadd.f32 %v4674_v11, %v3833_v34  ;;  %v5183_v3 = vpop.f32.mrf.mxu0  ;;  %v9716_v34 = vld [vmem:[#allocation32_spill] sm:$0xff]  ;;  %v9717_v58 = vld [vmem:[#allocation86_spill] sm:$0xff] }
 0x362   : > { %v3755_v10 = vpop.f32.mrf.mxu1  ;;  %v4364_v46 = vsel %vm4290_vm11, %v4359_v20, %v4363_v5  ;;  %v4365_v20 = vrot.slane %v9172_v23, 2 }
 0x363   : > { %v5263_v44 = vadd.f32 %v5183_v3, %v4753_v62  ;;  %4604 = vmatmul.bf16.gmra.mxu2 %v4362_v24  ;;  %v3756_v47 = vadd.f32 %v3755_v10, %v9712_v18  ;;  %v4253_v62 = vrot.slane %v4251_v31, 1 }
 0x364   : > { %5222 = vmatmul.bf16.gmra.mxu0 %v5058_v60 }
 0x365   : > { %v5386_v33 = vmul.f32 %v5263_v44, %v9713_v28  ;;  %v3834_v22 = vadd.f32 %v3756_v47, %v9714_v51 }
 0x366   : > { %v4565_v27 = vpop.f32.mrf.mxu2  ;;  %v4675_v43 = vpop.f32.mrf.mxu3 }
 0x367   : > { %v5426_v52 = vadd.f32 %v5425_v39, %v5386_v33  ;;  %v5474_v21 = vmul.f32 %v5386_v33, %v5263_v44  ;;  %v4676_v1 = vadd.f32 %v4675_v43, %v4562_v54  ;;  %v9719_v43 = vld [vmem:[#allocation93_spill] sm:$0xff] }
 0x369   : > { %v5514_v38 = vadd.f32 %v5513_v42, %v5474_v21  ;;  %v4754_v63 = vadd.f32 %v4676_v1, %v3834_v22  ;;  %v5185_v16 = vpop.f32.mrf.mxu0  ;;  %v4249_v42 = vor.u32 %v4247_v29, %v4245_v4  ;;  %v3981_v4 = vld [vmem:[#allocation3 + $0xb4] sm:$0x3]  ;;  %v9720_v22 = vld [vmem:[#allocation37_spill] sm:$0xff] }
 0x36a   : > { %v3758_v32 = vpop.f32.mrf.mxu1 }
 0x36b   : > { %v5264_v57 = vadd.f32 %v5185_v16, %v4754_v63  ;;  %4717 = vmatmul.bf16.gmra.mxu3 %v4364_v46  ;;  %v3759_v19 = vadd.f32 %v3758_v32, %v9715_v35  ;;  %v9221_v23 = vsel %vm1489_vm9, %v4249_v42, %v4253_v62 }
 0x36c   : > { %v4367_v59 = vrot.slane %v9221_v23, 2 }
 0x36d   : > { %v5387_v39 = vmul.f32 %v5264_v57, %v9716_v34  ;;  %v6720_v54 = vpack.c.bf16 %v5264_v57, %v5263_v44  ;;  %3797 = vmatmul.bf16.gmra.mxu1 %v9717_v58  ;;  %v3835_v3 = vadd.f32 %v3759_v19, %v9718_v61  ;;  %v4366_v44 = vsel %vm4290_vm11, %v4361_v41, %v4365_v20  ;;  %v9721_v41 = vld [vmem:[#allocation74_spill] sm:$0xff] }
 0x36e   : > { %v4567_v11 = vpop.f32.mrf.mxu2  ;;  %v4678_v12 = vpop.f32.mrf.mxu3  ;;  %v4368_v19 = vsel %vm4290_vm11, %v4363_v5, %v4367_v59 }
 0x36f   : > { %v5427_v24 = vadd.f32 %v5426_v52, %v5387_v39  ;;  %v5475_v30 = vmul.f32 %v5387_v39, %v5264_v57  ;;  %6808 = vst [vmem:[%s9021_s8 + $0x40] sm:$0xff] %v6720_v54   ;;  %v4679_v10 = vadd.f32 %v4678_v12, %v4565_v27  ;;  %v5060_v27 = vsel %vm5023_vm12, %v5057_v9, %v5059_v15  ;;  %v9234_v39 = vld [vmem:[#allocation3 + $0xa8] sm:$0xff]  ;;  %v9723_v12 = vld [vmem:[#allocation87_spill] sm:$0xff] }
 0x370   : > { %v9722_v54 = vld [vmem:[#allocation30_spill] sm:$0xff] }
 0x371   : > { %v5515_v18 = vadd.f32 %v5514_v38, %v5475_v30  ;;  %v4755_v47 = vadd.f32 %v4679_v10, %v3835_v3  ;;  %v5188_v60 = vpop.f32.mrf.mxu0  ;;  %v4066_v38 = vunpack.c.l.b16 %v3981_v4 }
 0x372   : > { %v3760_v28 = vpop.f32.mrf.mxu1 }
 0x373   : > { %v5265_v33 = vadd.f32 %v5188_v60, %v4755_v47  ;;  %4609 = vmatmul.bf16.gmra.mxu2 %v4366_v44  ;;  %v3761_v51 = vadd.f32 %v3760_v28, %v9719_v43  ;;  %v9231_v9 = vpack.c.b16 %v4066_v38, %v4065_v45  ;;  %v4257_v44 = vor.u32 %v4255_v48, %v4253_v62  ;;  %v6380_v38 = vld [vmem:[#allocation3 + $0xb0] sm:$0xf] }
 0x374   : > { %5227 = vmatmul.bf16.gmra.mxu0 %v5060_v27 }
 0x375   : > { %v5388_v52 = vmul.f32 %v5265_v33, %v9720_v22  ;;  %v3836_v63 = vadd.f32 %v3761_v51, %v9721_v41  ;;  %v4369_v5 = vrot.slane %v9231_v9, 2  ;;  %v4371_v27 = vrot.slane %v4257_v44, 2  ;;  %v6580_v41 = vld [vmem:[#allocation3 + $0xb0] sm:$0x70] }
 0x376   : > { %v4570_v21 = vpop.f32.mrf.mxu2  ;;  %v4680_v1 = vpop.f32.mrf.mxu3 }
 0x377   : > { %v5428_v16 = vadd.f32 %v5427_v24, %v5388_v52  ;;  %v5476_v46 = vmul.f32 %v5388_v52, %v5265_v33  ;;  %v4681_v31 = vadd.f32 %v4680_v1, %v4567_v11  ;;  %v4370_v60 = vsel %vm4290_vm11, %v4365_v20, %v4369_v5 }
 0x379   : > { %v5516_v32 = vadd.f32 %v5515_v18, %v5476_v46  ;;  %v4756_v57 = vadd.f32 %v4681_v31, %v3836_v63  ;;  %v5190_v35 = vpop.f32.mrf.mxu0  ;;  %v6381_v31 = vor.u32 %v6580_v41, %v6380_v38 }
 0x37a   : > { %v3763_v56 = vpop.f32.mrf.mxu1 }
 0x37b   : > { %v5266_v29 = vadd.f32 %v5190_v35, %v4756_v57  ;;  %4722 = vmatmul.bf16.gmra.mxu3 %v4368_v19  ;;  %v3764_v34 = vadd.f32 %v3763_v56, %v8790_v0  ;;  %v5061_v0 = vrot.slane %v9234_v39, 3  ;;  %v9726_v35 = vld [vmem:[#allocation88_spill] sm:$0xff]  ;;  %v9727_v56 = vld [vmem:[#allocation66_spill] sm:$0xff] }
 0x37d   : > { %v5389_v58 = vmul.f32 %v5266_v29, %v9722_v54  ;;  %v6725_v11 = vpack.c.bf16 %v5266_v29, %v5265_v33  ;;  %3802 = vmatmul.bf16.gmra.mxu1 %v9723_v12  ;;  %v3837_v45 = vadd.f32 %v3764_v34, %v8788_v26  ;;  %v5062_v36 = vsel %vm5023_vm12, %v5059_v15, %v5061_v0  ;;  %v9724_v26 = vld [vmem:[#allocation41_spill] sm:$0xff] }
 0x37e   : > { %v4572_v42 = vpop.f32.mrf.mxu2  ;;  %v4683_v61 = vpop.f32.mrf.mxu3 }
 0x37f   : > { %v5429_v3 = vadd.f32 %v5428_v16, %v5389_v58  ;;  %v5477_v24 = vmul.f32 %v5389_v58, %v5266_v29  ;;  %6809 = vst [vmem:[%s9021_s8 + $0x48] sm:$0xff] %v6725_v11   ;;  %v4684_v30 = vadd.f32 %v4683_v61, %v4570_v21  ;;  %v9728_v61 = vld [vmem:[#allocation94_spill] sm:$0xff] }
 0x381   : > { %v5517_v10 = vadd.f32 %v5516_v32, %v5477_v24  ;;  %v4757_v18 = vadd.f32 %v4684_v30, %v3837_v45  ;;  %v5193_v47 = vpop.f32.mrf.mxu0  ;;  %v9725_v32 = vld [vmem:[#allocation8_spill] sm:$0xff] }
 0x382   : > { %v3765_v28 = vpop.f32.mrf.mxu1 }
 0x383   : > { %v5267_v33 = vadd.f32 %v5193_v47, %v4757_v18  ;;  %4614 = vmatmul.bf16.gmra.mxu2 %v4370_v60  ;;  %v3766_v23 = vadd.f32 %v3765_v28, %v8798_v25  ;;  %v4372_v25 = vsel %vm4290_vm11, %v4367_v59, %v4371_v27  ;;  %v5063_v59 = vrot.slane %v6381_v31, 3  ;;  %v9730_v18 = vld [vmem:[#allocation45_spill] sm:$0xff]  ;;  %v9735_v31 = vld [vmem:[#allocation96_spill] sm:$0xff] }
 0x384   : > { %5232 = vmatmul.bf16.gmra.mxu0 %v5062_v36 }
 0x385   : > { %v5390_v4 = vmul.f32 %v5267_v33, %v9724_v26  ;;  %v3838_v22 = vadd.f32 %v3766_v23, %v8796_v7  ;;  %v5064_v45 = vsel %vm5023_vm12, %v5061_v0, %v5063_v59  ;;  %v9732_v0 = vld [vmem:[#allocation7_spill] sm:$0xff] }
 0x386   : > { %v4575_v43 = vpop.f32.mrf.mxu2  ;;  %v4685_v51 = vpop.f32.mrf.mxu3 }
 0x387   : > { %v5430_v52 = vadd.f32 %v5429_v3, %v5390_v4  ;;  %v5478_v21 = vmul.f32 %v5390_v4, %v5267_v33  ;;  %v4686_v1 = vadd.f32 %v4685_v51, %v4572_v42  ;;  %v9729_v3 = vld [vmem:[#allocation11_spill] sm:$0xff] }
 0x388   : > { %v9731_v4 = vld [vmem:[#allocation95_spill] sm:$0xff] }
 0x389   : > { %v5518_v20 = vadd.f32 %v5517_v10, %v5478_v21  ;;  %v4758_v62 = vadd.f32 %v4686_v1, %v3838_v22  ;;  %v5195_v63 = vpop.f32.mrf.mxu0 }
 0x38a   : > { %v3768_v15 = vpop.f32.mrf.mxu1 }
 0x38b   : > { %v5268_v16 = vadd.f32 %v5195_v63, %v4758_v62  ;;  %4727 = vmatmul.bf16.gmra.mxu3 %v4372_v25  ;;  %v3769_v46 = vadd.f32 %v3768_v15, %v8809_v49 }
 0x38d   : > { %v5391_v57 = vmul.f32 %v5268_v16, %v9725_v32  ;;  %v6730_v7 = vpack.c.bf16 %v5268_v16, %v5267_v33  ;;  %3807 = vmatmul.bf16.gmra.mxu1 %v9726_v35  ;;  %v3839_v29 = vadd.f32 %v3769_v46, %v9727_v56 }
 0x38e   : > { %v4577_v19 = vpop.f32.mrf.mxu2  ;;  %v4688_v9 = vpop.f32.mrf.mxu3 }
 0x38f   : > { %v5431_v34 = vadd.f32 %v5430_v52, %v5391_v57  ;;  %v5479_v39 = vmul.f32 %v5391_v57, %v5268_v16  ;;  %6810 = vst [vmem:[%s9021_s8 + $0x50] sm:$0xff] %v6730_v7   ;;  %v4689_v54 = vadd.f32 %v4688_v9, %v4575_v43  ;;  %v9733_v52 = vld [vmem:[#allocation46_spill] sm:$0xff]  ;;  %v9737_v9 = vld [vmem:[#allocation55_spill] sm:$0xff] }
 0x390   : > { %v9736_v57 = vld [vmem:[#allocation14_spill] sm:$0xff] }
 0x391   : > { %v5519_v58 = vadd.f32 %v5518_v20, %v5479_v39  ;;  %v4759_v11 = vadd.f32 %v4689_v54, %v3839_v29  ;;  %v5198_v12 = vpop.f32.mrf.mxu0  ;;  %v9734_v20 = vld [vmem:[#allocation52_spill] sm:$0xff] }
 0x392   : > { %v3770_v42 = vpop.f32.mrf.mxu1 }
 0x393   : > { %v5269_v49 = vadd.f32 %v5198_v12, %v4759_v11  ;;  %4619 = vmatmul.bf16.gmra.mxu2 %v4369_v5  ;;  %v3771_v48 = vadd.f32 %v3770_v42, %v9728_v61  ;;  %v9738_v61 = vld [vmem:[#allocation13_spill] sm:$0xff] }
 0x394   : > { %5237 = vmatmul.bf16.gmra.mxu0 %v5064_v45 }
 0x395   : > { %v5392_v24 = vmul.f32 %v5269_v49, %v9729_v3  ;;  %v3840_v47 = vadd.f32 %v3771_v48, %v9730_v18 }
 0x396   : > { %v4580_v30 = vpop.f32.mrf.mxu2  ;;  %v4690_v10 = vpop.f32.mrf.mxu3 }
 0x397   : > { %v5432_v60 = vadd.f32 %v5431_v34, %v5392_v24  ;;  %v5480_v44 = vmul.f32 %v5392_v24, %v5269_v49  ;;  %v4691_v28 = vadd.f32 %v4690_v10, %v4577_v19 }
 0x399   : > { %v5520_v33 = vadd.f32 %v5519_v58, %v5480_v44  ;;  %v4760_v23 = vadd.f32 %v4691_v28, %v3840_v47  ;;  %v5200_v36 = vpop.f32.mrf.mxu0 }
 0x39a   : > { %v3773_v26 = vpop.f32.mrf.mxu1 }
 0x39b   : > { %v5270_v5 = vadd.f32 %v5200_v36, %v4760_v23  ;;  %4732 = vmatmul.bf16.gmra.mxu3 %v4371_v27  ;;  %v3774_v43 = vadd.f32 %v3773_v26, %v9731_v4  ;;  %v9739_v23 = vld [vmem:[#allocation59_spill] sm:$0xff]  ;;  %v9740_v26 = vld [vmem:[#allocation20_spill] sm:$0xff] }
 0x39d   : > { %v5393_v51 = vmul.f32 %v5270_v5, %v9732_v0  ;;  %v6735_v22 = vpack.c.bf16 %v5270_v5, %v5269_v49  ;;  %3812 = vmatmul.bf16.gmra.mxu1 %v9733_v52  ;;  %v3841_v62 = vadd.f32 %v3774_v43, %v9734_v20  ;;  %v9741_v43 = vld [vmem:[#allocation62_spill] sm:$0xff] }
 0x39e   : > { %v4582_v21 = vpop.f32.mrf.mxu2  ;;  %v4693_v1 = vpop.f32.mrf.mxu3 }
 0x39f   : > { %v5433_v38 = vadd.f32 %v5432_v60, %v5393_v51  ;;  %v5481_v41 = vmul.f32 %v5393_v51, %v5270_v5  ;;  %6811 = vst [vmem:[%s9021_s8 + $0x58] sm:$0xff] %v6735_v22   ;;  %v4694_v63 = vadd.f32 %v4693_v1, %v4580_v30 }
 0x3a1   : > { %v5521_v25 = vadd.f32 %v5520_v33, %v5481_v41  ;;  %v4761_v15 = vadd.f32 %v4694_v63, %v3841_v62  ;;  %v5203_v16 = vpop.f32.mrf.mxu0  ;;  %v9742_v41 = vld [vmem:[#allocation19_spill] sm:$0xff] }
 0x3a2   : > { %v3775_v46 = vpop.f32.mrf.mxu1 }
 0x3a3   : > { %v5271_v27 = vadd.f32 %v5203_v16, %v4761_v15  ;;  %v3776_v32 = vadd.f32 %v3775_v46, %v9735_v31 }
 0x3a4   : > { %5242 = vmatmul.bf16.gmra.mxu0 %v5063_v59 }
 0x3a5   : > { %v5394_v7 = vmul.f32 %v5271_v27, %v9736_v57  ;;  %v3842_v56 = vadd.f32 %v3776_v32, %v9737_v9 }
 0x3a6   : > { %v4585_v35 = vpop.f32.mrf.mxu2  ;;  %v4695_v19 = vpop.f32.mrf.mxu3 }
 0x3a7   : > { %v5434_v29 = vadd.f32 %v5433_v38, %v5394_v7  ;;  %v5482_v34 = vmul.f32 %v5394_v7, %v5271_v27  ;;  %v4696_v39 = vadd.f32 %v4695_v19, %v4582_v21 }
 0x3a9   : > { %v5522_v54 = vadd.f32 %v5521_v25, %v5482_v34  ;;  %v4762_v58 = vadd.f32 %v4696_v39, %v3842_v56  ;;  %v5205_v11 = vpop.f32.mrf.mxu0 }
 0x3aa   : > { %v3778_v12 = vpop.f32.mrf.mxu1 }
 0x3ab   : > { %v5272_v42 = vadd.f32 %v5205_v11, %v4762_v58  ;;  %v3779_v49 = vadd.f32 %v3778_v12, %v8848_v14 }
 0x3ad   : > { %v5395_v48 = vmul.f32 %v5272_v42, %v9738_v61  ;;  %v6740_v45 = vpack.c.bf16 %v5272_v42, %v5271_v27  ;;  %v3843_v24 = vadd.f32 %v3779_v49, %v8846_v8 }
 0x3ae   : > { %v4587_v3 = vpop.f32.mrf.mxu2  ;;  %v4698_v59 = vpop.f32.mrf.mxu3 }
 0x3af   : > { %v5435_v30 = vadd.f32 %v5434_v29, %v5395_v48  ;;  %v5483_v10 = vmul.f32 %v5395_v48, %v5272_v42  ;;  %6812 = vst [vmem:[%s9021_s8 + $0x60] sm:$0xff] %v6740_v45   ;;  %v4699_v18 = vadd.f32 %v4698_v59, %v4585_v35  ;;  %v9743_v29 = vld [vmem:[#allocation26_spill] sm:$0xff]  ;;  %v9745_v59 = vld [vmem:[#allocation29_spill] sm:$0xff] }
 0x3b1   : > { %v5523_v47 = vadd.f32 %v5522_v54, %v5483_v10  ;;  %v4763_v60 = vadd.f32 %v4699_v18, %v3843_v24  ;;  %v5208_v44 = vpop.f32.mrf.mxu0  ;;  %v9744_v54 = vld [vmem:[#allocation60_spill] sm:$0xff]  ;;  %v9746_v18 = vld [vmem:[#allocation63_spill] sm:$0xff] }
 0x3b2   : > { %v3780_v28 = vpop.f32.mrf.mxu1 }
 0x3b3   : > { %v5273_v33 = vadd.f32 %v5208_v44, %v4763_v60  ;;  %v3781_v36 = vadd.f32 %v3780_v28, %v9739_v23 }
 0x3b5   : > { %v5396_v14 = vmul.f32 %v5273_v33, %v9740_v26  ;;  %v3844_v0 = vadd.f32 %v3781_v36, %v9741_v43  ;;  %v9748_v43 = vld [vmem:[#allocation35_spill] sm:$0xff] }
 0x3b6   : > { %v4590_v5 = vpop.f32.mrf.mxu2  ;;  %v4700_v4 = vpop.f32.mrf.mxu3 }
 0x3b7   : > { %v5436_v51 = vadd.f32 %v5435_v30, %v5396_v14  ;;  %v5484_v8 = vmul.f32 %v5396_v14, %v5273_v33  ;;  %v4701_v22 = vadd.f32 %v4700_v4, %v4587_v3 }
 0x3b9   : > { %v5524_v52 = vadd.f32 %v5523_v47, %v5484_v8  ;;  %v4764_v21 = vadd.f32 %v4701_v22, %v3844_v0  ;;  %v5210_v1 = vpop.f32.mrf.mxu0  ;;  %v9749_v8 = vld [vmem:[#allocation65_spill] sm:$0xff] }
 0x3ba   : > { %v3783_v20 = vpop.f32.mrf.mxu1 }
 0x3bb   : > { %v5274_v62 = vadd.f32 %v5210_v1, %v4764_v21  ;;  %v3784_v38 = vadd.f32 %v3783_v20, %v8868_v13 }
 0x3bd   : > { %v5397_v63 = vmul.f32 %v5274_v62, %v9742_v41  ;;  %v6745_v25 = vpack.c.bf16 %v5274_v62, %v5273_v33  ;;  %v3845_v46 = vadd.f32 %v3784_v38, %v8866_v40 }
 0x3be   : > { %v4592_v15 = vpop.f32.mrf.mxu2  ;;  %v4703_v16 = vpop.f32.mrf.mxu3 }
 0x3bf   : > { %v5437_v27 = vadd.f32 %v5436_v51, %v5397_v63  ;;  %v5485_v31 = vmul.f32 %v5397_v63, %v5274_v62  ;;  %6813 = vst [vmem:[%s9021_s8 + $0x68] sm:$0xff] %v6745_v25   ;;  %v4704_v32 = vadd.f32 %v4703_v16, %v4590_v5  ;;  %v9747_v5 = vld [vmem:[#allocation68_spill] sm:$0xff] }
 0x3c1   : > { %v5525_v57 = vadd.f32 %v5524_v52, %v5485_v31  ;;  %v4765_v7 = vadd.f32 %v4704_v32, %v3845_v46  ;;  %v5213_v35 = vpop.f32.mrf.mxu0  ;;  %v9751_v32 = vld [vmem:[#allocation72_spill] sm:$0xff] }
 0x3c2   : > { %v3785_v19 = vpop.f32.mrf.mxu1 }
 0x3c3   : > { %v5275_v9 = vadd.f32 %v5213_v35, %v4765_v7  ;;  %v3786_v56 = vadd.f32 %v3785_v19, %v8878_v6 }
 0x3c5   : > { %v5398_v13 = vmul.f32 %v5275_v9, %v9743_v29  ;;  %v3846_v58 = vadd.f32 %v3786_v56, %v9744_v54 }
 0x3c6   : > { %v4595_v34 = vpop.f32.mrf.mxu2  ;;  %v4705_v39 = vpop.f32.mrf.mxu3 }
 0x3c7   : > { %v5438_v11 = vadd.f32 %v5437_v27, %v5398_v13  ;;  %v5486_v40 = vmul.f32 %v5398_v13, %v5275_v9  ;;  %v4706_v12 = vadd.f32 %v4705_v39, %v4592_v15  ;;  %v9750_v15 = vld [vmem:[#allocation27_spill] sm:$0xff]  ;;  %v9752_v39 = vld [vmem:[#allocation97_spill] sm:$0xff] }
 0x3c9   : > { %v5526_v42 = vadd.f32 %v5525_v57, %v5486_v40  ;;  %v4766_v49 = vadd.f32 %v4706_v12, %v3846_v58  ;;  %v5215_v61 = vpop.f32.mrf.mxu0  ;;  %v9753_v58 = vld [vmem:[#allocation33_spill] sm:$0xff]  ;;  %v9754_v12 = vld [vmem:[#allocation79_spill] sm:$0xff] }
 0x3ca   : > { %v3788_v48 = vpop.f32.mrf.mxu1 }
 0x3cb   : > { %v5276_v45 = vadd.f32 %v5215_v61, %v4766_v49  ;;  %v3789_v3 = vadd.f32 %v3788_v48, %v8888_v2 }
 0x3cd   : > { %v5399_v24 = vmul.f32 %v5276_v45, %v9745_v59  ;;  %v6750_v6 = vpack.c.bf16 %v5276_v45, %v5275_v9  ;;  %v3847_v47 = vadd.f32 %v3789_v3, %v9746_v18 }
 0x3ce   : > { %v4597_v30 = vpop.f32.mrf.mxu2  ;;  %v4708_v10 = vpop.f32.mrf.mxu3 }
 0x3cf   : > { %v5439_v60 = vadd.f32 %v5438_v11, %v5399_v24  ;;  %v5487_v44 = vmul.f32 %v5399_v24, %v5276_v45  ;;  %6814 = vst [vmem:[%s9021_s8 + $0x70] sm:$0xff] %v6750_v6   ;;  %v4709_v28 = vadd.f32 %v4708_v10, %v4595_v34  ;;  %v9755_v10 = vld [vmem:[#allocation25_spill] sm:$0xff] }
 0x3d1   : > { %v5527_v33 = vadd.f32 %v5526_v42, %v5487_v44  ;;  %v4767_v23 = vadd.f32 %v4709_v28, %v3847_v47  ;;  %v5218_v36 = vpop.f32.mrf.mxu0  ;;  %v9756_v28 = vld [vmem:[#allocation81_spill] sm:$0xff] }
 0x3d2   : > { %v3790_v26 = vpop.f32.mrf.mxu1 }
 0x3d3   : > { %v5277_v14 = vadd.f32 %v5218_v36, %v4767_v23  ;;  %v3791_v4 = vadd.f32 %v3790_v26, %v9747_v5 }
 0x3d5   : > { %v5400_v2 = vmul.f32 %v5277_v14, %v9748_v43  ;;  %v3848_v22 = vadd.f32 %v3791_v4, %v9749_v8  ;;  %v9758_v8 = vld [vmem:[#allocation18_spill] sm:$0xff] }
 0x3d6   : > { %v4600_v0 = vpop.f32.mrf.mxu2  ;;  %v4710_v51 = vpop.f32.mrf.mxu3 }
 0x3d7   : > { %v5440_v52 = vadd.f32 %v5439_v60, %v5400_v2  ;;  %v5488_v21 = vmul.f32 %v5400_v2, %v5277_v14  ;;  %v4711_v1 = vadd.f32 %v4710_v51, %v4597_v30 }
 0x3d9   : > { %v5528_v20 = vadd.f32 %v5527_v33, %v5488_v21  ;;  %v4768_v62 = vadd.f32 %v4711_v1, %v3848_v22  ;;  %v5220_v38 = vpop.f32.mrf.mxu0  ;;  %v9759_v21 = vld [vmem:[#allocation98_spill] sm:$0xff] }
 0x3da   : > { %v3793_v41 = vpop.f32.mrf.mxu1 }
 0x3db   : > { %v5278_v63 = vadd.f32 %v5220_v38, %v4768_v62  ;;  %v3794_v25 = vadd.f32 %v3793_v41, %v8908_v55 }
 0x3dd   : > { %v5401_v16 = vmul.f32 %v5278_v63, %v9750_v15  ;;  %v6755_v46 = vpack.c.bf16 %v5278_v63, %v5277_v14  ;;  %v3849_v57 = vadd.f32 %v3794_v25, %v9751_v32 }
 0x3de   : > { %v4602_v27 = vpop.f32.mrf.mxu2  ;;  %v4713_v31 = vpop.f32.mrf.mxu3 }
 0x3df   : > { %v5441_v7 = vadd.f32 %v5440_v52, %v5401_v16  ;;  %v5489_v35 = vmul.f32 %v5401_v16, %v5278_v63  ;;  %6815 = vst [vmem:[%s9021_s8 + $0x78] sm:$0xff] %v6755_v46   ;;  %v4714_v19 = vadd.f32 %v4713_v31, %v4600_v0  ;;  %v9757_v0 = vld [vmem:[#allocation99_spill] sm:$0xff]  ;;  %v9760_v46 = vld [vmem:[#allocation70_spill] sm:$0xff]  ;;  %v9761_v31 = vld [vmem:[#allocation28_spill] sm:$0xff] }
 0x3e1   : > { %v5529_v9 = vadd.f32 %v5528_v20, %v5489_v35  ;;  %v4769_v56 = vadd.f32 %v4714_v19, %v3849_v57  ;;  %v5223_v29 = vpop.f32.mrf.mxu0  ;;  %v9762_v19 = vld [vmem:[#allocation71_spill] sm:$0xff] }
 0x3e2   : > { %v3795_v13 = vpop.f32.mrf.mxu1 }
 0x3e3   : > { %v5279_v34 = vadd.f32 %v5223_v29, %v4769_v56  ;;  %v3796_v54 = vadd.f32 %v3795_v13, %v9752_v39 }
 0x3e5   : > { %v5402_v55 = vmul.f32 %v5279_v34, %v9753_v58  ;;  %v3850_v42 = vadd.f32 %v3796_v54, %v9754_v12  ;;  %v9764_v12 = vld [vmem:[#allocation34_spill] sm:$0xff] }
 0x3e6   : > { %v4605_v11 = vpop.f32.mrf.mxu2  ;;  %v4715_v40 = vpop.f32.mrf.mxu3 }
 0x3e7   : > { %v5442_v49 = vadd.f32 %v5441_v7, %v5402_v55  ;;  %v5490_v61 = vmul.f32 %v5402_v55, %v5279_v34  ;;  %v4716_v48 = vadd.f32 %v4715_v40, %v4602_v27 }
 0x3e9   : > { %v5530_v45 = vadd.f32 %v5529_v9, %v5490_v61  ;;  %v4770_v3 = vadd.f32 %v4716_v48, %v3850_v42  ;;  %v5225_v59 = vpop.f32.mrf.mxu0  ;;  %v9765_v48 = vld [vmem:[#allocation75_spill] sm:$0xff] }
 0x3ea   : > { %v3798_v24 = vpop.f32.mrf.mxu1 }
 0x3eb   : > { %v5280_v6 = vadd.f32 %v5225_v59, %v4770_v3  ;;  %v3799_v30 = vadd.f32 %v3798_v24, %v8928_v50 }
 0x3ed   : > { %v5403_v18 = vmul.f32 %v5280_v6, %v9755_v10  ;;  %v6760_v47 = vpack.c.bf16 %v5280_v6, %v5279_v34  ;;  %v3851_v33 = vadd.f32 %v3799_v30, %v9756_v28 }
 0x3ee   : > { %v4607_v60 = vpop.f32.mrf.mxu2  ;;  %v4718_v44 = vpop.f32.mrf.mxu3 }
 0x3ef   : > { %v5443_v23 = vadd.f32 %v5442_v49, %v5403_v18  ;;  %v5491_v36 = vmul.f32 %v5403_v18, %v5280_v6  ;;  %6816 = vst [vmem:[%s9021_s8 + $0x80] sm:$0xff] %v6760_v47   ;;  %v4719_v26 = vadd.f32 %v4718_v44, %v4605_v11  ;;  %v9763_v11 = vld [vmem:[#allocation100_spill] sm:$0xff]  ;;  %v9766_v44 = vld [vmem:[#allocation38_spill] sm:$0xff] }
 0x3f1   : > { %v5531_v14 = vadd.f32 %v5530_v45, %v5491_v36  ;;  %v4771_v5 = vadd.f32 %v4719_v26, %v3851_v33  ;;  %v5228_v4 = vpop.f32.mrf.mxu0 }
 0x3f2   : > { %v3800_v43 = vpop.f32.mrf.mxu1 }
 0x3f3   : > { %v5281_v2 = vadd.f32 %v5228_v4, %v4771_v5  ;;  %v3801_v51 = vadd.f32 %v3800_v43, %v9757_v0 }
 0x3f5   : > { %v5404_v50 = vmul.f32 %v5281_v2, %v9758_v8  ;;  %v3852_v1 = vadd.f32 %v3801_v51, %v9759_v21 }
 0x3f6   : > { %v4610_v22 = vpop.f32.mrf.mxu2  ;;  %v4720_v52 = vpop.f32.mrf.mxu3 }
 0x3f7   : > { %v5444_v20 = vadd.f32 %v5443_v23, %v5404_v50  ;;  %v5492_v62 = vmul.f32 %v5404_v50, %v5281_v2  ;;  %v4721_v38 = vadd.f32 %v4720_v52, %v4607_v60  ;;  %v9767_v50 = vld [vmem:[#allocation78_spill] sm:$0xff] }
 0x3f8   : > { %v9768_v52 = vld [vmem:[#allocation42_spill] sm:$0xff] }
 0x3f9   : > { %v5532_v41 = vadd.f32 %v5531_v14, %v5492_v62  ;;  %v4772_v63 = vadd.f32 %v4721_v38, %v3852_v1  ;;  %v5230_v25 = vpop.f32.mrf.mxu0 }
 0x3fa   : > { %v3803_v15 = vpop.f32.mrf.mxu1 }
 0x3fb   : > { %v5282_v16 = vadd.f32 %v5230_v25, %v4772_v63  ;;  %v3804_v27 = vadd.f32 %v3803_v15, %v9760_v46 }
 0x3fd   : > { %v5405_v32 = vmul.f32 %v5282_v16, %v9761_v31  ;;  %v6765_v57 = vpack.c.bf16 %v5282_v16, %v5281_v2  ;;  %v3853_v9 = vadd.f32 %v3804_v27, %v9762_v19  ;;  %v9770_v31 = vld [vmem:[#allocation44_spill] sm:$0xff] }
 0x3fe   : > { %v4612_v7 = vpop.f32.mrf.mxu2  ;;  %v4723_v35 = vpop.f32.mrf.mxu3  ;;  %v9771_v19 = vld [vmem:[#allocation80_spill] sm:$0xff] }
 0x3ff   : > { %v5445_v56 = vadd.f32 %v5444_v20, %v5405_v32  ;;  %v5493_v29 = vmul.f32 %v5405_v32, %v5282_v16  ;;  %6817 = vst [vmem:[%s9021_s8 + $0x88] sm:$0xff] %v6765_v57   ;;  %v4724_v13 = vadd.f32 %v4723_v35, %v4610_v22  ;;  %v9769_v20 = vld [vmem:[#allocation76_spill] sm:$0xff] }
 0x401   : > { %v5533_v34 = vadd.f32 %v5532_v41, %v5493_v29  ;;  %v4773_v39 = vadd.f32 %v4724_v13, %v3853_v9  ;;  %v5233_v54 = vpop.f32.mrf.mxu0 }
 0x402   : > { %v3805_v58 = vpop.f32.mrf.mxu1 }
 0x403   : > { %v5283_v55 = vadd.f32 %v5233_v54, %v4773_v39  ;;  %v3806_v40 = vadd.f32 %v3805_v58, %v9763_v11  ;;  %v9772_v11 = vld [vmem:[#allocation43_spill] sm:$0xff] }
 0x405   : > { %v5406_v42 = vmul.f32 %v5283_v55, %v9764_v12  ;;  %v3854_v45 = vadd.f32 %v3806_v40, %v9765_v48 }
 0x406   : > { %v4615_v49 = vpop.f32.mrf.mxu2  ;;  %v4725_v61 = vpop.f32.mrf.mxu3 }
 0x407   : > { %v5446_v3 = vadd.f32 %v5445_v56, %v5406_v42  ;;  %v5494_v59 = vmul.f32 %v5406_v42, %v5283_v55  ;;  %v4726_v24 = vadd.f32 %v4725_v61, %v4612_v7 }
 0x409   : > { %v5534_v6 = vadd.f32 %v5533_v34, %v5494_v59  ;;  %v4774_v30 = vadd.f32 %v4726_v24, %v3854_v45  ;;  %v5235_v10 = vpop.f32.mrf.mxu0 }
 0x40a   : > { %v3808_v18 = vpop.f32.mrf.mxu1 }
 0x40b   : > { %v5284_v47 = vadd.f32 %v5235_v10, %v4774_v30  ;;  %v3809_v60 = vadd.f32 %v3808_v18, %v8968_v53 }
 0x40d   : > { %v5407_v28 = vmul.f32 %v5284_v47, %v9766_v44  ;;  %v6770_v33 = vpack.c.bf16 %v5284_v47, %v5283_v55  ;;  %v3855_v26 = vadd.f32 %v3809_v60, %v8966_v17 }
 0x40e   : > { %v4617_v23 = vpop.f32.mrf.mxu2  ;;  %v4728_v36 = vpop.f32.mrf.mxu3 }
 0x40f   : > { %v5447_v14 = vadd.f32 %v5446_v3, %v5407_v28  ;;  %v5495_v5 = vmul.f32 %v5407_v28, %v5284_v47  ;;  %6818 = vst [vmem:[%s9021_s8 + $0x90] sm:$0xff] %v6770_v33   ;;  %v4729_v4 = vadd.f32 %v4728_v36, %v4615_v49 }
 0x411   : > { %v5535_v43 = vadd.f32 %v5534_v6, %v5495_v5  ;;  %v4775_v2 = vadd.f32 %v4729_v4, %v3855_v26  ;;  %v5238_v0 = vpop.f32.mrf.mxu0 }
 0x412   : > { %v3810_v51 = vpop.f32.mrf.mxu1 }
 0x413   : > { %v5285_v8 = vadd.f32 %v5238_v0, %v4775_v2  ;;  %v3811_v22 = vadd.f32 %v3810_v51, %v9767_v50 }
 0x415   : > { %v5408_v53 = vmul.f32 %v5285_v8, %v9768_v52  ;;  %v3856_v62 = vadd.f32 %v3811_v22, %v9769_v20 }
 0x416   : > { %v4620_v21 = vpop.f32.mrf.mxu2  ;;  %v4730_v1 = vpop.f32.mrf.mxu3 }
 0x417   : > { %v5448_v38 = vadd.f32 %v5447_v14, %v5408_v53  ;;  %v5496_v17 = vmul.f32 %v5408_v53, %v5285_v8  ;;  %v4731_v41 = vadd.f32 %v4730_v1, %v4617_v23 }
 0x419   : > { %v5536_v63 = vadd.f32 %v5535_v43, %v5496_v17  ;;  %v4776_v25 = vadd.f32 %v4731_v41, %v3856_v62  ;;  %v5240_v15 = vpop.f32.mrf.mxu0 }
 0x41a   : > { %v3813_v16 = vpop.f32.mrf.mxu1 }
 0x41b   : > { %v5286_v46 = vadd.f32 %v5240_v15, %v4776_v25  ;;  %v3814_v27 = vadd.f32 %v3813_v16, %v8988_v37 }
 0x41d   : > { %v5409_v32 = vmul.f32 %v5286_v46, %v9770_v31  ;;  %v6775_v57 = vpack.c.bf16 %v5286_v46, %v5285_v8  ;;  %v3857_v9 = vadd.f32 %v3814_v27, %v9771_v19 }
 0x41e   : > { %v4622_v7 = vpop.f32.mrf.mxu2  ;;  %v4733_v35 = vpop.f32.mrf.mxu3 }
 0x41f   : > { %v5449_v56 = vadd.f32 %v5448_v38, %v5409_v32  ;;  %v5497_v29 = vmul.f32 %v5409_v32, %v5286_v46  ;;  %6819 = vst [vmem:[%s9021_s8 + $0x98] sm:$0xff] %v6775_v57   ;;  %v4734_v13 = vadd.f32 %v4733_v35, %v4620_v21 }
 0x421   : > { %v5537_v34 = vadd.f32 %v5536_v63, %v5497_v29  ;;  %v4777_v39 = vadd.f32 %v4734_v13, %v3857_v9  ;;  %v5243_v54 = vpop.f32.mrf.mxu0 }
 0x422   : > { %v3815_v58 = vpop.f32.mrf.mxu1 }
 0x423   : > { %v5287_v55 = vadd.f32 %v5243_v54, %v4777_v39 }
 0x425   : > { %v5410_v37 = vmul.f32 %v5287_v55, %v9772_v11  ;;  %v5586_v40 = vpack.c.bf16 %v5287_v55, %v5287_v55 }
 0x426   : > { %v4735_v12 = vpop.f32.mrf.mxu3 }
 0x427   : > { %v5450_v42 = vadd.f32 %v5449_v56, %v5410_v37  ;;  %v5498_v49 = vmul.f32 %v5410_v37, %v5287_v55  ;;  %5627 = vst [vmem:[%s9021_s8 + $0xa0] sm:$0xf] %v5586_v40 }
 0x429   : > { %v5451_v61 = vrot.slane %v5450_v42, 4  ;;  %v5538_v48 = vadd.f32 %v5537_v34, %v5498_v49  ;;  %v5245_v45 = vpop.f32.mrf.mxu0 }
 0x42b   : > { %v5452_v3 = vadd.f32 %v5451_v61, %v5450_v42  ;;  %v5539_v59 = vrot.slane %v5538_v48, 4 }
 0x42d   : > { %v5453_v24 = vrot.slane %v5452_v3, 2  ;;  %v5540_v6 = vadd.f32 %v5539_v59, %v5538_v48 }
 0x42f   : > { %v5454_v30 = vadd.f32 %v5453_v24, %v5452_v3  ;;  %v5541_v10 = vrot.slane %v5540_v6, 2 }
 0x431   : > { %v5455_v18 = vrot.slane %v5454_v30, 1  ;;  %v5542_v47 = vadd.f32 %v5541_v10, %v5540_v6 }
 0x433   : > { %v5456_v60 = vadd.f32 %v5455_v18, %v5454_v30  ;;  %v5543_v44 = vrot.slane %v5542_v47, 1 }
 0x435   : > { %5457 = vst [vmem:[%s262_s12] sm:$0x1] %v5456_v60  ;;  %v5544_v28 = vadd.f32 %v5543_v44, %v5542_v47 }
 0x437   : > { %5545 = vst [vmem:[%s262_s12 + $0x1] sm:$0x1] %v5544_v28 }
 0x438 PF: > { %s17_s21 = sadd.s32 1, %s6889_s21  }
 0x439   : > { %p14_p4 = scmp.ge.s32.totalorder %s17_s21, 4  }
 0x43b   :  { %16 = sbr.rel (!%p14_p4) target bundleno = 1 (0x1), region = 82 }

</bundles_post_ra>
